<compile_context>
chip_gen: v7x
topology: tpu7x:2x2x1
jax: 0.10.0
libtpu: 0.0.40
codegen_flags: <defaults>
</compile_context>

<pallas_src>
import functools

import jax
import jax.numpy as jnp
from jax.experimental import pallas as pl
from jax.experimental.pallas import tpu as pltpu

EPS = 1e-5   # BatchNorm2d default
LANE = 128


# ----------------------------------------------------------------------------
# small helpers
# ----------------------------------------------------------------------------
def _cpad(c):
    """Pad a channel count up to a multiple of 128 (lane-dense)."""
    return ((c + LANE - 1) // LANE) * LANE


def _bn_tile(m):
    for t in (2048, 1024, 512, 256, 128, 64, 32, 16, 8):
        if m % t == 0:
            return t
    return m  # odd M: fall back to a single resident tile


def _maybe_vmem_limit(block_bytes):
    # double-buffered estimate + headroom; only override the default scoped
    # limit when actually needed, and stay well under v7x's 64 MiB physical.
    est = 2 * int(block_bytes) + (4 << 20)
    if est <= (12 << 20):
        return None
    return min(est, 48 << 20)


def _cparams(semantics, block_bytes=0):
    kw = dict(dimension_semantics=semantics)
    v = _maybe_vmem_limit(block_bytes)
    if v is not None:
        kw["vmem_limit_bytes"] = int(v)
    return pltpu.CompilerParams(**kw)


# ----------------------------------------------------------------------------
# Pallas kernels
# ----------------------------------------------------------------------------
def _bn_stats_kernel(x_ref, o_ref):
    """Accumulate per-channel [sum; sum_sq] over M tiles (resident output)."""
    @pl.when(pl.program_id(0) == 0)
    def _():
        o_ref[...] = jnp.zeros_like(o_ref)

    x = x_ref[...]
    s = jnp.sum(x, axis=0, keepdims=True)
    sq = jnp.sum(x * x, axis=0, keepdims=True)
    o_ref[...] += jnp.concatenate([s, sq], axis=0)


def _bn_apply_kernel(x_ref, st_ref, g_ref, b_ref, o_ref, *, inv_count, relu):
    """y = gamma*(x-mean)*rsqrt(var+eps)+beta  (+ReLU), biased batch variance."""
    x = x_ref[...]
    mean = st_ref[0:1, :] * inv_count
    var = jnp.maximum(st_ref[1:2, :] * inv_count - mean * mean, 0.0)
    scale = g_ref[...] * jax.lax.rsqrt(var + EPS)
    y = (x - mean) * scale + b_ref[...]
    if relu:
        y = jnp.maximum(y, 0.0)
    o_ref[...] = y


def _conv3x3_kernel(*refs, H, W, has_sc, activation):
    """3x3 conv (pad=1, stride=1) as 9 shifted bf16 MXU matmuls, f32 accumulate.

    Optionally fuses the 1x1 learnable shortcut conv + residual add and a tanh
    epilogue.  One grid step == one batch image.
    """
    idx = 0
    xpad_ref = refs[idx]; idx += 1        # (1, H+2, W+2, C) f32
    w_ref = refs[idx]; idx += 1           # (9, C, N) bf16, tap-major
    b_ref = refs[idx]; idx += 1           # (1, N) f32
    if has_sc:
        xs_ref = refs[idx]; idx += 1      # (1, H*W, Cs) f32 (block input x)
        scw_ref = refs[idx]; idx += 1     # (Cs, N) bf16
        scb_ref = refs[idx]; idx += 1     # (1, N) f32
    o_ref = refs[idx]                     # (1, H*W, N) f32

    c = w_ref.shape[-2]
    n = w_ref.shape[-1]
    acc = jnp.zeros((H * W, n), jnp.float32)
    for dy in range(3):
        for dx in range(3):
            patch = xpad_ref[0, dy:dy + H, dx:dx + W, :]
            patch = patch.reshape(H * W, c).astype(jnp.bfloat16)
            acc = acc + jnp.dot(patch, w_ref[dy * 3 + dx],
                                preferred_element_type=jnp.float32)
    acc = acc + b_ref[...]
    if has_sc:
        xs = xs_ref[0].astype(jnp.bfloat16)
        acc = acc + jnp.dot(xs, scw_ref[...], preferred_element_type=jnp.float32)
        acc = acc + scb_ref[...]
    if activation == "tanh":
        acc = jnp.tanh(acc)
    o_ref[0] = acc


def _self_attention_kernel(x_ref, fw_ref, fb_ref, gw_ref, gb_ref,
                           hw_ref, hb_ref, iw_ref, ib_ref, gamma_ref, o_ref):
    """Fused SelfAttention + SelfAttentionPost for one batch element."""
    x = x_ref[0]                                      # (HW, C) f32
    xb = x.astype(jnp.bfloat16)
    f = jnp.dot(xb, fw_ref[...], preferred_element_type=jnp.float32) + fb_ref[...]
    g = jnp.dot(xb, gw_ref[...], preferred_element_type=jnp.float32) + gb_ref[...]
    # att[i, j] = sum_a f[i, a] * g[j, a]   (== torch.bmm(f, g) with g viewed (A, HW))
    logits = jax.lax.dot_general(
        f.astype(jnp.bfloat16), g.astype(jnp.bfloat16),
        (((1,), (1,)), ((), ())), preferred_element_type=jnp.float32)  # (HW, HW)
    # F.softmax(att, 1): normalize over the i index (axis 0 here).
    mx = jnp.max(logits, axis=0, keepdims=True)
    e = jnp.exp(logits - mx)
    att = e * pl.reciprocal(jnp.sum(e, axis=0, keepdims=True), approx=True)

    gamma = gamma_ref[0, 0]
    hp = (jnp.dot(xb, hw_ref[...], preferred_element_type=jnp.float32)
          + hb_ref[...]) * gamma                      # gamma * h(x), (HW, A)
    ctx = jnp.dot(att.astype(jnp.bfloat16), hp.astype(jnp.bfloat16),
                  preferred_element_type=jnp.float32)                  # bmm(att, h)
    out = jnp.dot(ctx.astype(jnp.bfloat16), iw_ref[...],
                  preferred_element_type=jnp.float32) + ib_ref[...] + x  # i(h) + m
    o_ref[0] = out


# ----------------------------------------------------------------------------
# pallas_call wrappers
# ----------------------------------------------------------------------------
def batchnorm_relu(x, gamma, beta, relu=True):
    b, h, w, c = x.shape
    m = b * h * w
    xf = x.reshape(m, c)
    tm = _bn_tile(m)
    grid = (m // tm,)

    stats = pl.pallas_call(
        _bn_stats_kernel,
        grid=grid,
        in_specs=[pl.BlockSpec((tm, c), lambda i: (i, 0))],
        out_specs=pl.BlockSpec((2, c), lambda i: (0, 0)),
        out_shape=jax.ShapeDtypeStruct((2, c), jnp.float32),
        compiler_params=_cparams(("arbitrary",), tm * c * 4),
    )(xf)

    y = pl.pallas_call(
        functools.partial(_bn_apply_kernel, inv_count=1.0 / float(m), relu=relu),
        grid=grid,
        in_specs=[pl.BlockSpec((tm, c), lambda i: (i, 0)),
                  pl.BlockSpec((2, c), lambda i: (0, 0)),
                  pl.BlockSpec((1, c), lambda i: (0, 0)),
                  pl.BlockSpec((1, c), lambda i: (0, 0))],
        out_specs=pl.BlockSpec((tm, c), lambda i: (i, 0)),
        out_shape=jax.ShapeDtypeStruct((m, c), jnp.float32),
        compiler_params=_cparams(("parallel",), 2 * tm * c * 4),
    )(xf, stats, gamma, beta)
    return y.reshape(b, h, w, c)


def conv3x3(x, w9, bias, shortcut=None, activation="none"):
    b, h, w, c = x.shape
    n = w9.shape[-1]
    hw = h * w
    xpad = jnp.pad(x, ((0, 0), (1, 1), (1, 1), (0, 0)))

    args = [xpad, w9, bias]
    in_specs = [
        pl.BlockSpec((1, h + 2, w + 2, c), lambda i: (i, 0, 0, 0)),
        pl.BlockSpec((9, c, n), lambda i: (0, 0, 0)),
        pl.BlockSpec((1, n), lambda i: (0, 0)),
    ]
    flops = 2 * b * hw * 9 * c * n
    bytes_acc = xpad.size * 4 + w9.size * 2 + bias.size * 4 + b * hw * n * 4
    block_bytes = ((h + 2) * (w + 2) * c * 4 + 9 * c * n * 2 + 2 * hw * n * 4)

    if shortcut is not None:
        xs, scw, scb = shortcut
        cs = xs.shape[-1]
        args += [xs.reshape(b, hw, cs), scw, scb]
        in_specs += [
            pl.BlockSpec((1, hw, cs), lambda i: (i, 0, 0)),
            pl.BlockSpec((cs, n), lambda i: (0, 0)),
            pl.BlockSpec((1, n), lambda i: (0, 0)),
        ]
        flops += 2 * b * hw * cs * n
        bytes_acc += xs.size * 4 + scw.size * 2 + scb.size * 4
        block_bytes += hw * cs * 4 + cs * n * 2

    out = pl.pallas_call(
        functools.partial(_conv3x3_kernel, H=h, W=w,
                          has_sc=shortcut is not None, activation=activation),
        grid=(b,),
        in_specs=in_specs,
        out_specs=pl.BlockSpec((1, hw, n), lambda i: (i, 0, 0)),
        out_shape=jax.ShapeDtypeStruct((b, hw, n), jnp.float32),
        compiler_params=_cparams(("parallel",), block_bytes),
        cost_estimate=pl.CostEstimate(
            flops=int(flops),
            transcendentals=int(b * hw * n) if activation == "tanh" else 0,
            bytes_accessed=int(bytes_acc)),
    )(*args)
    return out.reshape(b, h, w, n)


def self_attention_block(x, p):
    b, h, w, c = x.shape
    hw = h * w
    ap = p["f_w"].shape[-1]
    xf = x.reshape(b, hw, c)
    const2 = lambda i: (0, 0)

    in_specs = [
        pl.BlockSpec((1, hw, c), lambda i: (i, 0, 0)),
        pl.BlockSpec((c, ap), const2), pl.BlockSpec((1, ap), const2),
        pl.BlockSpec((c, ap), const2), pl.BlockSpec((1, ap), const2),
        pl.BlockSpec((c, ap), const2), pl.BlockSpec((1, ap), const2),
        pl.BlockSpec((ap, c), const2), pl.BlockSpec((1, c), const2),
        pl.BlockSpec(memory_space=pltpu.MemorySpace.SMEM),   # gamma scalar
    ]
    flops = b * (3 * 2 * hw * c * ap + 2 * 2 * hw * hw * ap + 2 * hw * ap * c)
    block_bytes = 2 * hw * c * 4 + hw * hw * 4 + 4 * c * ap * 2

    out = pl.pallas_call(
        _self_attention_kernel,
        grid=(b,),
        in_specs=in_specs,
        out_specs=pl.BlockSpec((1, hw, c), lambda i: (i, 0, 0)),
        out_shape=jax.ShapeDtypeStruct((b, hw, c), jnp.float32),
        compiler_params=_cparams(("parallel",), block_bytes),
        cost_estimate=pl.CostEstimate(
            flops=int(flops), transcendentals=int(b * hw * hw),
            bytes_accessed=int(2 * b * hw * c * 4 + 4 * c * ap * 2)),
    )(xf, p["f_w"], p["f_b"], p["g_w"], p["g_b"],
      p["h_w"], p["h_b"], p["i_w"], p["i_b"], p["gamma"])
    return out.reshape(b, h, w, c)


# ----------------------------------------------------------------------------
# module forward passes
# ----------------------------------------------------------------------------
def res_block_up(x, p):
    # upsample=False for all blocks in ResNetGenerator
    h1 = batchnorm_relu(x, p["b1_g"], p["b1_b"])
    h1 = conv3x3(h1, p["c1_w"], p["c1_b"])
    h2 = batchnorm_relu(h1, p["b2_g"], p["b2_b"])
    # c2(h) + c_sc(x): shortcut conv + residual add fused into the conv kernel
    return conv3x3(h2, p["c2_w"], p["c2_b"],
                   shortcut=(x, p["sc_w"], p["sc_b"]))


def resnet_generator_forward(x_nchw, params, output_nc=3):
    x = jnp.transpose(x_nchw, (0, 2, 3, 1)).astype(jnp.float32)   # NCHW -> NHWC
    b, h, w, cin = x.shape
    x = jnp.pad(x, ((0, 0), (0, 0), (0, 0), (0, _cpad(cin) - cin)))

    hid = x
    for i in range(1, 6):
        hid = res_block_up(hid, params[f"block{i}"])
    hid = self_attention_block(hid, params["att"])                # att + att_post
    hid = res_block_up(hid, params["block6"])
    hid = batchnorm_relu(hid, params["b7_g"], params["b7_b"])
    out = conv3x3(hid, params["l8_w"], params["l8_b"], activation="tanh")
    out = out[..., :output_nc]                                    # drop channel padding
    return jnp.transpose(out, (0, 3, 1, 2))                       # back to NCHW


# ----------------------------------------------------------------------------
# deterministic parameter init (channel-padded, bf16 weights, f32 biases)
# ----------------------------------------------------------------------------
def _spectral_sigma(w2d, key, iters=30):
    v = jax.random.normal(key, (w2d.shape[1],), jnp.float32)
    v = v / (jnp.linalg.norm(v) + 1e-12)
    u = jnp.zeros((w2d.shape[0],), jnp.float32)
    for _ in range(iters):
        u = w2d @ v
        u = u / (jnp.linalg.norm(u) + 1e-12)
        v = w2d.T @ u
        v = v / (jnp.linalg.norm(v) + 1e-12)
    return u @ (w2d @ v)


def _init_conv(key, cin, cout, k, spectral):
    wkey, bkey, skey = jax.random.split(key, 3)
    fan_in = cin * k * k
    w = jax.random.normal(wkey, (k * k * cin, cout), jnp.float32) / jnp.sqrt(float(fan_in))
    if spectral:
        w = w / _spectral_sigma(w, skey)
    bias = jax.random.normal(bkey, (cout,), jnp.float32) * 0.01
    cpin, cpout = _cpad(cin), _cpad(cout)
    bias_p = jnp.pad(bias, (0, cpout - cout)).reshape(1, cpout)
    if k == 1:
        w_p = jnp.pad(w, ((0, cpin - cin), (0, cpout - cout))).astype(jnp.bfloat16)
    else:
        w_p = jnp.pad(w.reshape(k * k, cin, cout),
                      ((0, 0), (0, cpin - cin), (0, cpout - cout))).astype(jnp.bfloat16)
    return w_p, bias_p


def _init_bn(c):
    cp = _cpad(c)
    return jnp.ones((1, cp), jnp.float32), jnp.zeros((1, cp), jnp.float32)


def _init_block(key, cin, cout):
    k1, k2, k3 = jax.random.split(key, 3)
    hidden = cout
    c1_w, c1_b = _init_conv(k1, cin, hidden, 3, spectral=True)
    c2_w, c2_b = _init_conv(k2, hidden, cout, 3, spectral=True)
    sc_w, sc_b = _init_conv(k3, cin, cout, 1, spectral=False)
    b1_g, b1_b = _init_bn(cin)
    b2_g, b2_b = _init_bn(hidden)
    return dict(b1_g=b1_g, b1_b=b1_b, b2_g=b2_g, b2_b=b2_b,
                c1_w=c1_w, c1_b=c1_b, c2_w=c2_w, c2_b=c2_b,
                sc_w=sc_w, sc_b=sc_b)


def init_generator_params(key, ngf, input_nc=3, output_nc=3):
    keys = jax.random.split(key, 12)
    ch = [input_nc, ngf, 16 * ngf, 8 * ngf, 4 * ngf, 2 * ngf]
    params = {}
    for i in range(5):
        params[f"block{i + 1}"] = _init_block(keys[i], ch[i], ch[i + 1])
    c = 2 * ngf
    a = 2 * ngf // 8  # attention_size
    f_w, f_b = _init_conv(keys[5], c, a, 1, spectral=True)
    g_w, g_b = _init_conv(keys[6], c, a, 1, spectral=True)
    h_w, h_b = _init_conv(keys[7], c, a, 1, spectral=True)
    i_w, i_b = _init_conv(keys[8], a, c, 1, spectral=True)
    params["att"] = dict(f_w=f_w, f_b=f_b, g_w=g_w, g_b=g_b,
                         h_w=h_w, h_b=h_b, i_w=i_w, i_b=i_b,
                         gamma=jnp.zeros((1, 1), jnp.float32))  # torch.tensor(0.0)
    params["block6"] = _init_block(keys[9], 2 * ngf, ngf)
    params["b7_g"], params["b7_b"] = _init_bn(ngf)
    l8_w, l8_b = _init_conv(keys[10], ngf, output_nc, 3, spectral=False)
    params["l8_w"] = l8_w
    params["l8_b"] = l8_b
    return params


# ----------------------------------------------------------------------------
if __name__ == "__main__":
    ngf = 8                       # channels 3, 8, 128, 64, 32, 16; attention_size 2
    B, H, W = 2, 16, 16
    key = jax.random.PRNGKey(0)
    pkey, xkey = jax.random.split(key)
    params = init_generator_params(pkey, ngf)
    x = jax.random.normal(xkey, (B, 3, H, W), jnp.float32)   # torch NCHW input

    fwd = jax.jit(functools.partial(resnet_generator_forward, output_nc=3))
    out = fwd(x, params)
    jax.block_until_ready(out)
    assert out.shape == (B, 3, H, W), out.shape
    assert bool(jnp.all(jnp.isfinite(out)))
    print("KERNEL_OK")
</pallas_src>

<mosaic_0001>
module attributes {stable_mosaic.version = 11 : i64} {
  func.func @_bn_stats_kernel(%arg0: i32, %arg1: memref<512x128xf32, #tpu.memory_space<vmem>>, %arg2: memref<2x128xf32, #tpu.memory_space<vmem>>) attributes {dimension_semantics = [#tpu.dimension_semantics<arbitrary>], iteration_bounds = array<i64: 1>, scalar_prefetch = 0 : i64, scratch_operands = 0 : i64, tpu.core_type = #tpu.core_type<tc>, window_params = [{transform_indices = @transform_0, window_bounds = array<i64: 512, 128>}, {pipeline_mode = #tpu.pipeline_mode<synchronous>, transform_indices = @transform_1, window_bounds = array<i64: 2, 128>}]} {
    %c0_i32 = arith.constant 0 : i32
    %0 = arith.cmpi eq, %arg0, %c0_i32 : i32
    %1 = arith.extui %0 : i1 to i32
    %c0_i32_0 = arith.constant 0 : i32
    %2 = arith.cmpi ne, %1, %c0_i32_0 : i32
    scf.if %2 {
      %cst_7 = arith.constant 0.000000e+00 : f32
      %13 = vector.broadcast %cst_7 : f32 to vector<2x128xf32>
      %c0_8 = arith.constant 0 : index
      %c0_9 = arith.constant 0 : index
      %14 = vector.load %arg2[%c0_8, %c0_9] : memref<2x128xf32, #tpu.memory_space<vmem>>, vector<2x128xf32>
      tpu.vector_store %arg2[%c0_8, %c0_9], %13 {strides = array<i32>} : memref<2x128xf32, #tpu.memory_space<vmem>>, vector<2x128xf32>,
    } else {
    }
    %c0 = arith.constant 0 : index
    %c0_1 = arith.constant 0 : index
    %3 = vector.load %arg1[%c0, %c0_1] : memref<512x128xf32, #tpu.memory_space<vmem>>, vector<512x128xf32>
    %cst = arith.constant dense<0.000000e+00> : vector<128xf32>
    %4 = vector.multi_reduction <add>, %3, %cst [0] : vector<512x128xf32> to vector<128xf32>
    %5 = vector.shape_cast %4 : vector<128xf32> to vector<1x128xf32>
    %6 = arith.mulf %3, %3 : vector<512x128xf32>
    %cst_2 = arith.constant dense<0.000000e+00> : vector<128xf32>
    %7 = vector.multi_reduction <add>, %6, %cst_2 [0] : vector<512x128xf32> to vector<128xf32>
    %8 = vector.shape_cast %7 : vector<128xf32> to vector<1x128xf32>
    %c0_3 = arith.constant 0 : index
    %c0_4 = arith.constant 0 : index
    %9 = vector.load %arg2[%c0_3, %c0_4] : memref<2x128xf32, #tpu.memory_space<vmem>>, vector<2x128xf32>
    %10 = tpu.concatenate %5, %8 in 0 : vector<1x128xf32>, vector<1x128xf32> -> vector<2x128xf32>
    %11 = arith.addf %9, %10 : vector<2x128xf32>
    %c0_5 = arith.constant 0 : index
    %c0_6 = arith.constant 0 : index
    %12 = vector.load %arg2[%c0_5, %c0_6] : memref<2x128xf32, #tpu.memory_space<vmem>>, vector<2x128xf32>
    tpu.vector_store %arg2[%c0_5, %c0_6], %11 {strides = array<i32>} : memref<2x128xf32, #tpu.memory_space<vmem>>, vector<2x128xf32>,
    return
  }
  func.func @transform_0(%arg0: i32) -> (i32, i32) {
    %c0_i32 = arith.constant 0 : i32
    %c0_i32_0 = arith.constant 0 : i32
    return %arg0, %c0_i32 : i32, i32
  }
  func.func @transform_1(%arg0: i32) -> (i32, i32) {
    %c0_i32 = arith.constant 0 : i32
    %c0_i32_0 = arith.constant 0 : i32
    %c0_i32_1 = arith.constant 0 : i32
    return %c0_i32, %c0_i32_0 : i32, i32
  }
}

module attributes {stable_mosaic.version = 11 : i64} {
  func.func @_bn_apply_kernel(%arg0: i32, %arg1: memref<512x128xf32, #tpu.memory_space<vmem>>, %arg2: memref<2x128xf32, #tpu.memory_space<vmem>>, %arg3: memref<1x128xf32, #tpu.memory_space<vmem>>, %arg4: memref<1x128xf32, #tpu.memory_space<vmem>>, %arg5: memref<512x128xf32, #tpu.memory_space<vmem>>) attributes {dimension_semantics = [#tpu.dimension_semantics<parallel>], iteration_bounds = array<i64: 1>, scalar_prefetch = 0 : i64, scratch_operands = 0 : i64, tpu.core_type = #tpu.core_type<tc>, window_params = [{transform_indices = @transform_0, window_bounds = array<i64: 512, 128>}, {pipeline_mode = #tpu.pipeline_mode<synchronous>, transform_indices = @transform_1, window_bounds = array<i64: 2, 128>}, {pipeline_mode = #tpu.pipeline_mode<synchronous>, transform_indices = @transform_2, window_bounds = array<i64: 1, 128>}, {pipeline_mode = #tpu.pipeline_mode<synchronous>, transform_indices = @transform_3, window_bounds = array<i64: 1, 128>}, {transform_indices = @transform_4, window_bounds = array<i64: 512, 128>}]} {
    %c0 = arith.constant 0 : index
    %c0_0 = arith.constant 0 : index
    %0 = vector.load %arg1[%c0, %c0_0] : memref<512x128xf32, #tpu.memory_space<vmem>>, vector<512x128xf32>
    %c0_1 = arith.constant 0 : index
    %c0_2 = arith.constant 0 : index
    %1 = vector.load %arg2[%c0_1, %c0_2] : memref<2x128xf32, #tpu.memory_space<vmem>>, vector<1x128xf32>
    %cst = arith.constant 0.001953125 : f32
    %2 = vector.broadcast %cst : f32 to vector<1x128xf32>
    %3 = arith.mulf %1, %2 : vector<1x128xf32>
    %c1 = arith.constant 1 : index
    %c0_3 = arith.constant 0 : index
    %4 = vector.load %arg2[%c1, %c0_3] : memref<2x128xf32, #tpu.memory_space<vmem>>, vector<1x128xf32>
    %cst_4 = arith.constant 0.001953125 : f32
    %5 = vector.broadcast %cst_4 : f32 to vector<1x128xf32>
    %6 = arith.mulf %4, %5 : vector<1x128xf32>
    %7 = arith.mulf %3, %3 : vector<1x128xf32>
    %8 = arith.subf %6, %7 : vector<1x128xf32>
    %cst_5 = arith.constant 0.000000e+00 : f32
    %9 = vector.broadcast %cst_5 : f32 to vector<1x128xf32>
    %10 = arith.maximumf %8, %9 : vector<1x128xf32>
    %c0_6 = arith.constant 0 : index
    %c0_7 = arith.constant 0 : index
    %11 = vector.load %arg3[%c0_6, %c0_7] : memref<1x128xf32, #tpu.memory_space<vmem>>, vector<1x128xf32>
    %cst_8 = arith.constant 9.99999974E-6 : f32
    %12 = vector.broadcast %cst_8 : f32 to vector<1x128xf32>
    %13 = arith.addf %10, %12 : vector<1x128xf32>
    %14 = math.rsqrt %13 : vector<1x128xf32>
    %15 = arith.mulf %11, %14 : vector<1x128xf32>
    %16 = vector.broadcast %3 : vector<1x128xf32> to vector<512x128xf32>
    %17 = arith.subf %0, %16 : vector<512x128xf32>
    %18 = vector.broadcast %15 : vector<1x128xf32> to vector<512x128xf32>
    %19 = arith.mulf %17, %18 : vector<512x128xf32>
    %c0_9 = arith.constant 0 : index
    %c0_10 = arith.constant 0 : index
    %20 = vector.load %arg4[%c0_9, %c0_10] : memref<1x128xf32, #tpu.memory_space<vmem>>, vector<1x128xf32>
    %21 = vector.broadcast %20 : vector<1x128xf32> to vector<512x128xf32>
    %22 = arith.addf %19, %21 : vector<512x128xf32>
    %cst_11 = arith.constant 0.000000e+00 : f32
    %23 = vector.broadcast %cst_11 : f32 to vector<512x128xf32>
    %24 = arith.maximumf %22, %23 : vector<512x128xf32>
    %c0_12 = arith.constant 0 : index
    %c0_13 = arith.constant 0 : index
    %25 = vector.load %arg5[%c0_12, %c0_13] : memref<512x128xf32, #tpu.memory_space<vmem>>, vector<512x128xf32>
    tpu.vector_store %arg5[%c0_12, %c0_13], %24 {strides = array<i32>} : memref<512x128xf32, #tpu.memory_space<vmem>>, vector<512x128xf32>,
    return
  }
  func.func @transform_0(%arg0: i32) -> (i32, i32) {
    %c0_i32 = arith.constant 0 : i32
    %c0_i32_0 = arith.constant 0 : i32
    return %arg0, %c0_i32 : i32, i32
  }
  func.func @transform_1(%arg0: i32) -> (i32, i32) {
    %c0_i32 = arith.constant 0 : i32
    %c0_i32_0 = arith.constant 0 : i32
    %c0_i32_1 = arith.constant 0 : i32
    return %c0_i32, %c0_i32_0 : i32, i32
  }
  func.func @transform_2(%arg0: i32) -> (i32, i32) {
    %c0_i32 = arith.constant 0 : i32
    %c0_i32_0 = arith.constant 0 : i32
    %c0_i32_1 = arith.constant 0 : i32
    return %c0_i32, %c0_i32_0 : i32, i32
  }
  func.func @transform_3(%arg0: i32) -> (i32, i32) {
    %c0_i32 = arith.constant 0 : i32
    %c0_i32_0 = arith.constant 0 : i32
    %c0_i32_1 = arith.constant 0 : i32
    return %c0_i32, %c0_i32_0 : i32, i32
  }
  func.func @transform_4(%arg0: i32) -> (i32, i32) {
    %c0_i32 = arith.constant 0 : i32
    %c0_i32_0 = arith.constant 0 : i32
    return %arg0, %c0_i32 : i32, i32
  }
}

module attributes {stable_mosaic.version = 11 : i64} {
  func.func @_conv3x3_kernel(%arg0: i32, %arg1: memref<1x18x18x128xf32, #tpu.memory_space<vmem>>, %arg2: memref<9x128x128xbf16, #tpu.memory_space<vmem>>, %arg3: memref<1x128xf32, #tpu.memory_space<vmem>>, %arg4: memref<1x256x128xf32, #tpu.memory_space<vmem>>) attributes {dimension_semantics = [#tpu.dimension_semantics<parallel>], iteration_bounds = array<i64: 2>, scalar_prefetch = 0 : i64, scratch_operands = 0 : i64, tpu.core_type = #tpu.core_type<tc>, window_params = [{transform_indices = @transform_0, window_bounds = array<i64: 1, 18, 18, 128>}, {pipeline_mode = #tpu.pipeline_mode<synchronous>, transform_indices = @transform_1, window_bounds = array<i64: 9, 128, 128>}, {pipeline_mode = #tpu.pipeline_mode<synchronous>, transform_indices = @transform_2, window_bounds = array<i64: 1, 128>}, {transform_indices = @transform_3, window_bounds = array<i64: 1, 256, 128>}]} {
    %cst = arith.constant 0.000000e+00 : f32
    %0 = vector.broadcast %cst : f32 to vector<256x128xf32>
    %c0 = arith.constant 0 : index
    %c0_0 = arith.constant 0 : index
    %c0_1 = arith.constant 0 : index
    %c0_2 = arith.constant 0 : index
    %1 = vector.load %arg1[%c0, %c0_0, %c0_1, %c0_2] : memref<1x18x18x128xf32, #tpu.memory_space<vmem>>, vector<1x16x16x128xf32>
    %2 = vector.shape_cast %1 : vector<1x16x16x128xf32> to vector<16x16x128xf32>
    %3 = vector.shape_cast %2 : vector<16x16x128xf32> to vector<256x128xf32>
    %4 = arith.truncf %3 : vector<256x128xf32> to vector<256x128xbf16>
    %c0_3 = arith.constant 0 : index
    %c0_4 = arith.constant 0 : index
    %c0_5 = arith.constant 0 : index
    %5 = vector.load %arg2[%c0_3, %c0_4, %c0_5] : memref<9x128x128xbf16, #tpu.memory_space<vmem>>, vector<1x128x128xbf16>
    %6 = vector.shape_cast %5 : vector<1x128x128xbf16> to vector<128x128xbf16>
    %cst_6 = arith.constant dense<0.000000e+00> : vector<256x128xf32>
    %7 = tpu.matmul %4, %6, %cst_6 {dimension_numbers = #tpu.dot_dimension_numbers<[1], [0], [0], [1], [0, 0, 1, 1], [], []>} : vector<256x128xbf16>, vector<128x128xbf16>, vector<256x128xf32> -> vector<256x128xf32>
    %8 = arith.addf %0, %7 : vector<256x128xf32>
    %c0_7 = arith.constant 0 : index
    %c0_8 = arith.constant 0 : index
    %c1 = arith.constant 1 : index
    %c0_9 = arith.constant 0 : index
    %9 = vector.load %arg1[%c0_7, %c0_8, %c1, %c0_9] : memref<1x18x18x128xf32, #tpu.memory_space<vmem>>, vector<1x16x16x128xf32>
    %10 = vector.shape_cast %9 : vector<1x16x16x128xf32> to vector<16x16x128xf32>
    %11 = vector.shape_cast %10 : vector<16x16x128xf32> to vector<256x128xf32>
    %12 = arith.truncf %11 : vector<256x128xf32> to vector<256x128xbf16>
    %c1_10 = arith.constant 1 : index
    %c0_11 = arith.constant 0 : index
    %c0_12 = arith.constant 0 : index
    %13 = vector.load %arg2[%c1_10, %c0_11, %c0_12] : memref<9x128x128xbf16, #tpu.memory_space<vmem>>, vector<1x128x128xbf16>
    %14 = vector.shape_cast %13 : vector<1x128x128xbf16> to vector<128x128xbf16>
    %cst_13 = arith.constant dense<0.000000e+00> : vector<256x128xf32>
    %15 = tpu.matmul %12, %14, %cst_13 {dimension_numbers = #tpu.dot_dimension_numbers<[1], [0], [0], [1], [0, 0, 1, 1], [], []>} : vector<256x128xbf16>, vector<128x128xbf16>, vector<256x128xf32> -> vector<256x128xf32>
    %16 = arith.addf %8, %15 : vector<256x128xf32>
    %c0_14 = arith.constant 0 : index
    %c0_15 = arith.constant 0 : index
    %c2 = arith.constant 2 : index
    %c0_16 = arith.constant 0 : index
    %17 = vector.load %arg1[%c0_14, %c0_15, %c2, %c0_16] : memref<1x18x18x128xf32, #tpu.memory_space<vmem>>, vector<1x16x16x128xf32>
    %18 = vector.shape_cast %17 : vector<1x16x16x128xf32> to vector<16x16x128xf32>
    %19 = vector.shape_cast %18 : vector<16x16x128xf32> to vector<256x128xf32>
    %20 = arith.truncf %19 : vector<256x128xf32> to vector<256x128xbf16>
    %c2_17 = arith.constant 2 : index
    %c0_18 = arith.constant 0 : index
    %c0_19 = arith.constant 0 : index
    %21 = vector.load %arg2[%c2_17, %c0_18, %c0_19] : memref<9x128x128xbf16, #tpu.memory_space<vmem>>, vector<1x128x128xbf16>
    %22 = vector.shape_cast %21 : vector<1x128x128xbf16> to vector<128x128xbf16>
    %cst_20 = arith.constant dense<0.000000e+00> : vector<256x128xf32>
    %23 = tpu.matmul %20, %22, %cst_20 {dimension_numbers = #tpu.dot_dimension_numbers<[1], [0], [0], [1], [0, 0, 1, 1], [], []>} : vector<256x128xbf16>, vector<128x128xbf16>, vector<256x128xf32> -> vector<256x128xf32>
    %24 = arith.addf %16, %23 : vector<256x128xf32>
    %c0_21 = arith.constant 0 : index
    %c1_22 = arith.constant 1 : index
    %c0_23 = arith.constant 0 : index
    %c0_24 = arith.constant 0 : index
    %25 = vector.load %arg1[%c0_21, %c1_22, %c0_23, %c0_24] : memref<1x18x18x128xf32, #tpu.memory_space<vmem>>, vector<1x16x16x128xf32>
    %26 = vector.shape_cast %25 : vector<1x16x16x128xf32> to vector<16x16x128xf32>
    %27 = vector.shape_cast %26 : vector<16x16x128xf32> to vector<256x128xf32>
    %28 = arith.truncf %27 : vector<256x128xf32> to vector<256x128xbf16>
    %c3 = arith.constant 3 : index
    %c0_25 = arith.constant 0 : index
    %c0_26 = arith.constant 0 : index
    %29 = vector.load %arg2[%c3, %c0_25, %c0_26] : memref<9x128x128xbf16, #tpu.memory_space<vmem>>, vector<1x128x128xbf16>
    %30 = vector.shape_cast %29 : vector<1x128x128xbf16> to vector<128x128xbf16>
    %cst_27 = arith.constant dense<0.000000e+00> : vector<256x128xf32>
    %31 = tpu.matmul %28, %30, %cst_27 {dimension_numbers = #tpu.dot_dimension_numbers<[1], [0], [0], [1], [0, 0, 1, 1], [], []>} : vector<256x128xbf16>, vector<128x128xbf16>, vector<256x128xf32> -> vector<256x128xf32>
    %32 = arith.addf %24, %31 : vector<256x128xf32>
    %c0_28 = arith.constant 0 : index
    %c1_29 = arith.constant 1 : index
    %c1_30 = arith.constant 1 : index
    %c0_31 = arith.constant 0 : index
    %33 = vector.load %arg1[%c0_28, %c1_29, %c1_30, %c0_31] : memref<1x18x18x128xf32, #tpu.memory_space<vmem>>, vector<1x16x16x128xf32>
    %34 = vector.shape_cast %33 : vector<1x16x16x128xf32> to vector<16x16x128xf32>
    %35 = vector.shape_cast %34 : vector<16x16x128xf32> to vector<256x128xf32>
    %36 = arith.truncf %35 : vector<256x128xf32> to vector<256x128xbf16>
    %c4 = arith.constant 4 : index
    %c0_32 = arith.constant 0 : index
    %c0_33 = arith.constant 0 : index
    %37 = vector.load %arg2[%c4, %c0_32, %c0_33] : memref<9x128x128xbf16, #tpu.memory_space<vmem>>, vector<1x128x128xbf16>
    %38 = vector.shape_cast %37 : vector<1x128x128xbf16> to vector<128x128xbf16>
    %cst_34 = arith.constant dense<0.000000e+00> : vector<256x128xf32>
    %39 = tpu.matmul %36, %38, %cst_34 {dimension_numbers = #tpu.dot_dimension_numbers<[1], [0], [0], [1], [0, 0, 1, 1], [], []>} : vector<256x128xbf16>, vector<128x128xbf16>, vector<256x128xf32> -> vector<256x128xf32>
    %40 = arith.addf %32, %39 : vector<256x128xf32>
    %c0_35 = arith.constant 0 : index
    %c1_36 = arith.constant 1 : index
    %c2_37 = arith.constant 2 : index
    %c0_38 = arith.constant 0 : index
    %41 = vector.load %arg1[%c0_35, %c1_36, %c2_37, %c0_38] : memref<1x18x18x128xf32, #tpu.memory_space<vmem>>, vector<1x16x16x128xf32>
    %42 = vector.shape_cast %41 : vector<1x16x16x128xf32> to vector<16x16x128xf32>
    %43 = vector.shape_cast %42 : vector<16x16x128xf32> to vector<256x128xf32>
    %44 = arith.truncf %43 : vector<256x128xf32> to vector<256x128xbf16>
    %c5 = arith.constant 5 : index
    %c0_39 = arith.constant 0 : index
    %c0_40 = arith.constant 0 : index
    %45 = vector.load %arg2[%c5, %c0_39, %c0_40] : memref<9x128x128xbf16, #tpu.memory_space<vmem>>, vector<1x128x128xbf16>
    %46 = vector.shape_cast %45 : vector<1x128x128xbf16> to vector<128x128xbf16>
    %cst_41 = arith.constant dense<0.000000e+00> : vector<256x128xf32>
    %47 = tpu.matmul %44, %46, %cst_41 {dimension_numbers = #tpu.dot_dimension_numbers<[1], [0], [0], [1], [0, 0, 1, 1], [], []>} : vector<256x128xbf16>, vector<128x128xbf16>, vector<256x128xf32> -> vector<256x128xf32>
    %48 = arith.addf %40, %47 : vector<256x128xf32>
    %c0_42 = arith.constant 0 : index
    %c2_43 = arith.constant 2 : index
    %c0_44 = arith.constant 0 : index
    %c0_45 = arith.constant 0 : index
    %49 = vector.load %arg1[%c0_42, %c2_43, %c0_44, %c0_45] : memref<1x18x18x128xf32, #tpu.memory_space<vmem>>, vector<1x16x16x128xf32>
    %50 = vector.shape_cast %49 : vector<1x16x16x128xf32> to vector<16x16x128xf32>
    %51 = vector.shape_cast %50 : vector<16x16x128xf32> to vector<256x128xf32>
    %52 = arith.truncf %51 : vector<256x128xf32> to vector<256x128xbf16>
    %c6 = arith.constant 6 : index
    %c0_46 = arith.constant 0 : index
    %c0_47 = arith.constant 0 : index
    %53 = vector.load %arg2[%c6, %c0_46, %c0_47] : memref<9x128x128xbf16, #tpu.memory_space<vmem>>, vector<1x128x128xbf16>
    %54 = vector.shape_cast %53 : vector<1x128x128xbf16> to vector<128x128xbf16>
    %cst_48 = arith.constant dense<0.000000e+00> : vector<256x128xf32>
    %55 = tpu.matmul %52, %54, %cst_48 {dimension_numbers = #tpu.dot_dimension_numbers<[1], [0], [0], [1], [0, 0, 1, 1], [], []>} : vector<256x128xbf16>, vector<128x128xbf16>, vector<256x128xf32> -> vector<256x128xf32>
    %56 = arith.addf %48, %55 : vector<256x128xf32>
    %c0_49 = arith.constant 0 : index
    %c2_50 = arith.constant 2 : index
    %c1_51 = arith.constant 1 : index
    %c0_52 = arith.constant 0 : index
    %57 = vector.load %arg1[%c0_49, %c2_50, %c1_51, %c0_52] : memref<1x18x18x128xf32, #tpu.memory_space<vmem>>, vector<1x16x16x128xf32>
    %58 = vector.shape_cast %57 : vector<1x16x16x128xf32> to vector<16x16x128xf32>
    %59 = vector.shape_cast %58 : vector<16x16x128xf32> to vector<256x128xf32>
    %60 = arith.truncf %59 : vector<256x128xf32> to vector<256x128xbf16>
    %c7 = arith.constant 7 : index
    %c0_53 = arith.constant 0 : index
    %c0_54 = arith.constant 0 : index
    %61 = vector.load %arg2[%c7, %c0_53, %c0_54] : memref<9x128x128xbf16, #tpu.memory_space<vmem>>, vector<1x128x128xbf16>
    %62 = vector.shape_cast %61 : vector<1x128x128xbf16> to vector<128x128xbf16>
    %cst_55 = arith.constant dense<0.000000e+00> : vector<256x128xf32>
    %63 = tpu.matmul %60, %62, %cst_55 {dimension_numbers = #tpu.dot_dimension_numbers<[1], [0], [0], [1], [0, 0, 1, 1], [], []>} : vector<256x128xbf16>, vector<128x128xbf16>, vector<256x128xf32> -> vector<256x128xf32>
    %64 = arith.addf %56, %63 : vector<256x128xf32>
    %c0_56 = arith.constant 0 : index
    %c2_57 = arith.constant 2 : index
    %c2_58 = arith.constant 2 : index
    %c0_59 = arith.constant 0 : index
    %65 = vector.load %arg1[%c0_56, %c2_57, %c2_58, %c0_59] : memref<1x18x18x128xf32, #tpu.memory_space<vmem>>, vector<1x16x16x128xf32>
    %66 = vector.shape_cast %65 : vector<1x16x16x128xf32> to vector<16x16x128xf32>
    %67 = vector.shape_cast %66 : vector<16x16x128xf32> to vector<256x128xf32>
    %68 = arith.truncf %67 : vector<256x128xf32> to vector<256x128xbf16>
    %c8 = arith.constant 8 : index
    %c0_60 = arith.constant 0 : index
    %c0_61 = arith.constant 0 : index
    %69 = vector.load %arg2[%c8, %c0_60, %c0_61] : memref<9x128x128xbf16, #tpu.memory_space<vmem>>, vector<1x128x128xbf16>
    %70 = vector.shape_cast %69 : vector<1x128x128xbf16> to vector<128x128xbf16>
    %cst_62 = arith.constant dense<0.000000e+00> : vector<256x128xf32>
    %71 = tpu.matmul %68, %70, %cst_62 {dimension_numbers = #tpu.dot_dimension_numbers<[1], [0], [0], [1], [0, 0, 1, 1], [], []>} : vector<256x128xbf16>, vector<128x128xbf16>, vector<256x128xf32> -> vector<256x128xf32>
    %72 = arith.addf %64, %71 : vector<256x128xf32>
    %c0_63 = arith.constant 0 : index
    %c0_64 = arith.constant 0 : index
    %73 = vector.load %arg3[%c0_63, %c0_64] : memref<1x128xf32, #tpu.memory_space<vmem>>, vector<1x128xf32>
    %74 = vector.broadcast %73 : vector<1x128xf32> to vector<256x128xf32>
    %75 = arith.addf %72, %74 : vector<256x128xf32>
    %c0_65 = arith.constant 0 : index
    %c0_66 = arith.constant 0 : index
    %c0_67 = arith.constant 0 : index
    %76 = vector.load %arg4[%c0_65, %c0_66, %c0_67] : memref<1x256x128xf32, #tpu.memory_space<vmem>>, vector<1x256x128xf32>
    %77 = vector.shape_cast %76 : vector<1x256x128xf32> to vector<256x128xf32>
    %78 = vector.shape_cast %75 : vector<256x128xf32> to vector<1x256x128xf32>
    tpu.vector_store %arg4[%c0_65, %c0_66, %c0_67], %78 {strides = array<i32>} : memref<1x256x128xf32, #tpu.memory_space<vmem>>, vector<1x256x128xf32>,
    return
  }
  func.func @transform_0(%arg0: i32) -> (i32, i32, i32, i32) {
    %c0_i32 = arith.constant 0 : i32
    %c0_i32_0 = arith.constant 0 : i32
    %c0_i32_1 = arith.constant 0 : i32
    %c0_i32_2 = arith.constant 0 : i32
    return %arg0, %c0_i32, %c0_i32_0, %c0_i32_1 : i32, i32, i32, i32
  }
  func.func @transform_1(%arg0: i32) -> (i32, i32, i32) {
    %c0_i32 = arith.constant 0 : i32
    %c0_i32_0 = arith.constant 0 : i32
    %c0_i32_1 = arith.constant 0 : i32
    %c0_i32_2 = arith.constant 0 : i32
    return %c0_i32, %c0_i32_0, %c0_i32_1 : i32, i32, i32
  }
  func.func @transform_2(%arg0: i32) -> (i32, i32) {
    %c0_i32 = arith.constant 0 : i32
    %c0_i32_0 = arith.constant 0 : i32
    %c0_i32_1 = arith.constant 0 : i32
    return %c0_i32, %c0_i32_0 : i32, i32
  }
  func.func @transform_3(%arg0: i32) -> (i32, i32, i32) {
    %c0_i32 = arith.constant 0 : i32
    %c0_i32_0 = arith.constant 0 : i32
    %c0_i32_1 = arith.constant 0 : i32
    return %arg0, %c0_i32, %c0_i32_0 : i32, i32, i32
  }
}

module attributes {stable_mosaic.version = 11 : i64} {
  func.func @_conv3x3_kernel(%arg0: i32, %arg1: memref<1x18x18x128xf32, #tpu.memory_space<vmem>>, %arg2: memref<9x128x128xbf16, #tpu.memory_space<vmem>>, %arg3: memref<1x128xf32, #tpu.memory_space<vmem>>, %arg4: memref<1x256x128xf32, #tpu.memory_space<vmem>>, %arg5: memref<128x128xbf16, #tpu.memory_space<vmem>>, %arg6: memref<1x128xf32, #tpu.memory_space<vmem>>, %arg7: memref<1x256x128xf32, #tpu.memory_space<vmem>>) attributes {dimension_semantics = [#tpu.dimension_semantics<parallel>], iteration_bounds = array<i64: 2>, scalar_prefetch = 0 : i64, scratch_operands = 0 : i64, tpu.core_type = #tpu.core_type<tc>, window_params = [{transform_indices = @transform_0, window_bounds = array<i64: 1, 18, 18, 128>}, {pipeline_mode = #tpu.pipeline_mode<synchronous>, transform_indices = @transform_1, window_bounds = array<i64: 9, 128, 128>}, {pipeline_mode = #tpu.pipeline_mode<synchronous>, transform_indices = @transform_2, window_bounds = array<i64: 1, 128>}, {transform_indices = @transform_3, window_bounds = array<i64: 1, 256, 128>}, {pipeline_mode = #tpu.pipeline_mode<synchronous>, transform_indices = @transform_4, window_bounds = array<i64: 128, 128>}, {pipeline_mode = #tpu.pipeline_mode<synchronous>, transform_indices = @transform_5, window_bounds = array<i64: 1, 128>}, {transform_indices = @transform_6, window_bounds = array<i64: 1, 256, 128>}]} {
    %cst = arith.constant 0.000000e+00 : f32
    %0 = vector.broadcast %cst : f32 to vector<256x128xf32>
    %c0 = arith.constant 0 : index
    %c0_0 = arith.constant 0 : index
    %c0_1 = arith.constant 0 : index
    %c0_2 = arith.constant 0 : index
    %1 = vector.load %arg1[%c0, %c0_0, %c0_1, %c0_2] : memref<1x18x18x128xf32, #tpu.memory_space<vmem>>, vector<1x16x16x128xf32>
    %2 = vector.shape_cast %1 : vector<1x16x16x128xf32> to vector<16x16x128xf32>
    %3 = vector.shape_cast %2 : vector<16x16x128xf32> to vector<256x128xf32>
    %4 = arith.truncf %3 : vector<256x128xf32> to vector<256x128xbf16>
    %c0_3 = arith.constant 0 : index
    %c0_4 = arith.constant 0 : index
    %c0_5 = arith.constant 0 : index
    %5 = vector.load %arg2[%c0_3, %c0_4, %c0_5] : memref<9x128x128xbf16, #tpu.memory_space<vmem>>, vector<1x128x128xbf16>
    %6 = vector.shape_cast %5 : vector<1x128x128xbf16> to vector<128x128xbf16>
    %cst_6 = arith.constant dense<0.000000e+00> : vector<256x128xf32>
    %7 = tpu.matmul %4, %6, %cst_6 {dimension_numbers = #tpu.dot_dimension_numbers<[1], [0], [0], [1], [0, 0, 1, 1], [], []>} : vector<256x128xbf16>, vector<128x128xbf16>, vector<256x128xf32> -> vector<256x128xf32>
    %8 = arith.addf %0, %7 : vector<256x128xf32>
    %c0_7 = arith.constant 0 : index
    %c0_8 = arith.constant 0 : index
    %c1 = arith.constant 1 : index
    %c0_9 = arith.constant 0 : index
    %9 = vector.load %arg1[%c0_7, %c0_8, %c1, %c0_9] : memref<1x18x18x128xf32, #tpu.memory_space<vmem>>, vector<1x16x16x128xf32>
    %10 = vector.shape_cast %9 : vector<1x16x16x128xf32> to vector<16x16x128xf32>
    %11 = vector.shape_cast %10 : vector<16x16x128xf32> to vector<256x128xf32>
    %12 = arith.truncf %11 : vector<256x128xf32> to vector<256x128xbf16>
    %c1_10 = arith.constant 1 : index
    %c0_11 = arith.constant 0 : index
    %c0_12 = arith.constant 0 : index
    %13 = vector.load %arg2[%c1_10, %c0_11, %c0_12] : memref<9x128x128xbf16, #tpu.memory_space<vmem>>, vector<1x128x128xbf16>
    %14 = vector.shape_cast %13 : vector<1x128x128xbf16> to vector<128x128xbf16>
    %cst_13 = arith.constant dense<0.000000e+00> : vector<256x128xf32>
    %15 = tpu.matmul %12, %14, %cst_13 {dimension_numbers = #tpu.dot_dimension_numbers<[1], [0], [0], [1], [0, 0, 1, 1], [], []>} : vector<256x128xbf16>, vector<128x128xbf16>, vector<256x128xf32> -> vector<256x128xf32>
    %16 = arith.addf %8, %15 : vector<256x128xf32>
    %c0_14 = arith.constant 0 : index
    %c0_15 = arith.constant 0 : index
    %c2 = arith.constant 2 : index
    %c0_16 = arith.constant 0 : index
    %17 = vector.load %arg1[%c0_14, %c0_15, %c2, %c0_16] : memref<1x18x18x128xf32, #tpu.memory_space<vmem>>, vector<1x16x16x128xf32>
    %18 = vector.shape_cast %17 : vector<1x16x16x128xf32> to vector<16x16x128xf32>
    %19 = vector.shape_cast %18 : vector<16x16x128xf32> to vector<256x128xf32>
    %20 = arith.truncf %19 : vector<256x128xf32> to vector<256x128xbf16>
    %c2_17 = arith.constant 2 : index
    %c0_18 = arith.constant 0 : index
    %c0_19 = arith.constant 0 : index
    %21 = vector.load %arg2[%c2_17, %c0_18, %c0_19] : memref<9x128x128xbf16, #tpu.memory_space<vmem>>, vector<1x128x128xbf16>
    %22 = vector.shape_cast %21 : vector<1x128x128xbf16> to vector<128x128xbf16>
    %cst_20 = arith.constant dense<0.000000e+00> : vector<256x128xf32>
    %23 = tpu.matmul %20, %22, %cst_20 {dimension_numbers = #tpu.dot_dimension_numbers<[1], [0], [0], [1], [0, 0, 1, 1], [], []>} : vector<256x128xbf16>, vector<128x128xbf16>, vector<256x128xf32> -> vector<256x128xf32>
    %24 = arith.addf %16, %23 : vector<256x128xf32>
    %c0_21 = arith.constant 0 : index
    %c1_22 = arith.constant 1 : index
    %c0_23 = arith.constant 0 : index
    %c0_24 = arith.constant 0 : index
    %25 = vector.load %arg1[%c0_21, %c1_22, %c0_23, %c0_24] : memref<1x18x18x128xf32, #tpu.memory_space<vmem>>, vector<1x16x16x128xf32>
    %26 = vector.shape_cast %25 : vector<1x16x16x128xf32> to vector<16x16x128xf32>
    %27 = vector.shape_cast %26 : vector<16x16x128xf32> to vector<256x128xf32>
    %28 = arith.truncf %27 : vector<256x128xf32> to vector<256x128xbf16>
    %c3 = arith.constant 3 : index
    %c0_25 = arith.constant 0 : index
    %c0_26 = arith.constant 0 : index
    %29 = vector.load %arg2[%c3, %c0_25, %c0_26] : memref<9x128x128xbf16, #tpu.memory_space<vmem>>, vector<1x128x128xbf16>
    %30 = vector.shape_cast %29 : vector<1x128x128xbf16> to vector<128x128xbf16>
    %cst_27 = arith.constant dense<0.000000e+00> : vector<256x128xf32>
    %31 = tpu.matmul %28, %30, %cst_27 {dimension_numbers = #tpu.dot_dimension_numbers<[1], [0], [0], [1], [0, 0, 1, 1], [], []>} : vector<256x128xbf16>, vector<128x128xbf16>, vector<256x128xf32> -> vector<256x128xf32>
    %32 = arith.addf %24, %31 : vector<256x128xf32>
    %c0_28 = arith.constant 0 : index
    %c1_29 = arith.constant 1 : index
    %c1_30 = arith.constant 1 : index
    %c0_31 = arith.constant 0 : index
    %33 = vector.load %arg1[%c0_28, %c1_29, %c1_30, %c0_31] : memref<1x18x18x128xf32, #tpu.memory_space<vmem>>, vector<1x16x16x128xf32>
    %34 = vector.shape_cast %33 : vector<1x16x16x128xf32> to vector<16x16x128xf32>
    %35 = vector.shape_cast %34 : vector<16x16x128xf32> to vector<256x128xf32>
    %36 = arith.truncf %35 : vector<256x128xf32> to vector<256x128xbf16>
    %c4 = arith.constant 4 : index
    %c0_32 = arith.constant 0 : index
    %c0_33 = arith.constant 0 : index
    %37 = vector.load %arg2[%c4, %c0_32, %c0_33] : memref<9x128x128xbf16, #tpu.memory_space<vmem>>, vector<1x128x128xbf16>
    %38 = vector.shape_cast %37 : vector<1x128x128xbf16> to vector<128x128xbf16>
    %cst_34 = arith.constant dense<0.000000e+00> : vector<256x128xf32>
    %39 = tpu.matmul %36, %38, %cst_34 {dimension_numbers = #tpu.dot_dimension_numbers<[1], [0], [0], [1], [0, 0, 1, 1], [], []>} : vector<256x128xbf16>, vector<128x128xbf16>, vector<256x128xf32> -> vector<256x128xf32>
    %40 = arith.addf %32, %39 : vector<256x128xf32>
    %c0_35 = arith.constant 0 : index
    %c1_36 = arith.constant 1 : index
    %c2_37 = arith.constant 2 : index
    %c0_38 = arith.constant 0 : index
    %41 = vector.load %arg1[%c0_35, %c1_36, %c2_37, %c0_38] : memref<1x18x18x128xf32, #tpu.memory_space<vmem>>, vector<1x16x16x128xf32>
    %42 = vector.shape_cast %41 : vector<1x16x16x128xf32> to vector<16x16x128xf32>
    %43 = vector.shape_cast %42 : vector<16x16x128xf32> to vector<256x128xf32>
    %44 = arith.truncf %43 : vector<256x128xf32> to vector<256x128xbf16>
    %c5 = arith.constant 5 : index
    %c0_39 = arith.constant 0 : index
    %c0_40 = arith.constant 0 : index
    %45 = vector.load %arg2[%c5, %c0_39, %c0_40] : memref<9x128x128xbf16, #tpu.memory_space<vmem>>, vector<1x128x128xbf16>
    %46 = vector.shape_cast %45 : vector<1x128x128xbf16> to vector<128x128xbf16>
    %cst_41 = arith.constant dense<0.000000e+00> : vector<256x128xf32>
    %47 = tpu.matmul %44, %46, %cst_41 {dimension_numbers = #tpu.dot_dimension_numbers<[1], [0], [0], [1], [0, 0, 1, 1], [], []>} : vector<256x128xbf16>, vector<128x128xbf16>, vector<256x128xf32> -> vector<256x128xf32>
    %48 = arith.addf %40, %47 : vector<256x128xf32>
    %c0_42 = arith.constant 0 : index
    %c2_43 = arith.constant 2 : index
    %c0_44 = arith.constant 0 : index
    %c0_45 = arith.constant 0 : index
    %49 = vector.load %arg1[%c0_42, %c2_43, %c0_44, %c0_45] : memref<1x18x18x128xf32, #tpu.memory_space<vmem>>, vector<1x16x16x128xf32>
    %50 = vector.shape_cast %49 : vector<1x16x16x128xf32> to vector<16x16x128xf32>
    %51 = vector.shape_cast %50 : vector<16x16x128xf32> to vector<256x128xf32>
    %52 = arith.truncf %51 : vector<256x128xf32> to vector<256x128xbf16>
    %c6 = arith.constant 6 : index
    %c0_46 = arith.constant 0 : index
    %c0_47 = arith.constant 0 : index
    %53 = vector.load %arg2[%c6, %c0_46, %c0_47] : memref<9x128x128xbf16, #tpu.memory_space<vmem>>, vector<1x128x128xbf16>
    %54 = vector.shape_cast %53 : vector<1x128x128xbf16> to vector<128x128xbf16>
    %cst_48 = arith.constant dense<0.000000e+00> : vector<256x128xf32>
    %55 = tpu.matmul %52, %54, %cst_48 {dimension_numbers = #tpu.dot_dimension_numbers<[1], [0], [0], [1], [0, 0, 1, 1], [], []>} : vector<256x128xbf16>, vector<128x128xbf16>, vector<256x128xf32> -> vector<256x128xf32>
    %56 = arith.addf %48, %55 : vector<256x128xf32>
    %c0_49 = arith.constant 0 : index
    %c2_50 = arith.constant 2 : index
    %c1_51 = arith.constant 1 : index
    %c0_52 = arith.constant 0 : index
    %57 = vector.load %arg1[%c0_49, %c2_50, %c1_51, %c0_52] : memref<1x18x18x128xf32, #tpu.memory_space<vmem>>, vector<1x16x16x128xf32>
    %58 = vector.shape_cast %57 : vector<1x16x16x128xf32> to vector<16x16x128xf32>
    %59 = vector.shape_cast %58 : vector<16x16x128xf32> to vector<256x128xf32>
    %60 = arith.truncf %59 : vector<256x128xf32> to vector<256x128xbf16>
    %c7 = arith.constant 7 : index
    %c0_53 = arith.constant 0 : index
    %c0_54 = arith.constant 0 : index
    %61 = vector.load %arg2[%c7, %c0_53, %c0_54] : memref<9x128x128xbf16, #tpu.memory_space<vmem>>, vector<1x128x128xbf16>
    %62 = vector.shape_cast %61 : vector<1x128x128xbf16> to vector<128x128xbf16>
    %cst_55 = arith.constant dense<0.000000e+00> : vector<256x128xf32>
    %63 = tpu.matmul %60, %62, %cst_55 {dimension_numbers = #tpu.dot_dimension_numbers<[1], [0], [0], [1], [0, 0, 1, 1], [], []>} : vector<256x128xbf16>, vector<128x128xbf16>, vector<256x128xf32> -> vector<256x128xf32>
    %64 = arith.addf %56, %63 : vector<256x128xf32>
    %c0_56 = arith.constant 0 : index
    %c2_57 = arith.constant 2 : index
    %c2_58 = arith.constant 2 : index
    %c0_59 = arith.constant 0 : index
    %65 = vector.load %arg1[%c0_56, %c2_57, %c2_58, %c0_59] : memref<1x18x18x128xf32, #tpu.memory_space<vmem>>, vector<1x16x16x128xf32>
    %66 = vector.shape_cast %65 : vector<1x16x16x128xf32> to vector<16x16x128xf32>
    %67 = vector.shape_cast %66 : vector<16x16x128xf32> to vector<256x128xf32>
    %68 = arith.truncf %67 : vector<256x128xf32> to vector<256x128xbf16>
    %c8 = arith.constant 8 : index
    %c0_60 = arith.constant 0 : index
    %c0_61 = arith.constant 0 : index
    %69 = vector.load %arg2[%c8, %c0_60, %c0_61] : memref<9x128x128xbf16, #tpu.memory_space<vmem>>, vector<1x128x128xbf16>
    %70 = vector.shape_cast %69 : vector<1x128x128xbf16> to vector<128x128xbf16>
    %cst_62 = arith.constant dense<0.000000e+00> : vector<256x128xf32>
    %71 = tpu.matmul %68, %70, %cst_62 {dimension_numbers = #tpu.dot_dimension_numbers<[1], [0], [0], [1], [0, 0, 1, 1], [], []>} : vector<256x128xbf16>, vector<128x128xbf16>, vector<256x128xf32> -> vector<256x128xf32>
    %72 = arith.addf %64, %71 : vector<256x128xf32>
    %c0_63 = arith.constant 0 : index
    %c0_64 = arith.constant 0 : index
    %73 = vector.load %arg3[%c0_63, %c0_64] : memref<1x128xf32, #tpu.memory_space<vmem>>, vector<1x128xf32>
    %74 = vector.broadcast %73 : vector<1x128xf32> to vector<256x128xf32>
    %75 = arith.addf %72, %74 : vector<256x128xf32>
    %c0_65 = arith.constant 0 : index
    %c0_66 = arith.constant 0 : index
    %c0_67 = arith.constant 0 : index
    %76 = vector.load %arg4[%c0_65, %c0_66, %c0_67] : memref<1x256x128xf32, #tpu.memory_space<vmem>>, vector<1x256x128xf32>
    %77 = vector.shape_cast %76 : vector<1x256x128xf32> to vector<256x128xf32>
    %78 = arith.truncf %77 : vector<256x128xf32> to vector<256x128xbf16>
    %c0_68 = arith.constant 0 : index
    %c0_69 = arith.constant 0 : index
    %79 = vector.load %arg5[%c0_68, %c0_69] : memref<128x128xbf16, #tpu.memory_space<vmem>>, vector<128x128xbf16>
    %cst_70 = arith.constant dense<0.000000e+00> : vector<256x128xf32>
    %80 = tpu.matmul %78, %79, %cst_70 {dimension_numbers = #tpu.dot_dimension_numbers<[1], [0], [0], [1], [0, 0, 1, 1], [], []>} : vector<256x128xbf16>, vector<128x128xbf16>, vector<256x128xf32> -> vector<256x128xf32>
    %81 = arith.addf %75, %80 : vector<256x128xf32>
    %c0_71 = arith.constant 0 : index
    %c0_72 = arith.constant 0 : index
    %82 = vector.load %arg6[%c0_71, %c0_72] : memref<1x128xf32, #tpu.memory_space<vmem>>, vector<1x128xf32>
    %83 = vector.broadcast %82 : vector<1x128xf32> to vector<256x128xf32>
    %84 = arith.addf %81, %83 : vector<256x128xf32>
    %c0_73 = arith.constant 0 : index
    %c0_74 = arith.constant 0 : index
    %c0_75 = arith.constant 0 : index
    %85 = vector.load %arg7[%c0_73, %c0_74, %c0_75] : memref<1x256x128xf32, #tpu.memory_space<vmem>>, vector<1x256x128xf32>
    %86 = vector.shape_cast %85 : vector<1x256x128xf32> to vector<256x128xf32>
    %87 = vector.shape_cast %84 : vector<256x128xf32> to vector<1x256x128xf32>
    tpu.vector_store %arg7[%c0_73, %c0_74, %c0_75], %87 {strides = array<i32>} : memref<1x256x128xf32, #tpu.memory_space<vmem>>, vector<1x256x128xf32>,
    return
  }
  func.func @transform_0(%arg0: i32) -> (i32, i32, i32, i32) {
    %c0_i32 = arith.constant 0 : i32
    %c0_i32_0 = arith.constant 0 : i32
    %c0_i32_1 = arith.constant 0 : i32
    %c0_i32_2 = arith.constant 0 : i32
    return %arg0, %c0_i32, %c0_i32_0, %c0_i32_1 : i32, i32, i32, i32
  }
  func.func @transform_1(%arg0: i32) -> (i32, i32, i32) {
    %c0_i32 = arith.constant 0 : i32
    %c0_i32_0 = arith.constant 0 : i32
    %c0_i32_1 = arith.constant 0 : i32
    %c0_i32_2 = arith.constant 0 : i32
    return %c0_i32, %c0_i32_0, %c0_i32_1 : i32, i32, i32
  }
  func.func @transform_2(%arg0: i32) -> (i32, i32) {
    %c0_i32 = arith.constant 0 : i32
    %c0_i32_0 = arith.constant 0 : i32
    %c0_i32_1 = arith.constant 0 : i32
    return %c0_i32, %c0_i32_0 : i32, i32
  }
  func.func @transform_3(%arg0: i32) -> (i32, i32, i32) {
    %c0_i32 = arith.constant 0 : i32
    %c0_i32_0 = arith.constant 0 : i32
    %c0_i32_1 = arith.constant 0 : i32
    return %arg0, %c0_i32, %c0_i32_0 : i32, i32, i32
  }
  func.func @transform_4(%arg0: i32) -> (i32, i32) {
    %c0_i32 = arith.constant 0 : i32
    %c0_i32_0 = arith.constant 0 : i32
    %c0_i32_1 = arith.constant 0 : i32
    return %c0_i32, %c0_i32_0 : i32, i32
  }
  func.func @transform_5(%arg0: i32) -> (i32, i32) {
    %c0_i32 = arith.constant 0 : i32
    %c0_i32_0 = arith.constant 0 : i32
    %c0_i32_1 = arith.constant 0 : i32
    return %c0_i32, %c0_i32_0 : i32, i32
  }
  func.func @transform_6(%arg0: i32) -> (i32, i32, i32) {
    %c0_i32 = arith.constant 0 : i32
    %c0_i32_0 = arith.constant 0 : i32
    %c0_i32_1 = arith.constant 0 : i32
    return %arg0, %c0_i32, %c0_i32_0 : i32, i32, i32
  }
}

module attributes {stable_mosaic.version = 11 : i64} {
  func.func @_self_attention_kernel(%arg0: i32, %arg1: memref<1x256x128xf32, #tpu.memory_space<vmem>>, %arg2: memref<128x128xbf16, #tpu.memory_space<vmem>>, %arg3: memref<1x128xf32, #tpu.memory_space<vmem>>, %arg4: memref<128x128xbf16, #tpu.memory_space<vmem>>, %arg5: memref<1x128xf32, #tpu.memory_space<vmem>>, %arg6: memref<128x128xbf16, #tpu.memory_space<vmem>>, %arg7: memref<1x128xf32, #tpu.memory_space<vmem>>, %arg8: memref<128x128xbf16, #tpu.memory_space<vmem>>, %arg9: memref<1x128xf32, #tpu.memory_space<vmem>>, %arg10: memref<1x1xf32, #tpu.memory_space<smem>>, %arg11: memref<1x256x128xf32, #tpu.memory_space<vmem>>) attributes {dimension_semantics = [#tpu.dimension_semantics<parallel>], iteration_bounds = array<i64: 2>, scalar_prefetch = 0 : i64, scratch_operands = 0 : i64, tpu.core_type = #tpu.core_type<tc>, window_params = [{transform_indices = @transform_0, window_bounds = array<i64: 1, 256, 128>}, {pipeline_mode = #tpu.pipeline_mode<synchronous>, transform_indices = @transform_1, window_bounds = array<i64: 128, 128>}, {pipeline_mode = #tpu.pipeline_mode<synchronous>, transform_indices = @transform_2, window_bounds = array<i64: 1, 128>}, {pipeline_mode = #tpu.pipeline_mode<synchronous>, transform_indices = @transform_3, window_bounds = array<i64: 128, 128>}, {pipeline_mode = #tpu.pipeline_mode<synchronous>, transform_indices = @transform_4, window_bounds = array<i64: 1, 128>}, {pipeline_mode = #tpu.pipeline_mode<synchronous>, transform_indices = @transform_5, window_bounds = array<i64: 128, 128>}, {pipeline_mode = #tpu.pipeline_mode<synchronous>, transform_indices = @transform_6, window_bounds = array<i64: 1, 128>}, {pipeline_mode = #tpu.pipeline_mode<synchronous>, transform_indices = @transform_7, window_bounds = array<i64: 128, 128>}, {pipeline_mode = #tpu.pipeline_mode<synchronous>, transform_indices = @transform_8, window_bounds = array<i64: 1, 128>}, {transform_indices = @transform_9, window_bounds = array<i64: 1, 1>}, {transform_indices = @transform_10, window_bounds = array<i64: 1, 256, 128>}]} {
    %c0 = arith.constant 0 : index
    %c0_0 = arith.constant 0 : index
    %c0_1 = arith.constant 0 : index
    %0 = vector.load %arg1[%c0, %c0_0, %c0_1] : memref<1x256x128xf32, #tpu.memory_space<vmem>>, vector<1x256x128xf32>
    %1 = vector.shape_cast %0 : vector<1x256x128xf32> to vector<256x128xf32>
    %2 = arith.truncf %1 : vector<256x128xf32> to vector<256x128xbf16>
    %c0_2 = arith.constant 0 : index
    %c0_3 = arith.constant 0 : index
    %3 = vector.load %arg2[%c0_2, %c0_3] : memref<128x128xbf16, #tpu.memory_space<vmem>>, vector<128x128xbf16>
    %cst = arith.constant dense<0.000000e+00> : vector<256x128xf32>
    %4 = tpu.matmul %2, %3, %cst {dimension_numbers = #tpu.dot_dimension_numbers<[1], [0], [0], [1], [0, 0, 1, 1], [], []>} : vector<256x128xbf16>, vector<128x128xbf16>, vector<256x128xf32> -> vector<256x128xf32>
    %c0_4 = arith.constant 0 : index
    %c0_5 = arith.constant 0 : index
    %5 = vector.load %arg3[%c0_4, %c0_5] : memref<1x128xf32, #tpu.memory_space<vmem>>, vector<1x128xf32>
    %6 = vector.broadcast %5 : vector<1x128xf32> to vector<256x128xf32>
    %7 = arith.addf %4, %6 : vector<256x128xf32>
    %c0_6 = arith.constant 0 : index
    %c0_7 = arith.constant 0 : index
    %8 = vector.load %arg4[%c0_6, %c0_7] : memref<128x128xbf16, #tpu.memory_space<vmem>>, vector<128x128xbf16>
    %cst_8 = arith.constant dense<0.000000e+00> : vector<256x128xf32>
    %9 = tpu.matmul %2, %8, %cst_8 {dimension_numbers = #tpu.dot_dimension_numbers<[1], [0], [0], [1], [0, 0, 1, 1], [], []>} : vector<256x128xbf16>, vector<128x128xbf16>, vector<256x128xf32> -> vector<256x128xf32>
    %c0_9 = arith.constant 0 : index
    %c0_10 = arith.constant 0 : index
    %10 = vector.load %arg5[%c0_9, %c0_10] : memref<1x128xf32, #tpu.memory_space<vmem>>, vector<1x128xf32>
    %11 = vector.broadcast %10 : vector<1x128xf32> to vector<256x128xf32>
    %12 = arith.addf %9, %11 : vector<256x128xf32>
    %13 = arith.truncf %7 : vector<256x128xf32> to vector<256x128xbf16>
    %14 = arith.truncf %12 : vector<256x128xf32> to vector<256x128xbf16>
    %cst_11 = arith.constant dense<0.000000e+00> : vector<256x256xf32>
    %15 = tpu.matmul %13, %14, %cst_11 {dimension_numbers = #tpu.dot_dimension_numbers<[1], [1], [0], [0], [0, 0, 1, 0], [], []>} : vector<256x128xbf16>, vector<256x128xbf16>, vector<256x256xf32> -> vector<256x256xf32>
    %cst_12 = arith.constant dense<0xFF800000> : vector<256xf32>
    %16 = vector.multi_reduction <maximumf>, %15, %cst_12 [0] : vector<256x256xf32> to vector<256xf32>
    %17 = vector.shape_cast %16 : vector<256xf32> to vector<1x256xf32>
    %18 = vector.broadcast %17 : vector<1x256xf32> to vector<256x256xf32>
    %19 = arith.subf %15, %18 : vector<256x256xf32>
    %20 = math.exp %19 : vector<256x256xf32>
    %cst_13 = arith.constant dense<0.000000e+00> : vector<256xf32>
    %21 = vector.multi_reduction <add>, %20, %cst_13 [0] : vector<256x256xf32> to vector<256xf32>
    %22 = vector.shape_cast %21 : vector<256xf32> to vector<1x256xf32>
    %23 = tpu.reciprocal %22 {approx = true} : vector<1x256xf32> -> vector<1x256xf32>
    %24 = vector.broadcast %23 : vector<1x256xf32> to vector<256x256xf32>
    %25 = arith.mulf %20, %24 : vector<256x256xf32>
    %c0_14 = arith.constant 0 : index
    %c0_15 = arith.constant 0 : index
    %26 = memref.load %arg10[%c0_14, %c0_15] : memref<1x1xf32, #tpu.memory_space<smem>>
    %c0_16 = arith.constant 0 : index
    %c0_17 = arith.constant 0 : index
    %27 = vector.load %arg6[%c0_16, %c0_17] : memref<128x128xbf16, #tpu.memory_space<vmem>>, vector<128x128xbf16>
    %cst_18 = arith.constant dense<0.000000e+00> : vector<256x128xf32>
    %28 = tpu.matmul %2, %27, %cst_18 {dimension_numbers = #tpu.dot_dimension_numbers<[1], [0], [0], [1], [0, 0, 1, 1], [], []>} : vector<256x128xbf16>, vector<128x128xbf16>, vector<256x128xf32> -> vector<256x128xf32>
    %c0_19 = arith.constant 0 : index
    %c0_20 = arith.constant 0 : index
    %29 = vector.load %arg7[%c0_19, %c0_20] : memref<1x128xf32, #tpu.memory_space<vmem>>, vector<1x128xf32>
    %30 = vector.broadcast %29 : vector<1x128xf32> to vector<256x128xf32>
    %31 = arith.addf %28, %30 : vector<256x128xf32>
    %32 = vector.broadcast %26 : f32 to vector<256x128xf32>
    %33 = arith.mulf %31, %32 : vector<256x128xf32>
    %34 = arith.truncf %25 : vector<256x256xf32> to vector<256x256xbf16>
    %35 = arith.truncf %33 : vector<256x128xf32> to vector<256x128xbf16>
    %cst_21 = arith.constant dense<0.000000e+00> : vector<256x128xf32>
    %36 = tpu.matmul %34, %35, %cst_21 {dimension_numbers = #tpu.dot_dimension_numbers<[1], [0], [0], [1], [0, 0, 1, 1], [], []>} : vector<256x256xbf16>, vector<256x128xbf16>, vector<256x128xf32> -> vector<256x128xf32>
    %37 = arith.truncf %36 : vector<256x128xf32> to vector<256x128xbf16>
    %c0_22 = arith.constant 0 : index
    %c0_23 = arith.constant 0 : index
    %38 = vector.load %arg8[%c0_22, %c0_23] : memref<128x128xbf16, #tpu.memory_space<vmem>>, vector<128x128xbf16>
    %cst_24 = arith.constant dense<0.000000e+00> : vector<256x128xf32>
    %39 = tpu.matmul %37, %38, %cst_24 {dimension_numbers = #tpu.dot_dimension_numbers<[1], [0], [0], [1], [0, 0, 1, 1], [], []>} : vector<256x128xbf16>, vector<128x128xbf16>, vector<256x128xf32> -> vector<256x128xf32>
    %c0_25 = arith.constant 0 : index
    %c0_26 = arith.constant 0 : index
    %40 = vector.load %arg9[%c0_25, %c0_26] : memref<1x128xf32, #tpu.memory_space<vmem>>, vector<1x128xf32>
    %41 = vector.broadcast %40 : vector<1x128xf32> to vector<256x128xf32>
    %42 = arith.addf %39, %41 : vector<256x128xf32>
    %43 = arith.addf %42, %1 : vector<256x128xf32>
    %c0_27 = arith.constant 0 : index
    %c0_28 = arith.constant 0 : index
    %c0_29 = arith.constant 0 : index
    %44 = vector.load %arg11[%c0_27, %c0_28, %c0_29] : memref<1x256x128xf32, #tpu.memory_space<vmem>>, vector<1x256x128xf32>
    %45 = vector.shape_cast %44 : vector<1x256x128xf32> to vector<256x128xf32>
    %46 = vector.shape_cast %43 : vector<256x128xf32> to vector<1x256x128xf32>
    tpu.vector_store %arg11[%c0_27, %c0_28, %c0_29], %46 {strides = array<i32>} : memref<1x256x128xf32, #tpu.memory_space<vmem>>, vector<1x256x128xf32>,
    return
  }
  func.func @transform_0(%arg0: i32) -> (i32, i32, i32) {
    %c0_i32 = arith.constant 0 : i32
    %c0_i32_0 = arith.constant 0 : i32
    %c0_i32_1 = arith.constant 0 : i32
    return %arg0, %c0_i32, %c0_i32_0 : i32, i32, i32
  }
  func.func @transform_1(%arg0: i32) -> (i32, i32) {
    %c0_i32 = arith.constant 0 : i32
    %c0_i32_0 = arith.constant 0 : i32
    %c0_i32_1 = arith.constant 0 : i32
    return %c0_i32, %c0_i32_0 : i32, i32
  }
  func.func @transform_2(%arg0: i32) -> (i32, i32) {
    %c0_i32 = arith.constant 0 : i32
    %c0_i32_0 = arith.constant 0 : i32
    %c0_i32_1 = arith.constant 0 : i32
    return %c0_i32, %c0_i32_0 : i32, i32
  }
  func.func @transform_3(%arg0: i32) -> (i32, i32) {
    %c0_i32 = arith.constant 0 : i32
    %c0_i32_0 = arith.constant 0 : i32
    %c0_i32_1 = arith.constant 0 : i32
    return %c0_i32, %c0_i32_0 : i32, i32
  }
  func.func @transform_4(%arg0: i32) -> (i32, i32) {
    %c0_i32 = arith.constant 0 : i32
    %c0_i32_0 = arith.constant 0 : i32
    %c0_i32_1 = arith.constant 0 : i32
    return %c0_i32, %c0_i32_0 : i32, i32
  }
  func.func @transform_5(%arg0: i32) -> (i32, i32) {
    %c0_i32 = arith.constant 0 : i32
    %c0_i32_0 = arith.constant 0 : i32
    %c0_i32_1 = arith.constant 0 : i32
    return %c0_i32, %c0_i32_0 : i32, i32
  }
  func.func @transform_6(%arg0: i32) -> (i32, i32) {
    %c0_i32 = arith.constant 0 : i32
    %c0_i32_0 = arith.constant 0 : i32
    %c0_i32_1 = arith.constant 0 : i32
    return %c0_i32, %c0_i32_0 : i32, i32
  }
  func.func @transform_7(%arg0: i32) -> (i32, i32) {
    %c0_i32 = arith.constant 0 : i32
    %c0_i32_0 = arith.constant 0 : i32
    %c0_i32_1 = arith.constant 0 : i32
    return %c0_i32, %c0_i32_0 : i32, i32
  }
  func.func @transform_8(%arg0: i32) -> (i32, i32) {
    %c0_i32 = arith.constant 0 : i32
    %c0_i32_0 = arith.constant 0 : i32
    %c0_i32_1 = arith.constant 0 : i32
    return %c0_i32, %c0_i32_0 : i32, i32
  }
  func.func @transform_9(%arg0: i32) -> (i32, i32) {
    %c0_i32 = arith.constant 0 : i32
    %c0_i32_0 = arith.constant 0 : i32
    %c0_i32_1 = arith.constant 0 : i32
    return %c0_i32, %c0_i32_0 : i32, i32
  }
  func.func @transform_10(%arg0: i32) -> (i32, i32, i32) {
    %c0_i32 = arith.constant 0 : i32
    %c0_i32_0 = arith.constant 0 : i32
    %c0_i32_1 = arith.constant 0 : i32
    return %arg0, %c0_i32, %c0_i32_0 : i32, i32, i32
  }
}

module attributes {stable_mosaic.version = 11 : i64} {
  func.func @_conv3x3_kernel(%arg0: i32, %arg1: memref<1x18x18x128xf32, #tpu.memory_space<vmem>>, %arg2: memref<9x128x128xbf16, #tpu.memory_space<vmem>>, %arg3: memref<1x128xf32, #tpu.memory_space<vmem>>, %arg4: memref<1x256x128xf32, #tpu.memory_space<vmem>>) attributes {dimension_semantics = [#tpu.dimension_semantics<parallel>], iteration_bounds = array<i64: 2>, scalar_prefetch = 0 : i64, scratch_operands = 0 : i64, tpu.core_type = #tpu.core_type<tc>, window_params = [{transform_indices = @transform_0, window_bounds = array<i64: 1, 18, 18, 128>}, {pipeline_mode = #tpu.pipeline_mode<synchronous>, transform_indices = @transform_1, window_bounds = array<i64: 9, 128, 128>}, {pipeline_mode = #tpu.pipeline_mode<synchronous>, transform_indices = @transform_2, window_bounds = array<i64: 1, 128>}, {transform_indices = @transform_3, window_bounds = array<i64: 1, 256, 128>}]} {
    %cst = arith.constant 0.000000e+00 : f32
    %0 = vector.broadcast %cst : f32 to vector<256x128xf32>
    %c0 = arith.constant 0 : index
    %c0_0 = arith.constant 0 : index
    %c0_1 = arith.constant 0 : index
    %c0_2 = arith.constant 0 : index
    %1 = vector.load %arg1[%c0, %c0_0, %c0_1, %c0_2] : memref<1x18x18x128xf32, #tpu.memory_space<vmem>>, vector<1x16x16x128xf32>
    %2 = vector.shape_cast %1 : vector<1x16x16x128xf32> to vector<16x16x128xf32>
    %3 = vector.shape_cast %2 : vector<16x16x128xf32> to vector<256x128xf32>
    %4 = arith.truncf %3 : vector<256x128xf32> to vector<256x128xbf16>
    %c0_3 = arith.constant 0 : index
    %c0_4 = arith.constant 0 : index
    %c0_5 = arith.constant 0 : index
    %5 = vector.load %arg2[%c0_3, %c0_4, %c0_5] : memref<9x128x128xbf16, #tpu.memory_space<vmem>>, vector<1x128x128xbf16>
    %6 = vector.shape_cast %5 : vector<1x128x128xbf16> to vector<128x128xbf16>
    %cst_6 = arith.constant dense<0.000000e+00> : vector<256x128xf32>
    %7 = tpu.matmul %4, %6, %cst_6 {dimension_numbers = #tpu.dot_dimension_numbers<[1], [0], [0], [1], [0, 0, 1, 1], [], []>} : vector<256x128xbf16>, vector<128x128xbf16>, vector<256x128xf32> -> vector<256x128xf32>
    %8 = arith.addf %0, %7 : vector<256x128xf32>
    %c0_7 = arith.constant 0 : index
    %c0_8 = arith.constant 0 : index
    %c1 = arith.constant 1 : index
    %c0_9 = arith.constant 0 : index
    %9 = vector.load %arg1[%c0_7, %c0_8, %c1, %c0_9] : memref<1x18x18x128xf32, #tpu.memory_space<vmem>>, vector<1x16x16x128xf32>
    %10 = vector.shape_cast %9 : vector<1x16x16x128xf32> to vector<16x16x128xf32>
    %11 = vector.shape_cast %10 : vector<16x16x128xf32> to vector<256x128xf32>
    %12 = arith.truncf %11 : vector<256x128xf32> to vector<256x128xbf16>
    %c1_10 = arith.constant 1 : index
    %c0_11 = arith.constant 0 : index
    %c0_12 = arith.constant 0 : index
    %13 = vector.load %arg2[%c1_10, %c0_11, %c0_12] : memref<9x128x128xbf16, #tpu.memory_space<vmem>>, vector<1x128x128xbf16>
    %14 = vector.shape_cast %13 : vector<1x128x128xbf16> to vector<128x128xbf16>
    %cst_13 = arith.constant dense<0.000000e+00> : vector<256x128xf32>
    %15 = tpu.matmul %12, %14, %cst_13 {dimension_numbers = #tpu.dot_dimension_numbers<[1], [0], [0], [1], [0, 0, 1, 1], [], []>} : vector<256x128xbf16>, vector<128x128xbf16>, vector<256x128xf32> -> vector<256x128xf32>
    %16 = arith.addf %8, %15 : vector<256x128xf32>
    %c0_14 = arith.constant 0 : index
    %c0_15 = arith.constant 0 : index
    %c2 = arith.constant 2 : index
    %c0_16 = arith.constant 0 : index
    %17 = vector.load %arg1[%c0_14, %c0_15, %c2, %c0_16] : memref<1x18x18x128xf32, #tpu.memory_space<vmem>>, vector<1x16x16x128xf32>
    %18 = vector.shape_cast %17 : vector<1x16x16x128xf32> to vector<16x16x128xf32>
    %19 = vector.shape_cast %18 : vector<16x16x128xf32> to vector<256x128xf32>
    %20 = arith.truncf %19 : vector<256x128xf32> to vector<256x128xbf16>
    %c2_17 = arith.constant 2 : index
    %c0_18 = arith.constant 0 : index
    %c0_19 = arith.constant 0 : index
    %21 = vector.load %arg2[%c2_17, %c0_18, %c0_19] : memref<9x128x128xbf16, #tpu.memory_space<vmem>>, vector<1x128x128xbf16>
    %22 = vector.shape_cast %21 : vector<1x128x128xbf16> to vector<128x128xbf16>
    %cst_20 = arith.constant dense<0.000000e+00> : vector<256x128xf32>
    %23 = tpu.matmul %20, %22, %cst_20 {dimension_numbers = #tpu.dot_dimension_numbers<[1], [0], [0], [1], [0, 0, 1, 1], [], []>} : vector<256x128xbf16>, vector<128x128xbf16>, vector<256x128xf32> -> vector<256x128xf32>
    %24 = arith.addf %16, %23 : vector<256x128xf32>
    %c0_21 = arith.constant 0 : index
    %c1_22 = arith.constant 1 : index
    %c0_23 = arith.constant 0 : index
    %c0_24 = arith.constant 0 : index
    %25 = vector.load %arg1[%c0_21, %c1_22, %c0_23, %c0_24] : memref<1x18x18x128xf32, #tpu.memory_space<vmem>>, vector<1x16x16x128xf32>
    %26 = vector.shape_cast %25 : vector<1x16x16x128xf32> to vector<16x16x128xf32>
    %27 = vector.shape_cast %26 : vector<16x16x128xf32> to vector<256x128xf32>
    %28 = arith.truncf %27 : vector<256x128xf32> to vector<256x128xbf16>
    %c3 = arith.constant 3 : index
    %c0_25 = arith.constant 0 : index
    %c0_26 = arith.constant 0 : index
    %29 = vector.load %arg2[%c3, %c0_25, %c0_26] : memref<9x128x128xbf16, #tpu.memory_space<vmem>>, vector<1x128x128xbf16>
    %30 = vector.shape_cast %29 : vector<1x128x128xbf16> to vector<128x128xbf16>
    %cst_27 = arith.constant dense<0.000000e+00> : vector<256x128xf32>
    %31 = tpu.matmul %28, %30, %cst_27 {dimension_numbers = #tpu.dot_dimension_numbers<[1], [0], [0], [1], [0, 0, 1, 1], [], []>} : vector<256x128xbf16>, vector<128x128xbf16>, vector<256x128xf32> -> vector<256x128xf32>
    %32 = arith.addf %24, %31 : vector<256x128xf32>
    %c0_28 = arith.constant 0 : index
    %c1_29 = arith.constant 1 : index
    %c1_30 = arith.constant 1 : index
    %c0_31 = arith.constant 0 : index
    %33 = vector.load %arg1[%c0_28, %c1_29, %c1_30, %c0_31] : memref<1x18x18x128xf32, #tpu.memory_space<vmem>>, vector<1x16x16x128xf32>
    %34 = vector.shape_cast %33 : vector<1x16x16x128xf32> to vector<16x16x128xf32>
    %35 = vector.shape_cast %34 : vector<16x16x128xf32> to vector<256x128xf32>
    %36 = arith.truncf %35 : vector<256x128xf32> to vector<256x128xbf16>
    %c4 = arith.constant 4 : index
    %c0_32 = arith.constant 0 : index
    %c0_33 = arith.constant 0 : index
    %37 = vector.load %arg2[%c4, %c0_32, %c0_33] : memref<9x128x128xbf16, #tpu.memory_space<vmem>>, vector<1x128x128xbf16>
    %38 = vector.shape_cast %37 : vector<1x128x128xbf16> to vector<128x128xbf16>
    %cst_34 = arith.constant dense<0.000000e+00> : vector<256x128xf32>
    %39 = tpu.matmul %36, %38, %cst_34 {dimension_numbers = #tpu.dot_dimension_numbers<[1], [0], [0], [1], [0, 0, 1, 1], [], []>} : vector<256x128xbf16>, vector<128x128xbf16>, vector<256x128xf32> -> vector<256x128xf32>
    %40 = arith.addf %32, %39 : vector<256x128xf32>
    %c0_35 = arith.constant 0 : index
    %c1_36 = arith.constant 1 : index
    %c2_37 = arith.constant 2 : index
    %c0_38 = arith.constant 0 : index
    %41 = vector.load %arg1[%c0_35, %c1_36, %c2_37, %c0_38] : memref<1x18x18x128xf32, #tpu.memory_space<vmem>>, vector<1x16x16x128xf32>
    %42 = vector.shape_cast %41 : vector<1x16x16x128xf32> to vector<16x16x128xf32>
    %43 = vector.shape_cast %42 : vector<16x16x128xf32> to vector<256x128xf32>
    %44 = arith.truncf %43 : vector<256x128xf32> to vector<256x128xbf16>
    %c5 = arith.constant 5 : index
    %c0_39 = arith.constant 0 : index
    %c0_40 = arith.constant 0 : index
    %45 = vector.load %arg2[%c5, %c0_39, %c0_40] : memref<9x128x128xbf16, #tpu.memory_space<vmem>>, vector<1x128x128xbf16>
    %46 = vector.shape_cast %45 : vector<1x128x128xbf16> to vector<128x128xbf16>
    %cst_41 = arith.constant dense<0.000000e+00> : vector<256x128xf32>
    %47 = tpu.matmul %44, %46, %cst_41 {dimension_numbers = #tpu.dot_dimension_numbers<[1], [0], [0], [1], [0, 0, 1, 1], [], []>} : vector<256x128xbf16>, vector<128x128xbf16>, vector<256x128xf32> -> vector<256x128xf32>
    %48 = arith.addf %40, %47 : vector<256x128xf32>
    %c0_42 = arith.constant 0 : index
    %c2_43 = arith.constant 2 : index
    %c0_44 = arith.constant 0 : index
    %c0_45 = arith.constant 0 : index
    %49 = vector.load %arg1[%c0_42, %c2_43, %c0_44, %c0_45] : memref<1x18x18x128xf32, #tpu.memory_space<vmem>>, vector<1x16x16x128xf32>
    %50 = vector.shape_cast %49 : vector<1x16x16x128xf32> to vector<16x16x128xf32>
    %51 = vector.shape_cast %50 : vector<16x16x128xf32> to vector<256x128xf32>
    %52 = arith.truncf %51 : vector<256x128xf32> to vector<256x128xbf16>
    %c6 = arith.constant 6 : index
    %c0_46 = arith.constant 0 : index
    %c0_47 = arith.constant 0 : index
    %53 = vector.load %arg2[%c6, %c0_46, %c0_47] : memref<9x128x128xbf16, #tpu.memory_space<vmem>>, vector<1x128x128xbf16>
    %54 = vector.shape_cast %53 : vector<1x128x128xbf16> to vector<128x128xbf16>
    %cst_48 = arith.constant dense<0.000000e+00> : vector<256x128xf32>
    %55 = tpu.matmul %52, %54, %cst_48 {dimension_numbers = #tpu.dot_dimension_numbers<[1], [0], [0], [1], [0, 0, 1, 1], [], []>} : vector<256x128xbf16>, vector<128x128xbf16>, vector<256x128xf32> -> vector<256x128xf32>
    %56 = arith.addf %48, %55 : vector<256x128xf32>
    %c0_49 = arith.constant 0 : index
    %c2_50 = arith.constant 2 : index
    %c1_51 = arith.constant 1 : index
    %c0_52 = arith.constant 0 : index
    %57 = vector.load %arg1[%c0_49, %c2_50, %c1_51, %c0_52] : memref<1x18x18x128xf32, #tpu.memory_space<vmem>>, vector<1x16x16x128xf32>
    %58 = vector.shape_cast %57 : vector<1x16x16x128xf32> to vector<16x16x128xf32>
    %59 = vector.shape_cast %58 : vector<16x16x128xf32> to vector<256x128xf32>
    %60 = arith.truncf %59 : vector<256x128xf32> to vector<256x128xbf16>
    %c7 = arith.constant 7 : index
    %c0_53 = arith.constant 0 : index
    %c0_54 = arith.constant 0 : index
    %61 = vector.load %arg2[%c7, %c0_53, %c0_54] : memref<9x128x128xbf16, #tpu.memory_space<vmem>>, vector<1x128x128xbf16>
    %62 = vector.shape_cast %61 : vector<1x128x128xbf16> to vector<128x128xbf16>
    %cst_55 = arith.constant dense<0.000000e+00> : vector<256x128xf32>
    %63 = tpu.matmul %60, %62, %cst_55 {dimension_numbers = #tpu.dot_dimension_numbers<[1], [0], [0], [1], [0, 0, 1, 1], [], []>} : vector<256x128xbf16>, vector<128x128xbf16>, vector<256x128xf32> -> vector<256x128xf32>
    %64 = arith.addf %56, %63 : vector<256x128xf32>
    %c0_56 = arith.constant 0 : index
    %c2_57 = arith.constant 2 : index
    %c2_58 = arith.constant 2 : index
    %c0_59 = arith.constant 0 : index
    %65 = vector.load %arg1[%c0_56, %c2_57, %c2_58, %c0_59] : memref<1x18x18x128xf32, #tpu.memory_space<vmem>>, vector<1x16x16x128xf32>
    %66 = vector.shape_cast %65 : vector<1x16x16x128xf32> to vector<16x16x128xf32>
    %67 = vector.shape_cast %66 : vector<16x16x128xf32> to vector<256x128xf32>
    %68 = arith.truncf %67 : vector<256x128xf32> to vector<256x128xbf16>
    %c8 = arith.constant 8 : index
    %c0_60 = arith.constant 0 : index
    %c0_61 = arith.constant 0 : index
    %69 = vector.load %arg2[%c8, %c0_60, %c0_61] : memref<9x128x128xbf16, #tpu.memory_space<vmem>>, vector<1x128x128xbf16>
    %70 = vector.shape_cast %69 : vector<1x128x128xbf16> to vector<128x128xbf16>
    %cst_62 = arith.constant dense<0.000000e+00> : vector<256x128xf32>
    %71 = tpu.matmul %68, %70, %cst_62 {dimension_numbers = #tpu.dot_dimension_numbers<[1], [0], [0], [1], [0, 0, 1, 1], [], []>} : vector<256x128xbf16>, vector<128x128xbf16>, vector<256x128xf32> -> vector<256x128xf32>
    %72 = arith.addf %64, %71 : vector<256x128xf32>
    %c0_63 = arith.constant 0 : index
    %c0_64 = arith.constant 0 : index
    %73 = vector.load %arg3[%c0_63, %c0_64] : memref<1x128xf32, #tpu.memory_space<vmem>>, vector<1x128xf32>
    %74 = vector.broadcast %73 : vector<1x128xf32> to vector<256x128xf32>
    %75 = arith.addf %72, %74 : vector<256x128xf32>
    %76 = math.tanh %75 : vector<256x128xf32>
    %c0_65 = arith.constant 0 : index
    %c0_66 = arith.constant 0 : index
    %c0_67 = arith.constant 0 : index
    %77 = vector.load %arg4[%c0_65, %c0_66, %c0_67] : memref<1x256x128xf32, #tpu.memory_space<vmem>>, vector<1x256x128xf32>
    %78 = vector.shape_cast %77 : vector<1x256x128xf32> to vector<256x128xf32>
    %79 = vector.shape_cast %76 : vector<256x128xf32> to vector<1x256x128xf32>
    tpu.vector_store %arg4[%c0_65, %c0_66, %c0_67], %79 {strides = array<i32>} : memref<1x256x128xf32, #tpu.memory_space<vmem>>, vector<1x256x128xf32>,
    return
  }
  func.func @transform_0(%arg0: i32) -> (i32, i32, i32, i32) {
    %c0_i32 = arith.constant 0 : i32
    %c0_i32_0 = arith.constant 0 : i32
    %c0_i32_1 = arith.constant 0 : i32
    %c0_i32_2 = arith.constant 0 : i32
    return %arg0, %c0_i32, %c0_i32_0, %c0_i32_1 : i32, i32, i32, i32
  }
  func.func @transform_1(%arg0: i32) -> (i32, i32, i32) {
    %c0_i32 = arith.constant 0 : i32
    %c0_i32_0 = arith.constant 0 : i32
    %c0_i32_1 = arith.constant 0 : i32
    %c0_i32_2 = arith.constant 0 : i32
    return %c0_i32, %c0_i32_0, %c0_i32_1 : i32, i32, i32
  }
  func.func @transform_2(%arg0: i32) -> (i32, i32) {
    %c0_i32 = arith.constant 0 : i32
    %c0_i32_0 = arith.constant 0 : i32
    %c0_i32_1 = arith.constant 0 : i32
    return %c0_i32, %c0_i32_0 : i32, i32
  }
  func.func @transform_3(%arg0: i32) -> (i32, i32, i32) {
    %c0_i32 = arith.constant 0 : i32
    %c0_i32_0 = arith.constant 0 : i32
    %c0_i32_1 = arith.constant 0 : i32
    return %arg0, %c0_i32, %c0_i32_0 : i32, i32, i32
  }
}

</mosaic_0001>

<bundles_post_ra>
// kernel: resnet_generator_forward.40
= control target key start
LH: loop header
LB: loop body
LE: loop exit
PB: predicated region body
PF: predicated region fallthrough
CT: control target
= control target key end

     0   :  { %v289_v0 = vmov 0.0   ;;  %vm280_vm0 = vcmask 1040384   ;;  %s501_s0 = inlined_call_operand.vmem [shape: f32[512,128], index: 0, kind: input, shape index: {}]   ;;  %s502_s1 = inlined_call_operand.vmem [shape: f32[2,128], index: 1, kind: output, shape index: {}]  }
   0x1   :  { %12 = vst [vmem:[%s502_s1] sm:$0x3] %v289_v0  ;;  %v13_v1 = vld [vmem:[%s501_s0] sm:$0xff]  ;;  %v14_v2 = vld [vmem:[%s501_s0 + $0x8] sm:$0xff]  ;;  %v15_v3 = vld [vmem:[%s501_s0 + $0x10] sm:$0xff] }
   0x2   :  { %v16_v4 = vld [vmem:[%s501_s0 + $0x18] sm:$0xff]  ;;  %v77_v5 = vadd.f32 %v14_v2, %v13_v1  ;;  %v146_v6 = vmul.f32 %v13_v1, %v13_v1  ;;  %v147_v7 = vmul.f32 %v14_v2, %v14_v2  ;;  %v148_v8 = vmul.f32 %v15_v3, %v15_v3  ;;  %v17_v9 = vld [vmem:[%s501_s0 + $0x20] sm:$0xff]  ;;  %v18_v13 = vld [vmem:[%s501_s0 + $0x28] sm:$0xff] }
   0x3   :  { %v149_v11 = vmul.f32 %v16_v4, %v16_v4  ;;  %v150_v15 = vmul.f32 %v17_v9, %v17_v9  ;;  %v19_v17 = vld [vmem:[%s501_s0 + $0x30] sm:$0xff]  ;;  %v151_v19 = vmul.f32 %v18_v13, %v18_v13  ;;  %v20_v21 = vld [vmem:[%s501_s0 + $0x38] sm:$0xff]  ;;  %v21_v25 = vld [vmem:[%s501_s0 + $0x40] sm:$0xff] }
   0x4   :  { %v78_v10 = vadd.f32 %v77_v5, %v15_v3  ;;  %v210_v12 = vadd.f32 %v147_v7, %v146_v6  ;;  %v152_v23 = vmul.f32 %v19_v17, %v19_v17  ;;  %v153_v27 = vmul.f32 %v20_v21, %v20_v21  ;;  %v22_v29 = vld [vmem:[%s501_s0 + $0x48] sm:$0xff]  ;;  %v23_v33 = vld [vmem:[%s501_s0 + $0x50] sm:$0xff]  ;;  %v24_v37 = vld [vmem:[%s501_s0 + $0x58] sm:$0xff] }
   0x5   :  { %v154_v31 = vmul.f32 %v21_v25, %v21_v25  ;;  %v155_v35 = vmul.f32 %v22_v29, %v22_v29  ;;  %v156_v39 = vmul.f32 %v23_v33, %v23_v33  ;;  %v25_v41 = vld [vmem:[%s501_s0 + $0x60] sm:$0xff]  ;;  %v157_v43 = vmul.f32 %v24_v37, %v24_v37  ;;  %v26_v45 = vld [vmem:[%s501_s0 + $0x68] sm:$0xff]  ;;  %v27_v49 = vld [vmem:[%s501_s0 + $0x70] sm:$0xff] }
   0x6   :  { %v79_v14 = vadd.f32 %v78_v10, %v16_v4  ;;  %v211_v16 = vadd.f32 %v210_v12, %v148_v8  ;;  %v158_v47 = vmul.f32 %v25_v41, %v25_v41  ;;  %v159_v51 = vmul.f32 %v26_v45, %v26_v45  ;;  %v28_v53 = vld [vmem:[%s501_s0 + $0x78] sm:$0xff]  ;;  %v29_v57 = vld [vmem:[%s501_s0 + $0x80] sm:$0xff]  ;;  %v30_v61 = vld [vmem:[%s501_s0 + $0x88] sm:$0xff] }
   0x7   :  { %v160_v55 = vmul.f32 %v27_v49, %v27_v49  ;;  %v161_v59 = vmul.f32 %v28_v53, %v28_v53  ;;  %v162_v63 = vmul.f32 %v29_v57, %v29_v57  ;;  %v31_v1 = vld [vmem:[%s501_s0 + $0x90] sm:$0xff]  ;;  %v163_v3 = vmul.f32 %v30_v61, %v30_v61  ;;  %v32_v5 = vld [vmem:[%s501_s0 + $0x98] sm:$0xff] }
   0x8   :  { %v80_v18 = vadd.f32 %v79_v14, %v17_v9  ;;  %v212_v20 = vadd.f32 %v211_v16, %v149_v11  ;;  %v164_v7 = vmul.f32 %v31_v1, %v31_v1  ;;  %v33_v9 = vld [vmem:[%s501_s0 + $0xa0] sm:$0xff]  ;;  %v165_v11 = vmul.f32 %v32_v5, %v32_v5 }
   0xa   :  { %v81_v22 = vadd.f32 %v80_v18, %v18_v13  ;;  %v213_v24 = vadd.f32 %v212_v20, %v150_v15  ;;  %v34_v13 = vld [vmem:[%s501_s0 + $0xa8] sm:$0xff]  ;;  %v166_v15 = vmul.f32 %v33_v9, %v33_v9 }
   0xc   :  { %v82_v26 = vadd.f32 %v81_v22, %v19_v17  ;;  %v214_v28 = vadd.f32 %v213_v24, %v151_v19  ;;  %v35_v17 = vld [vmem:[%s501_s0 + $0xb0] sm:$0xff]  ;;  %v167_v19 = vmul.f32 %v34_v13, %v34_v13 }
   0xe   :  { %v83_v30 = vadd.f32 %v82_v26, %v20_v21  ;;  %v215_v32 = vadd.f32 %v214_v28, %v152_v23  ;;  %v36_v21 = vld [vmem:[%s501_s0 + $0xb8] sm:$0xff]  ;;  %v168_v23 = vmul.f32 %v35_v17, %v35_v17 }
  0x10   :  { %v84_v34 = vadd.f32 %v83_v30, %v21_v25  ;;  %v216_v36 = vadd.f32 %v215_v32, %v153_v27  ;;  %v37_v25 = vld [vmem:[%s501_s0 + $0xc0] sm:$0xff]  ;;  %v169_v27 = vmul.f32 %v36_v21, %v36_v21 }
  0x12   :  { %v85_v38 = vadd.f32 %v84_v34, %v22_v29  ;;  %v217_v40 = vadd.f32 %v216_v36, %v154_v31  ;;  %v38_v29 = vld [vmem:[%s501_s0 + $0xc8] sm:$0xff]  ;;  %v170_v31 = vmul.f32 %v37_v25, %v37_v25 }
  0x14   :  { %v86_v42 = vadd.f32 %v85_v38, %v23_v33  ;;  %v218_v44 = vadd.f32 %v217_v40, %v155_v35  ;;  %v39_v33 = vld [vmem:[%s501_s0 + $0xd0] sm:$0xff]  ;;  %v171_v35 = vmul.f32 %v38_v29, %v38_v29 }
  0x16   :  { %v87_v46 = vadd.f32 %v86_v42, %v24_v37  ;;  %v219_v48 = vadd.f32 %v218_v44, %v156_v39  ;;  %v40_v37 = vld [vmem:[%s501_s0 + $0xd8] sm:$0xff]  ;;  %v172_v39 = vmul.f32 %v39_v33, %v39_v33 }
  0x18   :  { %v88_v50 = vadd.f32 %v87_v46, %v25_v41  ;;  %v220_v52 = vadd.f32 %v219_v48, %v157_v43  ;;  %v41_v41 = vld [vmem:[%s501_s0 + $0xe0] sm:$0xff]  ;;  %v173_v43 = vmul.f32 %v40_v37, %v40_v37 }
  0x1a   :  { %v89_v54 = vadd.f32 %v88_v50, %v26_v45  ;;  %v221_v56 = vadd.f32 %v220_v52, %v158_v47  ;;  %v42_v45 = vld [vmem:[%s501_s0 + $0xe8] sm:$0xff]  ;;  %v174_v47 = vmul.f32 %v41_v41, %v41_v41 }
  0x1c   :  { %v90_v58 = vadd.f32 %v89_v54, %v27_v49  ;;  %v222_v60 = vadd.f32 %v221_v56, %v159_v51  ;;  %v43_v49 = vld [vmem:[%s501_s0 + $0xf0] sm:$0xff]  ;;  %v175_v51 = vmul.f32 %v42_v45, %v42_v45 }
  0x1e   :  { %v91_v62 = vadd.f32 %v90_v58, %v28_v53  ;;  %v223_v0 = vadd.f32 %v222_v60, %v160_v55  ;;  %v44_v53 = vld [vmem:[%s501_s0 + $0xf8] sm:$0xff]  ;;  %v176_v55 = vmul.f32 %v43_v49, %v43_v49 }
  0x20   :  { %v92_v2 = vadd.f32 %v91_v62, %v29_v57  ;;  %v224_v4 = vadd.f32 %v223_v0, %v161_v59  ;;  %v45_v57 = vld [vmem:[%s501_s0 + $0x100] sm:$0xff]  ;;  %v177_v59 = vmul.f32 %v44_v53, %v44_v53 }
  0x22   :  { %v93_v6 = vadd.f32 %v92_v2, %v30_v61  ;;  %v225_v8 = vadd.f32 %v224_v4, %v162_v63  ;;  %v46_v61 = vld [vmem:[%s501_s0 + $0x108] sm:$0xff]  ;;  %v178_v63 = vmul.f32 %v45_v57, %v45_v57 }
  0x24   :  { %v94_v10 = vadd.f32 %v93_v6, %v31_v1  ;;  %v226_v12 = vadd.f32 %v225_v8, %v163_v3  ;;  %v47_v1 = vld [vmem:[%s501_s0 + $0x110] sm:$0xff]  ;;  %v179_v3 = vmul.f32 %v46_v61, %v46_v61 }
  0x26   :  { %v95_v14 = vadd.f32 %v94_v10, %v32_v5  ;;  %v227_v16 = vadd.f32 %v226_v12, %v164_v7  ;;  %v48_v5 = vld [vmem:[%s501_s0 + $0x118] sm:$0xff]  ;;  %v180_v7 = vmul.f32 %v47_v1, %v47_v1 }
  0x28   :  { %v96_v18 = vadd.f32 %v95_v14, %v33_v9  ;;  %v228_v20 = vadd.f32 %v227_v16, %v165_v11  ;;  %v49_v9 = vld [vmem:[%s501_s0 + $0x120] sm:$0xff]  ;;  %v181_v11 = vmul.f32 %v48_v5, %v48_v5 }
  0x2a   :  { %v97_v22 = vadd.f32 %v96_v18, %v34_v13  ;;  %v229_v24 = vadd.f32 %v228_v20, %v166_v15  ;;  %v50_v13 = vld [vmem:[%s501_s0 + $0x128] sm:$0xff]  ;;  %v182_v15 = vmul.f32 %v49_v9, %v49_v9 }
  0x2c   :  { %v98_v26 = vadd.f32 %v97_v22, %v35_v17  ;;  %v230_v28 = vadd.f32 %v229_v24, %v167_v19  ;;  %v51_v17 = vld [vmem:[%s501_s0 + $0x130] sm:$0xff]  ;;  %v183_v19 = vmul.f32 %v50_v13, %v50_v13 }
  0x2e   :  { %v99_v30 = vadd.f32 %v98_v26, %v36_v21  ;;  %v231_v32 = vadd.f32 %v230_v28, %v168_v23  ;;  %v52_v21 = vld [vmem:[%s501_s0 + $0x138] sm:$0xff]  ;;  %v184_v23 = vmul.f32 %v51_v17, %v51_v17 }
  0x30   :  { %v100_v34 = vadd.f32 %v99_v30, %v37_v25  ;;  %v232_v36 = vadd.f32 %v231_v32, %v169_v27  ;;  %v53_v25 = vld [vmem:[%s501_s0 + $0x140] sm:$0xff]  ;;  %v185_v27 = vmul.f32 %v52_v21, %v52_v21 }
  0x32   :  { %v101_v38 = vadd.f32 %v100_v34, %v38_v29  ;;  %v233_v40 = vadd.f32 %v232_v36, %v170_v31  ;;  %v54_v29 = vld [vmem:[%s501_s0 + $0x148] sm:$0xff]  ;;  %v186_v31 = vmul.f32 %v53_v25, %v53_v25 }
  0x34   :  { %v102_v42 = vadd.f32 %v101_v38, %v39_v33  ;;  %v234_v44 = vadd.f32 %v233_v40, %v171_v35  ;;  %v55_v33 = vld [vmem:[%s501_s0 + $0x150] sm:$0xff]  ;;  %v187_v35 = vmul.f32 %v54_v29, %v54_v29 }
  0x36   :  { %v103_v46 = vadd.f32 %v102_v42, %v40_v37  ;;  %v235_v48 = vadd.f32 %v234_v44, %v172_v39  ;;  %v56_v37 = vld [vmem:[%s501_s0 + $0x158] sm:$0xff]  ;;  %v188_v39 = vmul.f32 %v55_v33, %v55_v33 }
  0x38   :  { %v104_v50 = vadd.f32 %v103_v46, %v41_v41  ;;  %v236_v52 = vadd.f32 %v235_v48, %v173_v43  ;;  %v57_v41 = vld [vmem:[%s501_s0 + $0x160] sm:$0xff]  ;;  %v189_v43 = vmul.f32 %v56_v37, %v56_v37 }
  0x3a   :  { %v105_v54 = vadd.f32 %v104_v50, %v42_v45  ;;  %v237_v56 = vadd.f32 %v236_v52, %v174_v47  ;;  %v58_v45 = vld [vmem:[%s501_s0 + $0x168] sm:$0xff]  ;;  %v190_v47 = vmul.f32 %v57_v41, %v57_v41 }
  0x3c   :  { %v106_v58 = vadd.f32 %v105_v54, %v43_v49  ;;  %v238_v60 = vadd.f32 %v237_v56, %v175_v51  ;;  %v59_v49 = vld [vmem:[%s501_s0 + $0x170] sm:$0xff]  ;;  %v191_v51 = vmul.f32 %v58_v45, %v58_v45 }
  0x3e   :  { %v107_v62 = vadd.f32 %v106_v58, %v44_v53  ;;  %v239_v0 = vadd.f32 %v238_v60, %v176_v55  ;;  %v60_v53 = vld [vmem:[%s501_s0 + $0x178] sm:$0xff]  ;;  %v192_v55 = vmul.f32 %v59_v49, %v59_v49 }
  0x40   :  { %v108_v2 = vadd.f32 %v107_v62, %v45_v57  ;;  %v240_v4 = vadd.f32 %v239_v0, %v177_v59  ;;  %v61_v57 = vld [vmem:[%s501_s0 + $0x180] sm:$0xff]  ;;  %v193_v59 = vmul.f32 %v60_v53, %v60_v53 }
  0x42   :  { %v109_v6 = vadd.f32 %v108_v2, %v46_v61  ;;  %v241_v8 = vadd.f32 %v240_v4, %v178_v63  ;;  %v62_v61 = vld [vmem:[%s501_s0 + $0x188] sm:$0xff]  ;;  %v194_v63 = vmul.f32 %v61_v57, %v61_v57 }
  0x44   :  { %v110_v10 = vadd.f32 %v109_v6, %v47_v1  ;;  %v242_v12 = vadd.f32 %v241_v8, %v179_v3  ;;  %v63_v1 = vld [vmem:[%s501_s0 + $0x190] sm:$0xff]  ;;  %v195_v3 = vmul.f32 %v62_v61, %v62_v61 }
  0x46   :  { %v111_v14 = vadd.f32 %v110_v10, %v48_v5  ;;  %v243_v16 = vadd.f32 %v242_v12, %v180_v7  ;;  %v64_v5 = vld [vmem:[%s501_s0 + $0x198] sm:$0xff]  ;;  %v196_v7 = vmul.f32 %v63_v1, %v63_v1 }
  0x48   :  { %v112_v18 = vadd.f32 %v111_v14, %v49_v9  ;;  %v244_v20 = vadd.f32 %v243_v16, %v181_v11  ;;  %v65_v9 = vld [vmem:[%s501_s0 + $0x1a0] sm:$0xff]  ;;  %v197_v11 = vmul.f32 %v64_v5, %v64_v5 }
  0x4a   :  { %v113_v22 = vadd.f32 %v112_v18, %v50_v13  ;;  %v245_v24 = vadd.f32 %v244_v20, %v182_v15  ;;  %v66_v13 = vld [vmem:[%s501_s0 + $0x1a8] sm:$0xff]  ;;  %v198_v15 = vmul.f32 %v65_v9, %v65_v9 }
  0x4c   :  { %v114_v26 = vadd.f32 %v113_v22, %v51_v17  ;;  %v246_v28 = vadd.f32 %v245_v24, %v183_v19  ;;  %v67_v17 = vld [vmem:[%s501_s0 + $0x1b0] sm:$0xff]  ;;  %v199_v19 = vmul.f32 %v66_v13, %v66_v13 }
  0x4e   :  { %v115_v30 = vadd.f32 %v114_v26, %v52_v21  ;;  %v247_v32 = vadd.f32 %v246_v28, %v184_v23  ;;  %v68_v21 = vld [vmem:[%s501_s0 + $0x1b8] sm:$0xff]  ;;  %v200_v23 = vmul.f32 %v67_v17, %v67_v17 }
  0x50   :  { %v116_v34 = vadd.f32 %v115_v30, %v53_v25  ;;  %v248_v36 = vadd.f32 %v247_v32, %v185_v27  ;;  %v69_v25 = vld [vmem:[%s501_s0 + $0x1c0] sm:$0xff]  ;;  %v201_v27 = vmul.f32 %v68_v21, %v68_v21 }
  0x52   :  { %v117_v38 = vadd.f32 %v116_v34, %v54_v29  ;;  %v249_v40 = vadd.f32 %v248_v36, %v186_v31  ;;  %v70_v29 = vld [vmem:[%s501_s0 + $0x1c8] sm:$0xff]  ;;  %v202_v31 = vmul.f32 %v69_v25, %v69_v25 }
  0x54   :  { %v118_v42 = vadd.f32 %v117_v38, %v55_v33  ;;  %v250_v44 = vadd.f32 %v249_v40, %v187_v35  ;;  %v71_v33 = vld [vmem:[%s501_s0 + $0x1d0] sm:$0xff]  ;;  %v203_v35 = vmul.f32 %v70_v29, %v70_v29 }
  0x56   :  { %v119_v46 = vadd.f32 %v118_v42, %v56_v37  ;;  %v251_v48 = vadd.f32 %v250_v44, %v188_v39  ;;  %v72_v37 = vld [vmem:[%s501_s0 + $0x1d8] sm:$0xff]  ;;  %v204_v39 = vmul.f32 %v71_v33, %v71_v33 }
  0x58   :  { %v120_v50 = vadd.f32 %v119_v46, %v57_v41  ;;  %v252_v52 = vadd.f32 %v251_v48, %v189_v43  ;;  %v73_v41 = vld [vmem:[%s501_s0 + $0x1e0] sm:$0xff]  ;;  %v205_v43 = vmul.f32 %v72_v37, %v72_v37 }
  0x5a   :  { %v121_v54 = vadd.f32 %v120_v50, %v58_v45  ;;  %v253_v56 = vadd.f32 %v252_v52, %v190_v47  ;;  %v74_v45 = vld [vmem:[%s501_s0 + $0x1e8] sm:$0xff]  ;;  %v206_v47 = vmul.f32 %v73_v41, %v73_v41 }
  0x5c   :  { %v122_v58 = vadd.f32 %v121_v54, %v59_v49  ;;  %v254_v60 = vadd.f32 %v253_v56, %v191_v51  ;;  %v75_v49 = vld [vmem:[%s501_s0 + $0x1f0] sm:$0xff]  ;;  %v207_v51 = vmul.f32 %v74_v45, %v74_v45 }
  0x5e   :  { %v123_v62 = vadd.f32 %v122_v58, %v60_v53  ;;  %v255_v0 = vadd.f32 %v254_v60, %v192_v55  ;;  %v76_v53 = vld [vmem:[%s501_s0 + $0x1f8] sm:$0xff]  ;;  %v208_v55 = vmul.f32 %v75_v49, %v75_v49 }
  0x5f   :  { %v209_v58 = vmul.f32 %v76_v53, %v76_v53 }
  0x60   :  { %v124_v2 = vadd.f32 %v123_v62, %v61_v57  ;;  %v256_v4 = vadd.f32 %v255_v0, %v193_v59 }
  0x62   :  { %v125_v6 = vadd.f32 %v124_v2, %v62_v61  ;;  %v257_v8 = vadd.f32 %v256_v4, %v194_v63 }
  0x64   :  { %v126_v10 = vadd.f32 %v125_v6, %v63_v1  ;;  %v258_v12 = vadd.f32 %v257_v8, %v195_v3 }
  0x66   :  { %v127_v14 = vadd.f32 %v126_v10, %v64_v5  ;;  %v259_v16 = vadd.f32 %v258_v12, %v196_v7 }
  0x68   :  { %v128_v18 = vadd.f32 %v127_v14, %v65_v9  ;;  %v260_v20 = vadd.f32 %v259_v16, %v197_v11  ;;  %v279_v11 = vld [vmem:[%s502_s1] sm:$0x3] }
  0x6a   :  { %v129_v22 = vadd.f32 %v128_v18, %v66_v13  ;;  %v261_v24 = vadd.f32 %v260_v20, %v198_v15 }
  0x6c   :  { %v130_v26 = vadd.f32 %v129_v22, %v67_v17  ;;  %v262_v28 = vadd.f32 %v261_v24, %v199_v19 }
  0x6e   :  { %v131_v30 = vadd.f32 %v130_v26, %v68_v21  ;;  %v263_v32 = vadd.f32 %v262_v28, %v200_v23 }
  0x70   :  { %v132_v34 = vadd.f32 %v131_v30, %v69_v25  ;;  %v264_v36 = vadd.f32 %v263_v32, %v201_v27 }
  0x72   :  { %v133_v38 = vadd.f32 %v132_v34, %v70_v29  ;;  %v265_v40 = vadd.f32 %v264_v36, %v202_v31 }
  0x74   :  { %v134_v42 = vadd.f32 %v133_v38, %v71_v33  ;;  %v266_v44 = vadd.f32 %v265_v40, %v203_v35 }
  0x76   :  { %v135_v46 = vadd.f32 %v134_v42, %v72_v37  ;;  %v267_v48 = vadd.f32 %v266_v44, %v204_v39 }
  0x78   :  { %v136_v50 = vadd.f32 %v135_v46, %v73_v41  ;;  %v268_v52 = vadd.f32 %v267_v48, %v205_v43 }
  0x7a   :  { %v137_v54 = vadd.f32 %v136_v50, %v74_v45  ;;  %v269_v56 = vadd.f32 %v268_v52, %v206_v47 }
  0x7c   :  { %v138_v57 = vadd.f32 %v137_v54, %v75_v49  ;;  %v270_v59 = vadd.f32 %v269_v56, %v207_v51 }
  0x7e   :  { %v139_v60 = vadd.f32 %v138_v57, %v76_v53  ;;  %v271_v61 = vadd.f32 %v270_v59, %v208_v55 }
  0x80   :  { %v140_v62 = vrot.slane %v139_v60, 4  ;;  %v272_v63 = vadd.f32 %v271_v61, %v209_v58 }
  0x82   :  { %v141_v0 = vadd.f32 %v140_v62, %v139_v60  ;;  %v273_v1 = vrot.slane %v272_v63, 4 }
  0x84   :  { %v142_v2 = vrot.slane %v141_v0, 2  ;;  %v274_v3 = vadd.f32 %v273_v1, %v272_v63 }
  0x86   :  { %v143_v4 = vadd.f32 %v142_v2, %v141_v0  ;;  %v275_v5 = vrot.slane %v274_v3, 2 }
  0x88   :  { %v144_v6 = vrot.slane %v143_v4, 1  ;;  %v276_v7 = vadd.f32 %v275_v5, %v274_v3 }
  0x8a   :  { %v145_v8 = vadd.f32 %v144_v6, %v143_v4  ;;  %v277_v9 = vrot.slane %v276_v7, 1 }
  0x8c   :  { %v278_v10 = vadd.f32 %v277_v9, %v276_v7 }
  0x8e   :  { %v281_v12 = vsel %vm280_vm0, %v145_v8, %v278_v10 }
  0x8f   :  { %v282_v13 = vadd.f32 %v281_v12, %v279_v11 }
  0x91   :  { %283 = vst [vmem:[%s502_s1] sm:$0x3] %v282_v13 }

// kernel: resnet_generator_forward.41
= control target key start
LH: loop header
LB: loop body
LE: loop exit
PB: predicated region body
PF: predicated region fallthrough
CT: control target
= control target key end

     0   :  { %v92_v0 = vlaneseq  ;;  %s1446_s1 = inlined_call_operand.vmem [shape: f32[2,128], index: 1, kind: input, shape index: {}]   ;;  %s1447_s0 = inlined_call_operand.vmem [shape: f32[512,128], index: 0, kind: input, shape index: {}]   ;;  %s1448_s2 = inlined_call_operand.vmem [shape: f32[1,128], index: 2, kind: input, shape index: {}]   ;;  %s1449_s3 = inlined_call_operand.vmem [shape: f32[1,128], index: 3, kind: input, shape index: {}]   ;;  %s1450_s4 = inlined_call_operand.vmem [shape: f32[512,128], index: 4, kind: output, shape index: {}]  }
   0x1   :  { %v81_v1 = vld [vmem:[%s1446_s1] sm:$0x1]  ;;  %v83_v2 = vld [vmem:[%s1446_s1 + $0x1] sm:$0x1]  ;;  %v478_v9 = vld [vmem:[%s1447_s0 + $0x8] sm:$0xff] }
   0x2   :  { %v82_v3 = vmul.f32 0.001953125, %v81_v1  ;;  %v84_v4 = vmul.f32 0.001953125, %v83_v2  ;;  %v467_v5 = vshrl.u32 %v92_v0, 7  ;;  %v473_v8 = vld [vmem:[%s1447_s0] sm:$0xff]  ;;  %v483_v10 = vld [vmem:[%s1447_s0 + $0x10] sm:$0xff]  ;;  %v492_v13 = vld [vmem:[%s1447_s0 + $0x18] sm:$0xff] }
   0x3   :  { %v497_v14 = vld [vmem:[%s1447_s0 + $0x20] sm:$0xff]  ;;  %v502_v15 = vld [vmem:[%s1447_s0 + $0x28] sm:$0xff]  ;;  %v507_v16 = vld [vmem:[%s1447_s0 + $0x30] sm:$0xff] }
   0x4   :  { %v85_v6 = vmul.f32 %v82_v3, %v82_v3  ;;  %v1451_v7 = vsub.s32 0, %v467_v5  ;;  %v512_v17 = vld [vmem:[%s1447_s0 + $0x38] sm:$0xff]  ;;  %v517_v18 = vld [vmem:[%s1447_s0 + $0x40] sm:$0xff]  ;;  %v522_v19 = vld [vmem:[%s1447_s0 + $0x48] sm:$0xff] }
   0x5   :  { %v527_v21 = vld [vmem:[%s1447_s0 + $0x50] sm:$0xff]  ;;  %v532_v22 = vld [vmem:[%s1447_s0 + $0x58] sm:$0xff]  ;;  %v537_v23 = vld [vmem:[%s1447_s0 + $0x60] sm:$0xff] }
   0x6   :  { %v86_v11 = vsub.f32 %v84_v4, %v85_v6  ;;  %v487_v12 = vrot.slane %v82_v3, %v1451_v7  ;;  %v542_v24 = vld [vmem:[%s1447_s0 + $0x68] sm:$0xff]  ;;  %v547_v25 = vld [vmem:[%s1447_s0 + $0x70] sm:$0xff]  ;;  %v552_v26 = vld [vmem:[%s1447_s0 + $0x78] sm:$0xff] }
   0x7   :  { %v557_v27 = vld [vmem:[%s1447_s0 + $0x80] sm:$0xff]  ;;  %v562_v28 = vld [vmem:[%s1447_s0 + $0x88] sm:$0xff]  ;;  %v573_v33 = vld [vmem:[%s1447_s0 + $0x90] sm:$0xff] }
   0x8   :  { %v87_v20 = vmax.f32 %v86_v11, 0.0  ;;  %v578_v34 = vld [vmem:[%s1447_s0 + $0x98] sm:$0xff]  ;;  %v583_v35 = vld [vmem:[%s1447_s0 + $0xa0] sm:$0xff]  ;;  %v588_v36 = vld [vmem:[%s1447_s0 + $0xa8] sm:$0xff] }
   0x9   :  { %v601_v41 = vld [vmem:[%s1447_s0 + $0xb0] sm:$0xff]  ;;  %v606_v42 = vld [vmem:[%s1447_s0 + $0xb8] sm:$0xff]  ;;  %v611_v43 = vld [vmem:[%s1447_s0 + $0xc0] sm:$0xff] }
   0xa   :  { %v89_v29 = vadd.f32 1e-05, %v87_v20  ;;  %v616_v44 = vld [vmem:[%s1447_s0 + $0xc8] sm:$0xff]  ;;  %v627_v48 = vld [vmem:[%s1447_s0 + $0xd0] sm:$0xff]  ;;  %v632_v49 = vld [vmem:[%s1447_s0 + $0xd8] sm:$0xff] }
   0xb   :  { %v637_v50 = vld [vmem:[%s1447_s0 + $0xe0] sm:$0xff]  ;;  %v642_v51 = vld [vmem:[%s1447_s0 + $0xe8] sm:$0xff]  ;;  %v655_v56 = vld [vmem:[%s1447_s0 + $0xf0] sm:$0xff] }
   0xc   :  { %434 = vrsqrt.f32 %v89_v29  ;;  %v660_v57 = vld [vmem:[%s1447_s0 + $0xf8] sm:$0xff]  ;;  %v665_v58 = vld [vmem:[%s1447_s0 + $0x100] sm:$0xff]  ;;  %v670_v59 = vld [vmem:[%s1447_s0 + $0x108] sm:$0xff] }
   0xd   :  { %v683_v0 = vld [vmem:[%s1447_s0 + $0x110] sm:$0xff]  ;;  %v688_v1 = vld [vmem:[%s1447_s0 + $0x118] sm:$0xff]  ;;  %v693_v2 = vld [vmem:[%s1447_s0 + $0x120] sm:$0xff] }
   0xe   :  { %v706_v20 = vld [vmem:[%s1447_s0 + $0x128] sm:$0xff]  ;;  %v711_v29 = vld [vmem:[%s1447_s0 + $0x130] sm:$0xff]  ;;  %v716_v4 = vld [vmem:[%s1447_s0 + $0x138] sm:$0xff] }
   0xf   :  { %v729_v62 = vld [vmem:[%s1447_s0 + $0x140] sm:$0xff]  ;;  %v734_v61 = vld [vmem:[%s1447_s0 + $0x148] sm:$0xff]  ;;  %v739_v11 = vld [vmem:[%s1447_s0 + $0x150] sm:$0xff] }
  0x10   :  { %1469 = vst [vmem:[#allocation2_spill] sm:$0xff] %v739_v11  ;;  %v752_v55 = vld [vmem:[%s1447_s0 + $0x158] sm:$0xff]  ;;  %v757_v54 = vld [vmem:[%s1447_s0 + $0x160] sm:$0xff]  ;;  %v762_v63 = vld [vmem:[%s1447_s0 + $0x168] sm:$0xff] }
  0x11   :  { %1470 = vst [vmem:[#allocation3_spill] sm:$0xff] %v752_v55  ;;  %1471 = vst [vmem:[#allocation4_spill] sm:$0xff] %v757_v54  ;;  %v88_v6 = vld [vmem:[%s1448_s2] sm:$0x1]  ;;  %v778_v47 = vld [vmem:[%s1447_s0 + $0x170] sm:$0xff] }
  0x12   :  { %1472 = vst [vmem:[#allocation5_spill] sm:$0xff] %v762_v63  ;;  %1473 = vst [vmem:[#allocation6_spill] sm:$0xff] %v778_v47  ;;  %v783_v46 = vld [vmem:[%s1447_s0 + $0x178] sm:$0xff]  ;;  %v788_v3 = vld [vmem:[%s1447_s0 + $0x180] sm:$0xff]  ;;  %v1489_v63 = vsub.f32 %v483_v10, %v487_v12  ;;  %v1493_v10 = vsub.f32 %v507_v16, %v487_v12 }
  0x13   :  { %1474 = vst [vmem:[#allocation7_spill] sm:$0xff] %v783_v46  ;;  %1475 = vst [vmem:[#allocation8_spill] sm:$0xff] %v788_v3  ;;  %v801_v40 = vld [vmem:[%s1447_s0 + $0x188] sm:$0xff]  ;;  %v806_v39 = vld [vmem:[%s1447_s0 + $0x190] sm:$0xff] }
  0x14   :  { %1476 = vst [vmem:[#allocation9_spill] sm:$0xff] %v801_v40  ;;  %1477 = vst [vmem:[#allocation10_spill] sm:$0xff] %v806_v39  ;;  %v811_v52 = vld [vmem:[%s1447_s0 + $0x198] sm:$0xff]  ;;  %v824_v37 = vld [vmem:[%s1447_s0 + $0x1a0] sm:$0xff]  ;;  %v1488_v39 = vsub.f32 %v478_v9, %v487_v12  ;;  %v1492_v9 = vsub.f32 %v502_v15, %v487_v12 }
  0x15   :  { %1478 = vst [vmem:[#allocation11_spill] sm:$0xff] %v811_v52  ;;  %1479 = vst [vmem:[#allocation12_spill] sm:$0xff] %v824_v37  ;;  %v829_v32 = vld [vmem:[%s1447_s0 + $0x1a8] sm:$0xff]  ;;  %v834_v45 = vld [vmem:[%s1447_s0 + $0x1b0] sm:$0xff]  ;;  %v1486_v37 = vsub.s32 0, %v467_v5 }
  0x16   :  { %v847_v30 = vld [vmem:[%s1447_s0 + $0x1b8] sm:$0xff]  ;;  %v852_v7 = vld [vmem:[%s1447_s0 + $0x1c0] sm:$0xff]  ;;  %v857_v38 = vld [vmem:[%s1447_s0 + $0x1c8] sm:$0xff]  ;;  %v435_v53 = vpop.eup %434 }
  0x17   :  { %v870_v55 = vld [vmem:[%s1447_s0 + $0x1d0] sm:$0xff]  ;;  %v875_v11 = vld [vmem:[%s1447_s0 + $0x1d8] sm:$0xff]  ;;  %v880_v31 = vld [vmem:[%s1447_s0 + $0x1e0] sm:$0xff]  ;;  %v91_v60 = vmul.f32 %v435_v53, %v88_v6  ;;  %v1487_v6 = vsub.f32 %v473_v8, %v487_v12  ;;  %v1491_v8 = vsub.f32 %v497_v14, %v487_v12 }
  0x18   :  { %1480 = vst [vmem:[#allocation13_spill] sm:$0xff] %v870_v55  ;;  %1481 = vst [vmem:[#allocation14_spill] sm:$0xff] %v875_v11  ;;  %v891_v3 = vld [vmem:[%s1447_s0 + $0x1e8] sm:$0xff]  ;;  %v896_v46 = vld [vmem:[%s1447_s0 + $0x1f0] sm:$0xff] }
  0x19   :  { %1482 = vst [vmem:[#allocation15_spill] sm:$0xff] %v880_v31  ;;  %1483 = vst [vmem:[#allocation16_spill] sm:$0xff] %v891_v3  ;;  %v901_v53 = vld [vmem:[%s1447_s0 + $0x1f8] sm:$0xff]  ;;  %v913_v52 = vrot.slane %v91_v60, %v1486_v37  ;;  %v924_v54 = vld [vmem:[%s1449_s3] ss:$0 sm:$0xff]  ;;  %v1490_v37 = vsub.f32 %v492_v13, %v487_v12  ;;  %v1494_v13 = vsub.f32 %v512_v17, %v487_v12 }
  0x1a   :  { %1484 = vst [vmem:[#allocation17_spill] sm:$0xff] %v896_v46  ;;  %1485 = vst [vmem:[#allocation18_spill] sm:$0xff] %v901_v53 }
  0x1b   :  { %v166_v47 = vmul.f32 %v913_v52, %v1487_v6  ;;  %v167_v40 = vmul.f32 %v913_v52, %v1488_v39  ;;  %v168_v5 = vmul.f32 %v913_v52, %v1489_v63  ;;  %v169_v60 = vmul.f32 %v913_v52, %v1490_v37 }
  0x1c   :  { %v170_v6 = vmul.f32 %v913_v52, %v1491_v8  ;;  %v171_v39 = vmul.f32 %v913_v52, %v1492_v9  ;;  %v172_v63 = vmul.f32 %v913_v52, %v1493_v10  ;;  %v173_v37 = vmul.f32 %v913_v52, %v1494_v13 }
  0x1d   :  { %v237_v53 = vadd.f32 %v924_v54, %v166_v47  ;;  %v238_v14 = vadd.f32 %v924_v54, %v167_v40  ;;  %v239_v8 = vadd.f32 %v924_v54, %v168_v5  ;;  %v240_v15 = vadd.f32 %v924_v54, %v169_v60 }
  0x1e   :  { %v241_v9 = vadd.f32 %v924_v54, %v170_v6  ;;  %v242_v46 = vadd.f32 %v924_v54, %v171_v39  ;;  %v243_v16 = vadd.f32 %v924_v54, %v172_v63  ;;  %v244_v10 = vadd.f32 %v924_v54, %v173_v37 }
  0x1f   :  { %v301_v3 = vmax.f32 %v237_v53, 0.0  ;;  %v302_v17 = vmax.f32 %v238_v14, 0.0  ;;  %v303_v31 = vmax.f32 %v239_v8, 0.0  ;;  %v304_v13 = vmax.f32 %v240_v15, 0.0 }
  0x20   :  { %v305_v11 = vmax.f32 %v241_v9, 0.0  ;;  %v306_v47 = vmax.f32 %v242_v46, 0.0  ;;  %v307_v55 = vmax.f32 %v243_v16, 0.0  ;;  %v308_v40 = vmax.f32 %v244_v10, 0.0 }
  0x21   :  { %365 = vst [vmem:[%s1450_s4] sm:$0xff] %v301_v3  ;;  %366 = vst [vmem:[%s1450_s4 + $0x8] sm:$0xff] %v302_v17  ;;  %v1495_v46 = vsub.f32 %v517_v18, %v487_v12  ;;  %v1496_v3 = vsub.f32 %v522_v19, %v487_v12  ;;  %v1497_v60 = vsub.f32 %v527_v21, %v487_v12 }
  0x22   :  { %367 = vst [vmem:[%s1450_s4 + $0x10] sm:$0xff] %v303_v31  ;;  %368 = vst [vmem:[%s1450_s4 + $0x18] sm:$0xff] %v304_v13  ;;  %v1498_v31 = vsub.f32 %v532_v22, %v487_v12  ;;  %v1499_v18 = vsub.f32 %v537_v23, %v487_v12  ;;  %v1500_v21 = vsub.f32 %v542_v24, %v487_v12 }
  0x23   :  { %v174_v53 = vmul.f32 %v913_v52, %v1495_v46  ;;  %v175_v5 = vmul.f32 %v913_v52, %v1496_v3  ;;  %v176_v6 = vmul.f32 %v913_v52, %v1497_v60  ;;  %369 = vst [vmem:[%s1450_s4 + $0x20] sm:$0xff] %v305_v11  ;;  %370 = vst [vmem:[%s1450_s4 + $0x28] sm:$0xff] %v306_v47 }
  0x24   :  { %v177_v39 = vmul.f32 %v913_v52, %v1498_v31  ;;  %371 = vst [vmem:[%s1450_s4 + $0x30] sm:$0xff] %v307_v55  ;;  %372 = vst [vmem:[%s1450_s4 + $0x38] sm:$0xff] %v308_v40  ;;  %v178_v19 = vmul.f32 %v913_v52, %v1499_v18  ;;  %v179_v22 = vmul.f32 %v913_v52, %v1500_v21 }
  0x25   :  { %v1501_v11 = vsub.f32 %v547_v25, %v487_v12  ;;  %v1502_v55 = vsub.f32 %v552_v26, %v487_v12  ;;  %v245_v14 = vadd.f32 %v924_v54, %v174_v53  ;;  %v246_v23 = vadd.f32 %v924_v54, %v175_v5 }
  0x26   :  { %v247_v8 = vadd.f32 %v924_v54, %v176_v6  ;;  %v248_v24 = vadd.f32 %v924_v54, %v177_v39  ;;  %v249_v15 = vadd.f32 %v924_v54, %v178_v19  ;;  %v250_v9 = vadd.f32 %v924_v54, %v179_v22 }
  0x27   :  { %v180_v63 = vmul.f32 %v913_v52, %v1501_v11  ;;  %v181_v37 = vmul.f32 %v913_v52, %v1502_v55  ;;  %v309_v10 = vmax.f32 %v245_v14, 0.0  ;;  %v310_v26 = vmax.f32 %v246_v23, 0.0 }
  0x28   :  { %v311_v17 = vmax.f32 %v247_v8, 0.0  ;;  %v312_v13 = vmax.f32 %v248_v24, 0.0  ;;  %v313_v47 = vmax.f32 %v249_v15, 0.0  ;;  %v314_v40 = vmax.f32 %v250_v9, 0.0 }
  0x29   :  { %v251_v25 = vadd.f32 %v924_v54, %v180_v63  ;;  %v252_v16 = vadd.f32 %v924_v54, %v181_v37  ;;  %373 = vst [vmem:[%s1450_s4 + $0x40] sm:$0xff] %v309_v10  ;;  %374 = vst [vmem:[%s1450_s4 + $0x48] sm:$0xff] %v310_v26  ;;  %v1503_v3 = vsub.f32 %v557_v27, %v487_v12 }
  0x2a   :  { %375 = vst [vmem:[%s1450_s4 + $0x50] sm:$0xff] %v311_v17  ;;  %376 = vst [vmem:[%s1450_s4 + $0x58] sm:$0xff] %v312_v13  ;;  %v1504_v60 = vsub.f32 %v562_v28, %v487_v12  ;;  %v1505_v31 = vsub.f32 %v573_v33, %v487_v12  ;;  %v1506_v18 = vsub.f32 %v578_v34, %v487_v12 }
  0x2b   :  { %v315_v46 = vmax.f32 %v251_v25, 0.0  ;;  %v316_v53 = vmax.f32 %v252_v16, 0.0  ;;  %v182_v5 = vmul.f32 %v913_v52, %v1503_v3  ;;  %377 = vst [vmem:[%s1450_s4 + $0x60] sm:$0xff] %v313_v47  ;;  %378 = vst [vmem:[%s1450_s4 + $0x68] sm:$0xff] %v314_v40  ;;  %v1507_v27 = vsub.f32 %v583_v35, %v487_v12 }
  0x2c   :  { %v183_v6 = vmul.f32 %v913_v52, %v1504_v60  ;;  %v184_v39 = vmul.f32 %v913_v52, %v1505_v31  ;;  %v185_v19 = vmul.f32 %v913_v52, %v1506_v18  ;;  %v1508_v33 = vsub.f32 %v588_v36, %v487_v12 }
  0x2d   :  { %379 = vst [vmem:[%s1450_s4 + $0x70] sm:$0xff] %v315_v46  ;;  %380 = vst [vmem:[%s1450_s4 + $0x78] sm:$0xff] %v316_v53  ;;  %v186_v28 = vmul.f32 %v913_v52, %v1507_v27  ;;  %v1509_v21 = vsub.f32 %v601_v41, %v487_v12  ;;  %v1510_v11 = vsub.f32 %v606_v42, %v487_v12 }
  0x2e   :  { %v187_v34 = vmul.f32 %v913_v52, %v1508_v33  ;;  %v253_v55 = vadd.f32 %v924_v54, %v182_v5  ;;  %v254_v35 = vadd.f32 %v924_v54, %v183_v6  ;;  %v255_v37 = vadd.f32 %v924_v54, %v184_v39 }
  0x2f   :  { %v188_v22 = vmul.f32 %v913_v52, %v1509_v21  ;;  %v189_v63 = vmul.f32 %v913_v52, %v1510_v11  ;;  %v256_v36 = vadd.f32 %v924_v54, %v185_v19  ;;  %v257_v14 = vadd.f32 %v924_v54, %v186_v28 }
  0x30   :  { %v258_v23 = vadd.f32 %v924_v54, %v187_v34  ;;  %v317_v24 = vmax.f32 %v253_v55, 0.0  ;;  %v318_v42 = vmax.f32 %v254_v35, 0.0  ;;  %v319_v15 = vmax.f32 %v255_v37, 0.0 }
  0x31   :  { %v259_v41 = vadd.f32 %v924_v54, %v188_v22  ;;  %v260_v8 = vadd.f32 %v924_v54, %v189_v63  ;;  %v320_v9 = vmax.f32 %v256_v36, 0.0  ;;  %v321_v25 = vmax.f32 %v257_v14, 0.0 }
  0x32   :  { %v322_v16 = vmax.f32 %v258_v23, 0.0  ;;  %381 = vst [vmem:[%s1450_s4 + $0x80] sm:$0xff] %v317_v24  ;;  %382 = vst [vmem:[%s1450_s4 + $0x88] sm:$0xff] %v318_v42  ;;  %v1511_v17 = vsub.f32 %v611_v43, %v487_v12  ;;  %v1512_v47 = vsub.f32 %v616_v44, %v487_v12  ;;  %v1513_v46 = vsub.f32 %v627_v48, %v487_v12 }
  0x33   :  { %v323_v10 = vmax.f32 %v259_v41, 0.0  ;;  %v324_v26 = vmax.f32 %v260_v8, 0.0  ;;  %383 = vst [vmem:[%s1450_s4 + $0x90] sm:$0xff] %v319_v15  ;;  %384 = vst [vmem:[%s1450_s4 + $0x98] sm:$0xff] %v320_v9  ;;  %v1514_v3 = vsub.f32 %v632_v49, %v487_v12  ;;  %v1515_v43 = vsub.f32 %v637_v50, %v487_v12 }
  0x34   :  { %v190_v13 = vmul.f32 %v913_v52, %v1511_v17  ;;  %v191_v40 = vmul.f32 %v913_v52, %v1512_v47  ;;  %v192_v53 = vmul.f32 %v913_v52, %v1513_v46  ;;  %385 = vst [vmem:[%s1450_s4 + $0xa0] sm:$0xff] %v321_v25  ;;  %386 = vst [vmem:[%s1450_s4 + $0xa8] sm:$0xff] %v322_v16 }
  0x35   :  { %v193_v5 = vmul.f32 %v913_v52, %v1514_v3  ;;  %387 = vst [vmem:[%s1450_s4 + $0xb0] sm:$0xff] %v323_v10  ;;  %388 = vst [vmem:[%s1450_s4 + $0xb8] sm:$0xff] %v324_v26  ;;  %v194_v44 = vmul.f32 %v913_v52, %v1515_v43  ;;  %v1516_v48 = vsub.f32 %v642_v51, %v487_v12 }
  0x36   :  { %v1517_v60 = vsub.f32 %v655_v56, %v487_v12  ;;  %v1518_v31 = vsub.f32 %v660_v57, %v487_v12  ;;  %v261_v18 = vadd.f32 %v924_v54, %v190_v13  ;;  %v262_v50 = vadd.f32 %v924_v54, %v191_v40 }
  0x37   :  { %v195_v49 = vmul.f32 %v913_v52, %v1516_v48  ;;  %v263_v19 = vadd.f32 %v924_v54, %v192_v53  ;;  %v264_v51 = vadd.f32 %v924_v54, %v193_v5  ;;  %v265_v27 = vadd.f32 %v924_v54, %v194_v44 }
  0x38   :  { %v196_v6 = vmul.f32 %v913_v52, %v1517_v60  ;;  %v197_v39 = vmul.f32 %v913_v52, %v1518_v31  ;;  %v325_v34 = vmax.f32 %v261_v18, 0.0  ;;  %v326_v57 = vmax.f32 %v262_v50, 0.0  ;;  %v1529_v31 = vld [vmem:[#allocation2_spill] sm:$0xff]  ;;  %v1531_v50 = vld [vmem:[#allocation3_spill] sm:$0xff] }
  0x39   :  { %v266_v28 = vadd.f32 %v924_v54, %v195_v49  ;;  %v327_v21 = vmax.f32 %v263_v19, 0.0  ;;  %v328_v22 = vmax.f32 %v264_v51, 0.0  ;;  %v329_v11 = vmax.f32 %v265_v27, 0.0 }
  0x3a   :  { %v267_v56 = vadd.f32 %v924_v54, %v196_v6  ;;  %v268_v33 = vadd.f32 %v924_v54, %v197_v39  ;;  %389 = vst [vmem:[%s1450_s4 + $0xc0] sm:$0xff] %v325_v34  ;;  %390 = vst [vmem:[%s1450_s4 + $0xc8] sm:$0xff] %v326_v57  ;;  %v1519_v37 = vsub.f32 %v665_v58, %v487_v12  ;;  %v1537_v34 = vld [vmem:[#allocation6_spill] sm:$0xff] }
  0x3b   :  { %v330_v63 = vmax.f32 %v266_v28, 0.0  ;;  %391 = vst [vmem:[%s1450_s4 + $0xd0] sm:$0xff] %v327_v21  ;;  %392 = vst [vmem:[%s1450_s4 + $0xd8] sm:$0xff] %v328_v22  ;;  %v1520_v14 = vsub.f32 %v670_v59, %v487_v12  ;;  %v1521_v41 = vsub.f32 %v683_v0, %v487_v12  ;;  %v1522_v24 = vsub.f32 %v688_v1, %v487_v12  ;;  %v1535_v28 = vld [vmem:[#allocation5_spill] sm:$0xff]  ;;  %v1539_v22 = vld [vmem:[#allocation7_spill] sm:$0xff] }
  0x3c   :  { %v331_v55 = vmax.f32 %v267_v56, 0.0  ;;  %v332_v35 = vmax.f32 %v268_v33, 0.0  ;;  %v198_v36 = vmul.f32 %v913_v52, %v1519_v37  ;;  %393 = vst [vmem:[%s1450_s4 + $0xe0] sm:$0xff] %v329_v11  ;;  %v1523_v58 = vsub.f32 %v693_v2, %v487_v12 }
  0x3d   :  { %v199_v23 = vmul.f32 %v913_v52, %v1520_v14  ;;  %v200_v8 = vmul.f32 %v913_v52, %v1521_v41  ;;  %v201_v42 = vmul.f32 %v913_v52, %v1522_v24  ;;  %394 = vst [vmem:[%s1450_s4 + $0xe8] sm:$0xff] %v330_v63  ;;  %v1524_v0 = vsub.f32 %v706_v20, %v487_v12 }
  0x3e   :  { %395 = vst [vmem:[%s1450_s4 + $0xf0] sm:$0xff] %v331_v55  ;;  %396 = vst [vmem:[%s1450_s4 + $0xf8] sm:$0xff] %v332_v35  ;;  %v202_v59 = vmul.f32 %v913_v52, %v1523_v58  ;;  %v1525_v15 = vsub.f32 %v711_v29, %v487_v12  ;;  %v1526_v25 = vsub.f32 %v716_v4, %v487_v12 }
  0x3f   :  { %v203_v1 = vmul.f32 %v913_v52, %v1524_v0  ;;  %v269_v10 = vadd.f32 %v924_v54, %v198_v36  ;;  %v270_v2 = vadd.f32 %v924_v54, %v199_v23  ;;  %v271_v26 = vadd.f32 %v924_v54, %v200_v8 }
  0x40   :  { %v204_v9 = vmul.f32 %v913_v52, %v1525_v15  ;;  %v205_v16 = vmul.f32 %v913_v52, %v1526_v25  ;;  %v272_v20 = vadd.f32 %v924_v54, %v201_v42  ;;  %v273_v17 = vadd.f32 %v924_v54, %v202_v59  ;;  %v1541_v25 = vld [vmem:[#allocation8_spill] sm:$0xff] }
  0x41   :  { %v274_v13 = vadd.f32 %v924_v54, %v203_v1  ;;  %v333_v40 = vmax.f32 %v269_v10, 0.0  ;;  %v334_v4 = vmax.f32 %v270_v2, 0.0  ;;  %v335_v46 = vmax.f32 %v271_v26, 0.0  ;;  %v1543_v2 = vld [vmem:[#allocation9_spill] sm:$0xff] }
  0x42   :  { %v275_v29 = vadd.f32 %v924_v54, %v204_v9  ;;  %v276_v47 = vadd.f32 %v924_v54, %v205_v16  ;;  %v336_v53 = vmax.f32 %v272_v20, 0.0  ;;  %v337_v3 = vmax.f32 %v273_v17, 0.0  ;;  %v1545_v17 = vld [vmem:[#allocation10_spill] sm:$0xff] }
  0x43   :  { %v338_v5 = vmax.f32 %v274_v13, 0.0  ;;  %397 = vst [vmem:[%s1450_s4 + $0x100] sm:$0xff] %v333_v40  ;;  %398 = vst [vmem:[%s1450_s4 + $0x108] sm:$0xff] %v334_v4  ;;  %v1527_v48 = vsub.f32 %v729_v62, %v487_v12  ;;  %v1528_v60 = vsub.f32 %v734_v61, %v487_v12  ;;  %v1530_v39 = vsub.f32 %v1529_v31, %v487_v12  ;;  %v1533_v61 = vld [vmem:[#allocation4_spill] sm:$0xff] }
  0x44   :  { %v339_v43 = vmax.f32 %v275_v29, 0.0  ;;  %v340_v44 = vmax.f32 %v276_v47, 0.0  ;;  %399 = vst [vmem:[%s1450_s4 + $0x110] sm:$0xff] %v335_v46  ;;  %400 = vst [vmem:[%s1450_s4 + $0x118] sm:$0xff] %v336_v53  ;;  %v1532_v19 = vsub.f32 %v1531_v50, %v487_v12  ;;  %v1534_v62 = vsub.f32 %v1533_v61, %v487_v12  ;;  %v1547_v47 = vld [vmem:[#allocation11_spill] sm:$0xff]  ;;  %v1549_v46 = vld [vmem:[#allocation12_spill] sm:$0xff] }
  0x45   :  { %v206_v49 = vmul.f32 %v913_v52, %v1527_v48  ;;  %v207_v6 = vmul.f32 %v913_v52, %v1528_v60  ;;  %v208_v18 = vmul.f32 %v913_v52, %v1530_v39  ;;  %401 = vst [vmem:[%s1450_s4 + $0x120] sm:$0xff] %v337_v3  ;;  %402 = vst [vmem:[%s1450_s4 + $0x128] sm:$0xff] %v338_v5 }
  0x46   :  { %v209_v51 = vmul.f32 %v913_v52, %v1532_v19  ;;  %403 = vst [vmem:[%s1450_s4 + $0x130] sm:$0xff] %v339_v43  ;;  %404 = vst [vmem:[%s1450_s4 + $0x138] sm:$0xff] %v340_v44  ;;  %v210_v27 = vmul.f32 %v913_v52, %v1534_v62  ;;  %v1536_v56 = vsub.f32 %v1535_v28, %v487_v12 }
  0x47   :  { %v1538_v57 = vsub.f32 %v1537_v34, %v487_v12  ;;  %v1540_v11 = vsub.f32 %v1539_v22, %v487_v12  ;;  %v277_v55 = vadd.f32 %v924_v54, %v206_v49  ;;  %v278_v35 = vadd.f32 %v924_v54, %v207_v6 }
  0x48   :  { %v211_v33 = vmul.f32 %v913_v52, %v1536_v56  ;;  %v279_v37 = vadd.f32 %v924_v54, %v208_v18  ;;  %v280_v36 = vadd.f32 %v924_v54, %v209_v51  ;;  %v281_v14 = vadd.f32 %v924_v54, %v210_v27 }
  0x49   :  { %v212_v21 = vmul.f32 %v913_v52, %v1538_v57  ;;  %v213_v63 = vmul.f32 %v913_v52, %v1540_v11  ;;  %v341_v24 = vmax.f32 %v277_v55, 0.0  ;;  %v342_v42 = vmax.f32 %v278_v35, 0.0  ;;  %v1556_v11 = vld [vmem:[#allocation13_spill] sm:$0xff]  ;;  %v1558_v35 = vld [vmem:[#allocation14_spill] sm:$0xff] }
  0x4a   :  { %v282_v23 = vadd.f32 %v924_v54, %v211_v33  ;;  %v343_v58 = vmax.f32 %v279_v37, 0.0  ;;  %v344_v59 = vmax.f32 %v280_v36, 0.0  ;;  %v345_v0 = vmax.f32 %v281_v14, 0.0 }
  0x4b   :  { %v283_v41 = vadd.f32 %v924_v54, %v212_v21  ;;  %v284_v8 = vadd.f32 %v924_v54, %v213_v63  ;;  %405 = vst [vmem:[%s1450_s4 + $0x140] sm:$0xff] %v341_v24  ;;  %406 = vst [vmem:[%s1450_s4 + $0x148] sm:$0xff] %v342_v42  ;;  %v1542_v16 = vsub.f32 %v1541_v25, %v487_v12  ;;  %v1564_v24 = vld [vmem:[#allocation17_spill] sm:$0xff] }
  0x4c   :  { %v346_v1 = vmax.f32 %v282_v23, 0.0  ;;  %407 = vst [vmem:[%s1450_s4 + $0x150] sm:$0xff] %v343_v58  ;;  %408 = vst [vmem:[%s1450_s4 + $0x158] sm:$0xff] %v344_v59  ;;  %v1544_v26 = vsub.f32 %v1543_v2, %v487_v12  ;;  %v1546_v13 = vsub.f32 %v1545_v17, %v487_v12  ;;  %v1548_v40 = vsub.f32 %v1547_v47, %v487_v12  ;;  %v1562_v23 = vld [vmem:[#allocation16_spill] sm:$0xff]  ;;  %v1566_v59 = vld [vmem:[#allocation18_spill] sm:$0xff] }
  0x4d   :  { %v347_v15 = vmax.f32 %v283_v41, 0.0  ;;  %v348_v9 = vmax.f32 %v284_v8, 0.0  ;;  %v214_v10 = vmul.f32 %v913_v52, %v1542_v16  ;;  %409 = vst [vmem:[%s1450_s4 + $0x160] sm:$0xff] %v345_v0  ;;  %v1550_v53 = vsub.f32 %v1549_v46, %v487_v12 }
  0x4e   :  { %v215_v20 = vmul.f32 %v913_v52, %v1544_v26  ;;  %v216_v29 = vmul.f32 %v913_v52, %v1546_v13  ;;  %v217_v4 = vmul.f32 %v913_v52, %v1548_v40  ;;  %410 = vst [vmem:[%s1450_s4 + $0x168] sm:$0xff] %v346_v1  ;;  %v1551_v5 = vsub.f32 %v829_v32, %v487_v12 }
  0x4f   :  { %411 = vst [vmem:[%s1450_s4 + $0x170] sm:$0xff] %v347_v15  ;;  %412 = vst [vmem:[%s1450_s4 + $0x178] sm:$0xff] %v348_v9  ;;  %v218_v3 = vmul.f32 %v913_v52, %v1550_v53  ;;  %v1552_v44 = vsub.f32 %v834_v45, %v487_v12  ;;  %v1553_v49 = vsub.f32 %v847_v30, %v487_v12 }
  0x50   :  { %v219_v43 = vmul.f32 %v913_v52, %v1551_v5  ;;  %v285_v6 = vadd.f32 %v924_v54, %v214_v10  ;;  %v286_v31 = vadd.f32 %v924_v54, %v215_v20  ;;  %v287_v39 = vadd.f32 %v924_v54, %v216_v29 }
  0x51   :  { %v220_v48 = vmul.f32 %v913_v52, %v1552_v44  ;;  %v221_v60 = vmul.f32 %v913_v52, %v1553_v49  ;;  %v288_v32 = vadd.f32 %v924_v54, %v217_v4  ;;  %v289_v18 = vadd.f32 %v924_v54, %v218_v3 }
  0x52   :  { %v290_v50 = vadd.f32 %v924_v54, %v219_v43  ;;  %v349_v51 = vmax.f32 %v285_v6, 0.0  ;;  %v350_v30 = vmax.f32 %v286_v31, 0.0  ;;  %v351_v61 = vmax.f32 %v287_v39, 0.0 }
  0x53   :  { %v291_v45 = vadd.f32 %v924_v54, %v220_v48  ;;  %v292_v19 = vadd.f32 %v924_v54, %v221_v60  ;;  %v352_v62 = vmax.f32 %v288_v32, 0.0  ;;  %v353_v27 = vmax.f32 %v289_v18, 0.0 }
  0x54   :  { %v354_v28 = vmax.f32 %v290_v50, 0.0  ;;  %413 = vst [vmem:[%s1450_s4 + $0x180] sm:$0xff] %v349_v51  ;;  %414 = vst [vmem:[%s1450_s4 + $0x188] sm:$0xff] %v350_v30  ;;  %v1554_v34 = vsub.f32 %v852_v7, %v487_v12  ;;  %v1555_v21 = vsub.f32 %v857_v38, %v487_v12  ;;  %v1557_v63 = vsub.f32 %v1556_v11, %v487_v12  ;;  %v1560_v7 = vld [vmem:[#allocation15_spill] sm:$0xff] }
  0x55   :  { %v355_v56 = vmax.f32 %v291_v45, 0.0  ;;  %v356_v33 = vmax.f32 %v292_v19, 0.0  ;;  %415 = vst [vmem:[%s1450_s4 + $0x190] sm:$0xff] %v351_v61  ;;  %416 = vst [vmem:[%s1450_s4 + $0x198] sm:$0xff] %v352_v62  ;;  %v1559_v37 = vsub.f32 %v1558_v35, %v487_v12  ;;  %v1561_v38 = vsub.f32 %v1560_v7, %v487_v12 }
  0x56   :  { %v222_v57 = vmul.f32 %v913_v52, %v1554_v34  ;;  %v223_v22 = vmul.f32 %v913_v52, %v1555_v21  ;;  %v224_v55 = vmul.f32 %v913_v52, %v1557_v63  ;;  %417 = vst [vmem:[%s1450_s4 + $0x1a0] sm:$0xff] %v353_v27  ;;  %418 = vst [vmem:[%s1450_s4 + $0x1a8] sm:$0xff] %v354_v28 }
  0x57   :  { %v225_v36 = vmul.f32 %v913_v52, %v1559_v37  ;;  %419 = vst [vmem:[%s1450_s4 + $0x1b0] sm:$0xff] %v355_v56  ;;  %420 = vst [vmem:[%s1450_s4 + $0x1b8] sm:$0xff] %v356_v33  ;;  %v226_v14 = vmul.f32 %v913_v52, %v1561_v38  ;;  %v1563_v41 = vsub.f32 %v1562_v23, %v487_v12 }
  0x58   :  { %v1565_v42 = vsub.f32 %v1564_v24, %v487_v12  ;;  %v1567_v0 = vsub.f32 %v1566_v59, %v487_v12  ;;  %v293_v15 = vadd.f32 %v924_v54, %v222_v57  ;;  %v294_v9 = vadd.f32 %v924_v54, %v223_v22 }
  0x59   :  { %v227_v8 = vmul.f32 %v913_v52, %v1563_v41  ;;  %v295_v25 = vadd.f32 %v924_v54, %v224_v55  ;;  %v296_v16 = vadd.f32 %v924_v54, %v225_v36  ;;  %v297_v10 = vadd.f32 %v924_v54, %v226_v14 }
  0x5a   :  { %v228_v58 = vmul.f32 %v913_v52, %v1565_v42  ;;  %v229_v1 = vmul.f32 %v913_v52, %v1567_v0  ;;  %v357_v17 = vmax.f32 %v293_v15, 0.0  ;;  %v358_v12 = vmax.f32 %v294_v9, 0.0 }
  0x5b   :  { %v298_v2 = vadd.f32 %v924_v54, %v227_v8  ;;  %v359_v13 = vmax.f32 %v295_v25, 0.0  ;;  %v360_v52 = vmax.f32 %v296_v16, 0.0  ;;  %v361_v29 = vmax.f32 %v297_v10, 0.0 }
  0x5c   :  { %v299_v26 = vadd.f32 %v924_v54, %v228_v58  ;;  %v300_v20 = vadd.f32 %v924_v54, %v229_v1  ;;  %421 = vst [vmem:[%s1450_s4 + $0x1c0] sm:$0xff] %v357_v17  ;;  %422 = vst [vmem:[%s1450_s4 + $0x1c8] sm:$0xff] %v358_v12 }
  0x5d   :  { %v362_v47 = vmax.f32 %v298_v2, 0.0  ;;  %423 = vst [vmem:[%s1450_s4 + $0x1d0] sm:$0xff] %v359_v13  ;;  %424 = vst [vmem:[%s1450_s4 + $0x1d8] sm:$0xff] %v360_v52 }
  0x5e   :  { %v363_v40 = vmax.f32 %v299_v26, 0.0  ;;  %v364_v4 = vmax.f32 %v300_v20, 0.0  ;;  %425 = vst [vmem:[%s1450_s4 + $0x1e0] sm:$0xff] %v361_v29 }
  0x5f   :  { %426 = vst [vmem:[%s1450_s4 + $0x1e8] sm:$0xff] %v362_v47 }
  0x60   :  { %427 = vst [vmem:[%s1450_s4 + $0x1f0] sm:$0xff] %v363_v40  ;;  %428 = vst [vmem:[%s1450_s4 + $0x1f8] sm:$0xff] %v364_v4 }

// kernel: resnet_generator_forward.70
= control target key start
LH: loop header
LB: loop body
LE: loop exit
PB: predicated region body
PF: predicated region fallthrough
CT: control target
= control target key end

     0   :  { %s3114_s15 = smov 0   ;;  %s4754_s0 = inlined_call_operand.vmem [shape: f32[2,256,128], index: 0, kind: input, shape index: {}]   ;;  %s4755_s1 = inlined_call_operand.vmem [shape: bf16[128,128], index: 1, kind: input, shape index: {}]   ;;  %s4756_s2 = inlined_call_operand.vmem [shape: f32[1,128], index: 2, kind: input, shape index: {}]   ;;  %s4757_s3 = inlined_call_operand.vmem [shape: bf16[128,128], index: 3, kind: input, shape index: {}]   ;;  %s4758_s4 = inlined_call_operand.vmem [shape: f32[1,128], index: 4, kind: input, shape index: {}]   ;;  %s4759_s5 = inlined_call_operand.vmem [shape: bf16[128,128], index: 5, kind: input, shape index: {}]   ;;  %s4760_s6 = inlined_call_operand.vmem [shape: f32[1,128], index: 6, kind: input, shape index: {}]   ;;  %s4761_s7 = inlined_call_operand.vmem [shape: bf16[128,128], index: 7, kind: input, shape index: {}]   ;;  %s4762_s8 = inlined_call_operand.vmem [shape: f32[1,128], index: 8, kind: input, shape index: {}]   ;;  %s4763_s9 = inlined_call_operand.<no memory space> [shape: f32[1,1], index: 9, kind: input, shape index: {}]   ;;  %s4764_s10 = inlined_call_operand.vmem [shape: f32[2,256,128], index: 10, kind: output, shape index: {}]  }
   0x1   :  { %15 = sst [smem:[#allocation2]] %s4763_s9 }
   0x2 LB: > { %s2347_s16 = sadd.s32 4294967295, %s3054_s15   ;;  %p2351_p0 = scmp.ge.s32.totalorder %s3054_s15, 1  ;;  %s3054_s15 = sphi %s3114_s15, %s21_s15  }
   0x3   : > { %p313_p1 = scmp.lt.s32.totalorder %s3054_s15, 3 }
   0x5   : > { %p314_p2 = pnand %p2351_p0, %p313_p1 }
   0x7   : > { %317 = sbr.rel (%p314_p2) target bundleno = 1407 (0x57f), region = 60 }
   0xe   : > { %v2852_v0 = vld [vmem:[%s4757_s3] sm:$0xff]   ;;  %p351_p3 = scmp.lt.s32.totalorder %s2347_s16, 1  ;;  %v2853_v1 = vld [vmem:[%s4757_s3 + $0x8] sm:$0xff]   ;;  %v2854_v2 = vld [vmem:[%s4757_s3 + $0x10] sm:$0xff]   ;;  %s1505_s19 = sld [smem:[#allocation2]] }
   0xf   : > { %2700 = vmatprep.subr.bf16.mxu1 %v2852_v0  ;;  %v2855_v3 = vld [vmem:[%s4757_s3 + $0x18] sm:$0xff]   ;;  %v2856_v7 = vld [vmem:[%s4757_s3 + $0x20] sm:$0xff]   ;;  %v2857_v8 = vld [vmem:[%s4757_s3 + $0x28] sm:$0xff]  }
  0x10   : > { %s5015_s16 = smov (!%p351_p3, %s2347_s16), 1  ;;  %2701 = vmatpush3.bf16.msra.mxu1 %v2852_v0  ;;  %v2860_v9 = vld [vmem:[%s4755_s1] sm:$0xff]   ;;  %v2861_v10 = vld [vmem:[%s4755_s1 + $0x8] sm:$0xff]   ;;  %v2858_v11 = vld [vmem:[%s4757_s3 + $0x30] sm:$0xff]  }
  0x11   : > { %2702 = vmatprep.subr.bf16.mxu1 %v2853_v1  ;;  %s2394_s22 = sshll.u32 %s5015_s16, 8  ;;  %2652 = vmatprep.subr.bf16.mxu0 %v2860_v9  ;;  %v2862_v12 = vld [vmem:[%s4755_s1 + $0x10] sm:$0xff]   ;;  %v2859_v13 = vld [vmem:[%s4757_s3 + $0x38] sm:$0xff]   ;;  %v2864_v19 = vld [vmem:[%s4755_s1 + $0x20] sm:$0xff]  }
  0x12   : > { %s3139_s25 = scalar_lea.vmem %s4754_s0, %s2394_s22  ;;  %2653 = vmatpush3.bf16.msra.mxu0 %v2860_v9  ;;  %v2863_v16 = vld [vmem:[%s4755_s1 + $0x18] sm:$0xff]   ;;  %v2865_v22 = vld [vmem:[%s4755_s1 + $0x28] sm:$0xff]   ;;  %v2866_v27 = vld [vmem:[%s4755_s1 + $0x30] sm:$0xff]   ;;  %s4654_s27 = scalar_lea.vmem %s4764_s10, %s2394_s22 }
  0x13   : > { %v362_v4 = vld [vmem:[%s3139_s25] sm:$0xff]  ;;  %v363_v5 = vld [vmem:[%s3139_s25 + $0x8] sm:$0xff]  ;;  %2654 = vmatprep.subr.bf16.mxu0 %v2861_v10  ;;  %v364_v14 = vld [vmem:[%s3139_s25 + $0x10] sm:$0xff] }
  0x14   : > { %2703 = vmatpush3.bf16.msra.mxu1 %v2853_v1  ;;  %v3146_v6 = vpack.c.bf16 %v363_v5, %v362_v4  ;;  %v365_v15 = vld [vmem:[%s3139_s25 + $0x18] sm:$0xff]  ;;  %v366_v17 = vld [vmem:[%s3139_s25 + $0x20] sm:$0xff]  ;;  %v367_v18 = vld [vmem:[%s3139_s25 + $0x28] sm:$0xff] }
  0x15   : > { %2704 = vmatprep.subr.bf16.mxu1 %v2854_v2  ;;  %v3181_v20 = vpack.c.bf16 %v365_v15, %v364_v14  ;;  %v3183_v21 = vpack.c.bf16 %v367_v18, %v366_v17  ;;  %v368_v23 = vld [vmem:[%s3139_s25 + $0x30] sm:$0xff]  ;;  %v369_v24 = vld [vmem:[%s3139_s25 + $0x38] sm:$0xff]  ;;  %v370_v25 = vld [vmem:[%s3139_s25 + $0x40] sm:$0xff] }
  0x16   : > { %2716 = vmatprep.mubr.bf16.mxu1 %v3146_v6  ;;  %2668 = vmatprep.mubr.bf16.mxu0 %v3146_v6  ;;  %v371_v26 = vld [vmem:[%s3139_s25 + $0x48] sm:$0xff]  ;;  %v3197_v28 = vpack.c.bf16 %v369_v24, %v368_v23  ;;  %v2867_v30 = vld [vmem:[%s4755_s1 + $0x38] sm:$0xff]   ;;  %v372_v31 = vld [vmem:[%s3139_s25 + $0x50] sm:$0xff] }
  0x17   : > { %2655 = vmatpush3.bf16.msra.mxu0 %v2861_v10  ;;  %v3199_v29 = vpack.c.bf16 %v371_v26, %v370_v25  ;;  %v373_v32 = vld [vmem:[%s3139_s25 + $0x58] sm:$0xff]  ;;  %v374_v33 = vld [vmem:[%s3139_s25 + $0x60] sm:$0xff]  ;;  %v375_v34 = vld [vmem:[%s3139_s25 + $0x68] sm:$0xff] }
  0x18   : > { %2705 = vmatpush3.bf16.msra.mxu1 %v2854_v2  ;;  %2656 = vmatprep.subr.bf16.mxu0 %v2862_v12  ;;  %v3210_v35 = vpack.c.bf16 %v373_v32, %v372_v31  ;;  %v3212_v36 = vpack.c.bf16 %v375_v34, %v374_v33  ;;  %v376_v37 = vld [vmem:[%s3139_s25 + $0x70] sm:$0xff]  ;;  %v377_v38 = vld [vmem:[%s3139_s25 + $0x78] sm:$0xff]  ;;  %v378_v39 = vld [vmem:[%s3139_s25 + $0x80] sm:$0xff] }
  0x19   : > { %2706 = vmatprep.subr.bf16.mxu1 %v2855_v3  ;;  %v379_v40 = vld [vmem:[%s3139_s25 + $0x88] sm:$0xff]  ;;  %v3222_v41 = vpack.c.bf16 %v377_v38, %v376_v37  ;;  %v380_v43 = vld [vmem:[%s3139_s25 + $0x90] sm:$0xff]  ;;  %v381_v44 = vld [vmem:[%s3139_s25 + $0x98] sm:$0xff] }
  0x1a   : > { %v3224_v42 = vpack.c.bf16 %v379_v40, %v378_v39  ;;  %v382_v45 = vld [vmem:[%s3139_s25 + $0xa0] sm:$0xff]  ;;  %v383_v46 = vld [vmem:[%s3139_s25 + $0xa8] sm:$0xff]  ;;  %v3234_v47 = vpack.c.bf16 %v381_v44, %v380_v43  ;;  %v384_v49 = vld [vmem:[%s3139_s25 + $0xb0] sm:$0xff] }
  0x1b   : > { %2657 = vmatpush3.bf16.msra.mxu0 %v2862_v12  ;;  %v3236_v48 = vpack.c.bf16 %v383_v46, %v382_v45  ;;  %v385_v50 = vld [vmem:[%s3139_s25 + $0xb8] sm:$0xff]  ;;  %v386_v51 = vld [vmem:[%s3139_s25 + $0xc0] sm:$0xff]  ;;  %v387_v52 = vld [vmem:[%s3139_s25 + $0xc8] sm:$0xff] }
  0x1c   : > { %2707 = vmatpush3.bf16.msra.mxu1 %v2855_v3  ;;  %2658 = vmatprep.subr.bf16.mxu0 %v2863_v16  ;;  %v3246_v53 = vpack.c.bf16 %v385_v50, %v384_v49  ;;  %v3248_v54 = vpack.c.bf16 %v387_v52, %v386_v51  ;;  %v388_v55 = vld [vmem:[%s3139_s25 + $0xd0] sm:$0xff]  ;;  %v389_v56 = vld [vmem:[%s3139_s25 + $0xd8] sm:$0xff]  ;;  %v390_v57 = vld [vmem:[%s3139_s25 + $0xe0] sm:$0xff] }
  0x1d   : > { %2708 = vmatprep.subr.bf16.mxu1 %v2856_v7  ;;  %v391_v58 = vld [vmem:[%s3139_s25 + $0xe8] sm:$0xff]  ;;  %v3258_v59 = vpack.c.bf16 %v389_v56, %v388_v55  ;;  %v392_v61 = vld [vmem:[%s3139_s25 + $0xf0] sm:$0xff]  ;;  %v393_v62 = vld [vmem:[%s3139_s25 + $0xf8] sm:$0xff] }
  0x1e   : > { %v3260_v60 = vpack.c.bf16 %v391_v58, %v390_v57  ;;  %v3268_v63 = vpack.c.bf16 %v393_v62, %v392_v61  ;;  %v3280_v1 = vld [vmem:[%s4758_s4] ss:$0 sm:$0xff] }
  0x1f   : > { %2659 = vmatpush3.bf16.msra.mxu0 %v2863_v16  ;;  %v3317_v23 = vld [vmem:[%s4756_s2] ss:$0 sm:$0xff] }
  0x20   : > { %2709 = vmatpush3.bf16.msra.mxu1 %v2856_v7  ;;  %2660 = vmatprep.subr.bf16.mxu0 %v2864_v19 }
  0x21   : > { %2710 = vmatprep.subr.bf16.mxu1 %v2857_v8 }
  0x23   : > { %2661 = vmatpush3.bf16.msra.mxu0 %v2864_v19 }
  0x24   : > { %2711 = vmatpush3.bf16.msra.mxu1 %v2857_v8  ;;  %2662 = vmatprep.subr.bf16.mxu0 %v2865_v22 }
  0x25   : > { %2712 = vmatprep.subr.bf16.mxu1 %v2858_v11 }
  0x27   : > { %2663 = vmatpush3.bf16.msra.mxu0 %v2865_v22 }
  0x28   : > { %2713 = vmatpush3.bf16.msra.mxu1 %v2858_v11  ;;  %2664 = vmatprep.subr.bf16.mxu0 %v2866_v27 }
  0x29   : > { %2714 = vmatprep.subr.bf16.mxu1 %v2859_v13 }
  0x2b   : > { %2665 = vmatpush3.bf16.msra.mxu0 %v2866_v27 }
  0x2c   : > { %2715 = vmatpush3.bf16.msra.mxu1 %v2859_v13  ;;  %2666 = vmatprep.subr.bf16.mxu0 %v2867_v30 }
  0x2f   : > { %2717 = vmatmul.mubr.bf16.vlgmr.msra.gmra.mrb[0].mxu1 %v3181_v20  ;;  %2667 = vmatpush3.bf16.msra.mxu0 %v2867_v30 }
  0x30   : > { %2720 = vmatprep.mubr.bf16.mxu1 %v3183_v21 }
  0x32   : > { %2669 = vmatmul.mubr.bf16.vlgmr.msra.gmra.mrb[0].mxu0 %v3181_v20 }
  0x33   : > { %2672 = vmatprep.mubr.bf16.mxu0 %v3183_v21 }
  0x37   : > { %2721 = vmatmul.mubr.bf16.gmra.mrb[4].mxu1 %v3197_v28 }
  0x38   : > { %2724 = vmatprep.mubr.bf16.mxu1 %v3199_v29 }
  0x3a   : > { %2673 = vmatmul.mubr.bf16.gmra.mrb[4].mxu0 %v3197_v28 }
  0x3b   : > { %2676 = vmatprep.mubr.bf16.mxu0 %v3199_v29 }
  0x3f   : > { %2725 = vmatmul.mubr.bf16.gmra.mrb[8].mxu1 %v3210_v35 }
  0x40   : > { %2728 = vmatprep.mubr.bf16.mxu1 %v3212_v36 }
  0x42   : > { %2677 = vmatmul.mubr.bf16.gmra.mrb[8].mxu0 %v3210_v35 }
  0x43   : > { %2680 = vmatprep.mubr.bf16.mxu0 %v3212_v36 }
  0x47   : > { %2729 = vmatmul.mubr.bf16.gmra.mrb[12].mxu1 %v3222_v41 }
  0x48   : > { %2732 = vmatprep.mubr.bf16.mxu1 %v3224_v42 }
  0x4a   : > { %2681 = vmatmul.mubr.bf16.gmra.mrb[12].mxu0 %v3222_v41 }
  0x4b   : > { %2684 = vmatprep.mubr.bf16.mxu0 %v3224_v42 }
  0x4f   : > { %2733 = vmatmul.mubr.bf16.gmra.mrb[16].mxu1 %v3234_v47 }
  0x50   : > { %2736 = vmatprep.mubr.bf16.mxu1 %v3236_v48 }
  0x52   : > { %2685 = vmatmul.mubr.bf16.gmra.mrb[16].mxu0 %v3234_v47 }
  0x53   : > { %2688 = vmatprep.mubr.bf16.mxu0 %v3236_v48 }
  0x57   : > { %2737 = vmatmul.mubr.bf16.gmra.mrb[20].mxu1 %v3246_v53 }
  0x58   : > { %2740 = vmatprep.mubr.bf16.mxu1 %v3248_v54 }
  0x5a   : > { %2689 = vmatmul.mubr.bf16.gmra.mrb[20].mxu0 %v3246_v53 }
  0x5b   : > { %2692 = vmatprep.mubr.bf16.mxu0 %v3248_v54 }
  0x5f   : > { %2741 = vmatmul.mubr.bf16.gmra.mrb[24].mxu1 %v3258_v59 }
  0x60   : > { %2744 = vmatprep.mubr.bf16.mxu1 %v3260_v60 }
  0x62   : > { %2693 = vmatmul.mubr.bf16.gmra.mrb[24].mxu0 %v3258_v59 }
  0x63   : > { %2696 = vmatprep.mubr.bf16.mxu0 %v3260_v60 }
  0x67   : > { %2745 = vmatmul.mubr.bf16.gmra.mrb[28].mxu1 %v3268_v63 }
  0x68   : > { %2764 = vmatprep.mubr.bf16.mxu1 %v3146_v6 }
  0x6a   : > { %2697 = vmatmul.mubr.bf16.gmra.mrb[28].mxu0 %v3268_v63 }
 0x102   : > { %v2718_v0 = vpop.f32.mrb[0].mxu1 }
 0x103   : > { %v747_v2 = vpop.f32.mrb[1].mxu1  ;;  %v3283_v4 = vadd.f32 %v2718_v0, %v3280_v1 }
 0x104   : > { %v2719_v3 = vpop.f32.mrb[2].mxu1  ;;  %v3289_v7 = vadd.f32 %v3280_v1, %v747_v2 }
 0x105   : > { %v3286_v5 = vadd.f32 %v2719_v3, %v3280_v1  ;;  %v750_v6 = vpop.f32.mrb[3].mxu1  ;;  %v2670_v26 = vpop.f32.mrb[0].mxu0 }
 0x106   : > { %v3292_v8 = vadd.f32 %v3280_v1, %v750_v6  ;;  %v524_v30 = vadd.f32 %v2670_v26, %v3317_v23  ;;  %v515_v31 = vpop.f32.mrb[1].mxu0 }
 0x107   : > { %v891_v9 = vpack.c.bf16 %v3286_v5, %v3283_v4  ;;  %v516_v37 = vadd.f32 %v3317_v23, %v515_v31  ;;  %v2671_v38 = vpop.f32.mrb[2].mxu0 }
 0x108   : > { %v890_v10 = vpack.c.bf16 %v3292_v8, %v3289_v7  ;;  %v527_v43 = vadd.f32 %v2671_v38, %v3317_v23  ;;  %v518_v44 = vpop.f32.mrb[3].mxu0 }
 0x109   : > { %v519_v46 = vadd.f32 %v3317_v23, %v518_v44 }
 0x10a   : > { %v2722_v11 = vpop.f32.mrb[4].mxu1  ;;  %v3339_v50 = vpack.c.bf16 %v527_v43, %v524_v30 }
 0x10b   : > { %v763_v12 = vpop.f32.mrb[5].mxu1  ;;  %v3299_v14 = vadd.f32 %v2722_v11, %v3280_v1  ;;  %v3341_v51 = vpack.c.bf16 %v519_v46, %v516_v37 }
 0x10c   : > { %v2723_v13 = vpop.f32.mrb[6].mxu1  ;;  %v3305_v17 = vadd.f32 %v3280_v1, %v763_v12 }
 0x10d   : > { %v3302_v15 = vadd.f32 %v2723_v13, %v3280_v1  ;;  %v766_v16 = vpop.f32.mrb[7].mxu1  ;;  %2460 = vmatprep.mubr.bf16.mxu0 %v3341_v51  ;;  %v2674_v56 = vpop.f32.mrb[4].mxu0 }
 0x10e   : > { %v3308_v18 = vadd.f32 %v3280_v1, %v766_v16  ;;  %v540_v58 = vadd.f32 %v2674_v56, %v3317_v23  ;;  %v531_v61 = vpop.f32.mrb[5].mxu0 }
 0x10f   : > { %v893_v19 = vpack.c.bf16 %v3302_v15, %v3299_v14  ;;  %v532_v3 = vadd.f32 %v3317_v23, %v531_v61  ;;  %v2675_v6 = vpop.f32.mrb[6].mxu0 }
 0x110   : > { %v892_v22 = vpack.c.bf16 %v3308_v18, %v3305_v17  ;;  %v543_v13 = vadd.f32 %v2675_v6, %v3317_v23  ;;  %v534_v16 = vpop.f32.mrb[7].mxu0 }
 0x112   : > { %v2726_v24 = vpop.f32.mrb[8].mxu1 }
 0x113   : > { %v779_v25 = vpop.f32.mrb[9].mxu1  ;;  %v3321_v32 = vadd.f32 %v2726_v24, %v3280_v1 }
 0x114   : > { %v2727_v27 = vpop.f32.mrb[10].mxu1  ;;  %v3328_v39 = vadd.f32 %v3280_v1, %v779_v25  ;;  %v535_v25 = vadd.f32 %v3317_v23, %v534_v16 }
 0x115   : > { %v3324_v33 = vadd.f32 %v2727_v27, %v3280_v1  ;;  %v782_v34 = vpop.f32.mrb[11].mxu1  ;;  %v3364_v27 = vpack.c.bf16 %v543_v13, %v540_v58  ;;  %v2678_v37 = vpop.f32.mrb[8].mxu0 }
 0x116   : > { %v3331_v40 = vadd.f32 %v3280_v1, %v782_v34  ;;  %v3366_v30 = vpack.c.bf16 %v535_v25, %v532_v3  ;;  %v556_v43 = vadd.f32 %v2678_v37, %v3317_v23  ;;  %v547_v44 = vpop.f32.mrb[9].mxu0 }
 0x117   : > { %v895_v45 = vpack.c.bf16 %v3324_v33, %v3321_v32  ;;  %v548_v56 = vadd.f32 %v3317_v23, %v547_v44 }
 0x118   : > { %v894_v49 = vpack.c.bf16 %v3331_v40, %v3328_v39 }
 0x11a   : > { %v2730_v52 = vpop.f32.mrb[12].mxu1 }
 0x11b   : > { %v795_v55 = vpop.f32.mrb[13].mxu1  ;;  %v3346_v62 = vadd.f32 %v2730_v52, %v3280_v1 }
 0x11c   : > { %v2731_v57 = vpop.f32.mrb[14].mxu1  ;;  %v3353_v11 = vadd.f32 %v3280_v1, %v795_v55 }
 0x11d   : > { %v3349_v0 = vadd.f32 %v2731_v57, %v3280_v1  ;;  %v798_v2 = vpop.f32.mrb[15].mxu1  ;;  %v2679_v57 = vpop.f32.mrb[10].mxu0 }
 0x11e   : > { %v3356_v12 = vadd.f32 %v3280_v1, %v798_v2  ;;  %v559_v2 = vadd.f32 %v2679_v57, %v3317_v23  ;;  %v550_v3 = vpop.f32.mrb[11].mxu0 }
 0x11f   : > { %v897_v24 = vpack.c.bf16 %v3349_v0, %v3346_v62  ;;  %v551_v13 = vadd.f32 %v3317_v23, %v550_v3  ;;  %v2682_v44 = vpop.f32.mrb[12].mxu0 }
 0x120   : > { %v896_v26 = vpack.c.bf16 %v3356_v12, %v3353_v11  ;;  %v3376_v25 = vpack.c.bf16 %v559_v2, %v556_v43  ;;  %v2869_v43 = vld [vmem:[%s4759_s5 + $0x8] sm:$0xff]   ;;  %v563_v7 = vpop.f32.mrb[13].mxu0 }
 0x121   : > { %v564_v57 = vadd.f32 %v3317_v23, %v563_v7 }
 0x122   : > { %v2734_v31 = vpop.f32.mrb[16].mxu1 }
 0x123   : > { %v811_v34 = vpop.f32.mrb[17].mxu1  ;;  %v820_v46 = vadd.f32 %v2734_v31, %v3280_v1  ;;  %v3378_v31 = vpack.c.bf16 %v551_v13, %v548_v56  ;;  %v572_v56 = vadd.f32 %v2682_v44, %v3317_v23 }
 0x124   : > { %v2735_v38 = vpop.f32.mrb[18].mxu1  ;;  %v812_v58 = vadd.f32 %v3280_v1, %v811_v34 }
 0x125   : > { %v823_v52 = vadd.f32 %v2735_v38, %v3280_v1  ;;  %v814_v55 = vpop.f32.mrb[19].mxu1 }
 0x126   : > { %v815_v61 = vadd.f32 %v3280_v1, %v814_v55 }
 0x127   : > { %v899_v6 = vpack.c.bf16 %v823_v52, %v820_v46  ;;  %v2868_v46 = vld [vmem:[%s4759_s5] sm:$0xff]  }
 0x128   : > { %v898_v16 = vpack.c.bf16 %v815_v61, %v812_v58  ;;  %v2683_v58 = vpop.f32.mrb[14].mxu0  ;;  %2748 = vmatprep.subr.bf16.mxu1 %v2868_v46 }
 0x129   : > { %v575_v2 = vadd.f32 %v2683_v58, %v3317_v23  ;;  %v566_v3 = vpop.f32.mrb[15].mxu0  ;;  %2749 = vmatpush3.bf16.msra.mxu1 %v2868_v46 }
 0x12a   : > { %2444 = vmatprep.subr.bf16.mxu0 %v898_v16  ;;  %v2738_v37 = vpop.f32.mrb[20].mxu1  ;;  %v567_v13 = vadd.f32 %v3317_v23, %v566_v3  ;;  %2750 = vmatprep.subr.bf16.mxu1 %v2869_v43  ;;  %v2686_v7 = vpop.f32.mrb[16].mxu0 }
 0x12b   : > { %2445 = vmatpush3.bf16.xpose.msra.mxu0 %v890_v10  ;;  %v836_v34 = vadd.f32 %v2738_v37, %v3280_v1  ;;  %v827_v38 = vpop.f32.mrb[21].mxu1  ;;  %v3397_v37 = vpack.c.bf16 %v575_v2, %v572_v56 }
 0x12c   : > { %2446 = vmatprep.subr.bf16.mxu0 %v899_v6  ;;  %v828_v52 = vadd.f32 %v3280_v1, %v827_v38  ;;  %v2739_v55 = vpop.f32.mrb[22].mxu1  ;;  %v3399_v38 = vpack.c.bf16 %v567_v13, %v564_v57 }
 0x12d   : > { %v839_v8 = vadd.f32 %v2739_v55, %v3280_v1  ;;  %v830_v10 = vpop.f32.mrb[23].mxu1  ;;  %2751 = vmatpush3.bf16.msra.mxu1 %v2869_v43  ;;  %v2870_v55 = vld [vmem:[%s4759_s5 + $0x10] sm:$0xff]  }
 0x12e   : > { %v831_v61 = vadd.f32 %v3280_v1, %v830_v10  ;;  %v579_v10 = vpop.f32.mrb[17].mxu0  ;;  %2752 = vmatprep.subr.bf16.mxu1 %v2870_v55 }
 0x12f   : > { %v901_v6 = vpack.c.bf16 %v839_v8, %v836_v34  ;;  %v588_v8 = vadd.f32 %v2686_v7, %v3317_v23  ;;  %v2687_v57 = vpop.f32.mrb[18].mxu0 }
 0x130   : > { %v900_v16 = vpack.c.bf16 %v831_v61, %v828_v52  ;;  %v2871_v52 = vld [vmem:[%s4759_s5 + $0x18] sm:$0xff]   ;;  %v591_v61 = vadd.f32 %v2687_v57, %v3317_v23  ;;  %v582_v2 = vpop.f32.mrb[19].mxu0 }
 0x131   : > { %2753 = vmatpush3.bf16.msra.mxu1 %v2870_v55  ;;  %v583_v13 = vadd.f32 %v3317_v23, %v582_v2 }
 0x132   : > { %v2742_v44 = vpop.f32.mrb[24].mxu1  ;;  %2754 = vmatprep.subr.bf16.mxu1 %v2871_v52 }
 0x133   : > { %2447 = vmatpush3.bf16.xpose.msra.mxu0 %v891_v9  ;;  %v3408_v34 = vadd.f32 %v2742_v44, %v3280_v1  ;;  %v843_v46 = vpop.f32.mrb[25].mxu1  ;;  %v580_v9 = vadd.f32 %v3317_v23, %v579_v10  ;;  %v3424_v44 = vpack.c.bf16 %v591_v61, %v588_v8  ;;  %v2690_v10 = vpop.f32.mrb[20].mxu0 }
 0x134   : > { %2448 = vmatprep.subr.bf16.mxu0 %v900_v16  ;;  %v844_v43 = vadd.f32 %v3280_v1, %v843_v46  ;;  %v2743_v56 = vpop.f32.mrb[26].mxu1  ;;  %v604_v17 = vadd.f32 %v2690_v10, %v3317_v23  ;;  %v595_v18 = vpop.f32.mrb[21].mxu0  ;;  %v2874_v10 = vld [vmem:[%s4759_s5 + $0x30] sm:$0xff]  }
 0x135   : > { %v3416_v4 = vadd.f32 %v2743_v56, %v3280_v1  ;;  %v846_v5 = vpop.f32.mrb[27].mxu1  ;;  %v3426_v46 = vpack.c.bf16 %v583_v13, %v580_v9  ;;  %2755 = vmatpush3.bf16.msra.mxu1 %v2871_v52  ;;  %v2691_v9 = vpop.f32.mrb[22].mxu0 }
 0x136   : > { %v847_v58 = vadd.f32 %v3280_v1, %v846_v5  ;;  %v596_v5 = vadd.f32 %v3317_v23, %v595_v18  ;;  %v598_v61 = vpop.f32.mrb[23].mxu0 }
 0x137   : > { %v903_v3 = vpack.c.bf16 %v3416_v4, %v3408_v34  ;;  %v2872_v34 = vld [vmem:[%s4759_s5 + $0x20] sm:$0xff]   ;;  %v599_v2 = vadd.f32 %v3317_v23, %v598_v61 }
 0x138   : > { %v902_v16 = vpack.c.bf16 %v847_v58, %v844_v43  ;;  %v2873_v43 = vld [vmem:[%s4759_s5 + $0x28] sm:$0xff]   ;;  %2756 = vmatprep.subr.bf16.mxu1 %v2872_v34  ;;  %v607_v58 = vadd.f32 %v2691_v9, %v3317_v23 }
 0x139   : > { %2757 = vmatpush3.bf16.msra.mxu1 %v2872_v34 }
 0x13a   : > { %v2746_v7 = vpop.f32.mrb[28].mxu1  ;;  %2758 = vmatprep.subr.bf16.mxu1 %v2873_v43 }
 0x13b   : > { %2449 = vmatpush3.bf16.xpose.msra.mxu0 %v892_v22  ;;  %v3432_v56 = vadd.f32 %v2746_v7, %v3280_v1  ;;  %v859_v55 = vpop.f32.mrb[29].mxu1  ;;  %v3448_v7 = vpack.c.bf16 %v607_v58, %v604_v17 }
 0x13c   : > { %2450 = vmatprep.subr.bf16.mxu0 %v901_v6  ;;  %v860_v52 = vadd.f32 %v3280_v1, %v859_v55  ;;  %v2747_v8 = vpop.f32.mrb[30].mxu1  ;;  %v3450_v55 = vpack.c.bf16 %v599_v2, %v596_v5 }
 0x13d   : > { %v871_v22 = vadd.f32 %v2747_v8, %v3280_v1  ;;  %v862_v4 = vpop.f32.mrb[31].mxu1  ;;  %2759 = vmatpush3.bf16.msra.mxu1 %v2873_v43 }
 0x13e   : > { %v863_v57 = vadd.f32 %v3280_v1, %v862_v4  ;;  %v2694_v1 = vpop.f32.mrb[24].mxu0  ;;  %2760 = vmatprep.subr.bf16.mxu1 %v2874_v10 }
 0x13f   : > { %v905_v6 = vpack.c.bf16 %v871_v22, %v3432_v56  ;;  %v2875_v56 = vld [vmem:[%s4759_s5 + $0x38] sm:$0xff]   ;;  %v620_v34 = vadd.f32 %v2694_v1, %v3317_v23 }
 0x140   : > { %v904_v13 = vpack.c.bf16 %v863_v57, %v860_v52  ;;  %v611_v52 = vpop.f32.mrb[25].mxu0 }
 0x141   : > { %v612_v43 = vadd.f32 %v3317_v23, %v611_v52  ;;  %v2695_v8 = vpop.f32.mrb[26].mxu0  ;;  %2761 = vmatpush3.bf16.msra.mxu1 %v2874_v10 }
 0x142   : > { %v623_v17 = vadd.f32 %v2695_v8, %v3317_v23  ;;  %v614_v18 = vpop.f32.mrb[27].mxu0  ;;  %2762 = vmatprep.subr.bf16.mxu1 %v2875_v56 }
 0x143   : > { %2451 = vmatpush3.bf16.xpose.msra.mxu0 %v893_v19  ;;  %v615_v14 = vadd.f32 %v3317_v23, %v614_v18 }
 0x144   : > { %2452 = vmatprep.subr.bf16.mxu0 %v902_v16  ;;  %v887_v15 = vpack.c.bf16 %v623_v17, %v620_v34  ;;  %v2698_v16 = vpop.f32.mrb[28].mxu0 }
 0x145   : > { %v886_v19 = vpack.c.bf16 %v615_v14, %v612_v43  ;;  %2763 = vmatpush3.bf16.msra.mxu1 %v2875_v56  ;;  %v636_v22 = vadd.f32 %v2698_v16, %v3317_v23  ;;  %v627_v4 = vpop.f32.mrb[29].mxu0 }
 0x146   : > { %v628_v5 = vadd.f32 %v3317_v23, %v627_v4  ;;  %v2699_v9 = vpop.f32.mrb[30].mxu0 }
 0x147   : > { %v639_v57 = vadd.f32 %v2699_v9, %v3317_v23  ;;  %v630_v58 = vpop.f32.mrb[31].mxu0 }
 0x148   : > { %2765 = vmatmul.mubr.bf16.vlgmr.msra.gmra.mrb[32].mxu1 %v3181_v20  ;;  %v631_v61 = vadd.f32 %v3317_v23, %v630_v58 }
 0x149   : > { %2768 = vmatprep.mubr.bf16.mxu1 %v3183_v21  ;;  %v889_v2 = vpack.c.bf16 %v639_v57, %v636_v22  ;;  %v3522_v21 = vld [vmem:[%s4760_s6] ss:$0 sm:$0xff] }
 0x14a   : > { %v888_v39 = vpack.c.bf16 %v631_v61, %v628_v5 }
 0x14b   : > { %2453 = vmatpush3.bf16.xpose.msra.mxu0 %v894_v49 }
 0x14c   : > { %2454 = vmatprep.subr.bf16.mxu0 %v903_v3 }
 0x150   : > { %2769 = vmatmul.mubr.bf16.gmra.mrb[36].mxu1 %v3197_v28 }
 0x151   : > { %2772 = vmatprep.mubr.bf16.mxu1 %v3199_v29 }
 0x153   : > { %2455 = vmatpush3.bf16.xpose.msra.mxu0 %v895_v45 }
 0x154   : > { %2456 = vmatprep.subr.bf16.mxu0 %v904_v13 }
 0x158   : > { %2773 = vmatmul.mubr.bf16.gmra.mrb[40].mxu1 %v3210_v35 }
 0x159   : > { %2776 = vmatprep.mubr.bf16.mxu1 %v3212_v36 }
 0x15b   : > { %2457 = vmatpush3.bf16.xpose.msra.mxu0 %v896_v26 }
 0x15c   : > { %2458 = vmatprep.subr.bf16.mxu0 %v905_v6 }
 0x160   : > { %2777 = vmatmul.mubr.bf16.gmra.mrb[44].mxu1 %v3222_v41 }
 0x161   : > { %2780 = vmatprep.mubr.bf16.mxu1 %v3224_v42 }
 0x163   : > { %2459 = vmatpush3.bf16.xpose.msra.mxu0 %v897_v24 }
 0x168   : > { %2781 = vmatmul.mubr.bf16.gmra.mrb[48].mxu1 %v3234_v47 }
 0x169   : > { %2784 = vmatprep.mubr.bf16.mxu1 %v3236_v48 }
 0x16a   : > { %2461 = vmatmul.mubr.bf16.vlgmr.msra.gmra.mrb[32].mxu0 %v3341_v51 }
 0x16b   : > { %2462 = vmatprep.mubr.bf16.mxu0 %v3339_v50 }
 0x170   : > { %2785 = vmatmul.mubr.bf16.gmra.mrb[52].mxu1 %v3246_v53 }
 0x171   : > { %2788 = vmatprep.mubr.bf16.mxu1 %v3248_v54 }
 0x172   : > { %2463 = vmatmul.mubr.bf16.gmra.mrb[36].mxu0 %v3339_v50 }
 0x173   : > { %2464 = vmatprep.mubr.bf16.mxu0 %v3366_v30 }
 0x178   : > { %2789 = vmatmul.mubr.bf16.gmra.mrb[56].mxu1 %v3258_v59  ;;  %v3531_v59 = vstv %s1505_s19 }
 0x179   : > { %2792 = vmatprep.mubr.bf16.mxu1 %v3260_v60 }
 0x17a   : > { %2465 = vmatmul.mubr.bf16.gmra.mrb[40].mxu0 %v3366_v30 }
 0x17b   : > { %2466 = vmatprep.mubr.bf16.mxu0 %v3364_v27 }
 0x180   : > { %2793 = vmatmul.mubr.bf16.gmra.mrb[60].mxu1 %v3268_v63 }
 0x182   : > { %2467 = vmatmul.mubr.bf16.gmra.mrb[44].mxu0 %v3364_v27 }
 0x183   : > { %2468 = vmatprep.mubr.bf16.mxu0 %v3378_v31 }
 0x18a   : > { %2469 = vmatmul.mubr.bf16.gmra.mrb[48].mxu0 %v3378_v31 }
 0x18b   : > { %2470 = vmatprep.mubr.bf16.mxu0 %v3376_v25 }
 0x192   : > { %2471 = vmatmul.mubr.bf16.gmra.mrb[52].mxu0 %v3376_v25 }
 0x193   : > { %2472 = vmatprep.mubr.bf16.mxu0 %v3399_v38 }
 0x19a   : > { %2473 = vmatmul.mubr.bf16.gmra.mrb[56].mxu0 %v3399_v38 }
 0x19b   : > { %2474 = vmatprep.mubr.bf16.mxu0 %v3397_v37 }
 0x1a2   : > { %2475 = vmatmul.mubr.bf16.gmra.mrb[60].mxu0 %v3397_v37 }
 0x1a3   : > { %2476 = vmatprep.mubr.bf16.mxu0 %v3426_v46 }
 0x1aa   : > { %2477 = vmatmul.mubr.bf16.gmra.mrb[64].mxu0 %v3426_v46 }
 0x1ab   : > { %2478 = vmatprep.mubr.bf16.mxu0 %v3424_v44 }
 0x1b2   : > { %2479 = vmatmul.mubr.bf16.gmra.mrb[68].mxu0 %v3424_v44 }
 0x1b3   : > { %2480 = vmatprep.mubr.bf16.mxu0 %v3450_v55 }
 0x1ba   : > { %2481 = vmatmul.mubr.bf16.gmra.mrb[72].mxu0 %v3450_v55 }
 0x1bb   : > { %2482 = vmatprep.mubr.bf16.mxu0 %v3448_v7 }
 0x1c2   : > { %2483 = vmatmul.mubr.bf16.gmra.mrb[76].mxu0 %v3448_v7 }
 0x1c3   : > { %2484 = vmatprep.mubr.bf16.mxu0 %v886_v19 }
 0x1ca   : > { %2485 = vmatmul.mubr.bf16.gmra.mrb[80].mxu0 %v886_v19 }
 0x1cb   : > { %2486 = vmatprep.mubr.bf16.mxu0 %v887_v15 }
 0x1d2   : > { %2487 = vmatmul.mubr.bf16.gmra.mrb[84].mxu0 %v887_v15 }
 0x1d3   : > { %2488 = vmatprep.mubr.bf16.mxu0 %v888_v39 }
 0x1da   : > { %2489 = vmatmul.mubr.bf16.gmra.mrb[88].mxu0 %v888_v39 }
 0x1db   : > { %2490 = vmatprep.mubr.bf16.mxu0 %v889_v2 }
 0x1e2   : > { %2491 = vmatmul.mubr.bf16.gmra.mrb[92].mxu0 %v889_v2 }
 0x21b   : > { %v2766_v20 = vpop.f32.mrb[32].mxu1 }
 0x21c   : > { %v1611_v28 = vpop.f32.mrb[33].mxu1  ;;  %v1620_v35 = vadd.f32 %v2766_v20, %v3522_v21 }
 0x21d   : > { %v2767_v29 = vpop.f32.mrb[34].mxu1  ;;  %v1612_v36 = vadd.f32 %v3522_v21, %v1611_v28 }
 0x21e   : > { %v1623_v41 = vadd.f32 %v2767_v29, %v3522_v21  ;;  %v1614_v42 = vpop.f32.mrb[35].mxu1  ;;  %v3534_v63 = vmul.f32 %v3531_v59, %v1620_v35 }
 0x21f   : > { %v1615_v47 = vadd.f32 %v3522_v21, %v1614_v42  ;;  %v3537_v23 = vmul.f32 %v3531_v59, %v1612_v36 }
 0x220   : > { %v3540_v32 = vmul.f32 %v3531_v59, %v1623_v41 }
 0x221   : > { %v3543_v33 = vmul.f32 %v3531_v59, %v1615_v47 }
 0x223   : > { %v2770_v48 = vpop.f32.mrb[36].mxu1 }
 0x224   : > { %v1636_v53 = vadd.f32 %v2770_v48, %v3522_v21  ;;  %v3529_v54 = vpop.f32.mrb[37].mxu1 }
 0x225   : > { %v2771_v60 = vpop.f32.mrb[38].mxu1 }
 0x226   : > { %v3546_v40 = vmul.f32 %v3531_v59, %v1636_v53  ;;  %v1639_v45 = vadd.f32 %v2771_v60, %v3522_v21 }
 0x228   : > { %v3554_v51 = vmul.f32 %v3531_v59, %v1639_v45 }
 0x23d   : > { %v3556_v62 = vpop.f32.mrb[32].mxu0 }
 0x23e   : > { %v3560_v11 = vpop.f32.mrb[33].mxu0 }
 0x23f   : > { %4843 = vst [vmem:[#allocation3_spill] sm:$0xff] %v3560_v11  ;;  %v3562_v12 = vpop.f32.mrb[34].mxu0 }
 0x240   : > { %v3564_v24 = vpop.f32.mrb[35].mxu0 }
 0x241   : > { %4844 = vst [vmem:[#allocation4_spill] sm:$0xff] %v3564_v24 }
 0x245   : > { %v3566_v26 = vpop.f32.mrb[36].mxu0 }
 0x246   : > { %v1099_v27 = vmax.f32 %v3556_v62, %v3566_v26  ;;  %v3570_v30 = vpop.f32.mrb[37].mxu0 }
 0x247   : > { %4845 = vst [vmem:[#allocation5_spill] sm:$0xff] %v3570_v30  ;;  %v1136_v25 = vmax.f32 %v3560_v11, %v3570_v30  ;;  %v3574_v31 = vpop.f32.mrb[38].mxu0 }
 0x248   : > { %v1100_v37 = vmax.f32 %v3562_v12, %v3574_v31  ;;  %v3578_v38 = vpop.f32.mrb[39].mxu0 }
 0x249   : > { %4846 = vst [vmem:[#allocation6_spill] sm:$0xff] %v3578_v38  ;;  %v1137_v3 = vmax.f32 %v3564_v24, %v3578_v38 }
 0x24d   : > { %v3582_v44 = vpop.f32.mrb[40].mxu0 }
 0x24e   : > { %v1101_v46 = vmax.f32 %v1099_v27, %v3582_v44  ;;  %v3585_v6 = vpop.f32.mrb[41].mxu0 }
 0x24f   : > { %4847 = vst [vmem:[#allocation7_spill] sm:$0xff] %v3585_v6  ;;  %v1138_v13 = vmax.f32 %v1136_v25, %v3585_v6  ;;  %v3588_v7 = vpop.f32.mrb[42].mxu0 }
 0x250   : > { %v1102_v55 = vmax.f32 %v1100_v37, %v3588_v7  ;;  %v3591_v10 = vpop.f32.mrb[43].mxu0 }
 0x251   : > { %4848 = vst [vmem:[#allocation8_spill] sm:$0xff] %v3591_v10  ;;  %v1139_v1 = vmax.f32 %v1137_v3, %v3591_v10 }
 0x255   : > { %v3594_v56 = vpop.f32.mrb[44].mxu0 }
 0x256   : > { %v1103_v34 = vmax.f32 %v1101_v46, %v3594_v56  ;;  %v3597_v52 = vpop.f32.mrb[45].mxu0 }
 0x257   : > { %4849 = vst [vmem:[#allocation9_spill] sm:$0xff] %v3597_v52  ;;  %v1140_v43 = vmax.f32 %v1138_v13, %v3597_v52  ;;  %v3600_v8 = vpop.f32.mrb[46].mxu0 }
 0x258   : > { %v1104_v17 = vmax.f32 %v1102_v55, %v3600_v8  ;;  %v3603_v18 = vpop.f32.mrb[47].mxu0 }
 0x259   : > { %4850 = vst [vmem:[#allocation10_spill] sm:$0xff] %v3603_v18  ;;  %v1141_v14 = vmax.f32 %v1139_v1, %v3603_v18 }
 0x25d   : > { %v3606_v15 = vpop.f32.mrb[48].mxu0 }
 0x25e   : > { %v1105_v19 = vmax.f32 %v1103_v34, %v3606_v15  ;;  %v3609_v16 = vpop.f32.mrb[49].mxu0  ;;  %v1630_v34 = vpop.f32.mrb[39].mxu1 }
 0x25f   : > { %4851 = vst [vmem:[#allocation11_spill] sm:$0xff] %v3609_v16  ;;  %v1142_v22 = vmax.f32 %v1140_v43, %v3609_v16  ;;  %v3612_v4 = vpop.f32.mrb[50].mxu0 }
 0x260   : > { %v1106_v5 = vmax.f32 %v1104_v17, %v3612_v4  ;;  %v3615_v9 = vpop.f32.mrb[51].mxu0 }
 0x261   : > { %4852 = vst [vmem:[#allocation12_spill] sm:$0xff] %v3615_v9  ;;  %v1143_v57 = vmax.f32 %v1141_v14, %v3615_v9 }
 0x265   : > { %v3618_v58 = vpop.f32.mrb[52].mxu0 }
 0x266   : > { %v1107_v61 = vmax.f32 %v1105_v19, %v3618_v58  ;;  %v3621_v2 = vpop.f32.mrb[53].mxu0 }
 0x267   : > { %4853 = vst [vmem:[#allocation13_spill] sm:$0xff] %v3621_v2  ;;  %v1144_v39 = vmax.f32 %v1142_v22, %v3621_v2  ;;  %v3624_v20 = vpop.f32.mrb[54].mxu0 }
 0x268   : > { %v1108_v28 = vmax.f32 %v1106_v5, %v3624_v20  ;;  %v3627_v29 = vpop.f32.mrb[55].mxu0 }
 0x269   : > { %4854 = vst [vmem:[#allocation14_spill] sm:$0xff] %v3627_v29  ;;  %v1145_v35 = vmax.f32 %v1143_v57, %v3627_v29 }
 0x26d   : > { %v3630_v36 = vpop.f32.mrb[56].mxu0 }
 0x26e   : > { %v1109_v41 = vmax.f32 %v1107_v61, %v3630_v36  ;;  %v3633_v42 = vpop.f32.mrb[57].mxu0 }
 0x26f   : > { %4855 = vst [vmem:[#allocation15_spill] sm:$0xff] %v3633_v42  ;;  %v1146_v47 = vmax.f32 %v1144_v39, %v3633_v42  ;;  %v3636_v48 = vpop.f32.mrb[58].mxu0 }
 0x270   : > { %v1110_v53 = vmax.f32 %v1108_v28, %v3636_v48  ;;  %v3639_v60 = vpop.f32.mrb[59].mxu0 }
 0x271   : > { %4856 = vst [vmem:[#allocation16_spill] sm:$0xff] %v3639_v60  ;;  %v1147_v45 = vmax.f32 %v1145_v35, %v3639_v60 }
 0x275   : > { %v3642_v27 = vpop.f32.mrb[60].mxu0 }
 0x276   : > { %v1111_v25 = vmax.f32 %v1109_v41, %v3642_v27  ;;  %v3645_v37 = vpop.f32.mrb[61].mxu0 }
 0x277   : > { %4857 = vst [vmem:[#allocation17_spill] sm:$0xff] %v3645_v37  ;;  %v1148_v3 = vmax.f32 %v1146_v47, %v3645_v37  ;;  %v3648_v46 = vpop.f32.mrb[62].mxu0 }
 0x278   : > { %v1112_v13 = vmax.f32 %v1110_v53, %v3648_v46  ;;  %v3651_v55 = vpop.f32.mrb[63].mxu0 }
 0x279   : > { %4858 = vst [vmem:[#allocation18_spill] sm:$0xff] %v3651_v55  ;;  %v1149_v1 = vmax.f32 %v1147_v45, %v3651_v55 }
 0x27d   : > { %v3654_v43 = vpop.f32.mrb[64].mxu0 }
 0x27e   : > { %v1113_v17 = vmax.f32 %v1111_v25, %v3654_v43  ;;  %v3657_v14 = vpop.f32.mrb[65].mxu0 }
 0x27f   : > { %4859 = vst [vmem:[#allocation19_spill] sm:$0xff] %v3657_v14  ;;  %v1150_v19 = vmax.f32 %v1148_v3, %v3657_v14  ;;  %v3660_v22 = vpop.f32.mrb[66].mxu0 }
 0x280   : > { %v1114_v5 = vmax.f32 %v1112_v13, %v3660_v22  ;;  %v3663_v57 = vpop.f32.mrb[67].mxu0 }
 0x281   : > { %4860 = vst [vmem:[#allocation20_spill] sm:$0xff] %v3663_v57  ;;  %v1151_v61 = vmax.f32 %v1149_v1, %v3663_v57 }
 0x285   : > { %v3666_v39 = vpop.f32.mrb[68].mxu0 }
 0x286   : > { %v1115_v28 = vmax.f32 %v1113_v17, %v3666_v39  ;;  %v3669_v35 = vpop.f32.mrb[69].mxu0  ;;  %v1628_v17 = vadd.f32 %v3522_v21, %v3529_v54 }
 0x287   : > { %4861 = vst [vmem:[#allocation21_spill] sm:$0xff] %v3669_v35  ;;  %v1152_v41 = vmax.f32 %v1150_v19, %v3669_v35  ;;  %v3672_v47 = vpop.f32.mrb[70].mxu0 }
 0x288   : > { %v1116_v53 = vmax.f32 %v1114_v5, %v3672_v47  ;;  %v3675_v45 = vpop.f32.mrb[71].mxu0 }
 0x289   : > { %4862 = vst [vmem:[#allocation22_spill] sm:$0xff] %v3675_v45  ;;  %v1153_v25 = vmax.f32 %v1151_v61, %v3675_v45  ;;  %v3693_v61 = vmul.f32 %v3531_v59, %v1628_v17 }
 0x28d   : > { %v3678_v3 = vpop.f32.mrb[72].mxu0 }
 0x28e   : > { %v1117_v13 = vmax.f32 %v1115_v28, %v3678_v3  ;;  %v3681_v1 = vpop.f32.mrb[73].mxu0  ;;  %v1631_v28 = vadd.f32 %v3522_v21, %v1630_v34 }
 0x28f   : > { %4863 = vst [vmem:[#allocation23_spill] sm:$0xff] %v3681_v1  ;;  %v1154_v0 = vmax.f32 %v1152_v41, %v3681_v1  ;;  %v3686_v19 = vpop.f32.mrb[74].mxu0 }
 0x290   : > { %v1118_v49 = vmax.f32 %v1116_v53, %v3686_v19  ;;  %v3689_v5 = vpop.f32.mrb[75].mxu0  ;;  %v3697_v45 = vmul.f32 %v3531_v59, %v1631_v28  ;;  %v3713_v28 = vpop.f32.mrb[40].mxu1 }
 0x291   : > { %4864 = vst [vmem:[#allocation24_spill] sm:$0xff] %v3689_v5  ;;  %v1155_v50 = vmax.f32 %v1153_v25, %v3689_v5 }
 0x295   : > { %v3699_v35 = vpop.f32.mrb[76].mxu0 }
 0x296   : > { %v1119_v54 = vmax.f32 %v1117_v13, %v3699_v35  ;;  %v3702_v41 = vpop.f32.mrb[77].mxu0  ;;  %v3717_v13 = vpop.f32.mrb[41].mxu1 }
 0x297   : > { %4865 = vst [vmem:[#allocation25_spill] sm:$0xff] %v3702_v41  ;;  %v1156_v1 = vmax.f32 %v1154_v0, %v3702_v41  ;;  %v3707_v25 = vpop.f32.mrb[78].mxu0  ;;  %v3722_v53 = vpop.f32.mrb[42].mxu1 }
 0x298   : > { %v1120_v17 = vmax.f32 %v1118_v49, %v3707_v25  ;;  %v3710_v5 = vpop.f32.mrb[79].mxu0  ;;  %v3727_v49 = vpop.f32.mrb[43].mxu1 }
 0x299   : > { %4866 = vst [vmem:[#allocation26_spill] sm:$0xff] %v3710_v5  ;;  %v1157_v34 = vmax.f32 %v1155_v50, %v3710_v5  ;;  %v3732_v37 = vpop.f32.mrb[44].mxu1 }
 0x29a   : > { %4869 = vst [vmem:[#allocation29_spill] sm:$0xff] %v3732_v37  ;;  %v3735_v42 = vpop.f32.mrb[45].mxu1 }
 0x29d   : > { %v3715_v57 = vpop.f32.mrb[80].mxu0 }
 0x29e   : > { %v1121_v14 = vmax.f32 %v1119_v54, %v3715_v57  ;;  %v3720_v55 = vpop.f32.mrb[81].mxu0  ;;  %v3737_v54 = vpop.f32.mrb[46].mxu1 }
 0x29f   : > { %4867 = vst [vmem:[#allocation27_spill] sm:$0xff] %v3720_v55  ;;  %v1158_v0 = vmax.f32 %v1156_v1, %v3720_v55  ;;  %v3725_v41 = vpop.f32.mrb[82].mxu0  ;;  %4870 = vst [vmem:[#allocation30_spill] sm:$0xff] %v3737_v54  ;;  %v3739_v29 = vpop.f32.mrb[47].mxu1 }
 0x2a0   : > { %v1122_v50 = vmax.f32 %v1120_v17, %v3725_v41  ;;  %v3730_v5 = vpop.f32.mrb[83].mxu0  ;;  %v2782_v2 = vpop.f32.mrb[48].mxu1 }
 0x2a1   : > { %4868 = vst [vmem:[#allocation28_spill] sm:$0xff] %v3730_v5  ;;  %v1159_v60 = vmax.f32 %v1157_v34, %v3730_v5  ;;  %v1675_v55 = vpop.f32.mrb[49].mxu1  ;;  %v1684_v30 = vadd.f32 %v2782_v2, %v3522_v21 }
 0x2a2   : > { %v2783_v17 = vpop.f32.mrb[50].mxu1  ;;  %v1676_v54 = vadd.f32 %v3522_v21, %v1675_v55 }
 0x2a3   : > { %v1678_v34 = vpop.f32.mrb[51].mxu1 }
 0x2a4   : > { %v1679_v10 = vadd.f32 %v3522_v21, %v1678_v34  ;;  %v1757_v34 = vmul.f32 %v3531_v59, %v1684_v30 }
 0x2a5   : > { %v3741_v1 = vpop.f32.mrb[84].mxu0 }
 0x2a6   : > { %v1123_v9 = vmax.f32 %v1121_v14, %v3741_v1  ;;  %v3744_v16 = vpop.f32.mrb[85].mxu0  ;;  %v1755_v14 = vmul.f32 %v3531_v59, %v1676_v54  ;;  %v1756_v38 = vmul.f32 %v3531_v59, %v1679_v10 }
 0x2a7   : > { %4871 = vst [vmem:[#allocation31_spill] sm:$0xff] %v3744_v16  ;;  %v1160_v18 = vmax.f32 %v1158_v0, %v3744_v16  ;;  %v3747_v37 = vpop.f32.mrb[86].mxu0  ;;  %v1687_v0 = vadd.f32 %v2783_v17, %v3522_v21  ;;  %v2786_v16 = vpop.f32.mrb[52].mxu1 }
 0x2a8   : > { %4872 = vst [vmem:[#allocation32_spill] sm:$0xff] %v3747_v37  ;;  %v1124_v5 = vmax.f32 %v1122_v50, %v3747_v37  ;;  %v3750_v52 = vpop.f32.mrb[87].mxu0  ;;  %v1811_v24 = vpack.c.bf16 %v1756_v38, %v1755_v14  ;;  %v1691_v50 = vpop.f32.mrb[53].mxu1  ;;  %v4876_v38 = vpack.c.bf16 %v3543_v33, %v3537_v23  ;;  %v4877_v23 = vpack.c.bf16 %v3540_v32, %v3534_v63 }
 0x2a9   : > { %4873 = vst [vmem:[#allocation33_spill] sm:$0xff] %v3750_v52  ;;  %v1161_v6 = vmax.f32 %v1159_v60, %v3750_v52  ;;  %v1758_v60 = vmul.f32 %v3531_v59, %v1687_v0  ;;  %v2787_v54 = vpop.f32.mrb[54].mxu1  ;;  %v1692_v52 = vadd.f32 %v3522_v21, %v1691_v50  ;;  %v1700_v33 = vadd.f32 %v2786_v16, %v3522_v21 }
 0x2aa   : > { %2516 = vmatprep.subr.bf16.mxu1 %v1811_v24  ;;  %v1694_v17 = vpop.f32.mrb[55].mxu1 }
 0x2ab   : > { %2517 = vmatpush3.bf16.msra.mxu1 %v4876_v38  ;;  %v1695_v30 = vadd.f32 %v3522_v21, %v1694_v17  ;;  %v1812_v0 = vpack.c.bf16 %v1758_v60, %v1757_v34  ;;  %v2790_v38 = vpop.f32.mrb[56].mxu1 }
 0x2ac   : > { %v1707_v34 = vpop.f32.mrb[57].mxu1 }
 0x2ad   : > { %v3759_v11 = vpop.f32.mrb[88].mxu0  ;;  %2518 = vmatprep.subr.bf16.mxu1 %v1812_v0  ;;  %v1708_v0 = vadd.f32 %v3522_v21, %v1707_v34 }
 0x2ae   : > { %v1125_v37 = vmax.f32 %v1123_v9, %v3759_v11  ;;  %v3762_v55 = vpop.f32.mrb[89].mxu0 }
 0x2af   : > { %4874 = vst [vmem:[#allocation34_spill] sm:$0xff] %v3762_v55  ;;  %v1162_v10 = vmax.f32 %v1160_v18, %v3762_v55  ;;  %v3767_v2 = vpop.f32.mrb[90].mxu0  ;;  %v1759_v18 = vmul.f32 %v3531_v59, %v1692_v52  ;;  %v1760_v55 = vmul.f32 %v3531_v59, %v1695_v30  ;;  %2519 = vmatpush3.bf16.msra.mxu1 %v4877_v23  ;;  %v2791_v30 = vpop.f32.mrb[58].mxu1 }
 0x2b0   : > { %4875 = vst [vmem:[#allocation35_spill] sm:$0xff] %v3767_v2  ;;  %v1126_v14 = vmax.f32 %v1124_v5, %v3767_v2  ;;  %v3773_v9 = vpop.f32.mrb[91].mxu0  ;;  %v1703_v5 = vadd.f32 %v2787_v54, %v3522_v21  ;;  %v1761_v52 = vmul.f32 %v3531_v59, %v1700_v33  ;;  %v1710_v16 = vpop.f32.mrb[59].mxu1 }
 0x2b1   : > { %v1163_v24 = vmax.f32 %v1161_v6, %v3773_v9  ;;  %v1813_v50 = vpack.c.bf16 %v1760_v55, %v1759_v18  ;;  %v4878_v55 = vpack.c.bf16 %v3697_v45, %v3693_v61  ;;  %v1711_v18 = vadd.f32 %v3522_v21, %v1710_v16 }
 0x2b2   : > { %v1762_v17 = vmul.f32 %v3531_v59, %v1703_v5  ;;  %v1647_v5 = vadd.f32 %v3522_v21, %v3727_v49  ;;  %v1763_v45 = vmul.f32 %v3531_v59, %v1708_v0  ;;  %v1719_v49 = vadd.f32 %v2791_v30, %v3522_v21 }
 0x2b3   : > { %2520 = vmatprep.subr.bf16.mxu1 %v1813_v50  ;;  %v1764_v61 = vmul.f32 %v3531_v59, %v1711_v18 }
 0x2b4   : > { %2521 = vmatpush3.bf16.msra.mxu1 %v4878_v55  ;;  %v1814_v23 = vpack.c.bf16 %v1762_v17, %v1761_v52  ;;  %v1748_v16 = vmul.f32 %v3531_v59, %v1647_v5 }
 0x2b5   : > { %v3785_v2 = vpop.f32.mrb[92].mxu0  ;;  %v1815_v17 = vpack.c.bf16 %v1764_v61, %v1763_v45 }
 0x2b6   : > { %v1127_v6 = vmax.f32 %v1125_v37, %v3785_v2  ;;  %v3788_v60 = vpop.f32.mrb[93].mxu0  ;;  %2522 = vmatprep.subr.bf16.mxu1 %v1814_v23 }
 0x2b7   : > { %v1164_v63 = vmax.f32 %v1162_v10, %v3788_v60  ;;  %v3793_v32 = vpop.f32.mrb[94].mxu0  ;;  %v1644_v10 = vadd.f32 %v3522_v21, %v3717_v13  ;;  %v1716_v13 = vadd.f32 %v2790_v38, %v3522_v21 }
 0x2b8   : > { %v1128_v54 = vmax.f32 %v1126_v14, %v3793_v32  ;;  %v3799_v37 = vpop.f32.mrb[95].mxu0 }
 0x2b9   : > { %v1165_v33 = vmax.f32 %v1163_v24, %v3799_v37  ;;  %v1747_v34 = vmul.f32 %v3531_v59, %v1644_v10  ;;  %v4879_v24 = vpack.c.bf16 %v3554_v51, %v3546_v40  ;;  %v1765_v40 = vmul.f32 %v3531_v59, %v1716_v13 }
 0x2ba   : > { %v1129_v50 = vmax.f32 %v1127_v6, %v1128_v54  ;;  %v3817_v6 = vpop.f32.mrb[60].mxu1  ;;  %v1655_v54 = vadd.f32 %v3722_v53, %v3522_v21  ;;  %v1766_v51 = vmul.f32 %v3531_v59, %v1719_v49 }
 0x2bb   : > { %v1166_v14 = vmax.f32 %v1164_v63, %v1165_v33  ;;  %2523 = vmatpush3.bf16.msra.mxu1 %v4879_v24  ;;  %v1652_v63 = vadd.f32 %v3713_v28, %v3522_v21  ;;  %v1807_v0 = vpack.c.bf16 %v1748_v16, %v1747_v34  ;;  %v1723_v18 = vpop.f32.mrb[61].mxu1  ;;  %v1660_v16 = vadd.f32 %v3522_v21, %v3735_v42 }
 0x2bc   : > { %v1130_v52 = vrot.slane %v1129_v50, 4  ;;  %v3825_v38 = vpop.f32.mrb[62].mxu1  ;;  %2524 = vmatprep.subr.bf16.mxu1 %v1815_v17  ;;  %v1750_v10 = vmul.f32 %v3531_v59, %v1655_v54  ;;  %v1724_v53 = vadd.f32 %v3522_v21, %v1723_v18 }
 0x2bd   : > { %v1167_v55 = vrot.slane %v1166_v14, 4  ;;  %v1749_v33 = vmul.f32 %v3531_v59, %v1652_v63  ;;  %v1726_v5 = vpop.f32.mrb[63].mxu1  ;;  %v1751_v17 = vmul.f32 %v3531_v59, %v1660_v16 }
 0x2be   : > { %v1131_v23 = vmax.f32 %v1129_v50, %v1130_v52  ;;  %v1727_v45 = vadd.f32 %v3522_v21, %v1726_v5  ;;  %v1816_v50 = vpack.c.bf16 %v1766_v51, %v1765_v40  ;;  %v1767_v52 = vmul.f32 %v3531_v59, %v1724_v53  ;;  %v4893_v53 = vld [vmem:[#allocation12_spill] sm:$0xff] }
 0x2bf   : > { %v1168_v30 = vmax.f32 %v1166_v14, %v1167_v55  ;;  %2525 = vmatpush3.bf16.msra.mxu1 %v1807_v0  ;;  %v1808_v34 = vpack.c.bf16 %v1750_v10, %v1749_v33  ;;  %v1663_v14 = vadd.f32 %v3522_v21, %v3739_v29 }
 0x2c0   : > { %v1132_v28 = vrot.slane %v1131_v23, 2  ;;  %v1768_v13 = vmul.f32 %v3531_v59, %v1727_v45  ;;  %2526 = vmatprep.subr.bf16.mxu1 %v1816_v50  ;;  %v4886_v45 = vld [vmem:[#allocation7_spill] sm:$0xff] }
 0x2c1   : > { %v1169_v61 = vrot.slane %v1168_v30, 2  ;;  %v1752_v55 = vmul.f32 %v3531_v59, %v1663_v14  ;;  %v4882_v14 = vld [vmem:[#allocation3_spill] sm:$0xff] }
 0x2c2   : > { %v1133_v24 = vmax.f32 %v1131_v23, %v1132_v28  ;;  %v1817_v54 = vpack.c.bf16 %v1768_v13, %v1767_v52  ;;  %v4880_v52 = vld [vmem:[#allocation32_spill] sm:$0xff] }
 0x2c3   : > { %v1170_v49 = vmax.f32 %v1168_v30, %v1169_v61  ;;  %2527 = vmatpush3.bf16.msra.mxu1 %v1808_v34  ;;  %v1809_v18 = vpack.c.bf16 %v1752_v55, %v1751_v17  ;;  %v4881_v17 = vld [vmem:[#allocation35_spill] sm:$0xff]  ;;  %v4883_v13 = vld [vmem:[#allocation4_spill] sm:$0xff] }
 0x2c4   : > { %v1134_v63 = vrot.slane %v1133_v24, 1  ;;  %2528 = vmatprep.subr.bf16.mxu1 %v1817_v54  ;;  %v4885_v54 = vld [vmem:[#allocation6_spill] sm:$0xff] }
 0x2c5   : > { %v1171_v0 = vrot.slane %v1170_v49, 1 }
 0x2c6   : > { %v3839_v42 = vmax.f32 %v1133_v24, %v1134_v63  ;;  %v4915_v24 = vld [vmem:[#allocation33_spill] sm:$0xff] }
 0x2c7   : > { %v3841_v29 = vmax.f32 %v1170_v49, %v1171_v0  ;;  %2529 = vmatpush3.bf16.msra.mxu1 %v1809_v18 }
 0x2c8   : > { %v1173_v23 = vsub.f32 %v3556_v62, %v3839_v42  ;;  %v1175_v40 = vsub.f32 %v3562_v12, %v3839_v42  ;;  %v1177_v51 = vsub.f32 %v3566_v26, %v3839_v42  ;;  %v1179_v30 = vsub.f32 %v3574_v31, %v3839_v42 }
 0x2c9   : > { %v1181_v33 = vsub.f32 %v3582_v44, %v3839_v42  ;;  %v1183_v10 = vsub.f32 %v3588_v7, %v3839_v42  ;;  %v1185_v5 = vsub.f32 %v3594_v56, %v3839_v42  ;;  %v1187_v62 = vsub.f32 %v3600_v8, %v3839_v42 }
 0x2ca   : > { %v1189_v12 = vsub.f32 %v3606_v15, %v3839_v42  ;;  %v1191_v26 = vsub.f32 %v3612_v4, %v3839_v42  ;;  %v1193_v31 = vsub.f32 %v3618_v58, %v3839_v42  ;;  %v1237_v0 = vmul.f32 1.442695, %v1173_v23  ;;  %v4884_v23 = vld [vmem:[#allocation5_spill] sm:$0xff] }
 0x2cb   : > { %v1241_v18 = vmul.f32 1.442695, %v1175_v40  ;;  %v1245_v16 = vmul.f32 1.442695, %v1177_v51  ;;  %v1249_v49 = vmul.f32 1.442695, %v1179_v30  ;;  %v4919_v44 = vsub.f32 %v3636_v48, %v3839_v42 }
 0x2cc   : > { %2884 = vpow2.f32 %v1237_v0  ;;  %v1253_v55 = vmul.f32 1.442695, %v1181_v33  ;;  %v1257_v61 = vmul.f32 1.442695, %v1183_v10  ;;  %v1261_v63 = vmul.f32 1.442695, %v1185_v5 }
 0x2cd   : > { %2886 = vpow2.f32 %v1241_v18  ;;  %v1265_v50 = vmul.f32 1.442695, %v1187_v62  ;;  %v4887_v0 = vld [vmem:[#allocation8_spill] sm:$0xff]  ;;  %v1269_v33 = vmul.f32 1.442695, %v1189_v12  ;;  %v4889_v10 = vld [vmem:[#allocation9_spill] sm:$0xff]  ;;  %v4922_v48 = vsub.f32 %v3648_v46, %v3839_v42 }
 0x2ce   : > { %2888 = vpow2.f32 %v1245_v16  ;;  %v4890_v62 = vld [vmem:[#allocation10_spill] sm:$0xff]  ;;  %v4894_v30 = vld [vmem:[#allocation13_spill] sm:$0xff]  ;;  %v1273_v34 = vmul.f32 1.442695, %v1191_v26  ;;  %v1277_v8 = vmul.f32 1.442695, %v1193_v31 }
 0x2cf   : > { %2890 = vpow2.f32 %v1249_v49  ;;  %v4895_v12 = vld [vmem:[#allocation14_spill] sm:$0xff]  ;;  %v4896_v49 = vld [vmem:[#allocation15_spill] sm:$0xff]  ;;  %v4899_v51 = vld [vmem:[#allocation17_spill] sm:$0xff] }
 0x2d0   : > { %2892 = vpow2.f32 %v1253_v55  ;;  %v4897_v55 = vld [vmem:[#allocation16_spill] sm:$0xff]  ;;  %v4900_v40 = vld [vmem:[#allocation18_spill] sm:$0xff] }
 0x2d1   : > { %2894 = vpow2.f32 %v1257_v61  ;;  %v4891_v61 = vld [vmem:[#allocation11_spill] sm:$0xff]  ;;  %v4912_v31 = vld [vmem:[#allocation28_spill] sm:$0xff] }
 0x2d2   : > { %2896 = vpow2.f32 %v1261_v63 }
 0x2d3   : > { %2898 = vpow2.f32 %v1265_v50  ;;  %v4905_v50 = vld [vmem:[#allocation22_spill] sm:$0xff] }
 0x2d4   : > { %2900 = vpow2.f32 %v1269_v33  ;;  %v1289_v33 = vmul.f32 1.442695, %v4919_v44  ;;  %v1297_v44 = vmul.f32 1.442695, %v4922_v48 }
 0x2d5   : > { %2902 = vpow2.f32 %v1273_v34  ;;  %v4916_v34 = vld [vmem:[#allocation34_spill] sm:$0xff] }
 0x2d6   : > { %v3919_v16 = vpop.eup %2884  ;;  %2904 = vpow2.f32 %v1277_v8 }
 0x2d7   : > { %4888 = vst [vmem:[#allocation32_spill] sm:$0xff] %v3919_v16  ;;  %v3927_v18 = vpop.eup %2886 }
 0x2d8   : > { %4892 = vst [vmem:[#allocation35_spill] sm:$0xff] %v3927_v18  ;;  %v1365_v5 = vadd.f32 %v3927_v18, %v3919_v16  ;;  %v3941_v63 = vpop.eup %2888  ;;  %v4911_v16 = vld [vmem:[#allocation27_spill] sm:$0xff] }
 0x2d9   : > { %4898 = vst [vmem:[#allocation3_spill] sm:$0xff] %v3941_v63  ;;  %v3954_v18 = vpop.eup %2890 }
 0x2da   : > { %v1366_v56 = vadd.f32 %v3941_v63, %v1365_v5  ;;  %4904 = vst [vmem:[#allocation4_spill] sm:$0xff] %v3954_v18  ;;  %v4908_v5 = vsub.f32 %v3624_v20, %v3839_v42  ;;  %v3970_v26 = vpop.eup %2892  ;;  %v4913_v20 = vld [vmem:[#allocation31_spill] sm:$0xff] }
 0x2db   : > { %v3986_v15 = vpop.eup %2894 }
 0x2dc   : > { %v1281_v63 = vmul.f32 1.442695, %v4908_v5  ;;  %v1367_v7 = vadd.f32 %v3954_v18, %v1366_v56  ;;  %v4914_v56 = vsub.f32 %v3630_v36, %v3839_v42  ;;  %4917 = vst [vmem:[#allocation5_spill] sm:$0xff] %v3986_v15  ;;  %v4921_v5 = vsub.f32 %v3642_v27, %v3839_v42  ;;  %v4924_v27 = vld [vmem:[#allocation30_spill] sm:$0xff] }
 0x2de   : > { %v1285_v18 = vmul.f32 1.442695, %v4914_v56  ;;  %v1368_v58 = vadd.f32 %v3970_v26, %v1367_v7  ;;  %v3995_v56 = vpop.eup %2896  ;;  %2906 = vpow2.f32 %v1281_v63  ;;  %v1293_v28 = vmul.f32 1.442695, %v4921_v5 }
 0x2df   : > { %4918 = vst [vmem:[#allocation6_spill] sm:$0xff] %v3995_v56  ;;  %v4001_v4 = vpop.eup %2898  ;;  %v1735_v63 = vadd.f32 %v3825_v38, %v3522_v21  ;;  %v1671_v5 = vadd.f32 %v4924_v27, %v3522_v21 }
 0x2e0   : > { %v1369_v7 = vadd.f32 %v3986_v15, %v1368_v58  ;;  %4920 = vst [vmem:[#allocation7_spill] sm:$0xff] %v4001_v4  ;;  %2908 = vpow2.f32 %v1285_v18  ;;  %v1732_v58 = vadd.f32 %v3817_v6, %v3522_v21  ;;  %v4011_v15 = vpop.eup %2900  ;;  %v4923_v18 = vld [vmem:[#allocation29_spill] sm:$0xff] }
 0x2e1   : > { %2910 = vpow2.f32 %v1289_v33  ;;  %v4024_v38 = vpop.eup %2902  ;;  %v4926_v33 = vsub.f32 %v3660_v22, %v3839_v42 }
 0x2e2   : > { %v1370_v8 = vadd.f32 %v3995_v56, %v1369_v7  ;;  %v1668_v7 = vadd.f32 %v4923_v18, %v3522_v21  ;;  %2912 = vpow2.f32 %v1293_v28  ;;  %v4927_v18 = vsub.f32 %v4882_v14, %v3841_v29  ;;  %v4035_v27 = vpop.eup %2904 }
 0x2e3   : > { %v1305_v46 = vmul.f32 1.442695, %v4926_v33  ;;  %v1769_v21 = vmul.f32 %v3531_v59, %v1732_v58  ;;  %2914 = vpow2.f32 %v1297_v44  ;;  %v4928_v28 = vsub.f32 %v4883_v13, %v3841_v29 }
 0x2e4   : > { %v1371_v36 = vadd.f32 %v4001_v4, %v1370_v8  ;;  %v4925_v8 = vsub.f32 %v3654_v43, %v3839_v42  ;;  %v1239_v56 = vmul.f32 1.442695, %v4927_v18  ;;  %v1770_v43 = vmul.f32 %v3531_v59, %v1735_v63 }
 0x2e5   : > { %v1753_v22 = vmul.f32 %v3531_v59, %v1668_v7  ;;  %v4930_v63 = vsub.f32 %v4884_v23, %v3841_v29  ;;  %v4931_v13 = vsub.f32 %v3672_v47, %v3839_v42  ;;  %v4934_v23 = vsub.f32 %v3678_v3, %v3839_v42 }
 0x2e6   : > { %v1301_v6 = vmul.f32 1.442695, %v4925_v8  ;;  %v1372_v4 = vadd.f32 %v4011_v15, %v1371_v36  ;;  %v1243_v36 = vmul.f32 1.442695, %v4928_v28  ;;  %v1754_v8 = vmul.f32 %v3531_v59, %v1671_v5 }
 0x2e7   : > { %v1247_v44 = vmul.f32 1.442695, %v4930_v63  ;;  %v1313_v7 = vmul.f32 1.442695, %v4931_v13  ;;  %v1317_v18 = vmul.f32 1.442695, %v4934_v23  ;;  %v4944_v23 = vsub.f32 %v4891_v61, %v3841_v29 }
 0x2e8   : > { %v1373_v48 = vadd.f32 %v4024_v38, %v1372_v4  ;;  %2916 = vpow2.f32 %v1301_v6  ;;  %v4929_v4 = vsub.f32 %v3666_v39, %v3839_v42  ;;  %v4046_v33 = vpop.eup %2906  ;;  %v4933_v39 = vsub.f32 %v4885_v54, %v3841_v29 }
 0x2e9   : > { %2918 = vpow2.f32 %v1305_v46  ;;  %v1818_v46 = vpack.c.bf16 %v1770_v43, %v1769_v21  ;;  %v4937_v54 = vsub.f32 %v3686_v19, %v3839_v42  ;;  %v4940_v19 = vsub.f32 %v4889_v10, %v3841_v29 }
 0x2ea   : > { %v1309_v14 = vmul.f32 1.442695, %v4929_v4  ;;  %v1374_v58 = vadd.f32 %v4035_v27, %v1373_v48  ;;  %2920 = vpow2.f32 %v1239_v56  ;;  %v4055_v5 = vpop.eup %2908  ;;  %v1251_v6 = vmul.f32 1.442695, %v4933_v39 }
 0x2eb   : > { %4932 = vst [vmem:[#allocation8_spill] sm:$0xff] %v4055_v5  ;;  %2922 = vpow2.f32 %v1243_v36  ;;  %v1810_v48 = vpack.c.bf16 %v1754_v8, %v1753_v22  ;;  %v4064_v28 = vpop.eup %2910  ;;  %v4936_v56 = vsub.f32 %v4886_v45, %v3841_v29  ;;  %2530 = vmatprep.subr.bf16.mxu1 %v1818_v46  ;;  %v1321_v21 = vmul.f32 1.442695, %v4937_v54 }
 0x2ec   : > { %v1375_v59 = vadd.f32 %v4046_v33, %v1374_v58  ;;  %2924 = vpow2.f32 %v1309_v14  ;;  %4935 = vst [vmem:[#allocation9_spill] sm:$0xff] %v4064_v28  ;;  %v4073_v3 = vpop.eup %2912  ;;  %v4938_v22 = vsub.f32 %v4887_v0, %v3841_v29  ;;  %v4939_v45 = vsub.f32 %v3699_v35, %v3839_v42 }
 0x2ed   : > { %2926 = vpow2.f32 %v1247_v44  ;;  %v1255_v36 = vmul.f32 1.442695, %v4936_v56  ;;  %2531 = vmatpush3.bf16.msra.mxu1 %v1810_v48  ;;  %v4082_v58 = vpop.eup %2914  ;;  %v1263_v63 = vmul.f32 1.442695, %v4940_v19  ;;  %v4941_v0 = vsub.f32 %v3707_v25, %v3839_v42 }
 0x2ee   : > { %v1376_v47 = vadd.f32 %v4055_v5, %v1375_v59  ;;  %2928 = vpow2.f32 %v1313_v7  ;;  %v1259_v8 = vmul.f32 1.442695, %v4938_v22  ;;  %v1325_v4 = vmul.f32 1.442695, %v4939_v45 }
 0x2ef   : > { %2930 = vpow2.f32 %v1251_v6  ;;  %v1329_v13 = vmul.f32 1.442695, %v4941_v0  ;;  %v4942_v59 = vsub.f32 %v4890_v62, %v3841_v29  ;;  %v4943_v10 = vsub.f32 %v3715_v57, %v3839_v42 }
 0x2f0   : > { %v1377_v43 = vadd.f32 %v4064_v28, %v1376_v47  ;;  %2932 = vpow2.f32 %v1317_v18  ;;  %v1271_v18 = vmul.f32 1.442695, %v4944_v23  ;;  %v4945_v62 = vsub.f32 %v3725_v41, %v3839_v42 }
 0x2f1   : > { %2934 = vpow2.f32 %v1255_v36  ;;  %v1267_v39 = vmul.f32 1.442695, %v4942_v59  ;;  %v1333_v48 = vmul.f32 1.442695, %v4943_v10  ;;  %v4947_v22 = vsub.f32 %v3741_v1, %v3839_v42 }
 0x2f2   : > { %v1378_v14 = vadd.f32 %v4073_v3, %v1377_v43  ;;  %v4087_v44 = vpop.eup %2916  ;;  %2936 = vpow2.f32 %v1321_v21  ;;  %v1337_v56 = vmul.f32 1.442695, %v4945_v62  ;;  %v4946_v21 = vsub.f32 %v4893_v53, %v3841_v29 }
 0x2f3   : > { %v4093_v35 = vpop.eup %2918  ;;  %2938 = vpow2.f32 %v1259_v8  ;;  %v1341_v41 = vmul.f32 1.442695, %v4947_v22  ;;  %v4950_v59 = vsub.f32 %v4895_v12, %v3841_v29  ;;  %v4951_v10 = vsub.f32 %v3759_v11, %v3839_v42 }
 0x2f4   : > { %v1379_v7 = vadd.f32 %v4082_v58, %v1378_v14  ;;  %v4098_v6 = vpop.eup %2920  ;;  %2940 = vpow2.f32 %v1325_v4  ;;  %v1275_v61 = vmul.f32 1.442695, %v4946_v21  ;;  %v4948_v14 = vsub.f32 %v4894_v30, %v3841_v29 }
 0x2f5   : > { %v4104_v25 = vpop.eup %2922  ;;  %2942 = vpow2.f32 %v1263_v63  ;;  %v4949_v63 = vsub.f32 %v4880_v52, %v3839_v42 }
 0x2f6   : > { %v1380_v46 = vadd.f32 %v4087_v44, %v1379_v7  ;;  %v4109_v47 = vpop.eup %2924  ;;  %2944 = vpow2.f32 %v1329_v13  ;;  %v1402_v57 = vadd.f32 %v4104_v25, %v4098_v6  ;;  %v1279_v19 = vmul.f32 1.442695, %v4948_v14 }
 0x2f7   : > { %v4117_v54 = vpop.eup %2926  ;;  %2946 = vpow2.f32 %v1267_v39  ;;  %v1345_v0 = vmul.f32 1.442695, %v4949_v63  ;;  %v1283_v39 = vmul.f32 1.442695, %v4950_v59 }
 0x2f8   : > { %v1381_v36 = vadd.f32 %v4093_v35, %v1380_v46  ;;  %v4122_v43 = vpop.eup %2928  ;;  %2948 = vpow2.f32 %v1333_v48  ;;  %v1403_v45 = vadd.f32 %v4117_v54, %v1402_v57  ;;  %v1349_v48 = vmul.f32 1.442695, %v4951_v10 }
 0x2f9   : > { %v4129_v4 = vpop.eup %2930  ;;  %2950 = vpow2.f32 %v1271_v18  ;;  %v4952_v18 = vsub.f32 %v4896_v49, %v3841_v29 }
 0x2fa   : > { %v1382_v8 = vadd.f32 %v4109_v47, %v1381_v36  ;;  %v4134_v53 = vpop.eup %2932  ;;  %2952 = vpow2.f32 %v1337_v56  ;;  %v1404_v13 = vadd.f32 %v4129_v4, %v1403_v45  ;;  %v4953_v56 = vsub.f32 %v4881_v17, %v3839_v42 }
 0x2fb   : > { %v4141_v7 = vpop.eup %2934  ;;  %2954 = vpow2.f32 %v1275_v61  ;;  %v1287_v62 = vmul.f32 1.442695, %v4952_v18  ;;  %v4954_v61 = vsub.f32 %v4897_v55, %v3841_v29 }
 0x2fc   : > { %v1383_v1 = vadd.f32 %v4122_v43, %v1382_v8  ;;  %v4146_v30 = vpop.eup %2936  ;;  %2956 = vpow2.f32 %v1341_v41  ;;  %v1405_v46 = vadd.f32 %v4141_v7, %v1404_v13  ;;  %v1353_v36 = vmul.f32 1.442695, %v4953_v56 }
 0x2fd   : > { %v4153_v23 = vpop.eup %2938  ;;  %2958 = vpow2.f32 %v1279_v19  ;;  %v1291_v22 = vmul.f32 1.442695, %v4954_v61  ;;  %v4955_v41 = vsub.f32 %v3785_v2, %v3839_v42  ;;  %v4956_v19 = vsub.f32 %v4899_v51, %v3841_v29 }
 0x2fe   : > { %v1384_v52 = vadd.f32 %v4134_v53, %v1383_v1  ;;  %v4158_v12 = vpop.eup %2940  ;;  %2960 = vpow2.f32 %v1345_v0  ;;  %v1406_v57 = vadd.f32 %v4153_v23, %v1405_v46  ;;  %v4957_v0 = vsub.f32 %v3793_v32, %v3839_v42  ;;  %v4959_v42 = vld [vmem:[#allocation19_spill] sm:$0xff] }
 0x2ff   : > { %v4165_v21 = vpop.eup %2942  ;;  %2962 = vpow2.f32 %v1283_v39  ;;  %v1357_v8 = vmul.f32 1.442695, %v4955_v41  ;;  %v1295_v63 = vmul.f32 1.442695, %v4956_v19  ;;  %v4958_v39 = vsub.f32 %v4900_v40, %v3841_v29 }
 0x300   : > { %v1385_v11 = vadd.f32 %v4146_v30, %v1384_v52  ;;  %v4170_v49 = vpop.eup %2944  ;;  %2964 = vpow2.f32 %v1349_v48  ;;  %v1407_v45 = vadd.f32 %v4165_v21, %v1406_v57  ;;  %v1361_v1 = vmul.f32 1.442695, %v4957_v0 }
 0x301   : > { %v4177_v14 = vpop.eup %2946  ;;  %2966 = vpow2.f32 %v1287_v62  ;;  %v1299_v10 = vmul.f32 1.442695, %v4958_v39  ;;  %v4960_v46 = vsub.f32 %v4959_v42, %v3841_v29  ;;  %v4965_v39 = vsub.f32 %v4905_v50, %v3841_v29 }
 0x302   : > { %v1386_v17 = vadd.f32 %v4158_v12, %v1385_v11  ;;  %v4182_v55 = vpop.eup %2948  ;;  %2968 = vpow2.f32 %v1353_v36  ;;  %v1408_v13 = vadd.f32 %v4177_v14, %v1407_v45  ;;  %v4961_v11 = vld [vmem:[#allocation20_spill] sm:$0xff]  ;;  %v4963_v45 = vld [vmem:[#allocation21_spill] sm:$0xff] }
 0x303   : > { %v4189_v59 = vpop.eup %2950  ;;  %2970 = vpow2.f32 %v1291_v22  ;;  %v1303_v18 = vmul.f32 1.442695, %v4960_v46  ;;  %v4962_v57 = vsub.f32 %v4961_v11, %v3841_v29  ;;  %v4964_v19 = vsub.f32 %v4963_v45, %v3841_v29 }
 0x304   : > { %v1387_v2 = vadd.f32 %v4170_v49, %v1386_v17  ;;  %v4194_v51 = vpop.eup %2952  ;;  %2972 = vpow2.f32 %v1357_v8  ;;  %v1409_v52 = vadd.f32 %v4189_v59, %v1408_v13 }
 0x305   : > { %v4198_v32 = vpop.eup %2954  ;;  %2974 = vpow2.f32 %v1295_v63  ;;  %v1307_v61 = vmul.f32 1.442695, %v4962_v57  ;;  %v1311_v63 = vmul.f32 1.442695, %v4964_v19 }
 0x306   : > { %v1388_v48 = vadd.f32 %v4182_v55, %v1387_v2  ;;  %v4203_v62 = vpop.eup %2956  ;;  %2976 = vpow2.f32 %v1361_v1  ;;  %v1410_v56 = vadd.f32 %v4198_v32, %v1409_v52 }
 0x307   : > { %v4207_v36 = vpop.eup %2958  ;;  %2978 = vpow2.f32 %v1299_v10  ;;  %v1315_v10 = vmul.f32 1.442695, %v4965_v39  ;;  %v4971_v39 = vld [vmem:[#allocation25_spill] sm:$0xff] }
 0x308   : > { %v1389_v40 = vadd.f32 %v4194_v51, %v1388_v48  ;;  %v4212_v22 = vpop.eup %2960  ;;  %v1411_v8 = vadd.f32 %v4207_v36, %v1410_v56  ;;  %2980 = vpow2.f32 %v1303_v18  ;;  %v4967_v18 = vld [vmem:[#allocation23_spill] sm:$0xff] }
 0x309   : > { %v4216_v17 = vpop.eup %2962  ;;  %2982 = vpow2.f32 %v1307_v61 }
 0x30a   : > { %v1390_v41 = vadd.f32 %v4203_v62, %v1389_v40  ;;  %v4221_v0 = vpop.eup %2964  ;;  %v1412_v2 = vadd.f32 %v4216_v17, %v1411_v8  ;;  %2984 = vpow2.f32 %v1311_v63  ;;  %v4968_v40 = vsub.f32 %v4967_v18, %v3841_v29 }
 0x30b   : > { %v4225_v13 = vpop.eup %2966  ;;  %2986 = vpow2.f32 %v1315_v10 }
 0x30c   : > { %v1391_v1 = vadd.f32 %v4212_v22, %v1390_v41  ;;  %v4230_v48 = vpop.eup %2968  ;;  %v1413_v42 = vadd.f32 %v4225_v13, %v1412_v2  ;;  %v1319_v56 = vmul.f32 1.442695, %v4968_v40  ;;  %v4969_v41 = vld [vmem:[#allocation24_spill] sm:$0xff] }
 0x30d   : > { %v4234_v46 = vpop.eup %2970  ;;  %v4970_v8 = vsub.f32 %v4969_v41, %v3841_v29  ;;  %v4973_v41 = vld [vmem:[#allocation26_spill] sm:$0xff] }
 0x30e   : > { %v1392_v52 = vadd.f32 %v4221_v0, %v1391_v1  ;;  %4966 = vst [vmem:[#allocation10_spill] sm:$0xff] %v4234_v46  ;;  %v4239_v11 = vpop.eup %2972  ;;  %v1414_v50 = vadd.f32 %v4234_v46, %v1413_v42  ;;  %2988 = vpow2.f32 %v1319_v56  ;;  %v4975_v56 = vsub.f32 %v4911_v16, %v3841_v29 }
 0x30f   : > { %v4243_v61 = vpop.eup %2974  ;;  %v1323_v45 = vmul.f32 1.442695, %v4970_v8  ;;  %v4974_v8 = vsub.f32 %v4973_v41, %v3841_v29  ;;  %v4977_v16 = vsub.f32 %v4913_v20, %v3841_v29  ;;  %v4979_v20 = vsub.f32 %v4916_v34, %v3841_v29 }
 0x310   : > { %v1393_v57 = vadd.f32 %v4230_v48, %v1392_v52  ;;  %v4248_v19 = vpop.eup %2976  ;;  %v1415_v1 = vadd.f32 %v4243_v61, %v1414_v50  ;;  %v4972_v52 = vsub.f32 %v4971_v39, %v3841_v29  ;;  %v1335_v39 = vmul.f32 1.442695, %v4975_v56 }
 0x311   : > { %v4252_v2 = vpop.eup %2978  ;;  %2990 = vpow2.f32 %v1323_v45  ;;  %v4976_v45 = vsub.f32 %v4912_v31, %v3841_v29  ;;  %v4978_v31 = vsub.f32 %v4915_v24, %v3841_v29 }
 0x312   : > { %v1394_v63 = vadd.f32 %v4239_v11, %v1393_v57  ;;  %v1327_v42 = vmul.f32 1.442695, %v4972_v52  ;;  %v1416_v10 = vadd.f32 %v4252_v2, %v1415_v1  ;;  %v4259_v40 = vpop.eup %2980  ;;  %v1331_v57 = vmul.f32 1.442695, %v4974_v8 }
 0x313   : > { %v4265_v5 = vpop.eup %2982  ;;  %v1339_v41 = vmul.f32 1.442695, %v4976_v45 }
 0x314   : > { %v1395_v18 = vadd.f32 %v4248_v19, %v1394_v63  ;;  %v1417_v50 = vadd.f32 %v4259_v40, %v1416_v10  ;;  %2992 = vpow2.f32 %v1327_v42  ;;  %v4271_v52 = vpop.eup %2984  ;;  %v1343_v42 = vmul.f32 1.442695, %v4977_v16 }
 0x315   : > { %2994 = vpow2.f32 %v1331_v57  ;;  %v4277_v46 = vpop.eup %2986  ;;  %v1347_v57 = vmul.f32 1.442695, %v4978_v31 }
 0x316   : > { %v1396_v28 = vrot.slane %v1395_v18, 4  ;;  %v1418_v1 = vadd.f32 %v4265_v5, %v1417_v50  ;;  %2996 = vpow2.f32 %v1335_v39  ;;  %v1351_v39 = vmul.f32 1.442695, %v4979_v20 }
 0x317   : > { %2998 = vpow2.f32 %v1339_v41 }
 0x318   : > { %v1397_v63 = vadd.f32 %v1396_v28, %v1395_v18  ;;  %v1419_v10 = vadd.f32 %v4271_v52, %v1418_v1  ;;  %v4283_v50 = vpop.eup %2988  ;;  %3000 = vpow2.f32 %v1343_v42  ;;  %v4981_v42 = vsub.f32 %v3788_v60, %v3841_v29 }
 0x319   : > { %3002 = vpow2.f32 %v1347_v57 }
 0x31a   : > { %v1398_v8 = vrot.slane %v1397_v63, 2  ;;  %v1420_v18 = vadd.f32 %v4277_v46, %v1419_v10  ;;  %3004 = vpow2.f32 %v1351_v39  ;;  %v1359_v34 = vmul.f32 1.442695, %v4981_v42 }
 0x31b   : > { %v4289_v45 = vpop.eup %2990 }
 0x31c   : > { %v1399_v28 = vadd.f32 %v1398_v8, %v1397_v63  ;;  %v1421_v1 = vadd.f32 %v4283_v50, %v1420_v18  ;;  %v4980_v63 = vsub.f32 %v3773_v9, %v3841_v29 }
 0x31e   : > { %v1400_v56 = vrot.slane %v1399_v28, 1  ;;  %v1355_v8 = vmul.f32 1.442695, %v4980_v63  ;;  %v1422_v41 = vadd.f32 %v4289_v45, %v1421_v1  ;;  %v4298_v10 = vpop.eup %2992  ;;  %v4982_v1 = vsub.f32 %v3799_v37, %v3841_v29 }
 0x31f   : > { %v4301_v18 = vpop.eup %2994 }
 0x320   : > { %v1401_v24 = vadd.f32 %v1400_v56, %v1399_v28  ;;  %v1423_v16 = vadd.f32 %v4298_v10, %v1422_v41  ;;  %3006 = vpow2.f32 %v1355_v8  ;;  %v4307_v9 = vpop.eup %2996  ;;  %v1363_v28 = vmul.f32 1.442695, %v4982_v1 }
 0x321   : > { %v4313_v56 = vpop.eup %2998 }
 0x322   : > { %v1424_v31 = vadd.f32 %v4301_v18, %v1423_v16  ;;  %3008 = vrcp.f32 %v1401_v24  ;;  %v4316_v39 = vpop.eup %3000 }
 0x323   : > { %3010 = vpow2.f32 %v1359_v34  ;;  %v4319_v63 = vpop.eup %3002 }
 0x324   : > { %v1425_v57 = vadd.f32 %v4307_v9, %v1424_v31  ;;  %3012 = vpow2.f32 %v1363_v28  ;;  %v4322_v41 = vpop.eup %3004 }
 0x326   : > { %v1426_v20 = vadd.f32 %v4313_v56, %v1425_v57 }
 0x328   : > { %v1427_v60 = vadd.f32 %v4316_v39, %v1426_v20 }
 0x32a   : > { %v1428_v8 = vadd.f32 %v4319_v63, %v1427_v60  ;;  %v4324_v37 = vpop.eup %3006 }
 0x32c   : > { %v1429_v29 = vadd.f32 %v4322_v41, %v1428_v8  ;;  %v4327_v24 = vpop.eup %3008 }
 0x32d   : > { %v4330_v42 = vpop.eup %3010  ;;  %v4335_v31 = vmul.f32 %v4327_v24, %v4073_v3  ;;  %v4339_v1 = vmul.f32 %v4327_v24, %v4082_v58  ;;  %v4345_v57 = vmul.f32 %v4327_v24, %v4087_v44  ;;  %v4349_v20 = vmul.f32 %v4327_v24, %v4093_v35 }
 0x32e   : > { %v1430_v16 = vadd.f32 %v4324_v37, %v1429_v29  ;;  %v4341_v28 = vpop.eup %3012  ;;  %v4356_v8 = vmul.f32 %v4327_v24, %v4109_v47  ;;  %v4360_v58 = vmul.f32 %v4327_v24, %v4122_v43  ;;  %v4366_v35 = vmul.f32 %v4327_v24, %v4134_v53 }
 0x32f   : > { %v4370_v29 = vmul.f32 %v4327_v24, %v4146_v30  ;;  %v4384_v53 = vmul.f32 %v4327_v24, %v4182_v55  ;;  %v4390_v44 = vmul.f32 %v4327_v24, %v4194_v51  ;;  %v4398_v43 = vmul.f32 %v4327_v24, %v4212_v22 }
 0x330   : > { %v1431_v34 = vadd.f32 %v4330_v42, %v1430_v16  ;;  %v4374_v16 = vmul.f32 %v4327_v24, %v4158_v12  ;;  %v4394_v12 = vmul.f32 %v4327_v24, %v4203_v62  ;;  %v4404_v3 = vmul.f32 %v4327_v24, %v4221_v0 }
 0x331   : > { %4983 = vst [vmem:[#allocation11_spill] sm:$0xff] %v4384_v53  ;;  %v4408_v51 = vmul.f32 %v4327_v24, %v4230_v48  ;;  %v4416_v22 = vmul.f32 %v4327_v24, %v4239_v11  ;;  %v2876_v11 = vld [vmem:[%s4761_s7] sm:$0xff]  }
 0x332   : > { %v1432_v60 = vadd.f32 %v4341_v28, %v1431_v34  ;;  %v4380_v34 = vmul.f32 %v4327_v24, %v4170_v49  ;;  %4984 = vst [vmem:[#allocation12_spill] sm:$0xff] %v4394_v12  ;;  %4985 = vst [vmem:[#allocation13_spill] sm:$0xff] %v4404_v3  ;;  %v4989_v12 = vld [vmem:[#allocation32_spill] sm:$0xff]  ;;  %v4990_v3 = vld [vmem:[#allocation35_spill] sm:$0xff]  ;;  %2796 = vmatprep.subr.bf16.mxu0 %v2876_v11 }
 0x333   : > { %4986 = vst [vmem:[#allocation14_spill] sm:$0xff] %v4408_v51  ;;  %4987 = vst [vmem:[#allocation15_spill] sm:$0xff] %v4416_v22  ;;  %v1443_v48 = vmul.f32 %v4327_v24, %v4990_v3  ;;  %2797 = vmatpush3.bf16.msra.mxu0 %v2876_v11  ;;  %v4991_v3 = vld [vmem:[#allocation3_spill] sm:$0xff]  ;;  %v4992_v51 = vld [vmem:[#allocation4_spill] sm:$0xff] }
 0x334   : > { %v1433_v47 = vrot.slane %v1432_v60, 4 }
 0x336   : > { %v1434_v49 = vadd.f32 %v1433_v47, %v1432_v60  ;;  %v4420_v60 = vmul.f32 %v4327_v24, %v4248_v19  ;;  %v2877_v19 = vld [vmem:[%s4761_s7 + $0x8] sm:$0xff]   ;;  %v1441_v47 = vmul.f32 %v4327_v24, %v4989_v12 }
 0x337   : > { %2798 = vmatprep.subr.bf16.mxu0 %v2877_v19 }
 0x338   : > { %4988 = vst [vmem:[#allocation16_spill] sm:$0xff] %v4420_v60  ;;  %v1435_v0 = vrot.slane %v1434_v49, 2  ;;  %v1771_v12 = vpack.c.bf16 %v1443_v48, %v1441_v47  ;;  %v1445_v60 = vmul.f32 %v4327_v24, %v4991_v3  ;;  %2799 = vmatpush3.bf16.msra.mxu0 %v2877_v19 }
 0x33a   : > { %v1436_v55 = vadd.f32 %v1435_v0, %v1434_v49 }
 0x33c   : > { %v1437_v62 = vrot.slane %v1436_v55, 1 }
 0x33e   : > { %v1438_v53 = vadd.f32 %v1437_v62, %v1436_v55 }
 0x340   : > { %3014 = vrcp.f32 %v1438_v53 }
 0x34a   : > { %v4432_v30 = vpop.eup %3014 }
 0x34b   : > { %v1442_v53 = vmul.f32 %v4432_v30, %v4098_v6  ;;  %v1444_v49 = vmul.f32 %v4432_v30, %v4104_v25  ;;  %v1446_v55 = vmul.f32 %v4432_v30, %v4117_v54  ;;  %v1448_v62 = vmul.f32 %v4432_v30, %v4129_v4  ;;  %v2878_v54 = vld [vmem:[%s4761_s7 + $0x10] sm:$0xff]  }
 0x34c   : > { %v1447_v6 = vmul.f32 %v4327_v24, %v4992_v51  ;;  %v4452_v25 = vmul.f32 %v4432_v30, %v4243_v61  ;;  %v1450_v4 = vmul.f32 %v4432_v30, %v4141_v7  ;;  %v4461_v47 = vmul.f32 %v4432_v30, %v4252_v2  ;;  %2800 = vmatprep.subr.bf16.mxu0 %v2878_v54 }
 0x34d   : > { %v1772_v0 = vpack.c.bf16 %v1444_v49, %v1442_v53  ;;  %v1774_v22 = vpack.c.bf16 %v1448_v62, %v1446_v55  ;;  %v4465_v48 = vmul.f32 %v4432_v30, %v4259_v40  ;;  %v4469_v61 = vmul.f32 %v4432_v30, %v4265_v5  ;;  %2801 = vmatpush3.bf16.msra.mxu0 %v2878_v54 }
 0x34e   : > { %v1452_v51 = vmul.f32 %v4432_v30, %v4153_v23  ;;  %v4475_v11 = vmul.f32 %v4432_v30, %v4271_v52  ;;  %v4479_v7 = vmul.f32 %v4432_v30, %v4277_v46  ;;  %v4483_v2 = vmul.f32 %v4432_v30, %v4283_v50 }
 0x34f   : > { %1851 = vmatprep.mubr.bf16.mxu1 %v1772_v0  ;;  %v1786_v5 = vpack.c.bf16 %v4461_v47, %v4452_v25  ;;  %v1788_v40 = vpack.c.bf16 %v4469_v61, %v4465_v48  ;;  %v4491_v23 = vmul.f32 %v4432_v30, %v4289_v45  ;;  %v4495_v52 = vmul.f32 %v4432_v30, %v4298_v10  ;;  %v2879_v10 = vld [vmem:[%s4761_s7 + $0x18] sm:$0xff]   ;;  %v5011_v47 = vld [vmem:[#allocation16_spill] sm:$0xff]  ;;  %v5012_v48 = vld [vmem:[#allocation15_spill] sm:$0xff] }
 0x350   : > { %1852 = vmatmul.mubr.bf16.vlgmr.msra.gmra.mrb[64].mxu1 %v1771_v12  ;;  %v1790_v46 = vpack.c.bf16 %v4479_v7, %v4475_v11  ;;  %v4501_v50 = vmul.f32 %v4432_v30, %v4301_v18  ;;  %v4509_v45 = vmul.f32 %v4432_v30, %v4313_v56  ;;  %v4518_v18 = vmul.f32 %v4432_v30, %v4316_v39 }
 0x351   : > { %1859 = vmatprep.mubr.bf16.mxu1 %v1774_v22  ;;  %v4505_v22 = vmul.f32 %v4432_v30, %v4307_v9  ;;  %v1792_v19 = vpack.c.bf16 %v4491_v23, %v4483_v2  ;;  %v4522_v9 = vmul.f32 %v4432_v30, %v4319_v63  ;;  %v4526_v56 = vmul.f32 %v4432_v30, %v4322_v41  ;;  %v4995_v23 = vld [vmem:[#allocation7_spill] sm:$0xff] }
 0x352   : > { %v1794_v53 = vpack.c.bf16 %v4501_v50, %v4495_v52  ;;  %v4534_v55 = vmul.f32 %v4432_v30, %v4324_v37  ;;  %v4538_v39 = vmul.f32 %v4432_v30, %v4330_v42  ;;  %v1773_v63 = vpack.c.bf16 %v1447_v6, %v1445_v60  ;;  %2802 = vmatprep.subr.bf16.mxu0 %v2879_v10  ;;  %v4993_v60 = vld [vmem:[#allocation5_spill] sm:$0xff] }
 0x353   : > { %v1796_v49 = vpack.c.bf16 %v4509_v45, %v4505_v22  ;;  %v1798_v62 = vpack.c.bf16 %v4522_v9, %v4518_v18  ;;  %v4544_v41 = vmul.f32 %v4432_v30, %v4341_v28  ;;  %v1776_v0 = vpack.c.bf16 %v1452_v51, %v1450_v4  ;;  %2803 = vmatpush3.bf16.msra.mxu0 %v2879_v10  ;;  %v4994_v51 = vld [vmem:[#allocation6_spill] sm:$0xff] }
 0x354   : > { %v1800_v12 = vpack.c.bf16 %v4534_v55, %v4526_v56  ;;  %v1449_v42 = vmul.f32 %v4327_v24, %v3970_v26  ;;  %v1451_v3 = vmul.f32 %v4327_v24, %v4993_v60  ;;  %v1454_v28 = vmul.f32 %v4432_v30, %v4165_v21 }
 0x355   : > { %v1802_v37 = vpack.c.bf16 %v4544_v41, %v4538_v39  ;;  %v1456_v6 = vmul.f32 %v4432_v30, %v4177_v14  ;;  %v1453_v2 = vmul.f32 %v4327_v24, %v4994_v51  ;;  %v1455_v26 = vmul.f32 %v4327_v24, %v4995_v23 }
 0x356   : > { %v1775_v54 = vpack.c.bf16 %v1451_v3, %v1449_v42  ;;  %v1458_v52 = vmul.f32 %v4432_v30, %v4189_v59  ;;  %v1460_v50 = vmul.f32 %v4432_v30, %v4198_v32  ;;  %v1457_v14 = vmul.f32 %v4327_v24, %v4011_v15 }
 0x357   : > { %v1778_v4 = vpack.c.bf16 %v1456_v6, %v1454_v28  ;;  %v1777_v21 = vpack.c.bf16 %v1455_v26, %v1453_v2  ;;  %v1459_v45 = vmul.f32 %v4327_v24, %v4024_v38  ;;  %v1462_v10 = vmul.f32 %v4432_v30, %v4207_v36  ;;  %v4996_v38 = vld [vmem:[#allocation10_spill] sm:$0xff]  ;;  %v4998_v6 = vld [vmem:[#allocation9_spill] sm:$0xff] }
 0x358   : > { %1860 = vmatmul.mubr.bf16.gmra.mrb[68].mxu1 %v1773_v63  ;;  %v1780_v22 = vpack.c.bf16 %v1460_v50, %v1458_v52  ;;  %v1464_v63 = vmul.f32 %v4432_v30, %v4216_v17  ;;  %v1461_v32 = vmul.f32 %v4327_v24, %v4035_v27  ;;  %v1463_v42 = vmul.f32 %v4327_v24, %v4046_v33  ;;  %v4997_v17 = vld [vmem:[#allocation8_spill] sm:$0xff] }
 0x359   : > { %1867 = vmatprep.mubr.bf16.mxu1 %v1776_v0  ;;  %v1779_v59 = vpack.c.bf16 %v1459_v45, %v1457_v14  ;;  %v1466_v15 = vmul.f32 %v4432_v30, %v4225_v13  ;;  %v1468_v60 = vmul.f32 %v4432_v30, %v4996_v38  ;;  %v1465_v28 = vmul.f32 %v4327_v24, %v4997_v17  ;;  %v5009_v30 = vld [vmem:[#allocation13_spill] sm:$0xff] }
 0x35a   : > { %v1782_v0 = vpack.c.bf16 %v1464_v63, %v1462_v10  ;;  %v1781_v36 = vpack.c.bf16 %v1463_v42, %v1461_v32  ;;  %v4999_v33 = vpack.c.bf16 %v4339_v1, %v4335_v31  ;;  %v5000_v13 = vpack.c.bf16 %v4349_v20, %v4345_v57  ;;  %v2880_v1 = vld [vmem:[%s4761_s7 + $0x20] sm:$0xff]   ;;  %v2881_v20 = vld [vmem:[%s4761_s7 + $0x28] sm:$0xff]  }
 0x35b   : > { %v1784_v3 = vpack.c.bf16 %v1468_v60, %v1466_v15  ;;  %v5002_v31 = vpack.c.bf16 %v4370_v29, %v4366_v35  ;;  %2804 = vmatprep.subr.bf16.mxu0 %v2880_v1  ;;  %v5003_v57 = vpack.c.bf16 %v4380_v34, %v4374_v16  ;;  %v2883_v29 = vld [vmem:[%s4761_s7 + $0x38] sm:$0xff]   ;;  %v5006_v16 = vld [vmem:[#allocation12_spill] sm:$0xff]  ;;  %v5013_v61 = vpack.c.bf16 %v5011_v47, %v5012_v48 }
 0x35c   : > { %2805 = vmatpush3.bf16.msra.mxu0 %v2880_v1  ;;  %v5007_v34 = vpack.c.bf16 %v4398_v43, %v5006_v16 }
 0x35d   : > { %2806 = vmatprep.subr.bf16.mxu0 %v2881_v20 }
 0x360   : > { %1868 = vmatmul.mubr.bf16.gmra.mrb[72].mxu1 %v1775_v54  ;;  %v1467_v54 = vmul.f32 %v4327_v24, %v4998_v6  ;;  %v5001_v24 = vpack.c.bf16 %v4360_v58, %v4356_v8  ;;  %v2882_v8 = vld [vmem:[%s4761_s7 + $0x30] sm:$0xff]   ;;  %2807 = vmatpush3.bf16.msra.mxu0 %v2881_v20  ;;  %v5004_v58 = vld [vmem:[#allocation11_spill] sm:$0xff] }
 0x361   : > { %1875 = vmatprep.mubr.bf16.mxu1 %v1778_v4  ;;  %2808 = vmatprep.subr.bf16.mxu0 %v2882_v8  ;;  %v5005_v35 = vpack.c.bf16 %v4390_v44, %v5004_v58  ;;  %v5008_v44 = vld [vmem:[#allocation14_spill] sm:$0xff] }
 0x362   : > { %v1783_v27 = vpack.c.bf16 %v1467_v54, %v1465_v28  ;;  %v5010_v25 = vpack.c.bf16 %v5008_v44, %v5009_v30 }
 0x364   : > { %2809 = vmatpush3.bf16.msra.mxu0 %v2882_v8 }
 0x365   : > { %2810 = vmatprep.subr.bf16.mxu0 %v2883_v29 }
 0x368   : > { %1876 = vmatmul.mubr.bf16.gmra.mrb[76].mxu1 %v1777_v21  ;;  %2811 = vmatpush3.bf16.msra.mxu0 %v2883_v29 }
 0x369   : > { %1883 = vmatprep.mubr.bf16.mxu1 %v1780_v22 }
 0x370   : > { %1884 = vmatmul.mubr.bf16.gmra.mrb[80].mxu1 %v1779_v59 }
 0x371   : > { %1891 = vmatprep.mubr.bf16.mxu1 %v1782_v0 }
 0x378   : > { %1892 = vmatmul.mubr.bf16.gmra.mrb[84].mxu1 %v1781_v36 }
 0x379   : > { %1899 = vmatprep.mubr.bf16.mxu1 %v1784_v3 }
 0x380   : > { %1900 = vmatmul.mubr.bf16.gmra.mrb[88].mxu1 %v1783_v27 }
 0x381   : > { %1907 = vmatprep.mubr.bf16.mxu1 %v1786_v5 }
 0x388   : > { %1908 = vmatmul.mubr.bf16.gmra.mrb[92].mxu1 %v4999_v33 }
 0x389   : > { %1915 = vmatprep.mubr.bf16.mxu1 %v1788_v40 }
 0x390   : > { %1916 = vmatmul.mubr.bf16.gmra.mrb[96].mxu1 %v5000_v13 }
 0x391   : > { %1923 = vmatprep.mubr.bf16.mxu1 %v1790_v46 }
 0x398   : > { %1924 = vmatmul.mubr.bf16.gmra.mrb[100].mxu1 %v5001_v24 }
 0x399   : > { %1931 = vmatprep.mubr.bf16.mxu1 %v1792_v19 }
 0x3a0   : > { %1932 = vmatmul.mubr.bf16.gmra.mrb[104].mxu1 %v5002_v31 }
 0x3a1   : > { %1939 = vmatprep.mubr.bf16.mxu1 %v1794_v53 }
 0x3a8   : > { %1940 = vmatmul.mubr.bf16.gmra.mrb[108].mxu1 %v5003_v57 }
 0x3a9   : > { %1947 = vmatprep.mubr.bf16.mxu1 %v1796_v49 }
 0x3b0   : > { %1948 = vmatmul.mubr.bf16.gmra.mrb[112].mxu1 %v5005_v35 }
 0x3b1   : > { %1955 = vmatprep.mubr.bf16.mxu1 %v1798_v62 }
 0x3b8   : > { %1956 = vmatmul.mubr.bf16.gmra.mrb[116].mxu1 %v5007_v34 }
 0x3b9   : > { %1963 = vmatprep.mubr.bf16.mxu1 %v1800_v12 }
 0x3c0   : > { %1964 = vmatmul.mubr.bf16.gmra.mrb[120].mxu1 %v5010_v25 }
 0x3c1   : > { %1971 = vmatprep.mubr.bf16.mxu1 %v1802_v37 }
 0x3c8   : > { %1972 = vmatmul.mubr.bf16.gmra.mrb[124].mxu1 %v5013_v61 }
 0x423   : > { %v2532_v11 = vpop.f32.mrb[64].mxu1 }
 0x424   : > { %v2533_v7 = vpop.f32.mrb[65].mxu1 }
 0x425   : > { %v2534_v43 = vadd.f32 %v2533_v7, %v2532_v11  ;;  %v2535_v5 = vpop.f32.mrb[66].mxu1 }
 0x426   : > { %v2536_v40 = vpop.f32.mrb[67].mxu1 }
 0x427   : > { %v2537_v46 = vadd.f32 %v2536_v40, %v2535_v5 }
 0x429   : > { %v1980_v19 = vpack.c.bf16 %v2537_v46, %v2534_v43 }
 0x42b   : > { %v2538_v18 = vpop.f32.mrb[68].mxu1  ;;  %2812 = vmatprep.mubr.bf16.mxu0 %v1980_v19 }
 0x42c   : > { %v2539_v9 = vpop.f32.mrb[69].mxu1 }
 0x42d   : > { %v2540_v56 = vadd.f32 %v2539_v9, %v2538_v18  ;;  %v2541_v53 = vpop.f32.mrb[70].mxu1 }
 0x42e   : > { %v2542_v49 = vpop.f32.mrb[71].mxu1 }
 0x42f   : > { %v2543_v55 = vadd.f32 %v2542_v49, %v2541_v53 }
 0x431   : > { %v1981_v39 = vpack.c.bf16 %v2543_v55, %v2540_v56 }
 0x433   : > { %v2544_v62 = vpop.f32.mrb[72].mxu1  ;;  %2813 = vmatmul.mubr.bf16.vlgmr.msra.gmra.mrb[96].mxu0 %v1981_v39 }
 0x434   : > { %v2545_v41 = vpop.f32.mrb[73].mxu1 }
 0x435   : > { %v2546_v12 = vadd.f32 %v2545_v41, %v2544_v62  ;;  %v2547_v37 = vpop.f32.mrb[74].mxu1 }
 0x436   : > { %v2548_v4 = vpop.f32.mrb[75].mxu1 }
 0x437   : > { %v2549_v51 = vadd.f32 %v2548_v4, %v2547_v37 }
 0x439   : > { %v1982_v2 = vpack.c.bf16 %v2549_v51, %v2546_v12 }
 0x43b   : > { %v2550_v23 = vpop.f32.mrb[76].mxu1  ;;  %2816 = vmatprep.mubr.bf16.mxu0 %v1982_v2 }
 0x43c   : > { %v2551_v26 = vpop.f32.mrb[77].mxu1 }
 0x43d   : > { %v2552_v52 = vadd.f32 %v2551_v26, %v2550_v23  ;;  %v2553_v50 = vpop.f32.mrb[78].mxu1 }
 0x43e   : > { %v2554_v21 = vpop.f32.mrb[79].mxu1 }
 0x43f   : > { %v2555_v22 = vadd.f32 %v2554_v21, %v2553_v50 }
 0x441   : > { %v1983_v14 = vpack.c.bf16 %v2555_v22, %v2552_v52 }
 0x443   : > { %v2556_v45 = vpop.f32.mrb[80].mxu1  ;;  %2817 = vmatmul.mubr.bf16.gmra.mrb[100].mxu0 %v1983_v14 }
 0x444   : > { %v2557_v10 = vpop.f32.mrb[81].mxu1 }
 0x445   : > { %v2558_v63 = vadd.f32 %v2557_v10, %v2556_v45  ;;  %v2559_v59 = vpop.f32.mrb[82].mxu1 }
 0x446   : > { %v2560_v0 = vpop.f32.mrb[83].mxu1 }
 0x447   : > { %v2561_v32 = vadd.f32 %v2560_v0, %v2559_v59 }
 0x449   : > { %v1984_v42 = vpack.c.bf16 %v2561_v32, %v2558_v63 }
 0x44b   : > { %v2562_v15 = vpop.f32.mrb[84].mxu1  ;;  %2820 = vmatprep.mubr.bf16.mxu0 %v1984_v42 }
 0x44c   : > { %v2563_v38 = vpop.f32.mrb[85].mxu1 }
 0x44d   : > { %v2564_v60 = vadd.f32 %v2563_v38, %v2562_v15  ;;  %v2565_v36 = vpop.f32.mrb[86].mxu1 }
 0x44e   : > { %v2566_v3 = vpop.f32.mrb[87].mxu1 }
 0x44f   : > { %v2567_v17 = vadd.f32 %v2566_v3, %v2565_v36 }
 0x451   : > { %v1985_v28 = vpack.c.bf16 %v2567_v17, %v2564_v60 }
 0x453   : > { %v2568_v6 = vpop.f32.mrb[88].mxu1  ;;  %2821 = vmatmul.mubr.bf16.gmra.mrb[104].mxu0 %v1985_v28 }
 0x454   : > { %v2569_v54 = vpop.f32.mrb[89].mxu1 }
 0x455   : > { %v2570_v27 = vadd.f32 %v2569_v54, %v2568_v6  ;;  %v2571_v33 = vpop.f32.mrb[90].mxu1 }
 0x456   : > { %v2572_v13 = vpop.f32.mrb[91].mxu1 }
 0x457   : > { %v2573_v24 = vadd.f32 %v2572_v13, %v2571_v33 }
 0x459   : > { %v1986_v31 = vpack.c.bf16 %v2573_v24, %v2570_v27 }
 0x45b   : > { %v2574_v1 = vpop.f32.mrb[92].mxu1  ;;  %2824 = vmatprep.mubr.bf16.mxu0 %v1986_v31  ;;  %v4646_v31 = vld [vmem:[%s4762_s8] ss:$0 sm:$0xff] }
 0x45c   : > { %v2575_v57 = vpop.f32.mrb[93].mxu1 }
 0x45d   : > { %v2576_v20 = vadd.f32 %v2575_v57, %v2574_v1  ;;  %v2577_v8 = vpop.f32.mrb[94].mxu1 }
 0x45e   : > { %v2578_v58 = vpop.f32.mrb[95].mxu1 }
 0x45f   : > { %v2579_v35 = vadd.f32 %v2578_v58, %v2577_v8 }
 0x461   : > { %v1987_v29 = vpack.c.bf16 %v2579_v35, %v2576_v20  ;;  %v3016_v35 = vld [vmem:[%s3139_s25 + $0x10] sm:$0xff] }
 0x463   : > { %v2580_v16 = vpop.f32.mrb[96].mxu1  ;;  %2825 = vmatmul.mubr.bf16.gmra.mrb[108].mxu0 %v1987_v29 }
 0x464   : > { %v2581_v34 = vpop.f32.mrb[97].mxu1 }
 0x465   : > { %v2582_v44 = vadd.f32 %v2581_v34, %v2580_v16  ;;  %v2583_v30 = vpop.f32.mrb[98].mxu1 }
 0x466   : > { %v2584_v25 = vpop.f32.mrb[99].mxu1 }
 0x467   : > { %v2585_v47 = vadd.f32 %v2584_v25, %v2583_v30 }
 0x469   : > { %v1988_v48 = vpack.c.bf16 %v2585_v47, %v2582_v44  ;;  %v3017_v44 = vld [vmem:[%s3139_s25] sm:$0xff]  ;;  %v3018_v47 = vld [vmem:[%s3139_s25 + $0x18] sm:$0xff] }
 0x46b   : > { %v2586_v61 = vpop.f32.mrb[100].mxu1  ;;  %2828 = vmatprep.mubr.bf16.mxu0 %v1988_v48 }
 0x46c   : > { %v2587_v11 = vpop.f32.mrb[101].mxu1 }
 0x46d   : > { %v2588_v7 = vadd.f32 %v2587_v11, %v2586_v61  ;;  %v2589_v43 = vpop.f32.mrb[102].mxu1  ;;  %v3019_v61 = vld [vmem:[%s3139_s25 + $0x8] sm:$0xff] }
 0x46e   : > { %v2590_v5 = vpop.f32.mrb[103].mxu1 }
 0x46f   : > { %v2591_v40 = vadd.f32 %v2590_v5, %v2589_v43 }
 0x471   : > { %v1989_v46 = vpack.c.bf16 %v2591_v40, %v2588_v7 }
 0x473   : > { %v2592_v19 = vpop.f32.mrb[104].mxu1  ;;  %2829 = vmatmul.mubr.bf16.gmra.mrb[112].mxu0 %v1989_v46 }
 0x474   : > { %v2593_v18 = vpop.f32.mrb[105].mxu1 }
 0x475   : > { %v2594_v9 = vadd.f32 %v2593_v18, %v2592_v19  ;;  %v2595_v56 = vpop.f32.mrb[106].mxu1  ;;  %v3020_v19 = vld [vmem:[%s3139_s25 + $0x30] sm:$0xff] }
 0x476   : > { %v2596_v53 = vpop.f32.mrb[107].mxu1 }
 0x477   : > { %v2597_v49 = vadd.f32 %v2596_v53, %v2595_v56  ;;  %v3021_v53 = vld [vmem:[%s3139_s25 + $0x20] sm:$0xff] }
 0x479   : > { %v1990_v55 = vpack.c.bf16 %v2597_v49, %v2594_v9 }
 0x47b   : > { %v2598_v39 = vpop.f32.mrb[108].mxu1  ;;  %2832 = vmatprep.mubr.bf16.mxu0 %v1990_v55 }
 0x47c   : > { %v2599_v62 = vpop.f32.mrb[109].mxu1 }
 0x47d   : > { %v2600_v41 = vadd.f32 %v2599_v62, %v2598_v39  ;;  %v2601_v12 = vpop.f32.mrb[110].mxu1  ;;  %v3022_v39 = vld [vmem:[%s3139_s25 + $0x38] sm:$0xff] }
 0x47e   : > { %v2602_v37 = vpop.f32.mrb[111].mxu1 }
 0x47f   : > { %v2603_v4 = vadd.f32 %v2602_v37, %v2601_v12 }
 0x481   : > { %v1991_v51 = vpack.c.bf16 %v2603_v4, %v2600_v41  ;;  %v3023_v41 = vld [vmem:[%s3139_s25 + $0x28] sm:$0xff] }
 0x483   : > { %v2604_v2 = vpop.f32.mrb[112].mxu1  ;;  %2833 = vmatmul.mubr.bf16.gmra.mrb[116].mxu0 %v1991_v51 }
 0x484   : > { %v2605_v23 = vpop.f32.mrb[113].mxu1 }
 0x485   : > { %v2606_v26 = vadd.f32 %v2605_v23, %v2604_v2  ;;  %v2607_v52 = vpop.f32.mrb[114].mxu1 }
 0x486   : > { %v2608_v50 = vpop.f32.mrb[115].mxu1 }
 0x487   : > { %v2609_v21 = vadd.f32 %v2608_v50, %v2607_v52 }
 0x489   : > { %v1992_v22 = vpack.c.bf16 %v2609_v21, %v2606_v26  ;;  %v3024_v26 = vld [vmem:[%s3139_s25 + $0x50] sm:$0xff] }
 0x48b   : > { %v2610_v14 = vpop.f32.mrb[116].mxu1  ;;  %2836 = vmatprep.mubr.bf16.mxu0 %v1992_v22  ;;  %v3025_v22 = vld [vmem:[%s3139_s25 + $0x40] sm:$0xff] }
 0x48c   : > { %v2611_v45 = vpop.f32.mrb[117].mxu1 }
 0x48d   : > { %v2612_v10 = vadd.f32 %v2611_v45, %v2610_v14  ;;  %v2613_v63 = vpop.f32.mrb[118].mxu1 }
 0x48e   : > { %v2614_v59 = vpop.f32.mrb[119].mxu1 }
 0x48f   : > { %v2615_v0 = vadd.f32 %v2614_v59, %v2613_v63  ;;  %v3027_v59 = vld [vmem:[%s3139_s25 + $0x48] sm:$0xff] }
 0x491   : > { %v1993_v32 = vpack.c.bf16 %v2615_v0, %v2612_v10  ;;  %v3026_v10 = vld [vmem:[%s3139_s25 + $0x58] sm:$0xff] }
 0x493   : > { %v2616_v42 = vpop.f32.mrb[120].mxu1  ;;  %2837 = vmatmul.mubr.bf16.gmra.mrb[120].mxu0 %v1993_v32 }
 0x494   : > { %v2617_v15 = vpop.f32.mrb[121].mxu1 }
 0x495   : > { %v2618_v38 = vadd.f32 %v2617_v15, %v2616_v42  ;;  %v2619_v60 = vpop.f32.mrb[122].mxu1 }
 0x496   : > { %v2620_v36 = vpop.f32.mrb[123].mxu1 }
 0x497   : > { %v2621_v3 = vadd.f32 %v2620_v36, %v2619_v60  ;;  %v3028_v36 = vld [vmem:[%s3139_s25 + $0x70] sm:$0xff] }
 0x499   : > { %v1994_v17 = vpack.c.bf16 %v2621_v3, %v2618_v38 }
 0x49b   : > { %v2622_v28 = vpop.f32.mrb[124].mxu1  ;;  %2840 = vmatprep.mubr.bf16.mxu0 %v1994_v17 }
 0x49c   : > { %v2623_v6 = vpop.f32.mrb[125].mxu1 }
 0x49d   : > { %v2624_v54 = vadd.f32 %v2623_v6, %v2622_v28  ;;  %v2625_v27 = vpop.f32.mrb[126].mxu1  ;;  %v3029_v6 = vld [vmem:[%s3139_s25 + $0x60] sm:$0xff] }
 0x49e   : > { %v2626_v33 = vpop.f32.mrb[127].mxu1 }
 0x49f   : > { %v2627_v13 = vadd.f32 %v2626_v33, %v2625_v27  ;;  %v3030_v33 = vld [vmem:[%s3139_s25 + $0x78] sm:$0xff] }
 0x4a1   : > { %v1995_v24 = vpack.c.bf16 %v2627_v13, %v2624_v54 }
 0x4a3   : > { %2841 = vmatmul.mubr.bf16.gmra.mrb[124].mxu0 %v1995_v24  ;;  %v3031_v24 = vld [vmem:[%s3139_s25 + $0x68] sm:$0xff] }
 0x506   : > { %v2814_v1 = vpop.f32.mrb[96].mxu0 }
 0x507   : > { %v2110_v57 = vadd.f32 %v2814_v1, %v4646_v31  ;;  %v2101_v20 = vpop.f32.mrb[97].mxu0 }
 0x508   : > { %v2102_v8 = vadd.f32 %v4646_v31, %v2101_v20  ;;  %v2815_v58 = vpop.f32.mrb[98].mxu0 }
 0x509   : > { %v2230_v29 = vadd.f32 %v3016_v35, %v2110_v57  ;;  %v2113_v16 = vadd.f32 %v2815_v58, %v4646_v31  ;;  %v2104_v34 = vpop.f32.mrb[99].mxu0 }
 0x50a   : > { %v2228_v30 = vadd.f32 %v3017_v44, %v2102_v8  ;;  %v2105_v25 = vadd.f32 %v4646_v31, %v2104_v34 }
 0x50b   : > { %2262 = vst [vmem:[%s4654_s27 + $0x10] sm:$0xff] %v2230_v29  ;;  %v2231_v48 = vadd.f32 %v3018_v47, %v2113_v16  ;;  %v3032_v29 = vld [vmem:[%s3139_s25 + $0x90] sm:$0xff] }
 0x50c   : > { %2260 = vst [vmem:[%s4654_s27] sm:$0xff] %v2228_v30  ;;  %v2229_v11 = vadd.f32 %v3019_v61, %v2105_v25  ;;  %v3033_v30 = vld [vmem:[%s3139_s25 + $0x80] sm:$0xff] }
 0x50d   : > { %2263 = vst [vmem:[%s4654_s27 + $0x18] sm:$0xff] %v2231_v48  ;;  %v3034_v48 = vld [vmem:[%s3139_s25 + $0x98] sm:$0xff] }
 0x50e   : > { %2261 = vst [vmem:[%s4654_s27 + $0x8] sm:$0xff] %v2229_v11  ;;  %v3035_v11 = vld [vmem:[%s3139_s25 + $0x88] sm:$0xff] }
 0x516   : > { %v2818_v7 = vpop.f32.mrb[100].mxu0 }
 0x517   : > { %v2126_v43 = vadd.f32 %v2818_v7, %v4646_v31  ;;  %v2117_v5 = vpop.f32.mrb[101].mxu0 }
 0x518   : > { %v2118_v40 = vadd.f32 %v4646_v31, %v2117_v5  ;;  %v2819_v46 = vpop.f32.mrb[102].mxu0 }
 0x519   : > { %v2234_v18 = vadd.f32 %v3020_v19, %v2126_v43  ;;  %v2129_v9 = vadd.f32 %v2819_v46, %v4646_v31  ;;  %v2120_v56 = vpop.f32.mrb[103].mxu0 }
 0x51a   : > { %v2232_v49 = vadd.f32 %v3021_v53, %v2118_v40  ;;  %v2121_v55 = vadd.f32 %v4646_v31, %v2120_v56 }
 0x51b   : > { %2266 = vst [vmem:[%s4654_s27 + $0x30] sm:$0xff] %v2234_v18  ;;  %v2235_v62 = vadd.f32 %v3022_v39, %v2129_v9  ;;  %v3036_v18 = vld [vmem:[%s3139_s25 + $0xb0] sm:$0xff] }
 0x51c   : > { %2264 = vst [vmem:[%s4654_s27 + $0x20] sm:$0xff] %v2232_v49  ;;  %v2233_v12 = vadd.f32 %v3023_v41, %v2121_v55  ;;  %v3037_v49 = vld [vmem:[%s3139_s25 + $0xa0] sm:$0xff] }
 0x51d   : > { %2267 = vst [vmem:[%s4654_s27 + $0x38] sm:$0xff] %v2235_v62  ;;  %v3038_v62 = vld [vmem:[%s3139_s25 + $0xb8] sm:$0xff] }
 0x51e   : > { %2265 = vst [vmem:[%s4654_s27 + $0x28] sm:$0xff] %v2233_v12  ;;  %v3039_v12 = vld [vmem:[%s3139_s25 + $0xa8] sm:$0xff] }
 0x526   : > { %v2822_v37 = vpop.f32.mrb[104].mxu0 }
 0x527   : > { %v2142_v4 = vadd.f32 %v2822_v37, %v4646_v31  ;;  %v2133_v51 = vpop.f32.mrb[105].mxu0 }
 0x528   : > { %v2134_v2 = vadd.f32 %v4646_v31, %v2133_v51  ;;  %v2823_v23 = vpop.f32.mrb[106].mxu0 }
 0x529   : > { %v2238_v52 = vadd.f32 %v3024_v26, %v2142_v4  ;;  %v2145_v50 = vadd.f32 %v2823_v23, %v4646_v31  ;;  %v2136_v21 = vpop.f32.mrb[107].mxu0 }
 0x52a   : > { %v2236_v14 = vadd.f32 %v3025_v22, %v2134_v2  ;;  %v2137_v45 = vadd.f32 %v4646_v31, %v2136_v21 }
 0x52b   : > { %2270 = vst [vmem:[%s4654_s27 + $0x50] sm:$0xff] %v2238_v52  ;;  %v2239_v63 = vadd.f32 %v3026_v10, %v2145_v50  ;;  %v3040_v52 = vld [vmem:[%s3139_s25 + $0xd0] sm:$0xff] }
 0x52c   : > { %2268 = vst [vmem:[%s4654_s27 + $0x40] sm:$0xff] %v2236_v14  ;;  %v2237_v0 = vadd.f32 %v3027_v59, %v2137_v45  ;;  %v3041_v14 = vld [vmem:[%s3139_s25 + $0xc0] sm:$0xff] }
 0x52d   : > { %2271 = vst [vmem:[%s4654_s27 + $0x58] sm:$0xff] %v2239_v63  ;;  %v3042_v63 = vld [vmem:[%s3139_s25 + $0xd8] sm:$0xff] }
 0x52e   : > { %2269 = vst [vmem:[%s4654_s27 + $0x48] sm:$0xff] %v2237_v0  ;;  %v3043_v0 = vld [vmem:[%s3139_s25 + $0xc8] sm:$0xff] }
 0x536   : > { %v2826_v32 = vpop.f32.mrb[108].mxu0 }
 0x537   : > { %v2158_v42 = vadd.f32 %v2826_v32, %v4646_v31  ;;  %v2149_v15 = vpop.f32.mrb[109].mxu0 }
 0x538   : > { %v2150_v38 = vadd.f32 %v4646_v31, %v2149_v15  ;;  %v2827_v60 = vpop.f32.mrb[110].mxu0 }
 0x539   : > { %v2242_v3 = vadd.f32 %v3028_v36, %v2158_v42  ;;  %v2161_v17 = vadd.f32 %v2827_v60, %v4646_v31  ;;  %v2152_v28 = vpop.f32.mrb[111].mxu0 }
 0x53a   : > { %v2240_v54 = vadd.f32 %v3029_v6, %v2150_v38  ;;  %v2153_v27 = vadd.f32 %v4646_v31, %v2152_v28 }
 0x53b   : > { %2274 = vst [vmem:[%s4654_s27 + $0x70] sm:$0xff] %v2242_v3  ;;  %v2243_v13 = vadd.f32 %v3030_v33, %v2161_v17  ;;  %v3044_v3 = vld [vmem:[%s3139_s25 + $0xf0] sm:$0xff] }
 0x53c   : > { %2272 = vst [vmem:[%s4654_s27 + $0x60] sm:$0xff] %v2240_v54  ;;  %v2241_v1 = vadd.f32 %v3031_v24, %v2153_v27  ;;  %v3045_v54 = vld [vmem:[%s3139_s25 + $0xe0] sm:$0xff] }
 0x53d   : > { %2275 = vst [vmem:[%s4654_s27 + $0x78] sm:$0xff] %v2243_v13  ;;  %v3046_v13 = vld [vmem:[%s3139_s25 + $0xf8] sm:$0xff] }
 0x53e   : > { %2273 = vst [vmem:[%s4654_s27 + $0x68] sm:$0xff] %v2241_v1  ;;  %v3047_v1 = vld [vmem:[%s3139_s25 + $0xe8] sm:$0xff] }
 0x546   : > { %v2830_v57 = vpop.f32.mrb[112].mxu0 }
 0x547   : > { %v2174_v20 = vadd.f32 %v2830_v57, %v4646_v31  ;;  %v2165_v8 = vpop.f32.mrb[113].mxu0 }
 0x548   : > { %v2166_v58 = vadd.f32 %v4646_v31, %v2165_v8  ;;  %v2831_v35 = vpop.f32.mrb[114].mxu0 }
 0x549   : > { %v2246_v16 = vadd.f32 %v3032_v29, %v2174_v20  ;;  %v2177_v34 = vadd.f32 %v2831_v35, %v4646_v31  ;;  %v2168_v44 = vpop.f32.mrb[115].mxu0 }
 0x54a   : > { %v2244_v25 = vadd.f32 %v3033_v30, %v2166_v58  ;;  %v2169_v47 = vadd.f32 %v4646_v31, %v2168_v44 }
 0x54b   : > { %2278 = vst [vmem:[%s4654_s27 + $0x90] sm:$0xff] %v2246_v16  ;;  %v2247_v61 = vadd.f32 %v3034_v48, %v2177_v34 }
 0x54c   : > { %2276 = vst [vmem:[%s4654_s27 + $0x80] sm:$0xff] %v2244_v25  ;;  %v2245_v7 = vadd.f32 %v3035_v11, %v2169_v47 }
 0x54d   : > { %2279 = vst [vmem:[%s4654_s27 + $0x98] sm:$0xff] %v2247_v61 }
 0x54e   : > { %2277 = vst [vmem:[%s4654_s27 + $0x88] sm:$0xff] %v2245_v7 }
 0x556   : > { %v2834_v43 = vpop.f32.mrb[116].mxu0 }
 0x557   : > { %v2190_v5 = vadd.f32 %v2834_v43, %v4646_v31  ;;  %v2181_v40 = vpop.f32.mrb[117].mxu0 }
 0x558   : > { %v2182_v46 = vadd.f32 %v4646_v31, %v2181_v40  ;;  %v2835_v19 = vpop.f32.mrb[118].mxu0 }
 0x559   : > { %v2250_v9 = vadd.f32 %v3036_v18, %v2190_v5  ;;  %v2193_v56 = vadd.f32 %v2835_v19, %v4646_v31  ;;  %v2184_v53 = vpop.f32.mrb[119].mxu0 }
 0x55a   : > { %v2248_v55 = vadd.f32 %v3037_v49, %v2182_v46  ;;  %v2185_v39 = vadd.f32 %v4646_v31, %v2184_v53 }
 0x55b   : > { %2282 = vst [vmem:[%s4654_s27 + $0xb0] sm:$0xff] %v2250_v9  ;;  %v2251_v41 = vadd.f32 %v3038_v62, %v2193_v56 }
 0x55c   : > { %2280 = vst [vmem:[%s4654_s27 + $0xa0] sm:$0xff] %v2248_v55  ;;  %v2249_v37 = vadd.f32 %v3039_v12, %v2185_v39 }
 0x55d   : > { %2283 = vst [vmem:[%s4654_s27 + $0xb8] sm:$0xff] %v2251_v41 }
 0x55e   : > { %2281 = vst [vmem:[%s4654_s27 + $0xa8] sm:$0xff] %v2249_v37 }
 0x566   : > { %v2838_v4 = vpop.f32.mrb[120].mxu0 }
 0x567   : > { %v2206_v51 = vadd.f32 %v2838_v4, %v4646_v31  ;;  %v2197_v2 = vpop.f32.mrb[121].mxu0 }
 0x568   : > { %v2198_v23 = vadd.f32 %v4646_v31, %v2197_v2  ;;  %v2839_v26 = vpop.f32.mrb[122].mxu0 }
 0x569   : > { %v2254_v50 = vadd.f32 %v3040_v52, %v2206_v51  ;;  %v2209_v21 = vadd.f32 %v2839_v26, %v4646_v31  ;;  %v2200_v22 = vpop.f32.mrb[123].mxu0 }
 0x56a   : > { %v2252_v45 = vadd.f32 %v3041_v14, %v2198_v23  ;;  %v2201_v10 = vadd.f32 %v4646_v31, %v2200_v22 }
 0x56b   : > { %2286 = vst [vmem:[%s4654_s27 + $0xd0] sm:$0xff] %v2254_v50  ;;  %v2255_v59 = vadd.f32 %v3042_v63, %v2209_v21 }
 0x56c   : > { %2284 = vst [vmem:[%s4654_s27 + $0xc0] sm:$0xff] %v2252_v45  ;;  %v2253_v32 = vadd.f32 %v3043_v0, %v2201_v10 }
 0x56d   : > { %2287 = vst [vmem:[%s4654_s27 + $0xd8] sm:$0xff] %v2255_v59 }
 0x56e   : > { %2285 = vst [vmem:[%s4654_s27 + $0xc8] sm:$0xff] %v2253_v32 }
 0x576   : > { %v2842_v42 = vpop.f32.mrb[124].mxu0 }
 0x577   : > { %v2222_v15 = vadd.f32 %v2842_v42, %v4646_v31  ;;  %v2213_v38 = vpop.f32.mrb[125].mxu0 }
 0x578   : > { %v2214_v60 = vadd.f32 %v4646_v31, %v2213_v38  ;;  %v2843_v36 = vpop.f32.mrb[126].mxu0 }
 0x579   : > { %v2258_v17 = vadd.f32 %v3044_v3, %v2222_v15  ;;  %v2225_v28 = vadd.f32 %v2843_v36, %v4646_v31  ;;  %v2216_v6 = vpop.f32.mrb[127].mxu0 }
 0x57a   : > { %v2256_v27 = vadd.f32 %v3045_v54, %v2214_v60  ;;  %v2217_v33 = vadd.f32 %v4646_v31, %v2216_v6 }
 0x57b   : > { %2290 = vst [vmem:[%s4654_s27 + $0xf0] sm:$0xff] %v2258_v17  ;;  %v2259_v24 = vadd.f32 %v3046_v13, %v2225_v28 }
 0x57c   : > { %2288 = vst [vmem:[%s4654_s27 + $0xe0] sm:$0xff] %v2256_v27  ;;  %v2257_v57 = vadd.f32 %v3047_v1, %v2217_v33 }
 0x57d   : > { %2291 = vst [vmem:[%s4654_s27 + $0xf8] sm:$0xff] %v2259_v24 }
 0x57e   : > { %2289 = vst [vmem:[%s4654_s27 + $0xe8] sm:$0xff] %v2257_v57 }
 0x57f PF: > { %s21_s15 = sadd.s32 1, %s3054_s15  }
 0x580   : > { %p18_p4 = scmp.ge.s32.totalorder %s21_s15, 4  }
 0x582   :  { %20 = sbr.rel (!%p18_p4) target bundleno = 2 (0x2), region = 90 }

// kernel: resnet_generator_forward.42
= control target key start
LH: loop header
LB: loop body
LE: loop exit
PB: predicated region body
PF: predicated region fallthrough
CT: control target
= control target key end

     0   :  { %s4430_s12 = smov 0   ;;  %s5115_s0 = inlined_call_operand.vmem [shape: f32[2,18,18,128], index: 0, kind: input, shape index: {}]   ;;  %s5116_s1 = inlined_call_operand.vmem [shape: bf16[9,128,128], index: 1, kind: input, shape index: {}]   ;;  %s5117_s2 = inlined_call_operand.vmem [shape: f32[1,128], index: 2, kind: input, shape index: {}]   ;;  %s5118_s3 = inlined_call_operand.vmem [shape: f32[2,256,128], index: 3, kind: output, shape index: {}]  }
   0x1 LB: > { %s2989_s13 = sadd.s32 4294967295, %s4408_s12   ;;  %p2993_p0 = scmp.ge.s32.totalorder %s4408_s12, 1  ;;  %s4408_s12 = sphi %s4430_s12, %s13_s12  }
   0x2   : > { %p137_p1 = scmp.lt.s32.totalorder %s4408_s12, 3 }
   0x4   : > { %p138_p2 = pnand %p2993_p0, %p137_p1 }
   0x5   : > { %v4322_v0 = vld [vmem:[%s5116_s1 + $0x40] sm:$0xff] (!%p138_p2)   ;;  %p161_p3 = scmp.lt.s32.totalorder (!%p138_p2), %s2989_s13, 1  ;;  %v4324_v2 = vld [vmem:[%s5116_s1 + $0x48] sm:$0xff] (!%p138_p2)   ;;  %v4326_v4 = vld [vmem:[%s5116_s1 + $0x50] sm:$0xff] (!%p138_p2)  }
   0x6   : > { %141 = sbr.rel (%p138_p2) target bundleno = 539 (0x21b), region = 32  ;;  %v4323_v1 = vld [vmem:[%s5116_s1 + $0x100] sm:$0xff] (!%p138_p2)   ;;  %3609 = vmatprep.subr.bf16.mxu1 (!%p138_p2), %v4322_v0  ;;  %v4325_v3 = vld [vmem:[%s5116_s1 + $0x108] sm:$0xff] (!%p138_p2)   ;;  %v4327_v5 = vld [vmem:[%s5116_s1 + $0x110] sm:$0xff] (!%p138_p2)  }
   0x7   : > { %3801 = vmatprep.subr.bf16.mxu0 (!%p138_p2), %v4323_v1  ;;  %3610 = vmatpush3.bf16.msra.mxu1 (!%p138_p2), %v4322_v0  ;;  %v4328_v6 = vld [vmem:[%s5116_s1 + $0x58] sm:$0xff] (!%p138_p2)   ;;  %v4330_v8 = vld [vmem:[%s5116_s1 + $0x60] sm:$0xff] (!%p138_p2)   ;;  %v4332_v10 = vld [vmem:[%s5116_s1 + $0x68] sm:$0xff] (!%p138_p2)  }
   0x8   : > { %3802 = vmatpush3.bf16.msra.mxu0 (!%p138_p2), %v4323_v1  ;;  %3611 = vmatprep.subr.bf16.mxu1 (!%p138_p2), %v4324_v2  ;;  %v4329_v7 = vld [vmem:[%s5116_s1 + $0x118] sm:$0xff] (!%p138_p2)   ;;  %v4331_v9 = vld [vmem:[%s5116_s1 + $0x120] sm:$0xff] (!%p138_p2)   ;;  %v4333_v11 = vld [vmem:[%s5116_s1 + $0x128] sm:$0xff] (!%p138_p2)  }
   0x9   : > { %3803 = vmatprep.subr.bf16.mxu0 (!%p138_p2), %v4325_v3  ;;  %v4334_v18 = vld [vmem:[%s5116_s1 + $0x70] sm:$0xff] (!%p138_p2)   ;;  %v4336_v20 = vld [vmem:[%s5116_s1 + $0x78] sm:$0xff] (!%p138_p2)   ;;  %v4338_v22 = vld [vmem:[%s5116_s1] sm:$0xff] (!%p138_p2)  }
   0xa   : > { %v4335_v19 = vld [vmem:[%s5116_s1 + $0x130] sm:$0xff] (!%p138_p2)   ;;  %v4337_v21 = vld [vmem:[%s5116_s1 + $0x138] sm:$0xff] (!%p138_p2)   ;;  %v4339_v25 = vld [vmem:[%s5116_s1 + $0x140] sm:$0xff] (!%p138_p2)  }
   0xb   : > { %3612 = vmatpush3.bf16.msra.mxu1 (!%p138_p2), %v4324_v2  ;;  %v4340_v29 = vld [vmem:[%s5116_s1 + $0x148] sm:$0xff] (!%p138_p2)   ;;  %v4342_v34 = vld [vmem:[%s5116_s1 + $0x150] sm:$0xff] (!%p138_p2)   ;;  %v4343_v40 = vld [vmem:[%s5116_s1 + $0x158] sm:$0xff] (!%p138_p2)  }
   0xc   : > { %3804 = vmatpush3.bf16.msra.mxu0 (!%p138_p2), %v4325_v3  ;;  %3613 = vmatprep.subr.bf16.mxu1 (!%p138_p2), %v4326_v4  ;;  %v4341_v31 = vld [vmem:[%s5116_s1 + $0x8] sm:$0xff] (!%p138_p2)   ;;  %v4344_v36 = vld [vmem:[%s5116_s1 + $0x10] sm:$0xff] (!%p138_p2)   ;;  %v4347_v41 = vld [vmem:[%s5116_s1 + $0x18] sm:$0xff] (!%p138_p2)  }
   0xd   : > { %s5120_s13 = smov (!%p161_p3, %s2989_s13), 1  ;;  %3805 = vmatprep.subr.bf16.mxu0 %v4327_v5  ;;  %v4345_v44 = vld [vmem:[%s5116_s1 + $0x160] sm:$0xff]   ;;  %v4346_v50 = vld [vmem:[%s5116_s1 + $0x168] sm:$0xff]   ;;  %v4348_v54 = vld [vmem:[%s5116_s1 + $0x170] sm:$0xff]  }
   0xe   : > { %s4313_s30 = smul.u32 432, %s5120_s13  ;;  %v4350_v47 = vld [vmem:[%s5116_s1 + $0x20] sm:$0xff]   ;;  %v4352_v51 = vld [vmem:[%s5116_s1 + $0x28] sm:$0xff]   ;;  %v4354_v57 = vld [vmem:[%s5116_s1 + $0x30] sm:$0xff]  }
   0xf   : > { %3614 = vmatpush3.bf16.msra.mxu1 %v4326_v4  ;;  %v4349_v60 = vld [vmem:[%s5116_s1 + $0x178] sm:$0xff]   ;;  %v4351_v4 = vld [vmem:[%s5116_s1 + $0x180] sm:$0xff]  }
  0x10   : > { %3806 = vmatpush3.bf16.msra.mxu0 %v4327_v5  ;;  %3615 = vmatprep.subr.bf16.mxu1 %v4328_v6  ;;  %s4474_s10 = scalar_lea.vmem %s5115_s0, %s4313_s30  ;;  %v4356_v0 = vld [vmem:[%s5116_s1 + $0x38] sm:$0xff]  }
  0x11   : > { %3807 = vmatprep.subr.bf16.mxu0 %v4329_v7  ;;  %v236_v12 = vld [vmem:[%s4474_s10 + $0x1] sm:$0xff]  ;;  %v237_v13 = vld [vmem:[%s4474_s10 + $0x9] sm:$0xff]  ;;  %v3109_v14 = vld [vmem:[%s4474_s10 + $0x19] sm:$0xff] }
  0x12   : > { %v268_v15 = vpack.c.bf16 %v237_v13, %v236_v12  ;;  %v3110_v16 = vld [vmem:[%s4474_s10 + $0x21] sm:$0xff]  ;;  %v3111_v23 = vld [vmem:[%s4474_s10 + $0x31] sm:$0xff]  ;;  %v3112_v24 = vld [vmem:[%s4474_s10 + $0x39] sm:$0xff] }
  0x13   : > { %3616 = vmatpush3.bf16.msra.mxu1 %v4328_v6  ;;  %v1364_v17 = vpack.c.bf16 %v3110_v16, %v3109_v14  ;;  %v3113_v26 = vld [vmem:[%s4474_s10 + $0x49] sm:$0xff]  ;;  %v3114_v27 = vld [vmem:[%s4474_s10 + $0x51] sm:$0xff]  ;;  %v1365_v28 = vpack.c.bf16 %v3112_v24, %v3111_v23  ;;  %v3115_v32 = vld [vmem:[%s4474_s10 + $0x61] sm:$0xff] }
  0x14   : > { %3808 = vmatpush3.bf16.msra.mxu0 %v4329_v7  ;;  %3617 = vmatprep.subr.bf16.mxu1 %v4330_v8  ;;  %v1366_v30 = vpack.c.bf16 %v3114_v27, %v3113_v26  ;;  %v3116_v33 = vld [vmem:[%s4474_s10 + $0x69] sm:$0xff]  ;;  %v3117_v35 = vld [vmem:[%s4474_s10 + $0x79] sm:$0xff]  ;;  %v3118_v37 = vld [vmem:[%s4474_s10 + $0x81] sm:$0xff] }
  0x15   : > { %3809 = vmatprep.subr.bf16.mxu0 %v4331_v9  ;;  %3625 = vmatprep.mubr.bf16.mxu1 %v268_v15  ;;  %v1367_v38 = vpack.c.bf16 %v3116_v33, %v3115_v32  ;;  %v1368_v39 = vpack.c.bf16 %v3118_v37, %v3117_v35  ;;  %v3119_v42 = vld [vmem:[%s4474_s10 + $0x91] sm:$0xff]  ;;  %v3120_v43 = vld [vmem:[%s4474_s10 + $0x99] sm:$0xff]  ;;  %v3121_v45 = vld [vmem:[%s4474_s10 + $0xa9] sm:$0xff] }
  0x16   : > { %3817 = vmatprep.mubr.bf16.mxu0 %v1364_v17  ;;  %v3122_v46 = vld [vmem:[%s4474_s10 + $0xb1] sm:$0xff]  ;;  %v1369_v48 = vpack.c.bf16 %v3120_v43, %v3119_v42  ;;  %v3123_v52 = vld [vmem:[%s4474_s10 + $0xc1] sm:$0xff]  ;;  %v3124_v53 = vld [vmem:[%s4474_s10 + $0xc9] sm:$0xff] }
  0x17   : > { %3618 = vmatpush3.bf16.msra.mxu1 %v4330_v8  ;;  %v4540_v49 = vpack.c.bf16 %v3122_v46, %v3121_v45  ;;  %v3165_v55 = vld [vmem:[%s4474_s10 + $0x1a] sm:$0xff]  ;;  %v3166_v56 = vld [vmem:[%s4474_s10 + $0x22] sm:$0xff]  ;;  %v1371_v58 = vpack.c.bf16 %v3124_v53, %v3123_v52  ;;  %v3167_v63 = vld [vmem:[%s4474_s10 + $0x32] sm:$0xff] }
  0x18   : > { %3810 = vmatpush3.bf16.msra.mxu0 %v4331_v9  ;;  %3619 = vmatprep.subr.bf16.mxu1 %v4332_v10  ;;  %v4559_v59 = vpack.c.bf16 %v3166_v56, %v3165_v55  ;;  %v254_v61 = vld [vmem:[%s4474_s10 + $0xd9] sm:$0xff]  ;;  %v255_v62 = vld [vmem:[%s4474_s10 + $0xe1] sm:$0xff]  ;;  %v256_v2 = vld [vmem:[%s4474_s10 + $0xf1] sm:$0xff] }
  0x19   : > { %3811 = vmatprep.subr.bf16.mxu0 %v4333_v11  ;;  %v3168_v1 = vld [vmem:[%s4474_s10 + $0x3a] sm:$0xff]  ;;  %v3169_v5 = vld [vmem:[%s4474_s10 + $0x4a] sm:$0xff]  ;;  %v3170_v6 = vld [vmem:[%s4474_s10 + $0x52] sm:$0xff]  ;;  %v4580_v7 = vpack.c.bf16 %v255_v62, %v254_v61 }
  0x1a   : > { %v257_v3 = vld [vmem:[%s4474_s10 + $0xf9] sm:$0xff]  ;;  %v4587_v9 = vpack.c.bf16 %v3168_v1, %v3167_v63  ;;  %v4353_v12 = vld [vmem:[%s5116_s1 + $0x188] sm:$0xff]   ;;  %v259_v14 = vld [vmem:[%s4474_s10 + $0x111] sm:$0xff] }
  0x1b   : > { %3620 = vmatpush3.bf16.msra.mxu1 %v4332_v10  ;;  %v4585_v8 = vld [vmem:[%s5116_s1 + $0x80] sm:$0xff]   ;;  %v4589_v10 = vpack.c.bf16 %v257_v3, %v256_v2  ;;  %v258_v13 = vld [vmem:[%s4474_s10 + $0x109] sm:$0xff]  ;;  %v4357_v27 = vld [vmem:[%s5116_s1 + $0x198] sm:$0xff]  }
  0x1c   : > { %3812 = vmatpush3.bf16.msra.mxu0 %v4333_v11  ;;  %3621 = vmatprep.subr.bf16.mxu1 %v4334_v18  ;;  %v4591_v11 = vpack.c.bf16 %v3170_v6, %v3169_v5  ;;  %v3171_v15 = vld [vmem:[%s4474_s10 + $0x62] sm:$0xff]  ;;  %v3172_v16 = vld [vmem:[%s4474_s10 + $0x6a] sm:$0xff]  ;;  %v262_v26 = vld [vmem:[%s4474_s10 + $0x139] sm:$0xff] }
  0x1d   : > { %3813 = vmatprep.subr.bf16.mxu0 %v4335_v19  ;;  %v4614_v23 = vpack.c.bf16 %v3172_v16, %v3171_v15  ;;  %v265_v32 = vld [vmem:[%s4474_s10 + $0x159] sm:$0xff]  ;;  %v3177_v33 = vld [vmem:[%s4474_s10 + $0xaa] sm:$0xff]  ;;  %v3179_v43 = vld [vmem:[%s4474_s10 + $0xc2] sm:$0xff] }
  0x1e   : > { %v4359_v35 = vld [vmem:[%s5116_s1 + $0x1a0] sm:$0xff]   ;;  %v4361_v42 = vld [vmem:[%s5116_s1 + $0x1a8] sm:$0xff]   ;;  %v174_v55 = vld [vmem:[%s4474_s10 + $0x18] sm:$0xff] }
  0x1f   : > { %3622 = vmatpush3.bf16.msra.mxu1 %v4334_v18  ;;  %v261_v18 = vld [vmem:[%s4474_s10 + $0x129] sm:$0xff]  ;;  %v172_v45 = vld [vmem:[%s4474_s10] sm:$0xff]  ;;  %v177_v62 = vld [vmem:[%s4474_s10 + $0x38] sm:$0xff] }
  0x20   : > { %3814 = vmatpush3.bf16.msra.mxu0 %v4335_v19  ;;  %3623 = vmatprep.subr.bf16.mxu1 %v4336_v20  ;;  %v3173_v19 = vld [vmem:[%s4474_s10 + $0x7a] sm:$0xff]  ;;  %v173_v46 = vld [vmem:[%s4474_s10 + $0x8] sm:$0xff]  ;;  %v176_v61 = vld [vmem:[%s4474_s10 + $0x30] sm:$0xff] }
  0x21   : > { %3815 = vmatprep.subr.bf16.mxu0 %v4337_v21  ;;  %v204_v53 = vpack.c.bf16 %v173_v46, %v172_v45  ;;  %v175_v56 = vld [vmem:[%s4474_s10 + $0x20] sm:$0xff]  ;;  %v3185_v63 = vld [vmem:[%s4474_s10 + $0x10a] sm:$0xff] }
  0x22   : > { %v4687_v1 = vld [vmem:[%s5116_s1 + $0x1c0] sm:$0xff]   ;;  %v4689_v2 = vpack.c.bf16 %v175_v56, %v174_v55  ;;  %v178_v6 = vld [vmem:[%s4474_s10 + $0x48] sm:$0xff] }
  0x23   : > { %3624 = vmatpush3.bf16.msra.mxu1 %v4336_v20  ;;  %v3174_v20 = vld [vmem:[%s4474_s10 + $0x82] sm:$0xff]  ;;  %v3188_v15 = vld [vmem:[%s4474_s10 + $0x12a] sm:$0xff] }
  0x24   : > { %3816 = vmatpush3.bf16.msra.mxu0 %v4337_v21  ;;  %3657 = vmatprep.subr.bf16.mxu1 %v4338_v22  ;;  %v4355_v21 = vld [vmem:[%s5116_s1 + $0x190] sm:$0xff]   ;;  %v180_v16 = vld [vmem:[%s4474_s10 + $0x60] sm:$0xff]  ;;  %v4368_v46 = vld [vmem:[%s5116_s1 + $0xa8] sm:$0xff]  }
  0x25   : > { %3849 = vmatprep.subr.bf16.mxu0 %v4339_v25  ;;  %v188_v55 = vld [vmem:[%s4474_s10 + $0xc0] sm:$0xff]  ;;  %v189_v56 = vld [vmem:[%s4474_s10 + $0xc8] sm:$0xff] }
  0x26   : > { %3626 = vmatmul.mubr.bf16.vlgmr.msra.gmra.mrb[0].mxu1 %v1364_v17  ;;  %v260_v17 = vld [vmem:[%s4474_s10 + $0x121] sm:$0xff] }
  0x27   : > { %3818 = vmatmul.mubr.bf16.vlgmr.msra.gmra.mrb[0].mxu0 %v1365_v28  ;;  %3658 = vmatpush3.bf16.msra.mxu1 %v4338_v22  ;;  %v4612_v22 = vpack.c.bf16 %v259_v14, %v258_v13  ;;  %v4616_v24 = vpack.c.bf16 %v261_v18, %v260_v17  ;;  %v4360_v13 = vld [vmem:[%s5116_s1 + $0x88] sm:$0xff]   ;;  %v3189_v18 = vld [vmem:[%s4474_s10 + $0x13a] sm:$0xff] }
  0x28   : > { %3850 = vmatpush3.bf16.msra.mxu0 %v4339_v25  ;;  %3629 = vmatprep.mubr.bf16.mxu1 %v1365_v28  ;;  %v4618_v25 = vpack.c.bf16 %v3174_v20, %v3173_v19  ;;  %v263_v28 = vld [vmem:[%s4474_s10 + $0x141] sm:$0xff]  ;;  %v4362_v19 = vld [vmem:[%s5116_s1 + $0x90] sm:$0xff]  }
  0x29   : > { %3851 = vmatprep.subr.bf16.mxu0 %v4340_v29  ;;  %3821 = vmatprep.mubr.bf16.mxu0 %v1366_v30  ;;  %v3187_v14 = vld [vmem:[%s4474_s10 + $0x122] sm:$0xff] }
  0x2a   : > { %3659 = vmatprep.subr.bf16.mxu1 %v4341_v31  ;;  %v181_v17 = vld [vmem:[%s4474_s10 + $0x68] sm:$0xff] }
  0x2b   : > { %3660 = vmatpush3.bf16.msra.mxu1 %v4341_v31  ;;  %v264_v31 = vld [vmem:[%s4474_s10 + $0x151] sm:$0xff]  ;;  %v3190_v20 = vld [vmem:[%s4474_s10 + $0x142] sm:$0xff] }
  0x2c   : > { %3852 = vmatpush3.bf16.msra.mxu0 %v4340_v29  ;;  %3661 = vmatprep.subr.bf16.mxu1 %v4344_v36  ;;  %v3175_v29 = vld [vmem:[%s4474_s10 + $0x92] sm:$0xff] }
  0x2d   : > { %3853 = vmatprep.subr.bf16.mxu0 %v4342_v34 }
  0x2e   : > { %3630 = vmatmul.mubr.bf16.gmra.mrb[4].mxu1 %v1366_v30  ;;  %v3176_v30 = vld [vmem:[%s4474_s10 + $0x9a] sm:$0xff] }
  0x2f   : > { %3822 = vmatmul.mubr.bf16.gmra.mrb[4].mxu0 %v1367_v38  ;;  %3633 = vmatprep.mubr.bf16.mxu1 %v1367_v38  ;;  %v4640_v37 = vpack.c.bf16 %v3176_v30, %v3175_v29  ;;  %v4642_v38 = vpack.c.bf16 %v265_v32, %v264_v31  ;;  %v183_v29 = vld [vmem:[%s4474_s10 + $0x80] sm:$0xff]  ;;  %v4364_v30 = vld [vmem:[%s5116_s1 + $0x98] sm:$0xff]  }
  0x30   : > { %3854 = vmatpush3.bf16.msra.mxu0 %v4342_v34  ;;  %3825 = vmatprep.mubr.bf16.mxu0 %v1368_v39  ;;  %v3178_v34 = vld [vmem:[%s4474_s10 + $0xb2] sm:$0xff]  ;;  %v3192_v32 = vld [vmem:[%s4474_s10 + $0x15a] sm:$0xff] }
  0x31   : > { %3855 = vmatprep.subr.bf16.mxu0 %v4343_v40  ;;  %3662 = vmatpush3.bf16.msra.mxu1 %v4344_v36  ;;  %v4638_v36 = vpack.c.bf16 %v263_v28, %v262_v26  ;;  %v4721_v26 = vpack.c.bf16 %v181_v17, %v180_v16  ;;  %v182_v28 = vld [vmem:[%s4474_s10 + $0x78] sm:$0xff]  ;;  %v4369_v16 = vld [vmem:[%s5116_s1 + $0x1c8] sm:$0xff]  }
  0x32   : > { %3663 = vmatprep.subr.bf16.mxu1 %v4347_v41  ;;  %v3191_v31 = vld [vmem:[%s4474_s10 + $0x152] sm:$0xff]  ;;  %v194_v17 = vld [vmem:[%s4474_s10 + $0x108] sm:$0xff] }
  0x34   : > { %3856 = vmatpush3.bf16.msra.mxu0 %v4343_v40  ;;  %v266_v40 = vld [vmem:[%s4474_s10 + $0x169] sm:$0xff] }
  0x35   : > { %3857 = vmatprep.subr.bf16.mxu0 %v4345_v44  ;;  %3664 = vmatpush3.bf16.msra.mxu1 %v4347_v41  ;;  %v267_v41 = vld [vmem:[%s4474_s10 + $0x171] sm:$0xff] }
  0x36   : > { %3634 = vmatmul.mubr.bf16.gmra.mrb[8].mxu1 %v1368_v39  ;;  %3665 = vmatprep.subr.bf16.mxu1 %v4350_v47  ;;  %v4644_v39 = vpack.c.bf16 %v3178_v34, %v3177_v33  ;;  %v184_v33 = vld [vmem:[%s4474_s10 + $0x90] sm:$0xff]  ;;  %v185_v34 = vld [vmem:[%s4474_s10 + $0x98] sm:$0xff] }
  0x37   : > { %3826 = vmatmul.mubr.bf16.gmra.mrb[8].mxu0 %v1369_v48  ;;  %3637 = vmatprep.mubr.bf16.mxu1 %v1369_v48  ;;  %v3182_v48 = vld [vmem:[%s4474_s10 + $0xe2] sm:$0xff] }
  0x38   : > { %3858 = vmatpush3.bf16.msra.mxu0 %v4345_v44  ;;  %3829 = vmatprep.mubr.bf16.mxu0 %v4540_v49  ;;  %v3180_v44 = vld [vmem:[%s4474_s10 + $0xca] sm:$0xff] }
  0x39   : > { %3859 = vmatprep.subr.bf16.mxu0 %v4346_v50  ;;  %3666 = vmatpush3.bf16.msra.mxu1 %v4350_v47  ;;  %v3181_v47 = vld [vmem:[%s4474_s10 + $0xda] sm:$0xff]  ;;  %v4666_v52 = vpack.c.bf16 %v3180_v44, %v3179_v43  ;;  %v4745_v43 = vpack.c.bf16 %v3192_v32, %v3191_v31  ;;  %v4747_v44 = vpack.c.bf16 %v185_v34, %v184_v33  ;;  %v200_v33 = vld [vmem:[%s4474_s10 + $0x150] sm:$0xff] }
  0x3a   : > { %3667 = vmatprep.subr.bf16.mxu1 %v4352_v51  ;;  %v198_v31 = vld [vmem:[%s4474_s10 + $0x138] sm:$0xff]  ;;  %v199_v32 = vld [vmem:[%s4474_s10 + $0x140] sm:$0xff] }
  0x3b   : > { %v201_v34 = vld [vmem:[%s4474_s10 + $0x158] sm:$0xff] }
  0x3c   : > { %3860 = vmatpush3.bf16.msra.mxu0 %v4346_v50  ;;  %v4363_v50 = vld [vmem:[%s5116_s1 + $0x1b0] sm:$0xff]  }
  0x3d   : > { %3861 = vmatprep.subr.bf16.mxu0 %v4348_v54  ;;  %3668 = vmatpush3.bf16.msra.mxu1 %v4352_v51  ;;  %v4664_v51 = vpack.c.bf16 %v267_v41, %v266_v40  ;;  %v3194_v40 = vld [vmem:[%s4474_s10 + $0x172] sm:$0xff]  ;;  %v4366_v41 = vld [vmem:[%s5116_s1 + $0xa0] sm:$0xff]  }
  0x3e   : > { %3638 = vmatmul.mubr.bf16.gmra.mrb[12].mxu1 %v4540_v49  ;;  %3669 = vmatprep.subr.bf16.mxu1 %v4354_v57 }
  0x3f   : > { %3830 = vmatmul.mubr.bf16.gmra.mrb[12].mxu0 %v1371_v58  ;;  %3641 = vmatprep.mubr.bf16.mxu1 %v1371_v58  ;;  %v3183_v58 = vld [vmem:[%s4474_s10 + $0xf2] sm:$0xff] }
  0x40   : > { %3862 = vmatpush3.bf16.msra.mxu0 %v4348_v54  ;;  %3865 = vmatprep.mubr.bf16.mxu0 %v4559_v59  ;;  %v4668_v54 = vpack.c.bf16 %v3182_v48, %v3181_v47  ;;  %v186_v47 = vld [vmem:[%s4474_s10 + $0xa8] sm:$0xff]  ;;  %v187_v48 = vld [vmem:[%s4474_s10 + $0xb0] sm:$0xff] }
  0x41   : > { %3863 = vmatprep.subr.bf16.mxu0 %v4349_v60  ;;  %3670 = vmatpush3.bf16.msra.mxu1 %v4354_v57  ;;  %v4365_v57 = vld [vmem:[%s5116_s1 + $0x1b8] sm:$0xff]  }
  0x42   : > { %3671 = vmatprep.subr.bf16.mxu1 %v4356_v0 }
  0x44   : > { %3864 = vmatpush3.bf16.msra.mxu0 %v4349_v60  ;;  %v3184_v60 = vld [vmem:[%s4474_s10 + $0xfa] sm:$0xff] }
  0x45   : > { %3897 = vmatprep.subr.bf16.mxu0 %v4351_v4  ;;  %3672 = vmatpush3.bf16.msra.mxu1 %v4356_v0  ;;  %v3186_v0 = vld [vmem:[%s4474_s10 + $0x112] sm:$0xff]  ;;  %v4691_v3 = vpack.c.bf16 %v3184_v60, %v3183_v58  ;;  %v4767_v58 = vpack.c.bf16 %v187_v48, %v186_v47  ;;  %v202_v47 = vld [vmem:[%s4474_s10 + $0x168] sm:$0xff] }
  0x46   : > { %3642 = vmatmul.mubr.bf16.gmra.mrb[16].mxu1 %v4580_v7  ;;  %3705 = vmatprep.subr.bf16.mxu1 %v4585_v8  ;;  %v4695_v5 = vpack.c.bf16 %v3186_v0, %v3185_v63  ;;  %v190_v63 = vld [vmem:[%s4474_s10 + $0xd8] sm:$0xff]  ;;  %v191_v0 = vld [vmem:[%s4474_s10 + $0xe0] sm:$0xff]  ;;  %v203_v48 = vld [vmem:[%s4474_s10 + $0x170] sm:$0xff] }
  0x47   : > { %3866 = vmatmul.mubr.bf16.vlgmr.msra.gmra.mrb[0].mxu0 %v4587_v9  ;;  %3645 = vmatprep.mubr.bf16.mxu1 %v4589_v10 }
  0x48   : > { %3898 = vmatpush3.bf16.msra.mxu0 %v4351_v4  ;;  %3869 = vmatprep.mubr.bf16.mxu0 %v4591_v11  ;;  %v4693_v4 = vpack.c.bf16 %v177_v62, %v176_v61  ;;  %v4769_v61 = vpack.c.bf16 %v189_v56, %v188_v55  ;;  %v4372_v62 = vld [vmem:[%s5116_s1 + $0xb8] sm:$0xff]   ;;  %v4379_v55 = vld [vmem:[%s5116_s1 + $0x1f0] sm:$0xff]   ;;  %v4842_v56 = vpack.c.bf16 %v203_v48, %v202_v47 }
  0x49   : > { %3899 = vmatprep.subr.bf16.mxu0 %v4353_v12  ;;  %v3285_v47 = vld [vmem:[%s4474_s10 + $0x91] sm:$0xff]  ;;  %v3286_v48 = vld [vmem:[%s4474_s10 + $0x99] sm:$0xff] }
  0x4c   : > { %3900 = vmatpush3.bf16.msra.mxu0 %v4353_v12  ;;  %v179_v12 = vld [vmem:[%s4474_s10 + $0x50] sm:$0xff] }
  0x4d   : > { %3901 = vmatprep.subr.bf16.mxu0 %v4355_v21 }
  0x4e   : > { %3646 = vmatmul.mubr.bf16.gmra.mrb[20].mxu1 %v4612_v22 }
  0x4f   : > { %3870 = vmatmul.mubr.bf16.gmra.mrb[4].mxu0 %v4614_v23  ;;  %3649 = vmatprep.mubr.bf16.mxu1 %v4616_v24 }
  0x50   : > { %3873 = vmatprep.mubr.bf16.mxu0 %v4618_v25  ;;  %3902 = vmatpush3.bf16.msra.mxu0 %v4355_v21  ;;  %v4717_v21 = vpack.c.bf16 %v179_v12, %v178_v6  ;;  %v192_v6 = vld [vmem:[%s4474_s10 + $0xf0] sm:$0xff]  ;;  %v193_v12 = vld [vmem:[%s4474_s10 + $0xf8] sm:$0xff] }
  0x51   : > { %3903 = vmatprep.subr.bf16.mxu0 %v4357_v27 }
  0x54   : > { %3904 = vmatpush3.bf16.msra.mxu0 %v4357_v27  ;;  %v4723_v27 = vpack.c.bf16 %v3190_v20, %v3189_v18  ;;  %v195_v18 = vld [vmem:[%s4474_s10 + $0x110] sm:$0xff]  ;;  %v197_v20 = vld [vmem:[%s4474_s10 + $0x128] sm:$0xff] }
  0x55   : > { %3905 = vmatprep.subr.bf16.mxu0 %v4359_v35 }
  0x56   : > { %3650 = vmatmul.mubr.bf16.gmra.mrb[24].mxu1 %v4638_v36 }
  0x57   : > { %3874 = vmatmul.mubr.bf16.gmra.mrb[8].mxu0 %v4640_v37  ;;  %3653 = vmatprep.mubr.bf16.mxu1 %v4642_v38 }
  0x58   : > { %3877 = vmatprep.mubr.bf16.mxu0 %v4644_v39  ;;  %3906 = vmatpush3.bf16.msra.mxu0 %v4359_v35  ;;  %v3193_v35 = vld [vmem:[%s4474_s10 + $0x16a] sm:$0xff] }
  0x59   : > { %3907 = vmatprep.subr.bf16.mxu0 %v4361_v42  ;;  %v4749_v45 = vpack.c.bf16 %v3194_v40, %v3193_v35  ;;  %v4375_v35 = vld [vmem:[%s5116_s1 + $0x1e0] sm:$0xff]   ;;  %v4824_v40 = vpack.c.bf16 %v199_v32, %v198_v31  ;;  %v3282_v32 = vld [vmem:[%s4474_s10 + $0x69] sm:$0xff] }
  0x5a   : > { %v3281_v31 = vld [vmem:[%s4474_s10 + $0x61] sm:$0xff] }
  0x5c   : > { %3908 = vmatpush3.bf16.msra.mxu0 %v4361_v42  ;;  %v4743_v42 = vpack.c.bf16 %v183_v29, %v182_v28  ;;  %v4371_v28 = vld [vmem:[%s5116_s1 + $0x1d0] sm:$0xff]   ;;  %v4806_v29 = vpack.c.bf16 %v195_v18, %v194_v17  ;;  %v3278_v18 = vld [vmem:[%s4474_s10 + $0x39] sm:$0xff] }
  0x5d   : > { %3909 = vmatprep.subr.bf16.mxu0 %v4363_v50  ;;  %v3277_v17 = vld [vmem:[%s4474_s10 + $0x31] sm:$0xff] }
  0x5e   : > { %3654 = vmatmul.mubr.bf16.gmra.mrb[28].mxu1 %v4664_v51 }
  0x5f   : > { %3878 = vmatmul.mubr.bf16.gmra.mrb[12].mxu0 %v4666_v52  ;;  %3673 = vmatprep.mubr.bf16.mxu1 %v204_v53  ;;  %v3196_v53 = vld [vmem:[%s4474_s10 + $0x18a] sm:$0xff] }
  0x60   : > { %3881 = vmatprep.mubr.bf16.mxu0 %v4668_v54  ;;  %3910 = vmatpush3.bf16.msra.mxu0 %v4363_v50  ;;  %v3195_v50 = vld [vmem:[%s4474_s10 + $0x182] sm:$0xff] }
  0x61   : > { %3911 = vmatprep.subr.bf16.mxu0 %v4365_v57  ;;  %v1685_v60 = vpack.c.bf16 %v3196_v53, %v3195_v50  ;;  %v719_v50 = vld [vmem:[%s4474_s10 + $0x2] sm:$0xff]  ;;  %v720_v53 = vld [vmem:[%s4474_s10 + $0xa] sm:$0xff] }
  0x64   : > { %3912 = vmatpush3.bf16.msra.mxu0 %v4365_v57  ;;  %v4370_v57 = vld [vmem:[%s5116_s1 + $0xb0] sm:$0xff]  }
  0x65   : > { %3945 = vmatprep.subr.bf16.mxu0 %v4687_v1 }
  0x66   : > { %3674 = vmatmul.mubr.bf16.vlgmr.msra.gmra.mrb[0].mxu1 %v4689_v2 }
  0x67   : > { %3882 = vmatmul.mubr.bf16.gmra.mrb[16].mxu0 %v4691_v3  ;;  %3706 = vmatpush3.bf16.msra.mxu1 %v4585_v8  ;;  %v4719_v8 = vpack.c.bf16 %v3188_v15, %v3187_v14  ;;  %v4786_v14 = vpack.c.bf16 %v191_v0, %v190_v63  ;;  %v4788_v15 = vpack.c.bf16 %v193_v12, %v192_v6  ;;  %v4376_v63 = vld [vmem:[%s5116_s1 + $0xc8] sm:$0xff]   ;;  %v4378_v0 = vld [vmem:[%s5116_s1 + $0xd0] sm:$0xff]   ;;  %v4382_v12 = vld [vmem:[%s5116_s1 + $0xe0] sm:$0xff]  }
  0x68   : > { %3677 = vmatprep.mubr.bf16.mxu1 %v4693_v4  ;;  %3885 = vmatprep.mubr.bf16.mxu0 %v4695_v5  ;;  %v3250_v6 = vld [vmem:[%s4474_s10 + $0x188] sm:$0xff] }
  0x69   : > { %3707 = vmatprep.subr.bf16.mxu1 %v4360_v13 }
  0x6b   : > { %3708 = vmatpush3.bf16.msra.mxu1 %v4360_v13  ;;  %v4784_v13 = vld [vmem:[%s5116_s1 + $0xc0] sm:$0xff]  }
  0x6c   : > { %3709 = vmatprep.subr.bf16.mxu1 %v4362_v19 }
  0x6e   : > { %3678 = vmatmul.mubr.bf16.gmra.mrb[4].mxu1 %v4717_v21 }
  0x6f   : > { %3886 = vmatmul.mubr.bf16.gmra.mrb[20].mxu0 %v4719_v8  ;;  %3681 = vmatprep.mubr.bf16.mxu1 %v4721_v26 }
  0x70   : > { %3889 = vmatprep.mubr.bf16.mxu0 %v4723_v27  ;;  %3710 = vmatpush3.bf16.msra.mxu1 %v4362_v19  ;;  %v196_v19 = vld [vmem:[%s4474_s10 + $0x120] sm:$0xff] }
  0x71   : > { %3711 = vmatprep.subr.bf16.mxu1 %v4364_v30 }
  0x74   : > { %3712 = vmatpush3.bf16.msra.mxu1 %v4364_v30  ;;  %v4808_v30 = vpack.c.bf16 %v197_v20, %v196_v19  ;;  %v2283_v20 = vpack.c.bf16 %v3278_v18, %v3277_v17  ;;  %v3345_v17 = vld [vmem:[%s4474_s10 + $0xc2] sm:$0xff]  ;;  %v3346_v18 = vld [vmem:[%s4474_s10 + $0xca] sm:$0xff] }
  0x75   : > { %3713 = vmatprep.subr.bf16.mxu1 %v4366_v41 }
  0x76   : > { %3682 = vmatmul.mubr.bf16.gmra.mrb[8].mxu1 %v4743_v42 }
  0x77   : > { %3890 = vmatmul.mubr.bf16.gmra.mrb[24].mxu0 %v4745_v43  ;;  %3685 = vmatprep.mubr.bf16.mxu1 %v4747_v44 }
  0x78   : > { %3893 = vmatprep.mubr.bf16.mxu0 %v4749_v45  ;;  %3714 = vmatpush3.bf16.msra.mxu1 %v4366_v41  ;;  %v4826_v41 = vpack.c.bf16 %v201_v34, %v200_v33  ;;  %v2285_v34 = vpack.c.bf16 %v3282_v32, %v3281_v31 }
  0x79   : > { %3715 = vmatprep.subr.bf16.mxu1 %v4368_v46 }
  0x7c   : > { %3716 = vmatpush3.bf16.msra.mxu1 %v4368_v46  ;;  %v4377_v46 = vld [vmem:[%s5116_s1 + $0x1e8] sm:$0xff]  }
  0x7d   : > { %3717 = vmatprep.subr.bf16.mxu1 %v4370_v57 }
  0x7e   : > { %3686 = vmatmul.mubr.bf16.gmra.mrb[12].mxu1 %v4767_v58 }
  0x7f   : > { %3894 = vmatmul.mubr.bf16.gmra.mrb[28].mxu0 %v1685_v60  ;;  %3689 = vmatprep.mubr.bf16.mxu1 %v4769_v61  ;;  %v4381_v60 = vld [vmem:[%s5116_s1 + $0x1f8] sm:$0xff]  }
  0x80   : > { %3913 = vmatprep.mubr.bf16.mxu0 %v4693_v4  ;;  %3718 = vmatpush3.bf16.msra.mxu1 %v4370_v57  ;;  %v751_v57 = vpack.c.bf16 %v720_v53, %v719_v50  ;;  %v4387_v50 = vld [vmem:[%s5116_s1 + $0x210] sm:$0xff]  }
  0x81   : > { %3719 = vmatprep.subr.bf16.mxu1 %v4372_v62 }
  0x84   : > { %3720 = vmatpush3.bf16.msra.mxu1 %v4372_v62  ;;  %v4383_v62 = vld [vmem:[%s5116_s1 + $0x200] sm:$0xff]  }
  0x85   : > { %3753 = vmatprep.subr.bf16.mxu1 %v4784_v13 }
  0x86   : > { %3690 = vmatmul.mubr.bf16.gmra.mrb[16].mxu1 %v4786_v14 }
  0x87   : > { %3914 = vmatmul.mubr.bf16.vlgmr.msra.gmra.mrb[0].mxu0 %v4717_v21  ;;  %3693 = vmatprep.mubr.bf16.mxu1 %v4788_v15 }
  0x88   : > { %3946 = vmatpush3.bf16.msra.mxu0 %v4687_v1  ;;  %3917 = vmatprep.mubr.bf16.mxu0 %v4721_v26  ;;  %v4373_v1 = vld [vmem:[%s5116_s1 + $0x1d8] sm:$0xff]  }
  0x89   : > { %3947 = vmatprep.subr.bf16.mxu0 %v4369_v16 }
  0x8c   : > { %3948 = vmatpush3.bf16.msra.mxu0 %v4369_v16  ;;  %v3252_v16 = vld [vmem:[%s4474_s10 + $0x1a0] sm:$0xff] }
  0x8d   : > { %3949 = vmatprep.subr.bf16.mxu0 %v4371_v28 }
  0x8e   : > { %3694 = vmatmul.mubr.bf16.gmra.mrb[20].mxu1 %v4806_v29 }
  0x8f   : > { %3918 = vmatmul.mubr.bf16.gmra.mrb[4].mxu0 %v4743_v42  ;;  %3697 = vmatprep.mubr.bf16.mxu1 %v4808_v30 }
  0x90   : > { %3921 = vmatprep.mubr.bf16.mxu0 %v4747_v44  ;;  %3950 = vmatpush3.bf16.msra.mxu0 %v4371_v28  ;;  %v3279_v28 = vld [vmem:[%s4474_s10 + $0x49] sm:$0xff] }
  0x91   : > { %3951 = vmatprep.subr.bf16.mxu0 %v4373_v1 }
  0x94   : > { %3952 = vmatpush3.bf16.msra.mxu0 %v4373_v1  ;;  %v3280_v1 = vld [vmem:[%s4474_s10 + $0x51] sm:$0xff] }
  0x95   : > { %3953 = vmatprep.subr.bf16.mxu0 %v4375_v35  ;;  %v2284_v33 = vpack.c.bf16 %v3280_v1, %v3279_v28  ;;  %v3349_v28 = vld [vmem:[%s4474_s10 + $0xf2] sm:$0xff]  ;;  %v3350_v1 = vld [vmem:[%s4474_s10 + $0xfa] sm:$0xff] }
  0x96   : > { %3698 = vmatmul.mubr.bf16.gmra.mrb[24].mxu1 %v4824_v40  ;;  %v2597_v32 = vpack.c.bf16 %v3350_v1, %v3349_v28 }
  0x97   : > { %3922 = vmatmul.mubr.bf16.gmra.mrb[8].mxu0 %v4767_v58  ;;  %3701 = vmatprep.mubr.bf16.mxu1 %v4826_v41 }
  0x98   : > { %3925 = vmatprep.mubr.bf16.mxu0 %v4769_v61  ;;  %3954 = vmatpush3.bf16.msra.mxu0 %v4375_v35  ;;  %v3283_v35 = vld [vmem:[%s4474_s10 + $0x79] sm:$0xff] }
  0x99   : > { %3955 = vmatprep.subr.bf16.mxu0 %v4377_v46 }
  0x9c   : > { %3956 = vmatpush3.bf16.msra.mxu0 %v4377_v46  ;;  %v3284_v46 = vld [vmem:[%s4474_s10 + $0x81] sm:$0xff] }
  0x9d   : > { %3957 = vmatprep.subr.bf16.mxu0 %v4379_v55  ;;  %v2286_v53 = vpack.c.bf16 %v3284_v46, %v3283_v35  ;;  %v3130_v35 = vld [vmem:[%s4474_s10 + $0x111] sm:$0xff]  ;;  %v3353_v46 = vld [vmem:[%s4474_s10 + $0x122] sm:$0xff] }
  0x9e   : > { %3702 = vmatmul.mubr.bf16.gmra.mrb[28].mxu1 %v4842_v56 }
  0x9f   : > { %3926 = vmatmul.mubr.bf16.gmra.mrb[12].mxu0 %v4786_v14  ;;  %3721 = vmatprep.mubr.bf16.mxu1 %v751_v57  ;;  %v3290_v57 = vld [vmem:[%s4474_s10 + $0xc9] sm:$0xff] }
  0xa0   : > { %3929 = vmatprep.mubr.bf16.mxu0 %v4788_v15  ;;  %3958 = vmatpush3.bf16.msra.mxu0 %v4379_v55  ;;  %v2287_v55 = vpack.c.bf16 %v3286_v48, %v3285_v47  ;;  %v3354_v47 = vld [vmem:[%s4474_s10 + $0x12a] sm:$0xff] }
  0xa1   : > { %3959 = vmatprep.subr.bf16.mxu0 %v4381_v60 }
  0xa4   : > { %3960 = vmatpush3.bf16.msra.mxu0 %v4381_v60  ;;  %v4390_v60 = vld [vmem:[%s5116_s1 + $0x220] sm:$0xff]  }
  0xa5   : > { %3993 = vmatprep.subr.bf16.mxu0 %v4383_v62 }
  0xa6   : > { %3722 = vmatmul.mubr.bf16.vlgmr.msra.gmra.mrb[0].mxu1 %v4559_v59  ;;  %v4380_v59 = vld [vmem:[%s5116_s1 + $0xd8] sm:$0xff]  }
  0xa7   : > { %3930 = vmatmul.mubr.bf16.gmra.mrb[16].mxu0 %v4806_v29  ;;  %3754 = vmatpush3.bf16.msra.mxu1 %v4784_v13 }
  0xa8   : > { %3725 = vmatprep.mubr.bf16.mxu1 %v4587_v9  ;;  %3933 = vmatprep.mubr.bf16.mxu0 %v4808_v30  ;;  %v3249_v9 = vld [vmem:[%s4474_s10 + $0x180] sm:$0xff] }
  0xa9   : > { %3755 = vmatprep.subr.bf16.mxu1 %v4376_v63  ;;  %v4876_v13 = vpack.c.bf16 %v3250_v6, %v3249_v9  ;;  %v3340_v6 = vld [vmem:[%s4474_s10 + $0x82] sm:$0xff] }
  0xab   : > { %3756 = vmatpush3.bf16.msra.mxu1 %v4376_v63  ;;  %v4391_v63 = vld [vmem:[%s5116_s1 + $0x228] sm:$0xff]  }
  0xac   : > { %3757 = vmatprep.subr.bf16.mxu1 %v4378_v0 }
  0xae   : > { %3726 = vmatmul.mubr.bf16.gmra.mrb[4].mxu1 %v4591_v11  ;;  %v4384_v11 = vld [vmem:[%s5116_s1 + $0xe8] sm:$0xff]  }
  0xaf   : > { %3934 = vmatmul.mubr.bf16.gmra.mrb[20].mxu0 %v4824_v40  ;;  %3729 = vmatprep.mubr.bf16.mxu1 %v4614_v23  ;;  %v3251_v23 = vld [vmem:[%s4474_s10 + $0x198] sm:$0xff] }
  0xb0   : > { %3937 = vmatprep.mubr.bf16.mxu0 %v4826_v41  ;;  %3758 = vmatpush3.bf16.msra.mxu1 %v4378_v0  ;;  %v1992_v19 = vpack.c.bf16 %v3252_v16, %v3251_v23  ;;  %v3338_v0 = vld [vmem:[%s4474_s10 + $0x6a] sm:$0xff] }
  0xb1   : > { %3759 = vmatprep.subr.bf16.mxu1 %v4380_v59 }
  0xb4   : > { %3760 = vmatpush3.bf16.msra.mxu1 %v4380_v59  ;;  %v4401_v59 = vld [vmem:[%s5116_s1 + $0x138] sm:$0xff]  }
  0xb5   : > { %3761 = vmatprep.subr.bf16.mxu1 %v4382_v12 }
  0xb6   : > { %3730 = vmatmul.mubr.bf16.gmra.mrb[8].mxu1 %v4618_v25  ;;  %v4386_v25 = vld [vmem:[%s5116_s1 + $0xf0] sm:$0xff]  }
  0xb7   : > { %3938 = vmatmul.mubr.bf16.gmra.mrb[24].mxu0 %v4842_v56  ;;  %3733 = vmatprep.mubr.bf16.mxu1 %v4640_v37  ;;  %v4388_v37 = vld [vmem:[%s5116_s1 + $0xf8] sm:$0xff]  }
  0xb8   : > { %3941 = vmatprep.mubr.bf16.mxu0 %v4876_v13  ;;  %3762 = vmatpush3.bf16.msra.mxu1 %v4382_v12  ;;  %v3341_v12 = vld [vmem:[%s4474_s10 + $0x92] sm:$0xff] }
  0xb9   : > { %3763 = vmatprep.subr.bf16.mxu1 %v4384_v11 }
  0xbc   : > { %3764 = vmatpush3.bf16.msra.mxu1 %v4384_v11  ;;  %v3342_v11 = vld [vmem:[%s4474_s10 + $0x9a] sm:$0xff] }
  0xbd   : > { %3765 = vmatprep.subr.bf16.mxu1 %v4386_v25  ;;  %v2593_v16 = vpack.c.bf16 %v3342_v11, %v3341_v12 }
  0xbe   : > { %3734 = vmatmul.mubr.bf16.gmra.mrb[12].mxu1 %v4644_v39  ;;  %v4385_v39 = vld [vmem:[%s5116_s1 + $0x208] sm:$0xff]  }
  0xbf   : > { %3942 = vmatmul.mubr.bf16.gmra.mrb[28].mxu0 %v1992_v19  ;;  %3737 = vmatprep.mubr.bf16.mxu1 %v4666_v52  ;;  %v4394_v52 = vld [vmem:[%s5116_s1 + $0x100] sm:$0xff]   ;;  %v2595_v19 = vpack.c.bf16 %v3346_v18, %v3345_v17 }
  0xc0   : > { %3961 = vmatprep.mubr.bf16.mxu0 %v2283_v20  ;;  %3766 = vmatpush3.bf16.msra.mxu1 %v4386_v25  ;;  %v3125_v20 = vld [vmem:[%s4474_s10 + $0xd9] sm:$0xff] }
  0xc1   : > { %3767 = vmatprep.subr.bf16.mxu1 %v4388_v37 }
  0xc4   : > { %3768 = vmatpush3.bf16.msra.mxu1 %v4388_v37  ;;  %v3126_v37 = vld [vmem:[%s4474_s10 + $0xe1] sm:$0xff] }
  0xc5   : > { %4041 = vmatprep.subr.bf16.mxu1 %v4394_v52 }
  0xc6   : > { %3738 = vmatmul.mubr.bf16.gmra.mrb[16].mxu1 %v4668_v54  ;;  %v4389_v54 = vld [vmem:[%s5116_s1 + $0x218] sm:$0xff]  }
  0xc7   : > { %3962 = vmatmul.mubr.bf16.vlgmr.msra.gmra.mrb[0].mxu0 %v2284_v33  ;;  %3741 = vmatprep.mubr.bf16.mxu1 %v4691_v3  ;;  %v3289_v3 = vld [vmem:[%s4474_s10 + $0xc1] sm:$0xff]  ;;  %v3128_v33 = vld [vmem:[%s4474_s10 + $0xf9] sm:$0xff] }
  0xc8   : > { %3994 = vmatpush3.bf16.msra.mxu0 %v4383_v62  ;;  %3965 = vmatprep.mubr.bf16.mxu0 %v2285_v34  ;;  %v2289_v62 = vpack.c.bf16 %v3290_v57, %v3289_v3  ;;  %v3351_v34 = vld [vmem:[%s4474_s10 + $0x10a] sm:$0xff]  ;;  %v3355_v3 = vld [vmem:[%s4474_s10 + $0x13a] sm:$0xff]  ;;  %v3356_v57 = vld [vmem:[%s4474_s10 + $0x142] sm:$0xff] }
  0xc9   : > { %3995 = vmatprep.subr.bf16.mxu0 %v4385_v39 }
  0xcc   : > { %3996 = vmatpush3.bf16.msra.mxu0 %v4385_v39  ;;  %v3352_v39 = vld [vmem:[%s4474_s10 + $0x112] sm:$0xff] }
  0xcd   : > { %3997 = vmatprep.subr.bf16.mxu0 %v4387_v50  ;;  %v2598_v48 = vpack.c.bf16 %v3352_v39, %v3351_v34 }
  0xce   : > { %3742 = vmatmul.mubr.bf16.gmra.mrb[20].mxu1 %v4695_v5  ;;  %v4392_v5 = vld [vmem:[%s5116_s1 + $0x230] sm:$0xff]  }
  0xcf   : > { %3966 = vmatmul.mubr.bf16.gmra.mrb[4].mxu0 %v2286_v53  ;;  %3745 = vmatprep.mubr.bf16.mxu1 %v4719_v8  ;;  %v4393_v8 = vld [vmem:[%s5116_s1 + $0x238] sm:$0xff]   ;;  %v2599_v53 = vpack.c.bf16 %v3354_v47, %v3353_v46 }
  0xd0   : > { %3969 = vmatprep.mubr.bf16.mxu0 %v2287_v55  ;;  %3998 = vmatpush3.bf16.msra.mxu0 %v4387_v50  ;;  %v3131_v55 = vld [vmem:[%s4474_s10 + $0x121] sm:$0xff] }
  0xd1   : > { %3999 = vmatprep.subr.bf16.mxu0 %v4389_v54 }
  0xd4   : > { %4000 = vmatpush3.bf16.msra.mxu0 %v4389_v54  ;;  %v3132_v54 = vld [vmem:[%s4474_s10 + $0x129] sm:$0xff] }
  0xd5   : > { %4001 = vmatprep.subr.bf16.mxu0 %v4390_v60 }
  0xd6   : > { %3746 = vmatmul.mubr.bf16.gmra.mrb[24].mxu1 %v4723_v27  ;;  %v4399_v27 = vld [vmem:[%s5116_s1 + $0x128] sm:$0xff]  }
  0xd7   : > { %3970 = vmatmul.mubr.bf16.gmra.mrb[8].mxu0 %v4540_v49  ;;  %3749 = vmatprep.mubr.bf16.mxu1 %v4745_v43  ;;  %v4395_v49 = vld [vmem:[%s5116_s1 + $0x108] sm:$0xff]   ;;  %v4400_v43 = vld [vmem:[%s5116_s1 + $0x130] sm:$0xff]  }
  0xd8   : > { %3973 = vmatprep.mubr.bf16.mxu0 %v2289_v62  ;;  %4002 = vmatpush3.bf16.msra.mxu0 %v4390_v60  ;;  %v3133_v60 = vld [vmem:[%s4474_s10 + $0x139] sm:$0xff]  ;;  %v3134_v62 = vld [vmem:[%s4474_s10 + $0x141] sm:$0xff] }
  0xd9   : > { %4003 = vmatprep.subr.bf16.mxu0 %v4391_v63 }
  0xdc   : > { %4004 = vmatpush3.bf16.msra.mxu0 %v4391_v63  ;;  %v3357_v63 = vld [vmem:[%s4474_s10 + $0x152] sm:$0xff] }
  0xdd   : > { %4005 = vmatprep.subr.bf16.mxu0 %v4392_v5 }
  0xde   : > { %3750 = vmatmul.mubr.bf16.gmra.mrb[28].mxu1 %v4749_v45  ;;  %v3336_v45 = vld [vmem:[%s4474_s10 + $0x52] sm:$0xff] }
  0xdf   : > { %3974 = vmatmul.mubr.bf16.gmra.mrb[12].mxu0 %v4580_v7  ;;  %3769 = vmatprep.mubr.bf16.mxu1 %v4689_v2  ;;  %v4396_v7 = vld [vmem:[%s5116_s1 + $0x110] sm:$0xff]  }
  0xe0   : > { %3977 = vmatprep.mubr.bf16.mxu0 %v4589_v10  ;;  %4006 = vmatpush3.bf16.msra.mxu0 %v4392_v5  ;;  %v3305_v10 = vld [vmem:[%s4474_s10 + $0x181] sm:$0xff] }
  0xe1   : > { %4007 = vmatprep.subr.bf16.mxu0 %v4393_v8  ;;  %v3358_v5 = vld [vmem:[%s4474_s10 + $0x15a] sm:$0xff] }
  0xe4   : > { %4008 = vmatpush3.bf16.msra.mxu0 %v4393_v8  ;;  %v1375_v8 = vpack.c.bf16 %v3132_v54, %v3131_v55 }
  0xe6   : > { %3770 = vmatmul.mubr.bf16.vlgmr.msra.gmra.mrb[0].mxu1 %v4693_v4  ;;  %v3308_v4 = vld [vmem:[%s4474_s10 + $0x1a1] sm:$0xff] }
  0xe7   : > { %3978 = vmatmul.mubr.bf16.gmra.mrb[16].mxu0 %v4612_v22  ;;  %4049 = vmatpush3.bf16.msra.mxu1 %v4394_v52  ;;  %v3306_v22 = vld [vmem:[%s4474_s10 + $0x189] sm:$0xff] }
  0xe8   : > { %3773 = vmatprep.mubr.bf16.mxu1 %v4717_v21  ;;  %3981 = vmatprep.mubr.bf16.mxu0 %v4616_v24  ;;  %v4397_v24 = vld [vmem:[%s5116_s1 + $0x118] sm:$0xff]   ;;  %v4961_v2 = vpack.c.bf16 %v3306_v22, %v3305_v10  ;;  %v3129_v52 = vld [vmem:[%s4474_s10 + $0x109] sm:$0xff]  ;;  %v2601_v10 = vpack.c.bf16 %v3358_v5, %v3357_v63 }
  0xe9   : > { %4042 = vmatprep.subr.bf16.mxu1 %v4395_v49  ;;  %v3333_v21 = vld [vmem:[%s4474_s10 + $0x32] sm:$0xff]  ;;  %v1374_v50 = vpack.c.bf16 %v3130_v35, %v3129_v52 }
  0xea   : > { %v3135_v22 = vld [vmem:[%s4474_s10 + $0x151] sm:$0xff] }
  0xeb   : > { %4050 = vmatpush3.bf16.msra.mxu1 %v4395_v49  ;;  %v2600_v49 = vpack.c.bf16 %v3356_v57, %v3355_v3 }
  0xec   : > { %4043 = vmatprep.subr.bf16.mxu1 %v4396_v7 }
  0xee   : > { %3774 = vmatmul.mubr.bf16.gmra.mrb[4].mxu1 %v4721_v26  ;;  %v3334_v26 = vld [vmem:[%s4474_s10 + $0x3a] sm:$0xff] }
  0xef   : > { %3982 = vmatmul.mubr.bf16.gmra.mrb[20].mxu0 %v4638_v36  ;;  %3777 = vmatprep.mubr.bf16.mxu1 %v4743_v42  ;;  %v4398_v36 = vld [vmem:[%s5116_s1 + $0x120] sm:$0xff]  }
  0xf0   : > { %3985 = vmatprep.mubr.bf16.mxu0 %v4642_v38  ;;  %4051 = vmatpush3.bf16.msra.mxu1 %v4396_v7  ;;  %v3307_v38 = vld [vmem:[%s4474_s10 + $0x199] sm:$0xff]  ;;  %v1376_v7 = vpack.c.bf16 %v3134_v62, %v3133_v60 }
  0xf1   : > { %4044 = vmatprep.subr.bf16.mxu1 %v4397_v24  ;;  %v2298_v42 = vpack.c.bf16 %v3308_v4, %v3307_v38  ;;  %v3360_v38 = vld [vmem:[%s4474_s10 + $0x172] sm:$0xff]  ;;  %v3137_v4 = vld [vmem:[%s4474_s10 + $0x169] sm:$0xff] }
  0xf4   : > { %4052 = vmatpush3.bf16.msra.mxu1 %v4397_v24  ;;  %v3136_v24 = vld [vmem:[%s4474_s10 + $0x159] sm:$0xff] }
  0xf5   : > { %4045 = vmatprep.subr.bf16.mxu1 %v4398_v36 }
  0xf6   : > { %3778 = vmatmul.mubr.bf16.gmra.mrb[8].mxu1 %v4747_v44  ;;  %v3335_v44 = vld [vmem:[%s4474_s10 + $0x4a] sm:$0xff] }
  0xf7   : > { %3986 = vmatmul.mubr.bf16.gmra.mrb[24].mxu0 %v4664_v51  ;;  %3781 = vmatprep.mubr.bf16.mxu1 %v4767_v58  ;;  %v2589_v51 = vpack.c.bf16 %v3334_v26, %v3333_v21  ;;  %v3337_v58 = vld [vmem:[%s4474_s10 + $0x62] sm:$0xff]  ;;  %v2590_v9 = vpack.c.bf16 %v3336_v45, %v3335_v44  ;;  %v3138_v21 = vld [vmem:[%s4474_s10 + $0x171] sm:$0xff]  ;;  %v3363_v45 = vld [vmem:[%s4474_s10 + $0x19a] sm:$0xff] }
  0xf8   : > { %3989 = vmatprep.mubr.bf16.mxu0 %v4961_v2  ;;  %4053 = vmatpush3.bf16.msra.mxu1 %v4398_v36  ;;  %v3359_v36 = vld [vmem:[%s4474_s10 + $0x16a] sm:$0xff]  ;;  %v3361_v26 = vld [vmem:[%s4474_s10 + $0x182] sm:$0xff] }
  0xf9   : > { %4046 = vmatprep.subr.bf16.mxu1 %v4399_v27 }
  0xfc   : > { %4054 = vmatpush3.bf16.msra.mxu1 %v4399_v27  ;;  %v3362_v27 = vld [vmem:[%s4474_s10 + $0x18a] sm:$0xff] }
  0xfd   : > { %4047 = vmatprep.subr.bf16.mxu1 %v4400_v43  ;;  %v2603_v44 = vpack.c.bf16 %v3362_v27, %v3361_v26 }
  0xfe   : > { %3782 = vmatmul.mubr.bf16.gmra.mrb[12].mxu1 %v4769_v61  ;;  %v2591_v61 = vpack.c.bf16 %v3338_v0, %v3337_v58  ;;  %v3364_v58 = vld [vmem:[%s4474_s10 + $0x1a2] sm:$0xff] }
  0xff   : > { %3990 = vmatmul.mubr.bf16.gmra.mrb[28].mxu0 %v2298_v42  ;;  %3785 = vmatprep.mubr.bf16.mxu1 %v4786_v14  ;;  %v3339_v14 = vld [vmem:[%s4474_s10 + $0x7a] sm:$0xff]  ;;  %v1377_v42 = vpack.c.bf16 %v3136_v24, %v3135_v22  ;;  %v2604_v0 = vpack.c.bf16 %v3364_v58, %v3363_v45 }
 0x100   : > { %4009 = vmatprep.mubr.bf16.mxu0 %v2589_v51  ;;  %4055 = vmatpush3.bf16.msra.mxu1 %v4400_v43  ;;  %v2592_v23 = vpack.c.bf16 %v3340_v6, %v3339_v14  ;;  %v2602_v51 = vpack.c.bf16 %v3360_v38, %v3359_v36  ;;  %v1378_v43 = vpack.c.bf16 %v3138_v21, %v3137_v4 }
 0x101   : > { %4048 = vmatprep.subr.bf16.mxu1 %v4401_v59 }
 0x104   : > { %4056 = vmatpush3.bf16.msra.mxu1 %v4401_v59 }
 0x106   : > { %3786 = vmatmul.mubr.bf16.gmra.mrb[16].mxu1 %v4788_v15  ;;  %v3343_v15 = vld [vmem:[%s4474_s10 + $0xaa] sm:$0xff] }
 0x107   : > { %4010 = vmatmul.mubr.bf16.vlgmr.msra.gmra.mrb[0].mxu0 %v2590_v9  ;;  %3789 = vmatprep.mubr.bf16.mxu1 %v4806_v29  ;;  %v3344_v29 = vld [vmem:[%s4474_s10 + $0xb2] sm:$0xff] }
 0x108   : > { %4013 = vmatprep.mubr.bf16.mxu0 %v2591_v61  ;;  %v2594_v25 = vpack.c.bf16 %v3344_v29, %v3343_v15 }
 0x10e   : > { %3790 = vmatmul.mubr.bf16.gmra.mrb[20].mxu1 %v4808_v30  ;;  %v3347_v30 = vld [vmem:[%s4474_s10 + $0xda] sm:$0xff] }
 0x10f   : > { %4014 = vmatmul.mubr.bf16.gmra.mrb[4].mxu0 %v2592_v23  ;;  %3793 = vmatprep.mubr.bf16.mxu1 %v4824_v40  ;;  %v3348_v40 = vld [vmem:[%s4474_s10 + $0xe2] sm:$0xff] }
 0x110   : > { %4017 = vmatprep.mubr.bf16.mxu0 %v2593_v16  ;;  %v2596_v31 = vpack.c.bf16 %v3348_v40, %v3347_v30  ;;  %v5041_v40 = vld [vmem:[%s5117_s2] ss:$0 sm:$0xff] }
 0x116   : > { %3794 = vmatmul.mubr.bf16.gmra.mrb[24].mxu1 %v4826_v41  ;;  %v1372_v41 = vpack.c.bf16 %v3126_v37, %v3125_v20 }
 0x117   : > { %4018 = vmatmul.mubr.bf16.gmra.mrb[8].mxu0 %v2594_v25  ;;  %3797 = vmatprep.mubr.bf16.mxu1 %v4842_v56  ;;  %v3127_v56 = vld [vmem:[%s4474_s10 + $0xf1] sm:$0xff]  ;;  %s3392_s10 = sshll.u32 %s5120_s13, 8 }
 0x118   : > { %4021 = vmatprep.mubr.bf16.mxu0 %v2595_v19  ;;  %s5046_s11 = scalar_lea.vmem %s5118_s3, %s3392_s10 }
 0x11e   : > { %3798 = vmatmul.mubr.bf16.gmra.mrb[28].mxu1 %v4876_v13  ;;  %v1373_v13 = vpack.c.bf16 %v3128_v33, %v3127_v56 }
 0x11f   : > { %4022 = vmatmul.mubr.bf16.gmra.mrb[12].mxu0 %v2596_v31  ;;  %3833 = vmatprep.mubr.bf16.mxu1 %v1372_v41 }
 0x120   : > { %4025 = vmatprep.mubr.bf16.mxu0 %v2597_v32 }
 0x126   : > { %3834 = vmatmul.mubr.bf16.vlgmr.msra.gmra.mrb[16].mxu1 %v1373_v13 }
 0x127   : > { %4026 = vmatmul.mubr.bf16.gmra.mrb[16].mxu0 %v2598_v48  ;;  %3837 = vmatprep.mubr.bf16.mxu1 %v1374_v50 }
 0x128   : > { %4029 = vmatprep.mubr.bf16.mxu0 %v2599_v53 }
 0x12e   : > { %3838 = vmatmul.mubr.bf16.gmra.mrb[20].mxu1 %v1375_v8 }
 0x12f   : > { %4030 = vmatmul.mubr.bf16.gmra.mrb[20].mxu0 %v2600_v49  ;;  %3841 = vmatprep.mubr.bf16.mxu1 %v1376_v7 }
 0x130   : > { %4033 = vmatprep.mubr.bf16.mxu0 %v2601_v10 }
 0x136   : > { %3842 = vmatmul.mubr.bf16.gmra.mrb[24].mxu1 %v1377_v42 }
 0x137   : > { %4034 = vmatmul.mubr.bf16.gmra.mrb[24].mxu0 %v2602_v51  ;;  %3845 = vmatprep.mubr.bf16.mxu1 %v1378_v43 }
 0x138   : > { %4037 = vmatprep.mubr.bf16.mxu0 %v2603_v44 }
 0x13e   : > { %3846 = vmatmul.mubr.bf16.gmra.mrb[28].mxu1 %v4961_v2 }
 0x13f   : > { %4038 = vmatmul.mubr.bf16.gmra.mrb[28].mxu0 %v2604_v0 }
 0x1b9   : > { %v3771_v59 = vpop.f32.mrb[0].mxu1 }
 0x1ba   : > { %v1173_v9 = vpop.f32.mrb[1].mxu1 }
 0x1bb   : > { %v3772_v61 = vpop.f32.mrb[2].mxu1 }
 0x1bc   : > { %v1176_v14 = vpop.f32.mrb[3].mxu1 }
 0x1c1   : > { %v3775_v6 = vpop.f32.mrb[4].mxu1 }
 0x1c2   : > { %v1189_v12 = vpop.f32.mrb[5].mxu1 }
 0x1c3   : > { %v3776_v11 = vpop.f32.mrb[6].mxu1 }
 0x1c4   : > { %v1192_v23 = vpop.f32.mrb[7].mxu1 }
 0x1c9   : > { %v3779_v16 = vpop.f32.mrb[8].mxu1 }
 0x1ca   : > { %v1205_v15 = vpop.f32.mrb[9].mxu1 }
 0x1cb   : > { %v3780_v29 = vpop.f32.mrb[10].mxu1 }
 0x1cc   : > { %v1208_v17 = vpop.f32.mrb[11].mxu1 }
 0x1d1   : > { %v3783_v18 = vpop.f32.mrb[12].mxu1 }
 0x1d2   : > { %v1221_v25 = vpop.f32.mrb[13].mxu1 }
 0x1d3   : > { %v3784_v19 = vpop.f32.mrb[14].mxu1 }
 0x1d4   : > { %v1224_v30 = vpop.f32.mrb[15].mxu1 }
 0x1da   : > { %v4011_v2 = vpop.f32.mrb[0].mxu0 }
 0x1db   : > { %v4057_v20 = vadd.f32 %v4011_v2, %v3771_v59  ;;  %v2704_v37 = vpop.f32.mrb[1].mxu0 }
 0x1dc   : > { %v4058_v28 = vadd.f32 %v2704_v37, %v1173_v9  ;;  %v4012_v1 = vpop.f32.mrb[2].mxu0 }
 0x1dd   : > { %v2872_v31 = vadd.f32 %v4057_v20, %v5041_v40  ;;  %v4059_v41 = vadd.f32 %v4012_v1, %v3772_v61  ;;  %v2707_v32 = vpop.f32.mrb[3].mxu0 }
 0x1de   : > { %v2870_v56 = vadd.f32 %v4058_v28, %v5041_v40  ;;  %v4060_v33 = vadd.f32 %v2707_v32, %v1176_v14 }
 0x1df   : > { %2904 = vst [vmem:[%s5046_s11 + $0x10] sm:$0xff] %v2872_v31  ;;  %v2873_v34 = vadd.f32 %v4059_v41, %v5041_v40 }
 0x1e0   : > { %2902 = vst [vmem:[%s5046_s11] sm:$0xff] %v2870_v56  ;;  %v2871_v39 = vadd.f32 %v4060_v33, %v5041_v40 }
 0x1e1   : > { %2905 = vst [vmem:[%s5046_s11 + $0x18] sm:$0xff] %v2873_v34 }
 0x1e2   : > { %2903 = vst [vmem:[%s5046_s11 + $0x8] sm:$0xff] %v2871_v39  ;;  %v4015_v52 = vpop.f32.mrb[4].mxu0 }
 0x1e3   : > { %v4061_v35 = vadd.f32 %v4015_v52, %v3775_v6  ;;  %v2720_v46 = vpop.f32.mrb[5].mxu0 }
 0x1e4   : > { %v4062_v47 = vadd.f32 %v2720_v46, %v1189_v12  ;;  %v4016_v13 = vpop.f32.mrb[6].mxu0 }
 0x1e5   : > { %v2876_v48 = vadd.f32 %v4061_v35, %v5041_v40  ;;  %v4063_v50 = vadd.f32 %v4016_v13, %v3776_v11  ;;  %v2723_v53 = vpop.f32.mrb[7].mxu0 }
 0x1e6   : > { %v2874_v55 = vadd.f32 %v4062_v47, %v5041_v40  ;;  %v4064_v54 = vadd.f32 %v2723_v53, %v1192_v23 }
 0x1e7   : > { %2908 = vst [vmem:[%s5046_s11 + $0x30] sm:$0xff] %v2876_v48  ;;  %v2877_v3 = vadd.f32 %v4063_v50, %v5041_v40 }
 0x1e8   : > { %2906 = vst [vmem:[%s5046_s11 + $0x20] sm:$0xff] %v2874_v55  ;;  %v2875_v57 = vadd.f32 %v4064_v54, %v5041_v40 }
 0x1e9   : > { %2909 = vst [vmem:[%s5046_s11 + $0x38] sm:$0xff] %v2877_v3 }
 0x1ea   : > { %2907 = vst [vmem:[%s5046_s11 + $0x28] sm:$0xff] %v2875_v57  ;;  %v4019_v60 = vpop.f32.mrb[8].mxu0 }
 0x1eb   : > { %v4065_v62 = vadd.f32 %v4019_v60, %v3779_v16  ;;  %v2736_v63 = vpop.f32.mrb[9].mxu0 }
 0x1ec   : > { %v4066_v5 = vadd.f32 %v2736_v63, %v1205_v15  ;;  %v4020_v8 = vpop.f32.mrb[10].mxu0 }
 0x1ed   : > { %v2880_v49 = vadd.f32 %v4065_v62, %v5041_v40  ;;  %v4067_v7 = vadd.f32 %v4020_v8, %v3780_v29  ;;  %v2739_v10 = vpop.f32.mrb[11].mxu0 }
 0x1ee   : > { %v2878_v22 = vadd.f32 %v4066_v5, %v5041_v40  ;;  %v4068_v24 = vadd.f32 %v2739_v10, %v1208_v17 }
 0x1ef   : > { %2912 = vst [vmem:[%s5046_s11 + $0x50] sm:$0xff] %v2880_v49  ;;  %v2881_v36 = vadd.f32 %v4067_v7, %v5041_v40 }
 0x1f0   : > { %2910 = vst [vmem:[%s5046_s11 + $0x40] sm:$0xff] %v2878_v22  ;;  %v2879_v38 = vadd.f32 %v4068_v24, %v5041_v40 }
 0x1f1   : > { %2913 = vst [vmem:[%s5046_s11 + $0x58] sm:$0xff] %v2881_v36 }
 0x1f2   : > { %2911 = vst [vmem:[%s5046_s11 + $0x48] sm:$0xff] %v2879_v38  ;;  %v4023_v4 = vpop.f32.mrb[12].mxu0 }
 0x1f3   : > { %v4069_v21 = vadd.f32 %v4023_v4, %v3783_v18  ;;  %v2752_v26 = vpop.f32.mrb[13].mxu0 }
 0x1f4   : > { %v4070_v27 = vadd.f32 %v2752_v26, %v1221_v25  ;;  %v4024_v42 = vpop.f32.mrb[14].mxu0 }
 0x1f5   : > { %v2884_v51 = vadd.f32 %v4069_v21, %v5041_v40  ;;  %v4071_v43 = vadd.f32 %v4024_v42, %v3784_v19  ;;  %v2755_v44 = vpop.f32.mrb[15].mxu0 }
 0x1f6   : > { %v2882_v45 = vadd.f32 %v4070_v27, %v5041_v40  ;;  %v4072_v58 = vadd.f32 %v2755_v44, %v1224_v30 }
 0x1f7   : > { %2916 = vst [vmem:[%s5046_s11 + $0x70] sm:$0xff] %v2884_v51  ;;  %v2885_v0 = vadd.f32 %v4071_v43, %v5041_v40 }
 0x1f8   : > { %2914 = vst [vmem:[%s5046_s11 + $0x60] sm:$0xff] %v2882_v45  ;;  %v2883_v59 = vadd.f32 %v4072_v58, %v5041_v40 }
 0x1f9   : > { %2917 = vst [vmem:[%s5046_s11 + $0x78] sm:$0xff] %v2885_v0  ;;  %v3835_v9 = vpop.f32.mrb[16].mxu1 }
 0x1fa   : > { %2915 = vst [vmem:[%s5046_s11 + $0x68] sm:$0xff] %v2883_v59  ;;  %v4027_v61 = vpop.f32.mrb[16].mxu0  ;;  %v1543_v14 = vpop.f32.mrb[17].mxu1 }
 0x1fb   : > { %v4073_v6 = vadd.f32 %v4027_v61, %v3835_v9  ;;  %v2768_v12 = vpop.f32.mrb[17].mxu0  ;;  %v3836_v11 = vpop.f32.mrb[18].mxu1 }
 0x1fc   : > { %v4074_v23 = vadd.f32 %v2768_v12, %v1543_v14  ;;  %v4028_v16 = vpop.f32.mrb[18].mxu0  ;;  %v1546_v15 = vpop.f32.mrb[19].mxu1 }
 0x1fd   : > { %v2888_v29 = vadd.f32 %v4073_v6, %v5041_v40  ;;  %v4075_v17 = vadd.f32 %v4028_v16, %v3836_v11  ;;  %v2771_v18 = vpop.f32.mrb[19].mxu0 }
 0x1fe   : > { %v2886_v25 = vadd.f32 %v4074_v23, %v5041_v40  ;;  %v4076_v19 = vadd.f32 %v2771_v18, %v1546_v15 }
 0x1ff   : > { %2920 = vst [vmem:[%s5046_s11 + $0x90] sm:$0xff] %v2888_v29  ;;  %v2889_v30 = vadd.f32 %v4075_v17, %v5041_v40 }
 0x200   : > { %2918 = vst [vmem:[%s5046_s11 + $0x80] sm:$0xff] %v2886_v25  ;;  %v2887_v2 = vadd.f32 %v4076_v19, %v5041_v40 }
 0x201   : > { %2921 = vst [vmem:[%s5046_s11 + $0x98] sm:$0xff] %v2889_v30  ;;  %v3839_v20 = vpop.f32.mrb[20].mxu1 }
 0x202   : > { %2919 = vst [vmem:[%s5046_s11 + $0x88] sm:$0xff] %v2887_v2  ;;  %v4031_v37 = vpop.f32.mrb[20].mxu0  ;;  %v1559_v28 = vpop.f32.mrb[21].mxu1 }
 0x203   : > { %v4077_v1 = vadd.f32 %v4031_v37, %v3839_v20  ;;  %v2784_v31 = vpop.f32.mrb[21].mxu0  ;;  %v3840_v41 = vpop.f32.mrb[22].mxu1 }
 0x204   : > { %v4078_v32 = vadd.f32 %v2784_v31, %v1559_v28  ;;  %v4032_v56 = vpop.f32.mrb[22].mxu0  ;;  %v1562_v33 = vpop.f32.mrb[23].mxu1 }
 0x205   : > { %v2892_v34 = vadd.f32 %v4077_v1, %v5041_v40  ;;  %v4079_v39 = vadd.f32 %v4032_v56, %v3840_v41  ;;  %v2787_v52 = vpop.f32.mrb[23].mxu0 }
 0x206   : > { %v2890_v35 = vadd.f32 %v4078_v32, %v5041_v40  ;;  %v4080_v46 = vadd.f32 %v2787_v52, %v1562_v33 }
 0x207   : > { %2924 = vst [vmem:[%s5046_s11 + $0xb0] sm:$0xff] %v2892_v34  ;;  %v2893_v47 = vadd.f32 %v4079_v39, %v5041_v40 }
 0x208   : > { %2922 = vst [vmem:[%s5046_s11 + $0xa0] sm:$0xff] %v2890_v35  ;;  %v2891_v13 = vadd.f32 %v4080_v46, %v5041_v40 }
 0x209   : > { %2925 = vst [vmem:[%s5046_s11 + $0xb8] sm:$0xff] %v2893_v47  ;;  %v3843_v48 = vpop.f32.mrb[24].mxu1 }
 0x20a   : > { %2923 = vst [vmem:[%s5046_s11 + $0xa8] sm:$0xff] %v2891_v13  ;;  %v4035_v50 = vpop.f32.mrb[24].mxu0  ;;  %v1575_v53 = vpop.f32.mrb[25].mxu1 }
 0x20b   : > { %v4081_v55 = vadd.f32 %v4035_v50, %v3843_v48  ;;  %v2800_v54 = vpop.f32.mrb[25].mxu0  ;;  %v3844_v3 = vpop.f32.mrb[26].mxu1 }
 0x20c   : > { %v4082_v57 = vadd.f32 %v2800_v54, %v1575_v53  ;;  %v4036_v60 = vpop.f32.mrb[26].mxu0  ;;  %v1578_v62 = vpop.f32.mrb[27].mxu1 }
 0x20d   : > { %v2896_v63 = vadd.f32 %v4081_v55, %v5041_v40  ;;  %v4083_v5 = vadd.f32 %v4036_v60, %v3844_v3  ;;  %v2803_v8 = vpop.f32.mrb[27].mxu0 }
 0x20e   : > { %v2894_v49 = vadd.f32 %v4082_v57, %v5041_v40  ;;  %v4084_v7 = vadd.f32 %v2803_v8, %v1578_v62 }
 0x20f   : > { %2928 = vst [vmem:[%s5046_s11 + $0xd0] sm:$0xff] %v2896_v63  ;;  %v2897_v10 = vadd.f32 %v4083_v5, %v5041_v40 }
 0x210   : > { %2926 = vst [vmem:[%s5046_s11 + $0xc0] sm:$0xff] %v2894_v49  ;;  %v2895_v22 = vadd.f32 %v4084_v7, %v5041_v40 }
 0x211   : > { %2929 = vst [vmem:[%s5046_s11 + $0xd8] sm:$0xff] %v2897_v10  ;;  %v3847_v24 = vpop.f32.mrb[28].mxu1 }
 0x212   : > { %2927 = vst [vmem:[%s5046_s11 + $0xc8] sm:$0xff] %v2895_v22  ;;  %v4039_v36 = vpop.f32.mrb[28].mxu0  ;;  %v1591_v38 = vpop.f32.mrb[29].mxu1 }
 0x213   : > { %v4085_v4 = vadd.f32 %v4039_v36, %v3847_v24  ;;  %v2816_v21 = vpop.f32.mrb[29].mxu0  ;;  %v3848_v26 = vpop.f32.mrb[30].mxu1 }
 0x214   : > { %v4086_v27 = vadd.f32 %v2816_v21, %v1591_v38  ;;  %v4040_v42 = vpop.f32.mrb[30].mxu0  ;;  %v1594_v51 = vpop.f32.mrb[31].mxu1 }
 0x215   : > { %v2900_v43 = vadd.f32 %v4085_v4, %v5041_v40  ;;  %v4087_v44 = vadd.f32 %v4040_v42, %v3848_v26  ;;  %v2819_v45 = vpop.f32.mrb[31].mxu0 }
 0x216   : > { %v2898_v58 = vadd.f32 %v4086_v27, %v5041_v40  ;;  %v4088_v0 = vadd.f32 %v2819_v45, %v1594_v51 }
 0x217   : > { %2932 = vst [vmem:[%s5046_s11 + $0xf0] sm:$0xff] %v2900_v43  ;;  %v2901_v59 = vadd.f32 %v4087_v44, %v5041_v40 }
 0x218   : > { %2930 = vst [vmem:[%s5046_s11 + $0xe0] sm:$0xff] %v2898_v58  ;;  %v2899_v9 = vadd.f32 %v4088_v0, %v5041_v40 }
 0x219   : > { %2933 = vst [vmem:[%s5046_s11 + $0xf8] sm:$0xff] %v2901_v59 }
 0x21a   : > { %2931 = vst [vmem:[%s5046_s11 + $0xe8] sm:$0xff] %v2899_v9 }
 0x21b PF: > { %s13_s12 = sadd.s32 1, %s4408_s12  }
 0x21c   : > { %p10_p4 = scmp.ge.s32.totalorder %s13_s12, 4  }
 0x21e   :  { %12 = sbr.rel (!%p10_p4) target bundleno = 1 (0x1), region = 72 }

// kernel: resnet_generator_forward.45
= control target key start
LH: loop header
LB: loop body
LE: loop exit
PB: predicated region body
PF: predicated region fallthrough
CT: control target
= control target key end

     0   :  { %s5034_s21 = smov 0   ;;  %s5820_s0 = inlined_call_operand.vmem [shape: f32[2,18,18,128], index: 0, kind: input, shape index: {}]   ;;  %s5821_s1 = inlined_call_operand.vmem [shape: bf16[9,128,128], index: 1, kind: input, shape index: {}]   ;;  %s5822_s2 = inlined_call_operand.vmem [shape: f32[1,128], index: 2, kind: input, shape index: {}]   ;;  %s5823_s3 = inlined_call_operand.vmem [shape: f32[2,256,128], index: 3, kind: input, shape index: {}]   ;;  %s5824_s4 = inlined_call_operand.vmem [shape: bf16[128,128], index: 4, kind: input, shape index: {}]   ;;  %s5825_s5 = inlined_call_operand.vmem [shape: f32[1,128], index: 5, kind: input, shape index: {}]   ;;  %s5826_s6 = inlined_call_operand.vmem [shape: f32[2,256,128], index: 6, kind: output, shape index: {}]  }
   0x1 LB: > { %s3446_s22 = sadd.s32 4294967295, %s4997_s21   ;;  %p3450_p0 = scmp.ge.s32.totalorder %s4997_s21, 1  ;;  %s4997_s21 = sphi %s5034_s21, %s16_s21  }
   0x2   : > { %p222_p1 = scmp.lt.s32.totalorder %s4997_s21, 3 }
   0x4   : > { %p223_p2 = pnand %p3450_p0, %p222_p1 }
   0x5   : > { %v4911_v0 = vld [vmem:[%s5821_s1 + $0x40] sm:$0xff] (!%p223_p2)   ;;  %p257_p3 = scmp.lt.s32.totalorder (!%p223_p2), %s3446_s22, 1  ;;  %v4913_v2 = vld [vmem:[%s5821_s1 + $0x48] sm:$0xff] (!%p223_p2)   ;;  %v4915_v4 = vld [vmem:[%s5821_s1 + $0x50] sm:$0xff] (!%p223_p2)  }
   0x6   : > { %226 = sbr.rel (%p223_p2) target bundleno = 572 (0x23c), region = 44  ;;  %v4912_v1 = vld [vmem:[%s5821_s1 + $0x140] sm:$0xff] (!%p223_p2)   ;;  %4102 = vmatprep.subr.bf16.mxu1 (!%p223_p2), %v4911_v0  ;;  %v4914_v3 = vld [vmem:[%s5821_s1 + $0x148] sm:$0xff] (!%p223_p2)   ;;  %v4916_v5 = vld [vmem:[%s5821_s1 + $0x150] sm:$0xff] (!%p223_p2)  }
   0x7   : > { %4342 = vmatprep.subr.bf16.mxu0 (!%p223_p2), %v4912_v1  ;;  %4103 = vmatpush3.bf16.msra.mxu1 (!%p223_p2), %v4911_v0  ;;  %v4917_v6 = vld [vmem:[%s5821_s1 + $0x58] sm:$0xff] (!%p223_p2)   ;;  %v4919_v8 = vld [vmem:[%s5821_s1 + $0x60] sm:$0xff] (!%p223_p2)   ;;  %v4921_v10 = vld [vmem:[%s5821_s1 + $0x68] sm:$0xff] (!%p223_p2)  }
   0x8   : > { %4343 = vmatpush3.bf16.msra.mxu0 (!%p223_p2), %v4912_v1  ;;  %4104 = vmatprep.subr.bf16.mxu1 (!%p223_p2), %v4913_v2  ;;  %v4918_v7 = vld [vmem:[%s5821_s1 + $0x158] sm:$0xff] (!%p223_p2)   ;;  %v4920_v9 = vld [vmem:[%s5821_s1 + $0x160] sm:$0xff] (!%p223_p2)   ;;  %v4922_v14 = vld [vmem:[%s5821_s1 + $0x168] sm:$0xff] (!%p223_p2)  }
   0x9   : > { %4344 = vmatprep.subr.bf16.mxu0 (!%p223_p2), %v4914_v3  ;;  %v4923_v18 = vld [vmem:[%s5821_s1 + $0x70] sm:$0xff] (!%p223_p2)   ;;  %v4925_v20 = vld [vmem:[%s5821_s1 + $0x78] sm:$0xff] (!%p223_p2)   ;;  %v4927_v24 = vld [vmem:[%s5821_s1] sm:$0xff] (!%p223_p2)  }
   0xa   : > { %v4924_v19 = vld [vmem:[%s5821_s1 + $0x170] sm:$0xff] (!%p223_p2)   ;;  %v4926_v21 = vld [vmem:[%s5821_s1 + $0x178] sm:$0xff] (!%p223_p2)   ;;  %v4928_v27 = vld [vmem:[%s5821_s1 + $0x180] sm:$0xff] (!%p223_p2)  }
   0xb   : > { %4105 = vmatpush3.bf16.msra.mxu1 (!%p223_p2), %v4913_v2  ;;  %v4929_v38 = vld [vmem:[%s5821_s1 + $0x8] sm:$0xff] (!%p223_p2)   ;;  %v4931_v45 = vld [vmem:[%s5821_s1 + $0x10] sm:$0xff] (!%p223_p2)   ;;  %v4933_v52 = vld [vmem:[%s5821_s1 + $0x18] sm:$0xff] (!%p223_p2)  }
   0xc   : > { %4345 = vmatpush3.bf16.msra.mxu0 (!%p223_p2), %v4914_v3  ;;  %4106 = vmatprep.subr.bf16.mxu1 (!%p223_p2), %v4915_v4  ;;  %v4930_v40 = vld [vmem:[%s5821_s1 + $0x188] sm:$0xff] (!%p223_p2)   ;;  %v4932_v47 = vld [vmem:[%s5821_s1 + $0x190] sm:$0xff] (!%p223_p2)   ;;  %v4934_v55 = vld [vmem:[%s5821_s1 + $0x198] sm:$0xff] (!%p223_p2)  }
   0xd   : > { %s5828_s22 = smov (!%p257_p3, %s3446_s22), 1  ;;  %4346 = vmatprep.subr.bf16.mxu0 %v4916_v5  ;;  %v4935_v62 = vld [vmem:[%s5821_s1 + $0x20] sm:$0xff]  }
   0xe   : > { %s4902_s15 = smul.u32 432, %s5828_s22  ;;  %v4936_v0 = vld [vmem:[%s5821_s1 + $0x1a0] sm:$0xff]  }
   0xf   : > { %4107 = vmatpush3.bf16.msra.mxu1 %v4915_v4 }
  0x10   : > { %4347 = vmatpush3.bf16.msra.mxu0 %v4916_v5  ;;  %4108 = vmatprep.subr.bf16.mxu1 %v4917_v6  ;;  %s5078_s24 = scalar_lea.vmem %s5820_s0, %s4902_s15  ;;  %s3860_s15 = sshll.u32 %s5828_s22, 8 }
  0x11   : > { %4348 = vmatprep.subr.bf16.mxu0 %v4918_v7  ;;  %v337_v11 = vld [vmem:[%s5078_s24 + $0x1] sm:$0xff]  ;;  %v338_v12 = vld [vmem:[%s5078_s24 + $0x9] sm:$0xff]  ;;  %v339_v22 = vld [vmem:[%s5078_s24 + $0x19] sm:$0xff]  ;;  %s5635_s18 = scalar_lea.vmem %s5823_s3, %s3860_s15  ;;  %s5722_s27 = scalar_lea.vmem %s5826_s6, %s3860_s15 }
  0x12   : > { %v3624_v13 = vld [vmem:[%s5078_s24 + $0x1a] sm:$0xff]  ;;  %v369_v15 = vpack.c.bf16 %v338_v12, %v337_v11  ;;  %v3625_v16 = vld [vmem:[%s5078_s24 + $0x22] sm:$0xff]  ;;  %v3626_v25 = vld [vmem:[%s5078_s24 + $0x32] sm:$0xff] }
  0x13   : > { %4109 = vmatpush3.bf16.msra.mxu1 %v4917_v6  ;;  %v5090_v17 = vpack.c.bf16 %v3625_v16, %v3624_v13  ;;  %v340_v23 = vld [vmem:[%s5078_s24 + $0x21] sm:$0xff]  ;;  %v341_v28 = vld [vmem:[%s5078_s24 + $0x31] sm:$0xff]  ;;  %v342_v29 = vld [vmem:[%s5078_s24 + $0x39] sm:$0xff] }
  0x14   : > { %4349 = vmatpush3.bf16.msra.mxu0 %v4918_v7  ;;  %4110 = vmatprep.subr.bf16.mxu1 %v4919_v8  ;;  %v3627_v26 = vld [vmem:[%s5078_s24 + $0x3a] sm:$0xff]  ;;  %v370_v30 = vpack.c.bf16 %v340_v23, %v339_v22  ;;  %v3628_v31 = vld [vmem:[%s5078_s24 + $0x4a] sm:$0xff]  ;;  %v3629_v32 = vld [vmem:[%s5078_s24 + $0x52] sm:$0xff]  ;;  %v5121_v34 = vpack.c.bf16 %v342_v29, %v341_v28 }
  0x15   : > { %4350 = vmatprep.subr.bf16.mxu0 %v4920_v9  ;;  %4118 = vmatprep.mubr.bf16.mxu1 %v369_v15  ;;  %v5119_v33 = vpack.c.bf16 %v3627_v26, %v3626_v25  ;;  %v5123_v35 = vpack.c.bf16 %v3629_v32, %v3628_v31  ;;  %v343_v36 = vld [vmem:[%s5078_s24 + $0x49] sm:$0xff]  ;;  %v344_v37 = vld [vmem:[%s5078_s24 + $0x51] sm:$0xff]  ;;  %v345_v42 = vld [vmem:[%s5078_s24 + $0x61] sm:$0xff] }
  0x16   : > { %4358 = vmatprep.mubr.bf16.mxu0 %v5090_v17  ;;  %v3630_v39 = vld [vmem:[%s5078_s24 + $0x62] sm:$0xff]  ;;  %v3631_v41 = vld [vmem:[%s5078_s24 + $0x6a] sm:$0xff]  ;;  %v3632_v44 = vld [vmem:[%s5078_s24 + $0x7a] sm:$0xff]  ;;  %v5148_v48 = vpack.c.bf16 %v344_v37, %v343_v36 }
  0x17   : > { %4111 = vmatpush3.bf16.msra.mxu1 %v4919_v8  ;;  %v346_v43 = vld [vmem:[%s5078_s24 + $0x69] sm:$0xff]  ;;  %v5150_v49 = vpack.c.bf16 %v3631_v41, %v3630_v39  ;;  %v347_v53 = vld [vmem:[%s5078_s24 + $0x79] sm:$0xff]  ;;  %v348_v54 = vld [vmem:[%s5078_s24 + $0x81] sm:$0xff] }
  0x18   : > { %4351 = vmatpush3.bf16.msra.mxu0 %v4920_v9  ;;  %4112 = vmatprep.subr.bf16.mxu1 %v4921_v10  ;;  %v3633_v46 = vld [vmem:[%s5078_s24 + $0x82] sm:$0xff]  ;;  %v5152_v50 = vpack.c.bf16 %v346_v43, %v345_v42  ;;  %v3634_v56 = vld [vmem:[%s5078_s24 + $0x92] sm:$0xff]  ;;  %v3635_v57 = vld [vmem:[%s5078_s24 + $0x9a] sm:$0xff]  ;;  %v5177_v63 = vpack.c.bf16 %v348_v54, %v347_v53 }
  0x19   : > { %4352 = vmatprep.subr.bf16.mxu0 %v4922_v14  ;;  %v5154_v51 = vpack.c.bf16 %v3633_v46, %v3632_v44  ;;  %v349_v58 = vld [vmem:[%s5078_s24 + $0x91] sm:$0xff]  ;;  %v350_v59 = vld [vmem:[%s5078_s24 + $0x99] sm:$0xff]  ;;  %v5182_v1 = vpack.c.bf16 %v3635_v57, %v3634_v56  ;;  %v351_v4 = vld [vmem:[%s5078_s24 + $0xa9] sm:$0xff] }
  0x1a   : > { %v3636_v60 = vld [vmem:[%s5078_s24 + $0xaa] sm:$0xff]  ;;  %v3637_v61 = vld [vmem:[%s5078_s24 + $0xb2] sm:$0xff]  ;;  %v5184_v2 = vpack.c.bf16 %v350_v59, %v349_v58  ;;  %v3638_v7 = vld [vmem:[%s5078_s24 + $0xc2] sm:$0xff] }
  0x1b   : > { %4113 = vmatpush3.bf16.msra.mxu1 %v4921_v10  ;;  %v5186_v3 = vpack.c.bf16 %v3637_v61, %v3636_v60  ;;  %v352_v5 = vld [vmem:[%s5078_s24 + $0xb1] sm:$0xff]  ;;  %v4937_v6 = vld [vmem:[%s5821_s1 + $0x28] sm:$0xff]   ;;  %v3640_v12 = vld [vmem:[%s5078_s24 + $0xda] sm:$0xff] }
  0x1c   : > { %4353 = vmatpush3.bf16.msra.mxu0 %v4922_v14  ;;  %4114 = vmatprep.subr.bf16.mxu1 %v4923_v18  ;;  %v4938_v8 = vld [vmem:[%s5821_s1 + $0x1a8] sm:$0xff]   ;;  %v4939_v14 = vld [vmem:[%s5821_s1 + $0x30] sm:$0xff]   ;;  %v5209_v15 = vpack.c.bf16 %v352_v5, %v351_v4  ;;  %v4941_v23 = vld [vmem:[%s5821_s1 + $0x38] sm:$0xff]  }
  0x1d   : > { %4354 = vmatprep.subr.bf16.mxu0 %v4924_v19  ;;  %v3639_v9 = vld [vmem:[%s5078_s24 + $0xca] sm:$0xff]  ;;  %v353_v10 = vld [vmem:[%s5078_s24 + $0xc1] sm:$0xff]  ;;  %v4942_v25 = vld [vmem:[%s5821_s1 + $0x1b8] sm:$0xff]  }
  0x1e   : > { %v354_v11 = vld [vmem:[%s5078_s24 + $0xc9] sm:$0xff]  ;;  %v356_v22 = vld [vmem:[%s5078_s24 + $0xe1] sm:$0xff]  ;;  %v358_v28 = vld [vmem:[%s5078_s24 + $0xf9] sm:$0xff] }
  0x1f   : > { %4115 = vmatpush3.bf16.msra.mxu1 %v4923_v18  ;;  %v3641_v13 = vld [vmem:[%s5078_s24 + $0xe2] sm:$0xff]  ;;  %v4940_v16 = vld [vmem:[%s5821_s1 + $0x1b0] sm:$0xff]   ;;  %v5214_v18 = vpack.c.bf16 %v3639_v9, %v3638_v7  ;;  %v3643_v26 = vld [vmem:[%s5078_s24 + $0xfa] sm:$0xff] }
  0x20   : > { %4355 = vmatpush3.bf16.msra.mxu0 %v4924_v19  ;;  %4116 = vmatprep.subr.bf16.mxu1 %v4925_v20  ;;  %v5216_v19 = vpack.c.bf16 %v354_v11, %v353_v10  ;;  %v3644_v29 = vld [vmem:[%s5078_s24 + $0x10a] sm:$0xff]  ;;  %v5241_v31 = vld [vmem:[%s5821_s1 + $0x80] sm:$0xff]   ;;  %v3650_v58 = vld [vmem:[%s5078_s24 + $0x152] sm:$0xff] }
  0x21   : > { %4356 = vmatprep.subr.bf16.mxu0 %v4926_v21  ;;  %v5248_v36 = vld [vmem:[%s5821_s1 + $0x1c0] sm:$0xff]   ;;  %v360_v41 = vld [vmem:[%s5078_s24 + $0x111] sm:$0xff] }
  0x22   : > { %v3646_v42 = vld [vmem:[%s5078_s24 + $0x122] sm:$0xff]  ;;  %v3647_v43 = vld [vmem:[%s5078_s24 + $0x12a] sm:$0xff]  ;;  %v3648_v46 = vld [vmem:[%s5078_s24 + $0x13a] sm:$0xff] }
  0x23   : > { %4117 = vmatpush3.bf16.msra.mxu1 %v4925_v20  ;;  %v5218_v20 = vpack.c.bf16 %v3641_v13, %v3640_v12  ;;  %v361_v44 = vld [vmem:[%s5078_s24 + $0x121] sm:$0xff]  ;;  %v5272_v53 = vpack.c.bf16 %v3647_v43, %v3646_v42  ;;  %v363_v56 = vld [vmem:[%s5078_s24 + $0x139] sm:$0xff]  ;;  %v365_v60 = vld [vmem:[%s5078_s24 + $0x151] sm:$0xff] }
  0x24   : > { %4357 = vmatpush3.bf16.msra.mxu0 %v4926_v21  ;;  %4150 = vmatprep.subr.bf16.mxu1 %v4927_v24  ;;  %v355_v21 = vld [vmem:[%s5078_s24 + $0xd9] sm:$0xff]  ;;  %v364_v57 = vld [vmem:[%s5078_s24 + $0x141] sm:$0xff]  ;;  %v368_v9 = vld [vmem:[%s5078_s24 + $0x171] sm:$0xff] }
  0x25   : > { %4390 = vmatprep.subr.bf16.mxu0 %v4928_v27  ;;  %v5243_v32 = vpack.c.bf16 %v356_v22, %v355_v21  ;;  %v3651_v59 = vld [vmem:[%s5078_s24 + $0x15a] sm:$0xff]  ;;  %v5290_v4 = vpack.c.bf16 %v364_v57, %v363_v56  ;;  %v3654_v10 = vld [vmem:[%s5078_s24 + $0x182] sm:$0xff]  ;;  %v3655_v11 = vld [vmem:[%s5078_s24 + $0x18a] sm:$0xff] }
  0x26   : > { %4119 = vmatmul.mubr.bf16.vlgmr.msra.gmra.mrb[0].mxu1 %v370_v30  ;;  %v3645_v30 = vld [vmem:[%s5078_s24 + $0x112] sm:$0xff]  ;;  %v5292_v5 = vpack.c.bf16 %v3651_v59, %v3650_v58  ;;  %v273_v12 = vld [vmem:[%s5078_s24] sm:$0xff]  ;;  %v274_v13 = vld [vmem:[%s5078_s24 + $0x8] sm:$0xff]  ;;  %v1786_v22 = vpack.c.bf16 %v3655_v11, %v3654_v10 }
  0x27   : > { %4359 = vmatmul.mubr.bf16.vlgmr.msra.gmra.mrb[0].mxu0 %v5119_v33  ;;  %4151 = vmatpush3.bf16.msra.mxu1 %v4927_v24  ;;  %v3642_v24 = vld [vmem:[%s5078_s24 + $0xf2] sm:$0xff]  ;;  %v5254_v39 = vpack.c.bf16 %v3645_v30, %v3644_v29  ;;  %v3684_v29 = vld [vmem:[%s5078_s24 + $0x60] sm:$0xff]  ;;  %v4945_v43 = vld [vmem:[%s5821_s1 + $0x88] sm:$0xff]  }
  0x28   : > { %4391 = vmatpush3.bf16.msra.mxu0 %v4928_v27  ;;  %4122 = vmatprep.mubr.bf16.mxu1 %v5121_v34  ;;  %v357_v27 = vld [vmem:[%s5078_s24 + $0xf1] sm:$0xff]  ;;  %v5250_v37 = vpack.c.bf16 %v3643_v26, %v3642_v24  ;;  %v366_v61 = vld [vmem:[%s5078_s24 + $0x159] sm:$0xff] }
  0x29   : > { %4362 = vmatprep.mubr.bf16.mxu0 %v5123_v35  ;;  %4152 = vmatprep.subr.bf16.mxu1 %v4929_v38  ;;  %v276_v26 = vld [vmem:[%s5078_s24 + $0x20] sm:$0xff]  ;;  %v4947_v56 = vld [vmem:[%s5821_s1 + $0x90] sm:$0xff]   ;;  %v3689_v57 = vld [vmem:[%s5078_s24 + $0x98] sm:$0xff] }
  0x2a   : > { %4392 = vmatprep.subr.bf16.mxu0 %v4930_v40  ;;  %v4949_v59 = vld [vmem:[%s5821_s1 + $0x98] sm:$0xff]   ;;  %v4952_v10 = vld [vmem:[%s5821_s1 + $0x1e0] sm:$0xff]  }
  0x2b   : > { %4153 = vmatpush3.bf16.msra.mxu1 %v4929_v38  ;;  %v5252_v38 = vpack.c.bf16 %v358_v28, %v357_v27  ;;  %v3682_v27 = vld [vmem:[%s5078_s24 + $0x48] sm:$0xff]  ;;  %v3683_v28 = vld [vmem:[%s5078_s24 + $0x50] sm:$0xff] }
  0x2c   : > { %4393 = vmatpush3.bf16.msra.mxu0 %v4930_v40  ;;  %4154 = vmatprep.subr.bf16.mxu1 %v4931_v45  ;;  %v359_v40 = vld [vmem:[%s5078_s24 + $0x109] sm:$0xff] }
  0x2d   : > { %4394 = vmatprep.subr.bf16.mxu0 %v4932_v47 }
  0x2e   : > { %4123 = vmatmul.mubr.bf16.gmra.mrb[4].mxu1 %v5148_v48 }
  0x2f   : > { %4363 = vmatmul.mubr.bf16.gmra.mrb[4].mxu0 %v5150_v49  ;;  %4126 = vmatprep.mubr.bf16.mxu1 %v5152_v50 }
  0x30   : > { %4366 = vmatprep.mubr.bf16.mxu0 %v5154_v51  ;;  %4155 = vmatpush3.bf16.msra.mxu1 %v4931_v45  ;;  %v362_v45 = vld [vmem:[%s5078_s24 + $0x129] sm:$0xff] }
  0x31   : > { %4395 = vmatpush3.bf16.msra.mxu0 %v4932_v47  ;;  %4156 = vmatprep.subr.bf16.mxu1 %v4933_v52  ;;  %v3649_v47 = vld [vmem:[%s5078_s24 + $0x142] sm:$0xff]  ;;  %v5274_v54 = vpack.c.bf16 %v362_v45, %v361_v44  ;;  %v3686_v45 = vld [vmem:[%s5078_s24 + $0x78] sm:$0xff] }
  0x32   : > { %4396 = vmatprep.subr.bf16.mxu0 %v4934_v55  ;;  %v4946_v44 = vld [vmem:[%s5821_s1 + $0x1c8] sm:$0xff]  }
  0x34   : > { %4157 = vmatpush3.bf16.msra.mxu1 %v4933_v52  ;;  %v5270_v52 = vpack.c.bf16 %v360_v41, %v359_v40  ;;  %v3685_v40 = vld [vmem:[%s5078_s24 + $0x68] sm:$0xff]  ;;  %v5324_v41 = vpack.c.bf16 %v3683_v28, %v3682_v27  ;;  %v4956_v27 = vld [vmem:[%s5821_s1 + $0x1f0] sm:$0xff]  }
  0x35   : > { %4397 = vmatpush3.bf16.msra.mxu0 %v4934_v55  ;;  %4158 = vmatprep.subr.bf16.mxu1 %v4935_v62  ;;  %v5276_v55 = vpack.c.bf16 %v3649_v47, %v3648_v46  ;;  %v5326_v42 = vpack.c.bf16 %v3685_v40, %v3684_v29  ;;  %v3687_v46 = vld [vmem:[%s5078_s24 + $0x80] sm:$0xff]  ;;  %v3688_v47 = vld [vmem:[%s5078_s24 + $0x90] sm:$0xff]  ;;  %v4957_v40 = vld [vmem:[%s5821_s1 + $0xb8] sm:$0xff]  }
  0x36   : > { %4127 = vmatmul.mubr.bf16.gmra.mrb[8].mxu1 %v5177_v63  ;;  %4398 = vmatprep.subr.bf16.mxu0 %v4936_v0  ;;  %v5352_v58 = vpack.c.bf16 %v3689_v57, %v3688_v47  ;;  %v3701_v47 = vld [vmem:[%s5078_s24 + $0x128] sm:$0xff]  ;;  %v4960_v57 = vld [vmem:[%s5821_s1 + $0x200] sm:$0xff]  }
  0x37   : > { %4367 = vmatmul.mubr.bf16.gmra.mrb[8].mxu0 %v5182_v1  ;;  %4130 = vmatprep.mubr.bf16.mxu1 %v5184_v2 }
  0x38   : > { %4370 = vmatprep.mubr.bf16.mxu0 %v5186_v3  ;;  %4159 = vmatpush3.bf16.msra.mxu1 %v4935_v62  ;;  %v3652_v62 = vld [vmem:[%s5078_s24 + $0x16a] sm:$0xff] }
  0x39   : > { %4399 = vmatpush3.bf16.msra.mxu0 %v4936_v0  ;;  %4160 = vmatprep.subr.bf16.mxu1 %v4937_v6  ;;  %v3653_v0 = vld [vmem:[%s5078_s24 + $0x172] sm:$0xff] }
  0x3a   : > { %4400 = vmatprep.subr.bf16.mxu0 %v4938_v8  ;;  %v5296_v7 = vpack.c.bf16 %v3653_v0, %v3652_v62  ;;  %v4950_v62 = vld [vmem:[%s5821_s1 + $0x1d8] sm:$0xff]   ;;  %v3692_v0 = vld [vmem:[%s5078_s24 + $0xc0] sm:$0xff] }
  0x3c   : > { %4161 = vmatpush3.bf16.msra.mxu1 %v4937_v6  ;;  %v5294_v6 = vpack.c.bf16 %v366_v61, %v365_v60  ;;  %v3690_v60 = vld [vmem:[%s5078_s24 + $0xa8] sm:$0xff]  ;;  %v3691_v61 = vld [vmem:[%s5078_s24 + $0xb0] sm:$0xff] }
  0x3d   : > { %4401 = vmatpush3.bf16.msra.mxu0 %v4938_v8  ;;  %4162 = vmatprep.subr.bf16.mxu1 %v4939_v14  ;;  %v367_v8 = vld [vmem:[%s5078_s24 + $0x169] sm:$0xff]  ;;  %v5374_v11 = vpack.c.bf16 %v3691_v61, %v3690_v60  ;;  %v3702_v60 = vld [vmem:[%s5078_s24 + $0x138] sm:$0xff]  ;;  %v3703_v61 = vld [vmem:[%s5078_s24 + $0x140] sm:$0xff] }
  0x3e   : > { %4131 = vmatmul.mubr.bf16.gmra.mrb[12].mxu1 %v5209_v15  ;;  %4402 = vmatprep.subr.bf16.mxu0 %v4940_v16  ;;  %v5310_v21 = vpack.c.bf16 %v368_v9, %v367_v8  ;;  %v3693_v8 = vld [vmem:[%s5078_s24 + $0xc8] sm:$0xff]  ;;  %v4951_v9 = vld [vmem:[%s5821_s1 + $0xa0] sm:$0xff]  }
  0x3f   : > { %4371 = vmatmul.mubr.bf16.gmra.mrb[12].mxu0 %v5214_v18  ;;  %4134 = vmatprep.mubr.bf16.mxu1 %v5216_v19 }
  0x40   : > { %4374 = vmatprep.mubr.bf16.mxu0 %v5218_v20  ;;  %4163 = vmatpush3.bf16.msra.mxu1 %v4939_v14  ;;  %v3680_v14 = vld [vmem:[%s5078_s24 + $0x30] sm:$0xff] }
  0x41   : > { %4403 = vmatpush3.bf16.msra.mxu0 %v4940_v16  ;;  %4164 = vmatprep.subr.bf16.mxu1 %v4941_v23  ;;  %v3681_v16 = vld [vmem:[%s5078_s24 + $0x38] sm:$0xff] }
  0x42   : > { %4404 = vmatprep.subr.bf16.mxu0 %v4942_v25  ;;  %v5312_v24 = vpack.c.bf16 %v3681_v16, %v3680_v14  ;;  %v4954_v14 = vld [vmem:[%s5821_s1 + $0x1e8] sm:$0xff]   ;;  %v3694_v16 = vld [vmem:[%s5078_s24 + $0xd8] sm:$0xff] }
  0x44   : > { %4165 = vmatpush3.bf16.msra.mxu1 %v4941_v23  ;;  %v305_v23 = vpack.c.bf16 %v274_v13, %v273_v12  ;;  %v5376_v12 = vpack.c.bf16 %v3693_v8, %v3692_v0  ;;  %v4953_v13 = vld [vmem:[%s5821_s1 + $0xa8] sm:$0xff]   ;;  %v3705_v0 = vld [vmem:[%s5078_s24 + $0x158] sm:$0xff]  ;;  %v5434_v8 = vpack.c.bf16 %v3703_v61, %v3702_v60  ;;  %v4979_v60 = vld [vmem:[%s5821_s1 + $0x110] sm:$0xff]  }
  0x45   : > { %4405 = vmatpush3.bf16.msra.mxu0 %v4942_v25  ;;  %4198 = vmatprep.subr.bf16.mxu1 %v5241_v31  ;;  %v275_v25 = vld [vmem:[%s5078_s24 + $0x18] sm:$0xff] }
  0x46   : > { %4135 = vmatmul.mubr.bf16.gmra.mrb[16].mxu1 %v5243_v32  ;;  %4438 = vmatprep.subr.bf16.mxu0 %v5248_v36  ;;  %v5321_v30 = vpack.c.bf16 %v276_v26, %v275_v25  ;;  %v3697_v25 = vld [vmem:[%s5078_s24 + $0xf8] sm:$0xff]  ;;  %v4955_v26 = vld [vmem:[%s5821_s1 + $0xb0] sm:$0xff]  }
  0x47   : > { %4375 = vmatmul.mubr.bf16.gmra.mrb[16].mxu0 %v5250_v37  ;;  %4138 = vmatprep.mubr.bf16.mxu1 %v5252_v38  ;;  %v3800_v61 = vld [vmem:[%s5078_s24 + $0x92] sm:$0xff] }
  0x48   : > { %4378 = vmatprep.mubr.bf16.mxu0 %v5254_v39 }
  0x4e   : > { %4139 = vmatmul.mubr.bf16.gmra.mrb[20].mxu1 %v5270_v52 }
  0x4f   : > { %4379 = vmatmul.mubr.bf16.gmra.mrb[20].mxu0 %v5272_v53  ;;  %4142 = vmatprep.mubr.bf16.mxu1 %v5274_v54 }
  0x50   : > { %4382 = vmatprep.mubr.bf16.mxu0 %v5276_v55 }
  0x56   : > { %4143 = vmatmul.mubr.bf16.gmra.mrb[24].mxu1 %v5290_v4 }
  0x57   : > { %4383 = vmatmul.mubr.bf16.gmra.mrb[24].mxu0 %v5292_v5  ;;  %4146 = vmatprep.mubr.bf16.mxu1 %v5294_v6 }
  0x58   : > { %4386 = vmatprep.mubr.bf16.mxu0 %v5296_v7 }
  0x5e   : > { %4147 = vmatmul.mubr.bf16.gmra.mrb[28].mxu1 %v5310_v21 }
  0x5f   : > { %4387 = vmatmul.mubr.bf16.gmra.mrb[28].mxu0 %v1786_v22  ;;  %4166 = vmatprep.mubr.bf16.mxu1 %v305_v23  ;;  %v3695_v22 = vld [vmem:[%s5078_s24 + $0xe0] sm:$0xff]  ;;  %v3696_v23 = vld [vmem:[%s5078_s24 + $0xf0] sm:$0xff] }
  0x60   : > { %4406 = vmatprep.mubr.bf16.mxu0 %v5312_v24  ;;  %v5398_v28 = vpack.c.bf16 %v3695_v22, %v3694_v16  ;;  %v5400_v29 = vpack.c.bf16 %v3697_v25, %v3696_v23  ;;  %v3709_v16 = vld [vmem:[%s5078_s24 + $0x188] sm:$0xff]  ;;  %v3710_v25 = vld [vmem:[%s5078_s24 + $0x198] sm:$0xff] }
  0x66   : > { %4167 = vmatmul.mubr.bf16.vlgmr.msra.gmra.mrb[0].mxu1 %v5321_v30 }
  0x67   : > { %4407 = vmatmul.mubr.bf16.vlgmr.msra.gmra.mrb[0].mxu0 %v5324_v41  ;;  %4199 = vmatpush3.bf16.msra.mxu1 %v5241_v31  ;;  %v4948_v31 = vld [vmem:[%s5821_s1 + $0x1d0] sm:$0xff]  }
  0x68   : > { %4439 = vmatpush3.bf16.msra.mxu0 %v5248_v36  ;;  %4170 = vmatprep.mubr.bf16.mxu1 %v5312_v24  ;;  %v5350_v36 = vpack.c.bf16 %v3687_v46, %v3686_v45  ;;  %v3699_v45 = vld [vmem:[%s5078_s24 + $0x110] sm:$0xff]  ;;  %v3700_v46 = vld [vmem:[%s5078_s24 + $0x120] sm:$0xff] }
  0x69   : > { %4410 = vmatprep.mubr.bf16.mxu0 %v5326_v42  ;;  %4200 = vmatprep.subr.bf16.mxu1 %v4945_v43 }
  0x6a   : > { %4440 = vmatprep.subr.bf16.mxu0 %v4946_v44 }
  0x6b   : > { %4201 = vmatpush3.bf16.msra.mxu1 %v4945_v43  ;;  %v4958_v43 = vld [vmem:[%s5821_s1 + $0x1f8] sm:$0xff]  }
  0x6c   : > { %4441 = vmatpush3.bf16.msra.mxu0 %v4946_v44  ;;  %4202 = vmatprep.subr.bf16.mxu1 %v4947_v56  ;;  %v3698_v44 = vld [vmem:[%s5078_s24 + $0x108] sm:$0xff] }
  0x6d   : > { %4442 = vmatprep.subr.bf16.mxu0 %v4948_v31 }
  0x6e   : > { %4171 = vmatmul.mubr.bf16.gmra.mrb[4].mxu1 %v5324_v41 }
  0x6f   : > { %4411 = vmatmul.mubr.bf16.gmra.mrb[4].mxu0 %v5350_v36  ;;  %4174 = vmatprep.mubr.bf16.mxu1 %v5326_v42 }
  0x70   : > { %4414 = vmatprep.mubr.bf16.mxu0 %v5352_v58  ;;  %4203 = vmatpush3.bf16.msra.mxu1 %v4947_v56  ;;  %v4959_v56 = vld [vmem:[%s5821_s1 + $0xc0] sm:$0xff]  }
  0x71   : > { %4443 = vmatpush3.bf16.msra.mxu0 %v4948_v31  ;;  %4204 = vmatprep.subr.bf16.mxu1 %v4949_v59  ;;  %v5422_v31 = vpack.c.bf16 %v3699_v45, %v3698_v44  ;;  %v4961_v45 = vld [vmem:[%s5821_s1 + $0xc8] sm:$0xff]  }
  0x72   : > { %4444 = vmatprep.subr.bf16.mxu0 %v4950_v62 }
  0x74   : > { %4205 = vmatpush3.bf16.msra.mxu1 %v4949_v59  ;;  %v5424_v59 = vpack.c.bf16 %v3701_v47, %v3700_v46  ;;  %v4962_v46 = vld [vmem:[%s5821_s1 + $0x208] sm:$0xff]  }
  0x75   : > { %4445 = vmatpush3.bf16.msra.mxu0 %v4950_v62  ;;  %4206 = vmatprep.subr.bf16.mxu1 %v4951_v9  ;;  %v3704_v62 = vld [vmem:[%s5078_s24 + $0x150] sm:$0xff] }
  0x76   : > { %4175 = vmatmul.mubr.bf16.gmra.mrb[8].mxu1 %v5350_v36  ;;  %4446 = vmatprep.subr.bf16.mxu0 %v4952_v10 }
  0x77   : > { %4415 = vmatmul.mubr.bf16.gmra.mrb[8].mxu0 %v5374_v11  ;;  %4178 = vmatprep.mubr.bf16.mxu1 %v5352_v58 }
  0x78   : > { %4418 = vmatprep.mubr.bf16.mxu0 %v5376_v12  ;;  %4207 = vmatpush3.bf16.msra.mxu1 %v4951_v9  ;;  %v5436_v9 = vpack.c.bf16 %v3705_v0, %v3704_v62  ;;  %v4980_v62 = vld [vmem:[%s5824_s4 + $0x10] sm:$0xff]  }
  0x79   : > { %4447 = vmatpush3.bf16.msra.mxu0 %v4952_v10  ;;  %4208 = vmatprep.subr.bf16.mxu1 %v4953_v13  ;;  %v3706_v10 = vld [vmem:[%s5078_s24 + $0x168] sm:$0xff] }
  0x7a   : > { %4448 = vmatprep.subr.bf16.mxu0 %v4954_v14 }
  0x7c   : > { %4209 = vmatpush3.bf16.msra.mxu1 %v4953_v13  ;;  %v3707_v13 = vld [vmem:[%s5078_s24 + $0x170] sm:$0xff] }
  0x7d   : > { %4449 = vmatpush3.bf16.msra.mxu0 %v4954_v14  ;;  %4210 = vmatprep.subr.bf16.mxu1 %v4955_v26  ;;  %v3708_v14 = vld [vmem:[%s5078_s24 + $0x180] sm:$0xff]  ;;  %v5446_v22 = vpack.c.bf16 %v3707_v13, %v3706_v10  ;;  %v4981_v10 = vld [vmem:[%s5821_s1 + $0x118] sm:$0xff]  }
  0x7e   : > { %4179 = vmatmul.mubr.bf16.gmra.mrb[12].mxu1 %v5374_v11  ;;  %4450 = vmatprep.subr.bf16.mxu0 %v4956_v27  ;;  %v5448_v23 = vpack.c.bf16 %v3709_v16, %v3708_v14  ;;  %v4982_v13 = vld [vmem:[%s5824_s4 + $0x18] sm:$0xff]   ;;  %v3802_v14 = vld [vmem:[%s5078_s24 + $0xaa] sm:$0xff] }
  0x7f   : > { %4419 = vmatmul.mubr.bf16.gmra.mrb[12].mxu0 %v5398_v28  ;;  %4182 = vmatprep.mubr.bf16.mxu1 %v5376_v12  ;;  %v3803_v16 = vld [vmem:[%s5078_s24 + $0xb2] sm:$0xff] }
  0x80   : > { %4422 = vmatprep.mubr.bf16.mxu0 %v5400_v29  ;;  %4211 = vmatpush3.bf16.msra.mxu1 %v4955_v26  ;;  %v3711_v26 = vld [vmem:[%s5078_s24 + $0x1a0] sm:$0xff] }
  0x81   : > { %4451 = vmatpush3.bf16.msra.mxu0 %v4956_v27  ;;  %4212 = vmatprep.subr.bf16.mxu1 %v4957_v40  ;;  %v820_v27 = vld [vmem:[%s5078_s24 + $0x2] sm:$0xff] }
  0x82   : > { %4452 = vmatprep.subr.bf16.mxu0 %v4958_v43 }
  0x84   : > { %4213 = vmatpush3.bf16.msra.mxu1 %v4957_v40  ;;  %v821_v40 = vld [vmem:[%s5078_s24 + $0xa] sm:$0xff] }
  0x85   : > { %4453 = vmatpush3.bf16.msra.mxu0 %v4958_v43  ;;  %4246 = vmatprep.subr.bf16.mxu1 %v4959_v56  ;;  %v2093_v43 = vpack.c.bf16 %v3711_v26, %v3710_v25  ;;  %v852_v44 = vpack.c.bf16 %v821_v40, %v820_v27  ;;  %v3804_v25 = vld [vmem:[%s5078_s24 + $0xc2] sm:$0xff]  ;;  %v3805_v26 = vld [vmem:[%s5078_s24 + $0xca] sm:$0xff] }
  0x86   : > { %4183 = vmatmul.mubr.bf16.gmra.mrb[16].mxu1 %v5398_v28  ;;  %4486 = vmatprep.subr.bf16.mxu0 %v4960_v57  ;;  %v4984_v27 = vld [vmem:[%s5824_s4 + $0x20] sm:$0xff]   ;;  %v2696_v40 = vpack.c.bf16 %v3805_v26, %v3804_v25  ;;  %v3012_v26 = vld [vmem:[%s5635_s18 + $0x48] sm:$0xff] }
  0x87   : > { %4423 = vmatmul.mubr.bf16.gmra.mrb[16].mxu0 %v5422_v31  ;;  %4186 = vmatprep.mubr.bf16.mxu1 %v5400_v29  ;;  %v3011_v25 = vld [vmem:[%s5635_s18 + $0x40] sm:$0xff] }
  0x88   : > { %4426 = vmatprep.mubr.bf16.mxu0 %v5424_v59 }
  0x8e   : > { %4187 = vmatmul.mubr.bf16.gmra.mrb[20].mxu1 %v5422_v31 }
  0x8f   : > { %4427 = vmatmul.mubr.bf16.gmra.mrb[20].mxu0 %v5434_v8  ;;  %4190 = vmatprep.mubr.bf16.mxu1 %v5424_v59 }
  0x90   : > { %4430 = vmatprep.mubr.bf16.mxu0 %v5436_v9 }
  0x96   : > { %4191 = vmatmul.mubr.bf16.gmra.mrb[24].mxu1 %v5434_v8 }
  0x97   : > { %4431 = vmatmul.mubr.bf16.gmra.mrb[24].mxu0 %v5446_v22  ;;  %4194 = vmatprep.mubr.bf16.mxu1 %v5436_v9 }
  0x98   : > { %4434 = vmatprep.mubr.bf16.mxu0 %v5448_v23 }
  0x9e   : > { %4195 = vmatmul.mubr.bf16.gmra.mrb[28].mxu1 %v5446_v22 }
  0x9f   : > { %4435 = vmatmul.mubr.bf16.gmra.mrb[28].mxu0 %v2093_v43  ;;  %4214 = vmatprep.mubr.bf16.mxu1 %v852_v44  ;;  %v4985_v43 = vld [vmem:[%s5821_s1 + $0x128] sm:$0xff]  }
  0xa0   : > { %4454 = vmatprep.mubr.bf16.mxu0 %v5121_v34  ;;  %v4963_v34 = vld [vmem:[%s5821_s1 + $0xd0] sm:$0xff]   ;;  %v4986_v44 = vld [vmem:[%s5824_s4 + $0x28] sm:$0xff]  }
  0xa6   : > { %4215 = vmatmul.mubr.bf16.vlgmr.msra.gmra.mrb[0].mxu1 %v5090_v17  ;;  %v4964_v17 = vld [vmem:[%s5821_s1 + $0x210] sm:$0xff]  }
  0xa7   : > { %4455 = vmatmul.mubr.bf16.vlgmr.msra.gmra.mrb[0].mxu0 %v5148_v48  ;;  %4247 = vmatpush3.bf16.msra.mxu1 %v4959_v56  ;;  %v4966_v48 = vld [vmem:[%s5821_s1 + $0x218] sm:$0xff]   ;;  %v4977_v56 = vld [vmem:[%s5821_s1 + $0x108] sm:$0xff]  }
  0xa8   : > { %4487 = vmatpush3.bf16.msra.mxu0 %v4960_v57  ;;  %4218 = vmatprep.mubr.bf16.mxu1 %v5119_v33  ;;  %v4965_v33 = vld [vmem:[%s5821_s1 + $0xd8] sm:$0xff]   ;;  %v3799_v57 = vld [vmem:[%s5078_s24 + $0x82] sm:$0xff] }
  0xa9   : > { %4458 = vmatprep.mubr.bf16.mxu0 %v5152_v50  ;;  %4248 = vmatprep.subr.bf16.mxu1 %v4961_v45  ;;  %v4967_v50 = vld [vmem:[%s5821_s1 + $0xe0] sm:$0xff]  }
  0xaa   : > { %4488 = vmatprep.subr.bf16.mxu0 %v4962_v46 }
  0xab   : > { %4249 = vmatpush3.bf16.msra.mxu1 %v4961_v45  ;;  %v3806_v45 = vld [vmem:[%s5078_s24 + $0xda] sm:$0xff] }
  0xac   : > { %4489 = vmatpush3.bf16.msra.mxu0 %v4962_v46  ;;  %4250 = vmatprep.subr.bf16.mxu1 %v4963_v34  ;;  %v3807_v46 = vld [vmem:[%s5078_s24 + $0xe2] sm:$0xff] }
  0xad   : > { %4490 = vmatprep.subr.bf16.mxu0 %v4964_v17 }
  0xae   : > { %4219 = vmatmul.mubr.bf16.gmra.mrb[4].mxu1 %v5123_v35  ;;  %v4968_v35 = vld [vmem:[%s5821_s1 + $0x220] sm:$0xff]  }
  0xaf   : > { %4459 = vmatmul.mubr.bf16.gmra.mrb[4].mxu0 %v5177_v63  ;;  %4222 = vmatprep.mubr.bf16.mxu1 %v5150_v49  ;;  %v4969_v49 = vld [vmem:[%s5821_s1 + $0xe8] sm:$0xff]  }
  0xb0   : > { %4462 = vmatprep.mubr.bf16.mxu0 %v5184_v2  ;;  %4251 = vmatpush3.bf16.msra.mxu1 %v4963_v34  ;;  %v4970_v63 = vld [vmem:[%s5821_s1 + $0x228] sm:$0xff]   ;;  %v4971_v2 = vld [vmem:[%s5821_s1 + $0xf0] sm:$0xff]  }
  0xb1   : > { %4491 = vmatpush3.bf16.msra.mxu0 %v4964_v17  ;;  %4252 = vmatprep.subr.bf16.mxu1 %v4965_v33  ;;  %v3808_v34 = vld [vmem:[%s5078_s24 + $0xf2] sm:$0xff]  ;;  %v3809_v17 = vld [vmem:[%s5078_s24 + $0xfa] sm:$0xff] }
  0xb2   : > { %4492 = vmatprep.subr.bf16.mxu0 %v4966_v48 }
  0xb4   : > { %4253 = vmatpush3.bf16.msra.mxu1 %v4965_v33  ;;  %v4988_v33 = vld [vmem:[%s5824_s4 + $0x30] sm:$0xff]  }
  0xb5   : > { %4493 = vmatpush3.bf16.msra.mxu0 %v4966_v48  ;;  %4254 = vmatprep.subr.bf16.mxu1 %v4967_v50  ;;  %v2698_v48 = vpack.c.bf16 %v3809_v17, %v3808_v34  ;;  %v3580_v34 = vld [vmem:[%s5078_s24 + $0xa9] sm:$0xff]  ;;  %v3581_v17 = vld [vmem:[%s5078_s24 + $0xb1] sm:$0xff] }
  0xb6   : > { %4223 = vmatmul.mubr.bf16.gmra.mrb[8].mxu1 %v5154_v51  ;;  %4494 = vmatprep.subr.bf16.mxu0 %v4968_v35  ;;  %v4972_v51 = vld [vmem:[%s5821_s1 + $0x230] sm:$0xff]  }
  0xb7   : > { %4463 = vmatmul.mubr.bf16.gmra.mrb[8].mxu0 %v5209_v15  ;;  %4226 = vmatprep.mubr.bf16.mxu1 %v5182_v1  ;;  %v4973_v1 = vld [vmem:[%s5821_s1 + $0xf8] sm:$0xff]  }
  0xb8   : > { %4466 = vmatprep.mubr.bf16.mxu0 %v5216_v19  ;;  %4255 = vmatpush3.bf16.msra.mxu1 %v4967_v50  ;;  %v4974_v15 = vld [vmem:[%s5821_s1 + $0x238] sm:$0xff]   ;;  %v4975_v19 = vld [vmem:[%s5821_s1 + $0x100] sm:$0xff]  }
  0xb9   : > { %4495 = vmatpush3.bf16.msra.mxu0 %v4968_v35  ;;  %4256 = vmatprep.subr.bf16.mxu1 %v4969_v49  ;;  %v4989_v50 = vld [vmem:[%s5821_s1 + $0x138] sm:$0xff]  }
  0xba   : > { %4496 = vmatprep.subr.bf16.mxu0 %v4970_v63  ;;  %v4990_v35 = vld [vmem:[%s5824_s4 + $0x38] sm:$0xff]  }
  0xbc   : > { %4257 = vmatpush3.bf16.msra.mxu1 %v4969_v49  ;;  %v3810_v49 = vld [vmem:[%s5078_s24 + $0x10a] sm:$0xff] }
  0xbd   : > { %4497 = vmatpush3.bf16.msra.mxu0 %v4970_v63  ;;  %4258 = vmatprep.subr.bf16.mxu1 %v4971_v2  ;;  %v3811_v63 = vld [vmem:[%s5078_s24 + $0x112] sm:$0xff] }
  0xbe   : > { %4227 = vmatmul.mubr.bf16.gmra.mrb[12].mxu1 %v5186_v3  ;;  %4498 = vmatprep.subr.bf16.mxu0 %v4972_v51  ;;  %v4976_v3 = vld [vmem:[%s5824_s4] sm:$0xff]  }
  0xbf   : > { %4467 = vmatmul.mubr.bf16.gmra.mrb[12].mxu0 %v5243_v32  ;;  %4230 = vmatprep.mubr.bf16.mxu1 %v5214_v18  ;;  %v3764_v18 = vld [vmem:[%s5078_s24 + $0x181] sm:$0xff] }
  0xc0   : > { %4470 = vmatprep.mubr.bf16.mxu0 %v5252_v38  ;;  %4259 = vmatpush3.bf16.msra.mxu1 %v4971_v2  ;;  %v3767_v38 = vld [vmem:[%s5078_s24 + $0x1a1] sm:$0xff] }
  0xc1   : > { %4499 = vmatpush3.bf16.msra.mxu0 %v4972_v51  ;;  %4260 = vmatprep.subr.bf16.mxu1 %v4973_v1  ;;  %v3812_v2 = vld [vmem:[%s5078_s24 + $0x122] sm:$0xff]  ;;  %v3813_v51 = vld [vmem:[%s5078_s24 + $0x12a] sm:$0xff] }
  0xc2   : > { %4500 = vmatprep.subr.bf16.mxu0 %v4974_v15 }
  0xc4   : > { %4261 = vmatpush3.bf16.msra.mxu1 %v4973_v1  ;;  %v2700_v1 = vpack.c.bf16 %v3813_v51, %v3812_v2  ;;  %v3017_v2 = vld [vmem:[%s5635_s18 + $0x70] sm:$0xff]  ;;  %v3018_v51 = vld [vmem:[%s5635_s18 + $0x78] sm:$0xff] }
  0xc5   : > { %4501 = vmatpush3.bf16.msra.mxu0 %v4974_v15  ;;  %4294 = vmatprep.subr.bf16.mxu1 %v4975_v19  ;;  %v3815_v15 = vld [vmem:[%s5078_s24 + $0x142] sm:$0xff] }
  0xc6   : > { %4231 = vmatmul.mubr.bf16.gmra.mrb[16].mxu1 %v5218_v20  ;;  %4534 = vmatprep.subr.bf16.mxu0 %v4976_v3  ;;  %v3765_v20 = vld [vmem:[%s5078_s24 + $0x189] sm:$0xff] }
  0xc7   : > { %4471 = vmatmul.mubr.bf16.gmra.mrb[16].mxu0 %v5270_v52  ;;  %4234 = vmatprep.mubr.bf16.mxu1 %v5250_v37  ;;  %v5534_v32 = vpack.c.bf16 %v3765_v20, %v3764_v18  ;;  %v3766_v37 = vld [vmem:[%s5078_s24 + $0x199] sm:$0xff] }
  0xc8   : > { %4474 = vmatprep.mubr.bf16.mxu0 %v5274_v54  ;;  %v3793_v52 = vld [vmem:[%s5078_s24 + $0x3a] sm:$0xff] }
  0xce   : > { %4235 = vmatmul.mubr.bf16.gmra.mrb[20].mxu1 %v5254_v39  ;;  %v3792_v39 = vld [vmem:[%s5078_s24 + $0x32] sm:$0xff] }
  0xcf   : > { %4475 = vmatmul.mubr.bf16.gmra.mrb[20].mxu0 %v5290_v4  ;;  %4238 = vmatprep.mubr.bf16.mxu1 %v5272_v53  ;;  %v2399_v53 = vpack.c.bf16 %v3767_v38, %v3766_v37  ;;  %v2690_v54 = vpack.c.bf16 %v3793_v52, %v3792_v39  ;;  %v3795_v4 = vld [vmem:[%s5078_s24 + $0x52] sm:$0xff]  ;;  %v3820_v37 = vld [vmem:[%s5078_s24 + $0x182] sm:$0xff]  ;;  %v3821_v38 = vld [vmem:[%s5078_s24 + $0x18a] sm:$0xff] }
  0xd0   : > { %4478 = vmatprep.mubr.bf16.mxu0 %v5294_v6  ;;  %v3796_v6 = vld [vmem:[%s5078_s24 + $0x62] sm:$0xff]  ;;  %v2704_v52 = vpack.c.bf16 %v3821_v38, %v3820_v37  ;;  %v3021_v37 = vld [vmem:[%s5635_s18 + $0x90] sm:$0xff]  ;;  %v3022_v38 = vld [vmem:[%s5635_s18 + $0x98] sm:$0xff] }
  0xd6   : > { %4239 = vmatmul.mubr.bf16.gmra.mrb[24].mxu1 %v5276_v55  ;;  %v3794_v55 = vld [vmem:[%s5078_s24 + $0x4a] sm:$0xff] }
  0xd7   : > { %4479 = vmatmul.mubr.bf16.gmra.mrb[24].mxu0 %v5310_v21  ;;  %4242 = vmatprep.mubr.bf16.mxu1 %v5292_v5  ;;  %v3797_v5 = vld [vmem:[%s5078_s24 + $0x6a] sm:$0xff]  ;;  %v2691_v21 = vpack.c.bf16 %v3795_v4, %v3794_v55 }
  0xd8   : > { %4482 = vmatprep.mubr.bf16.mxu0 %v5534_v32  ;;  %v2692_v47 = vpack.c.bf16 %v3797_v5, %v3796_v6  ;;  %v3004_v55 = vld [vmem:[%s5635_s18 + $0x8] sm:$0xff] }
  0xde   : > { %4243 = vmatmul.mubr.bf16.gmra.mrb[28].mxu1 %v5296_v7  ;;  %v4978_v7 = vld [vmem:[%s5824_s4 + $0x8] sm:$0xff]  }
  0xdf   : > { %4483 = vmatmul.mubr.bf16.gmra.mrb[28].mxu0 %v2399_v53  ;;  %4262 = vmatprep.mubr.bf16.mxu1 %v5321_v30  ;;  %v3798_v30 = vld [vmem:[%s5078_s24 + $0x7a] sm:$0xff] }
  0xe0   : > { %4502 = vmatprep.mubr.bf16.mxu0 %v2690_v54  ;;  %v2693_v0 = vpack.c.bf16 %v3799_v57, %v3798_v30  ;;  %v3569_v53 = vld [vmem:[%s5078_s24 + $0x21] sm:$0xff]  ;;  %v3573_v30 = vld [vmem:[%s5078_s24 + $0x51] sm:$0xff] }
  0xe1   : > { %v3003_v54 = vld [vmem:[%s5635_s18] sm:$0xff] }
  0xe2   : > { %v3035_v5 = vpack.c.bf16 %v3004_v55, %v3003_v54  ;;  %v3007_v57 = vld [vmem:[%s5635_s18 + $0x20] sm:$0xff] }
  0xe6   : > { %4263 = vmatmul.mubr.bf16.vlgmr.msra.gmra.mrb[0].mxu1 %v5312_v24  ;;  %v3801_v24 = vld [vmem:[%s5078_s24 + $0x9a] sm:$0xff] }
  0xe7   : > { %4503 = vmatmul.mubr.bf16.vlgmr.msra.gmra.mrb[0].mxu0 %v2691_v21  ;;  %4295 = vmatpush3.bf16.msra.mxu1 %v4975_v19  ;;  %v3816_v19 = vld [vmem:[%s5078_s24 + $0x152] sm:$0xff] }
  0xe8   : > { %4535 = vmatpush3.bf16.msra.mxu0 %v4976_v3  ;;  %4266 = vmatprep.mubr.bf16.mxu1 %v5324_v41  ;;  %v2694_v41 = vpack.c.bf16 %v3801_v24, %v3800_v61  ;;  %v3817_v3 = vld [vmem:[%s5078_s24 + $0x15a] sm:$0xff] }
  0xe9   : > { %4506 = vmatprep.mubr.bf16.mxu0 %v2692_v47  ;;  %4296 = vmatprep.subr.bf16.mxu1 %v4977_v56  ;;  %v2702_v20 = vpack.c.bf16 %v3817_v3, %v3816_v19  ;;  %v3571_v21 = vld [vmem:[%s5078_s24 + $0x39] sm:$0xff]  ;;  %v3005_v47 = vld [vmem:[%s5635_s18 + $0x10] sm:$0xff]  ;;  %v3042_v3 = vpack.c.bf16 %v3018_v51, %v3017_v2 }
  0xea   : > { %4536 = vmatprep.subr.bf16.mxu0 %v4978_v7 }
  0xeb   : > { %4297 = vmatpush3.bf16.msra.mxu1 %v4977_v56  ;;  %v3006_v56 = vld [vmem:[%s5635_s18 + $0x18] sm:$0xff] }
  0xec   : > { %4537 = vmatpush3.bf16.msra.mxu0 %v4978_v7  ;;  %4298 = vmatprep.subr.bf16.mxu1 %v4979_v60  ;;  %v3572_v7 = vld [vmem:[%s5078_s24 + $0x49] sm:$0xff]  ;;  %v3036_v61 = vpack.c.bf16 %v3006_v56, %v3005_v47  ;;  %v3593_v47 = vld [vmem:[%s5078_s24 + $0x141] sm:$0xff] }
  0xed   : > { %4538 = vmatprep.subr.bf16.mxu0 %v4980_v62  ;;  %v1467_v24 = vpack.c.bf16 %v3573_v30, %v3572_v7  ;;  %v3027_v56 = vld [vmem:[%s5635_s18 + $0xc0] sm:$0xff]  ;;  %v3028_v7 = vld [vmem:[%s5635_s18 + $0xc8] sm:$0xff] }
  0xee   : > { %4267 = vmatmul.mubr.bf16.gmra.mrb[4].mxu1 %v5326_v42  ;;  %v4983_v42 = vld [vmem:[%s5821_s1 + $0x120] sm:$0xff]  }
  0xef   : > { %4507 = vmatmul.mubr.bf16.gmra.mrb[4].mxu0 %v2693_v0  ;;  %4270 = vmatprep.mubr.bf16.mxu1 %v5350_v36  ;;  %v2695_v36 = vpack.c.bf16 %v3803_v16, %v3802_v14  ;;  %v3574_v0 = vld [vmem:[%s5078_s24 + $0x61] sm:$0xff]  ;;  %v3576_v14 = vld [vmem:[%s5078_s24 + $0x79] sm:$0xff] }
  0xf0   : > { %4510 = vmatprep.mubr.bf16.mxu0 %v2694_v41  ;;  %4299 = vmatpush3.bf16.msra.mxu1 %v4979_v60  ;;  %v3008_v60 = vld [vmem:[%s5635_s18 + $0x28] sm:$0xff] }
  0xf1   : > { %4539 = vmatpush3.bf16.msra.mxu0 %v4980_v62  ;;  %4300 = vmatprep.subr.bf16.mxu1 %v4981_v10  ;;  %v3037_v62 = vpack.c.bf16 %v3008_v60, %v3007_v57  ;;  %v3575_v41 = vld [vmem:[%s5078_s24 + $0x69] sm:$0xff]  ;;  %v3577_v16 = vld [vmem:[%s5078_s24 + $0x81] sm:$0xff] }
  0xf2   : > { %4540 = vmatprep.subr.bf16.mxu0 %v4982_v13 }
  0xf4   : > { %4301 = vmatpush3.bf16.msra.mxu1 %v4981_v10  ;;  %v3009_v10 = vld [vmem:[%s5635_s18 + $0x30] sm:$0xff] }
  0xf5   : > { %4541 = vmatpush3.bf16.msra.mxu0 %v4982_v13  ;;  %4302 = vmatprep.subr.bf16.mxu1 %v4983_v42  ;;  %v3010_v13 = vld [vmem:[%s5635_s18 + $0x38] sm:$0xff] }
  0xf6   : > { %4271 = vmatmul.mubr.bf16.gmra.mrb[8].mxu1 %v5352_v58  ;;  %4542 = vmatprep.subr.bf16.mxu0 %v4984_v27  ;;  %v4987_v58 = vld [vmem:[%s5821_s1 + $0x130] sm:$0xff]  }
  0xf7   : > { %4511 = vmatmul.mubr.bf16.gmra.mrb[8].mxu0 %v2695_v36  ;;  %4274 = vmatprep.mubr.bf16.mxu1 %v5374_v11  ;;  %v2697_v11 = vpack.c.bf16 %v3807_v46, %v3806_v45  ;;  %v1469_v36 = vpack.c.bf16 %v3577_v16, %v3576_v14  ;;  %v3013_v45 = vld [vmem:[%s5635_s18 + $0x50] sm:$0xff]  ;;  %v3014_v46 = vld [vmem:[%s5635_s18 + $0x58] sm:$0xff]  ;;  %v3032_v14 = vld [vmem:[%s5635_s18 + $0xe8] sm:$0xff] }
  0xf8   : > { %4514 = vmatprep.mubr.bf16.mxu0 %v2696_v40  ;;  %4303 = vmatpush3.bf16.msra.mxu1 %v4983_v42  ;;  %v1468_v42 = vpack.c.bf16 %v3575_v41, %v3574_v0  ;;  %v3039_v40 = vpack.c.bf16 %v3012_v26, %v3011_v25  ;;  %v3030_v0 = vld [vmem:[%s5635_s18 + $0xd8] sm:$0xff]  ;;  %v3596_v41 = vld [vmem:[%s5078_s24 + $0x169] sm:$0xff] }
  0xf9   : > { %4543 = vmatpush3.bf16.msra.mxu0 %v4984_v27  ;;  %4304 = vmatprep.subr.bf16.mxu1 %v4985_v43  ;;  %v3038_v27 = vpack.c.bf16 %v3010_v13, %v3009_v10  ;;  %v3597_v10 = vld [vmem:[%s5078_s24 + $0x171] sm:$0xff]  ;;  %v3031_v13 = vld [vmem:[%s5635_s18 + $0xe0] sm:$0xff] }
  0xfa   : > { %4544 = vmatprep.subr.bf16.mxu0 %v4986_v44  ;;  %v1479_v26 = vpack.c.bf16 %v3597_v10, %v3596_v41 }
  0xfc   : > { %4305 = vmatpush3.bf16.msra.mxu1 %v4985_v43  ;;  %v3578_v43 = vld [vmem:[%s5078_s24 + $0x91] sm:$0xff] }
  0xfd   : > { %4545 = vmatpush3.bf16.msra.mxu0 %v4986_v44  ;;  %4306 = vmatprep.subr.bf16.mxu1 %v4987_v58  ;;  %v3579_v44 = vld [vmem:[%s5078_s24 + $0x99] sm:$0xff] }
  0xfe   : > { %4275 = vmatmul.mubr.bf16.gmra.mrb[12].mxu1 %v5376_v12  ;;  %4546 = vmatprep.subr.bf16.mxu0 %v4988_v33  ;;  %v2699_v12 = vpack.c.bf16 %v3811_v63, %v3810_v49  ;;  %v3582_v49 = vld [vmem:[%s5078_s24 + $0xc1] sm:$0xff]  ;;  %v3583_v63 = vld [vmem:[%s5078_s24 + $0xc9] sm:$0xff] }
  0xff   : > { %4515 = vmatmul.mubr.bf16.gmra.mrb[12].mxu0 %v2697_v11  ;;  %4278 = vmatprep.mubr.bf16.mxu1 %v5398_v28  ;;  %v3814_v28 = vld [vmem:[%s5078_s24 + $0x13a] sm:$0xff]  ;;  %v1470_v11 = vpack.c.bf16 %v3579_v44, %v3578_v43  ;;  %v1472_v19 = vpack.c.bf16 %v3583_v63, %v3582_v49 }
 0x100   : > { %4518 = vmatprep.mubr.bf16.mxu0 %v2698_v48  ;;  %4307 = vmatpush3.bf16.msra.mxu1 %v4987_v58  ;;  %v2701_v18 = vpack.c.bf16 %v3815_v15, %v3814_v28  ;;  %v3015_v58 = vld [vmem:[%s5635_s18 + $0x60] sm:$0xff]  ;;  %v3040_v48 = vpack.c.bf16 %v3014_v46, %v3013_v45  ;;  %v3020_v15 = vld [vmem:[%s5635_s18 + $0x88] sm:$0xff] }
 0x101   : > { %4547 = vmatpush3.bf16.msra.mxu0 %v4988_v33  ;;  %4308 = vmatprep.subr.bf16.mxu1 %v4989_v50  ;;  %v3016_v33 = vld [vmem:[%s5635_s18 + $0x68] sm:$0xff]  ;;  %v3019_v28 = vld [vmem:[%s5635_s18 + $0x80] sm:$0xff] }
 0x102   : > { %4548 = vmatprep.subr.bf16.mxu0 %v4990_v35  ;;  %v5707_v43 = vld [vmem:[%s5822_s2] ss:$0 sm:$0xff] }
 0x104   : > { %4309 = vmatpush3.bf16.msra.mxu1 %v4989_v50  ;;  %v1471_v50 = vpack.c.bf16 %v3581_v17, %v3580_v34  ;;  %v5713_v17 = vld [vmem:[%s5825_s5] ss:$0 sm:$0xff] }
 0x105   : > { %4549 = vmatpush3.bf16.msra.mxu0 %v4990_v35  ;;  %v3041_v35 = vpack.c.bf16 %v3016_v33, %v3015_v58 }
 0x106   : > { %4279 = vmatmul.mubr.bf16.gmra.mrb[16].mxu1 %v5400_v29  ;;  %v3818_v29 = vld [vmem:[%s5078_s24 + $0x16a] sm:$0xff] }
 0x107   : > { %4519 = vmatmul.mubr.bf16.gmra.mrb[16].mxu0 %v2699_v12  ;;  %4282 = vmatprep.mubr.bf16.mxu1 %v5422_v31  ;;  %v3819_v31 = vld [vmem:[%s5078_s24 + $0x172] sm:$0xff] }
 0x108   : > { %4522 = vmatprep.mubr.bf16.mxu0 %v2700_v1  ;;  %v2703_v39 = vpack.c.bf16 %v3819_v31, %v3818_v29  ;;  %v3584_v12 = vld [vmem:[%s5078_s24 + $0xd9] sm:$0xff]  ;;  %v3585_v1 = vld [vmem:[%s5078_s24 + $0xe1] sm:$0xff]  ;;  %v3586_v29 = vld [vmem:[%s5078_s24 + $0xf1] sm:$0xff] }
 0x109   : > { %v3587_v31 = vld [vmem:[%s5078_s24 + $0xf9] sm:$0xff] }
 0x10e   : > { %4283 = vmatmul.mubr.bf16.gmra.mrb[20].mxu1 %v5424_v59  ;;  %v3822_v59 = vld [vmem:[%s5078_s24 + $0x19a] sm:$0xff] }
 0x10f   : > { %4523 = vmatmul.mubr.bf16.gmra.mrb[20].mxu0 %v2701_v18  ;;  %4286 = vmatprep.mubr.bf16.mxu1 %v5434_v8  ;;  %v3823_v8 = vld [vmem:[%s5078_s24 + $0x1a2] sm:$0xff]  ;;  %v1473_v18 = vpack.c.bf16 %v3585_v1, %v3584_v12 }
 0x110   : > { %4526 = vmatprep.mubr.bf16.mxu0 %v2702_v20  ;;  %v2705_v4 = vpack.c.bf16 %v3823_v8, %v3822_v59  ;;  %v3043_v20 = vpack.c.bf16 %v3020_v15, %v3019_v28  ;;  %v3023_v59 = vld [vmem:[%s5635_s18 + $0xa0] sm:$0xff]  ;;  %v3024_v8 = vld [vmem:[%s5635_s18 + $0xa8] sm:$0xff] }
 0x111   : > { %v3045_v55 = vpack.c.bf16 %v3024_v8, %v3023_v59 }
 0x116   : > { %4287 = vmatmul.mubr.bf16.gmra.mrb[24].mxu1 %v5436_v9  ;;  %v3568_v9 = vld [vmem:[%s5078_s24 + $0x19] sm:$0xff] }
 0x117   : > { %4527 = vmatmul.mubr.bf16.gmra.mrb[24].mxu0 %v2703_v39  ;;  %4290 = vmatprep.mubr.bf16.mxu1 %v5446_v22  ;;  %v1465_v6 = vpack.c.bf16 %v3569_v53, %v3568_v9  ;;  %v3570_v22 = vld [vmem:[%s5078_s24 + $0x31] sm:$0xff]  ;;  %v3588_v39 = vld [vmem:[%s5078_s24 + $0x109] sm:$0xff]  ;;  %v1474_v9 = vpack.c.bf16 %v3587_v31, %v3586_v29  ;;  %v3044_v53 = vpack.c.bf16 %v3022_v38, %v3021_v37 }
 0x118   : > { %4530 = vmatprep.mubr.bf16.mxu0 %v2704_v52  ;;  %v3589_v52 = vld [vmem:[%s5078_s24 + $0x111] sm:$0xff] }
 0x119   : > { %v1475_v54 = vpack.c.bf16 %v3589_v52, %v3588_v39 }
 0x11e   : > { %4291 = vmatmul.mubr.bf16.gmra.mrb[28].mxu1 %v5448_v23  ;;  %v1466_v23 = vpack.c.bf16 %v3571_v21, %v3570_v22  ;;  %v3026_v22 = vld [vmem:[%s5635_s18 + $0xb8] sm:$0xff] }
 0x11f   : > { %4531 = vmatmul.mubr.bf16.gmra.mrb[28].mxu0 %v2705_v4  ;;  %4310 = vmatprep.mubr.bf16.mxu1 %v1465_v6  ;;  %v3590_v4 = vld [vmem:[%s5078_s24 + $0x121] sm:$0xff]  ;;  %v3591_v6 = vld [vmem:[%s5078_s24 + $0x129] sm:$0xff]  ;;  %v3592_v21 = vld [vmem:[%s5078_s24 + $0x139] sm:$0xff] }
 0x120   : > { %4550 = vmatprep.mubr.bf16.mxu0 %v3035_v5  ;;  %v3025_v5 = vld [vmem:[%s5635_s18 + $0xb0] sm:$0xff]  ;;  %v1476_v30 = vpack.c.bf16 %v3591_v6, %v3590_v4  ;;  %v1477_v60 = vpack.c.bf16 %v3593_v47, %v3592_v21 }
 0x121   : > { %v3046_v57 = vpack.c.bf16 %v3026_v22, %v3025_v5 }
 0x126   : > { %4311 = vmatmul.mubr.bf16.vlgmr.msra.gmra.mrb[0].mxu1 %v1466_v23  ;;  %v3047_v23 = vpack.c.bf16 %v3028_v7, %v3027_v56 }
 0x127   : > { %4551 = vmatmul.mubr.bf16.vlgmr.msra.gmra.mrb[0].mxu0 %v3036_v61  ;;  %4314 = vmatprep.mubr.bf16.mxu1 %v1467_v24  ;;  %v3594_v61 = vld [vmem:[%s5078_s24 + $0x151] sm:$0xff]  ;;  %v3595_v24 = vld [vmem:[%s5078_s24 + $0x159] sm:$0xff] }
 0x128   : > { %4554 = vmatprep.mubr.bf16.mxu0 %v3037_v62  ;;  %v3029_v62 = vld [vmem:[%s5635_s18 + $0xd0] sm:$0xff]  ;;  %v1478_v16 = vpack.c.bf16 %v3595_v24, %v3594_v61 }
 0x129   : > { %v3048_v25 = vpack.c.bf16 %v3030_v0, %v3029_v62 }
 0x12e   : > { %4315 = vmatmul.mubr.bf16.gmra.mrb[4].mxu1 %v1468_v42  ;;  %v3049_v42 = vpack.c.bf16 %v3032_v14, %v3031_v13 }
 0x12f   : > { %4555 = vmatmul.mubr.bf16.gmra.mrb[4].mxu0 %v3038_v27  ;;  %4318 = vmatprep.mubr.bf16.mxu1 %v1469_v36  ;;  %v3033_v27 = vld [vmem:[%s5635_s18 + $0xf0] sm:$0xff]  ;;  %v3034_v36 = vld [vmem:[%s5635_s18 + $0xf8] sm:$0xff] }
 0x130   : > { %4558 = vmatprep.mubr.bf16.mxu0 %v3039_v40  ;;  %v3050_v40 = vpack.c.bf16 %v3034_v36, %v3033_v27 }
 0x136   : > { %4319 = vmatmul.mubr.bf16.gmra.mrb[8].mxu1 %v1470_v11 }
 0x137   : > { %4559 = vmatmul.mubr.bf16.gmra.mrb[8].mxu0 %v3040_v48  ;;  %4322 = vmatprep.mubr.bf16.mxu1 %v1471_v50 }
 0x138   : > { %4562 = vmatprep.mubr.bf16.mxu0 %v3041_v35 }
 0x13e   : > { %4323 = vmatmul.mubr.bf16.gmra.mrb[12].mxu1 %v1472_v19 }
 0x13f   : > { %4563 = vmatmul.mubr.bf16.gmra.mrb[12].mxu0 %v3042_v3  ;;  %4326 = vmatprep.mubr.bf16.mxu1 %v1473_v18 }
 0x140   : > { %4566 = vmatprep.mubr.bf16.mxu0 %v3043_v20 }
 0x146   : > { %4327 = vmatmul.mubr.bf16.gmra.mrb[16].mxu1 %v1474_v9 }
 0x147   : > { %4567 = vmatmul.mubr.bf16.gmra.mrb[16].mxu0 %v3044_v53  ;;  %4330 = vmatprep.mubr.bf16.mxu1 %v1475_v54 }
 0x148   : > { %4570 = vmatprep.mubr.bf16.mxu0 %v3045_v55 }
 0x14e   : > { %4331 = vmatmul.mubr.bf16.gmra.mrb[20].mxu1 %v1476_v30 }
 0x14f   : > { %4571 = vmatmul.mubr.bf16.gmra.mrb[20].mxu0 %v3046_v57  ;;  %4334 = vmatprep.mubr.bf16.mxu1 %v1477_v60 }
 0x150   : > { %4574 = vmatprep.mubr.bf16.mxu0 %v3047_v23 }
 0x156   : > { %4335 = vmatmul.mubr.bf16.gmra.mrb[24].mxu1 %v1478_v16 }
 0x157   : > { %4575 = vmatmul.mubr.bf16.gmra.mrb[24].mxu0 %v3048_v25  ;;  %4338 = vmatprep.mubr.bf16.mxu1 %v1479_v26 }
 0x158   : > { %4578 = vmatprep.mubr.bf16.mxu0 %v3049_v42 }
 0x15e   : > { %4339 = vmatmul.mubr.bf16.gmra.mrb[28].mxu1 %v5534_v32 }
 0x15f   : > { %4579 = vmatmul.mubr.bf16.gmra.mrb[28].mxu0 %v3050_v40 }
 0x1f9   : > { %v4312_v44 = vpop.f32.mrb[0].mxu1 }
 0x1fa   : > { %v4582_v45 = vadd.f32 %v4312_v44, %v5707_v43  ;;  %v4552_v46 = vpop.f32.mrb[0].mxu0  ;;  %v1580_v34 = vpop.f32.mrb[1].mxu1 }
 0x1fb   : > { %v4584_v58 = vadd.f32 %v5707_v43, %v1580_v34  ;;  %v3149_v33 = vpop.f32.mrb[1].mxu0  ;;  %v4313_v32 = vpop.f32.mrb[2].mxu1 }
 0x1fc   : > { %v4583_v11 = vadd.f32 %v4582_v45, %v4552_v46  ;;  %v4586_v48 = vadd.f32 %v4313_v32, %v5707_v43  ;;  %v4553_v50 = vpop.f32.mrb[2].mxu0  ;;  %v1583_v35 = vpop.f32.mrb[3].mxu1 }
 0x1fd   : > { %v4585_v49 = vadd.f32 %v4584_v58, %v3149_v33  ;;  %v4588_v63 = vadd.f32 %v5707_v43, %v1583_v35  ;;  %v3152_v2 = vpop.f32.mrb[3].mxu0 }
 0x1fe   : > { %v3317_v51 = vadd.f32 %v4583_v11, %v5713_v17  ;;  %v4587_v12 = vadd.f32 %v4586_v48, %v4553_v50 }
 0x1ff   : > { %v3315_v1 = vadd.f32 %v4585_v49, %v5713_v17  ;;  %v4589_v28 = vadd.f32 %v4588_v63, %v3152_v2 }
 0x200   : > { %3349 = vst [vmem:[%s5722_s27 + $0x10] sm:$0xff] %v3317_v51  ;;  %v3318_v15 = vadd.f32 %v4587_v12, %v5713_v17 }
 0x201   : > { %3347 = vst [vmem:[%s5722_s27] sm:$0xff] %v3315_v1  ;;  %v3316_v19 = vadd.f32 %v4589_v28, %v5713_v17  ;;  %v4316_v3 = vpop.f32.mrb[4].mxu1 }
 0x202   : > { %3350 = vst [vmem:[%s5722_s27 + $0x18] sm:$0xff] %v3318_v15  ;;  %v4590_v18 = vadd.f32 %v4316_v3, %v5707_v43  ;;  %v4556_v20 = vpop.f32.mrb[4].mxu0  ;;  %v1596_v29 = vpop.f32.mrb[5].mxu1 }
 0x203   : > { %3348 = vst [vmem:[%s5722_s27 + $0x8] sm:$0xff] %v3316_v19  ;;  %v4592_v31 = vadd.f32 %v5707_v43, %v1596_v29  ;;  %v3165_v37 = vpop.f32.mrb[5].mxu0  ;;  %v4317_v38 = vpop.f32.mrb[6].mxu1 }
 0x204   : > { %v4591_v39 = vadd.f32 %v4590_v18, %v4556_v20  ;;  %v4594_v52 = vadd.f32 %v4317_v38, %v5707_v43  ;;  %v4557_v59 = vpop.f32.mrb[6].mxu0  ;;  %v1599_v8 = vpop.f32.mrb[7].mxu1 }
 0x205   : > { %v4593_v9 = vadd.f32 %v4592_v31, %v3165_v37  ;;  %v4596_v53 = vadd.f32 %v5707_v43, %v1599_v8  ;;  %v3168_v54 = vpop.f32.mrb[7].mxu0 }
 0x206   : > { %v3321_v55 = vadd.f32 %v4591_v39, %v5713_v17  ;;  %v4595_v4 = vadd.f32 %v4594_v52, %v4557_v59 }
 0x207   : > { %v3319_v6 = vadd.f32 %v4593_v9, %v5713_v17  ;;  %v4597_v5 = vadd.f32 %v4596_v53, %v3168_v54 }
 0x208   : > { %3353 = vst [vmem:[%s5722_s27 + $0x30] sm:$0xff] %v3321_v55  ;;  %v3322_v22 = vadd.f32 %v4595_v4, %v5713_v17 }
 0x209   : > { %3351 = vst [vmem:[%s5722_s27 + $0x20] sm:$0xff] %v3319_v6  ;;  %v3320_v21 = vadd.f32 %v4597_v5, %v5713_v17  ;;  %v4320_v47 = vpop.f32.mrb[8].mxu1 }
 0x20a   : > { %3354 = vst [vmem:[%s5722_s27 + $0x38] sm:$0xff] %v3322_v22  ;;  %v4598_v56 = vadd.f32 %v4320_v47, %v5707_v43  ;;  %v4560_v7 = vpop.f32.mrb[8].mxu0  ;;  %v1612_v30 = vpop.f32.mrb[9].mxu1 }
 0x20b   : > { %3352 = vst [vmem:[%s5722_s27 + $0x28] sm:$0xff] %v3320_v21  ;;  %v4600_v57 = vadd.f32 %v5707_v43, %v1612_v30  ;;  %v3181_v60 = vpop.f32.mrb[9].mxu0  ;;  %v4321_v23 = vpop.f32.mrb[10].mxu1 }
 0x20c   : > { %v4599_v61 = vadd.f32 %v4598_v56, %v4560_v7  ;;  %v4602_v24 = vadd.f32 %v4321_v23, %v5707_v43  ;;  %v4561_v62 = vpop.f32.mrb[10].mxu0  ;;  %v1615_v0 = vpop.f32.mrb[11].mxu1 }
 0x20d   : > { %v4601_v41 = vadd.f32 %v4600_v57, %v3181_v60  ;;  %v4604_v10 = vadd.f32 %v5707_v43, %v1615_v0  ;;  %v3184_v13 = vpop.f32.mrb[11].mxu0 }
 0x20e   : > { %v3325_v14 = vadd.f32 %v4599_v61, %v5713_v17  ;;  %v4603_v16 = vadd.f32 %v4602_v24, %v4561_v62 }
 0x20f   : > { %v3323_v25 = vadd.f32 %v4601_v41, %v5713_v17  ;;  %v4605_v26 = vadd.f32 %v4604_v10, %v3184_v13 }
 0x210   : > { %3357 = vst [vmem:[%s5722_s27 + $0x50] sm:$0xff] %v3325_v14  ;;  %v3326_v42 = vadd.f32 %v4603_v16, %v5713_v17 }
 0x211   : > { %3355 = vst [vmem:[%s5722_s27 + $0x40] sm:$0xff] %v3323_v25  ;;  %v3324_v27 = vadd.f32 %v4605_v26, %v5713_v17  ;;  %v4324_v36 = vpop.f32.mrb[12].mxu1 }
 0x212   : > { %3358 = vst [vmem:[%s5722_s27 + $0x58] sm:$0xff] %v3326_v42  ;;  %v4606_v40 = vadd.f32 %v4324_v36, %v5707_v43  ;;  %v4564_v44 = vpop.f32.mrb[12].mxu0  ;;  %v1628_v45 = vpop.f32.mrb[13].mxu1 }
 0x213   : > { %3356 = vst [vmem:[%s5722_s27 + $0x48] sm:$0xff] %v3324_v27  ;;  %v4608_v46 = vadd.f32 %v5707_v43, %v1628_v45  ;;  %v3197_v34 = vpop.f32.mrb[13].mxu0  ;;  %v4325_v58 = vpop.f32.mrb[14].mxu1 }
 0x214   : > { %v4607_v33 = vadd.f32 %v4606_v40, %v4564_v44  ;;  %v4610_v32 = vadd.f32 %v4325_v58, %v5707_v43  ;;  %v4565_v11 = vpop.f32.mrb[14].mxu0  ;;  %v1631_v48 = vpop.f32.mrb[15].mxu1 }
 0x215   : > { %v4609_v50 = vadd.f32 %v4608_v46, %v3197_v34  ;;  %v4612_v35 = vadd.f32 %v5707_v43, %v1631_v48  ;;  %v3200_v49 = vpop.f32.mrb[15].mxu0 }
 0x216   : > { %v3329_v63 = vadd.f32 %v4607_v33, %v5713_v17  ;;  %v4611_v2 = vadd.f32 %v4610_v32, %v4565_v11 }
 0x217   : > { %v3327_v51 = vadd.f32 %v4609_v50, %v5713_v17  ;;  %v4613_v12 = vadd.f32 %v4612_v35, %v3200_v49 }
 0x218   : > { %3361 = vst [vmem:[%s5722_s27 + $0x70] sm:$0xff] %v3329_v63  ;;  %v3330_v1 = vadd.f32 %v4611_v2, %v5713_v17 }
 0x219   : > { %3359 = vst [vmem:[%s5722_s27 + $0x60] sm:$0xff] %v3327_v51  ;;  %v3328_v28 = vadd.f32 %v4613_v12, %v5713_v17  ;;  %v4328_v15 = vpop.f32.mrb[16].mxu1 }
 0x21a   : > { %3362 = vst [vmem:[%s5722_s27 + $0x78] sm:$0xff] %v3330_v1  ;;  %v4614_v19 = vadd.f32 %v4328_v15, %v5707_v43  ;;  %v4568_v3 = vpop.f32.mrb[16].mxu0  ;;  %v1644_v18 = vpop.f32.mrb[17].mxu1 }
 0x21b   : > { %3360 = vst [vmem:[%s5722_s27 + $0x68] sm:$0xff] %v3328_v28  ;;  %v4616_v20 = vadd.f32 %v5707_v43, %v1644_v18  ;;  %v3213_v29 = vpop.f32.mrb[17].mxu0  ;;  %v4329_v31 = vpop.f32.mrb[18].mxu1 }
 0x21c   : > { %v4615_v37 = vadd.f32 %v4614_v19, %v4568_v3  ;;  %v4618_v38 = vadd.f32 %v4329_v31, %v5707_v43  ;;  %v4569_v39 = vpop.f32.mrb[18].mxu0  ;;  %v1647_v52 = vpop.f32.mrb[19].mxu1 }
 0x21d   : > { %v4617_v59 = vadd.f32 %v4616_v20, %v3213_v29  ;;  %v4620_v8 = vadd.f32 %v5707_v43, %v1647_v52  ;;  %v3216_v9 = vpop.f32.mrb[19].mxu0 }
 0x21e   : > { %v3333_v53 = vadd.f32 %v4615_v37, %v5713_v17  ;;  %v4619_v54 = vadd.f32 %v4618_v38, %v4569_v39 }
 0x21f   : > { %v3331_v55 = vadd.f32 %v4617_v59, %v5713_v17  ;;  %v4621_v4 = vadd.f32 %v4620_v8, %v3216_v9 }
 0x220   : > { %3365 = vst [vmem:[%s5722_s27 + $0x90] sm:$0xff] %v3333_v53  ;;  %v3334_v6 = vadd.f32 %v4619_v54, %v5713_v17 }
 0x221   : > { %3363 = vst [vmem:[%s5722_s27 + $0x80] sm:$0xff] %v3331_v55  ;;  %v3332_v5 = vadd.f32 %v4621_v4, %v5713_v17  ;;  %v4332_v22 = vpop.f32.mrb[20].mxu1 }
 0x222   : > { %3366 = vst [vmem:[%s5722_s27 + $0x98] sm:$0xff] %v3334_v6  ;;  %v4622_v21 = vadd.f32 %v4332_v22, %v5707_v43  ;;  %v4572_v47 = vpop.f32.mrb[20].mxu0  ;;  %v1660_v56 = vpop.f32.mrb[21].mxu1 }
 0x223   : > { %3364 = vst [vmem:[%s5722_s27 + $0x88] sm:$0xff] %v3332_v5  ;;  %v4624_v7 = vadd.f32 %v5707_v43, %v1660_v56  ;;  %v3229_v30 = vpop.f32.mrb[21].mxu0  ;;  %v4333_v57 = vpop.f32.mrb[22].mxu1 }
 0x224   : > { %v4623_v60 = vadd.f32 %v4622_v21, %v4572_v47  ;;  %v4626_v23 = vadd.f32 %v4333_v57, %v5707_v43  ;;  %v4573_v61 = vpop.f32.mrb[22].mxu0  ;;  %v1663_v24 = vpop.f32.mrb[23].mxu1 }
 0x225   : > { %v4625_v62 = vadd.f32 %v4624_v7, %v3229_v30  ;;  %v4628_v0 = vadd.f32 %v5707_v43, %v1663_v24  ;;  %v3232_v41 = vpop.f32.mrb[23].mxu0 }
 0x226   : > { %v3337_v10 = vadd.f32 %v4623_v60, %v5713_v17  ;;  %v4627_v13 = vadd.f32 %v4626_v23, %v4573_v61 }
 0x227   : > { %v3335_v14 = vadd.f32 %v4625_v62, %v5713_v17  ;;  %v4629_v16 = vadd.f32 %v4628_v0, %v3232_v41 }
 0x228   : > { %3369 = vst [vmem:[%s5722_s27 + $0xb0] sm:$0xff] %v3337_v10  ;;  %v3338_v25 = vadd.f32 %v4627_v13, %v5713_v17 }
 0x229   : > { %3367 = vst [vmem:[%s5722_s27 + $0xa0] sm:$0xff] %v3335_v14  ;;  %v3336_v26 = vadd.f32 %v4629_v16, %v5713_v17  ;;  %v4336_v42 = vpop.f32.mrb[24].mxu1 }
 0x22a   : > { %3370 = vst [vmem:[%s5722_s27 + $0xb8] sm:$0xff] %v3338_v25  ;;  %v4630_v27 = vadd.f32 %v4336_v42, %v5707_v43  ;;  %v4576_v36 = vpop.f32.mrb[24].mxu0  ;;  %v1676_v40 = vpop.f32.mrb[25].mxu1 }
 0x22b   : > { %3368 = vst [vmem:[%s5722_s27 + $0xa8] sm:$0xff] %v3336_v26  ;;  %v4632_v44 = vadd.f32 %v5707_v43, %v1676_v40  ;;  %v3245_v45 = vpop.f32.mrb[25].mxu0  ;;  %v4337_v46 = vpop.f32.mrb[26].mxu1 }
 0x22c   : > { %v4631_v34 = vadd.f32 %v4630_v27, %v4576_v36  ;;  %v4634_v58 = vadd.f32 %v4337_v46, %v5707_v43  ;;  %v4577_v33 = vpop.f32.mrb[26].mxu0  ;;  %v1679_v32 = vpop.f32.mrb[27].mxu1 }
 0x22d   : > { %v4633_v11 = vadd.f32 %v4632_v44, %v3245_v45  ;;  %v4636_v48 = vadd.f32 %v5707_v43, %v1679_v32  ;;  %v3248_v50 = vpop.f32.mrb[27].mxu0 }
 0x22e   : > { %v3341_v35 = vadd.f32 %v4631_v34, %v5713_v17  ;;  %v4635_v49 = vadd.f32 %v4634_v58, %v4577_v33 }
 0x22f   : > { %v3339_v63 = vadd.f32 %v4633_v11, %v5713_v17  ;;  %v4637_v2 = vadd.f32 %v4636_v48, %v3248_v50 }
 0x230   : > { %3373 = vst [vmem:[%s5722_s27 + $0xd0] sm:$0xff] %v3341_v35  ;;  %v3342_v51 = vadd.f32 %v4635_v49, %v5713_v17 }
 0x231   : > { %3371 = vst [vmem:[%s5722_s27 + $0xc0] sm:$0xff] %v3339_v63  ;;  %v3340_v12 = vadd.f32 %v4637_v2, %v5713_v17  ;;  %v4340_v1 = vpop.f32.mrb[28].mxu1 }
 0x232   : > { %3374 = vst [vmem:[%s5722_s27 + $0xd8] sm:$0xff] %v3342_v51  ;;  %v4638_v28 = vadd.f32 %v4340_v1, %v5707_v43  ;;  %v4580_v15 = vpop.f32.mrb[28].mxu0  ;;  %v1692_v19 = vpop.f32.mrb[29].mxu1 }
 0x233   : > { %3372 = vst [vmem:[%s5722_s27 + $0xc8] sm:$0xff] %v3340_v12  ;;  %v4640_v3 = vadd.f32 %v5707_v43, %v1692_v19  ;;  %v3261_v18 = vpop.f32.mrb[29].mxu0  ;;  %v4341_v20 = vpop.f32.mrb[30].mxu1 }
 0x234   : > { %v4639_v29 = vadd.f32 %v4638_v28, %v4580_v15  ;;  %v4642_v31 = vadd.f32 %v4341_v20, %v5707_v43  ;;  %v4581_v37 = vpop.f32.mrb[30].mxu0  ;;  %v1695_v38 = vpop.f32.mrb[31].mxu1 }
 0x235   : > { %v4641_v39 = vadd.f32 %v4640_v3, %v3261_v18  ;;  %v4644_v52 = vadd.f32 %v5707_v43, %v1695_v38  ;;  %v3264_v59 = vpop.f32.mrb[31].mxu0 }
 0x236   : > { %v3345_v8 = vadd.f32 %v4639_v29, %v5713_v17  ;;  %v4643_v9 = vadd.f32 %v4642_v31, %v4581_v37 }
 0x237   : > { %v3343_v53 = vadd.f32 %v4641_v39, %v5713_v17  ;;  %v4645_v54 = vadd.f32 %v4644_v52, %v3264_v59 }
 0x238   : > { %3377 = vst [vmem:[%s5722_s27 + $0xf0] sm:$0xff] %v3345_v8  ;;  %v3346_v55 = vadd.f32 %v4643_v9, %v5713_v17 }
 0x239   : > { %3375 = vst [vmem:[%s5722_s27 + $0xe0] sm:$0xff] %v3343_v53  ;;  %v3344_v4 = vadd.f32 %v4645_v54, %v5713_v17 }
 0x23a   : > { %3378 = vst [vmem:[%s5722_s27 + $0xf8] sm:$0xff] %v3346_v55 }
 0x23b   : > { %3376 = vst [vmem:[%s5722_s27 + $0xe8] sm:$0xff] %v3344_v4 }
 0x23c PF: > { %s16_s21 = sadd.s32 1, %s4997_s21  }
 0x23d   : > { %p13_p4 = scmp.ge.s32.totalorder %s16_s21, 4  }
 0x23f   :  { %15 = sbr.rel (!%p13_p4) target bundleno = 1 (0x1), region = 87 }

// kernel: resnet_generator_forward.79
= control target key start
LH: loop header
LB: loop body
LE: loop exit
PB: predicated region body
PF: predicated region fallthrough
CT: control target
= control target key end

     0   :  { %s4526_s12 = smov 0   ;;  %s5223_s0 = inlined_call_operand.vmem [shape: f32[2,18,18,128], index: 0, kind: input, shape index: {}]   ;;  %s5224_s1 = inlined_call_operand.vmem [shape: bf16[9,128,128], index: 1, kind: input, shape index: {}]   ;;  %s5225_s2 = inlined_call_operand.vmem [shape: f32[1,128], index: 2, kind: input, shape index: {}]   ;;  %s5226_s3 = inlined_call_operand.vmem [shape: f32[2,256,128], index: 3, kind: output, shape index: {}]  }
   0x1 LB: > { %s3021_s13 = sadd.s32 4294967295, %s4504_s12   ;;  %p3025_p0 = scmp.ge.s32.totalorder %s4504_s12, 1  ;;  %s4504_s12 = sphi %s4526_s12, %s13_s12  }
   0x2   : > { %p137_p1 = scmp.lt.s32.totalorder %s4504_s12, 3 }
   0x4   : > { %p138_p2 = pnand %p3025_p0, %p137_p1 }
   0x5   : > { %v4354_v0 = vld [vmem:[%s5224_s1 + $0x40] sm:$0xff] (!%p138_p2)   ;;  %p161_p3 = scmp.lt.s32.totalorder (!%p138_p2), %s3021_s13, 1  ;;  %v4356_v2 = vld [vmem:[%s5224_s1 + $0x48] sm:$0xff] (!%p138_p2)   ;;  %v4358_v4 = vld [vmem:[%s5224_s1 + $0x50] sm:$0xff] (!%p138_p2)  }
   0x6   : > { %141 = sbr.rel (%p138_p2) target bundleno = 551 (0x227), region = 32  ;;  %v4355_v1 = vld [vmem:[%s5224_s1 + $0x100] sm:$0xff] (!%p138_p2)   ;;  %3641 = vmatprep.subr.bf16.mxu1 (!%p138_p2), %v4354_v0  ;;  %v4357_v3 = vld [vmem:[%s5224_s1 + $0x108] sm:$0xff] (!%p138_p2)   ;;  %v4359_v5 = vld [vmem:[%s5224_s1 + $0x110] sm:$0xff] (!%p138_p2)  }
   0x7   : > { %3833 = vmatprep.subr.bf16.mxu0 (!%p138_p2), %v4355_v1  ;;  %3642 = vmatpush3.bf16.msra.mxu1 (!%p138_p2), %v4354_v0  ;;  %v4360_v6 = vld [vmem:[%s5224_s1 + $0x58] sm:$0xff] (!%p138_p2)   ;;  %v4362_v8 = vld [vmem:[%s5224_s1 + $0x60] sm:$0xff] (!%p138_p2)   ;;  %v4364_v10 = vld [vmem:[%s5224_s1 + $0x68] sm:$0xff] (!%p138_p2)  }
   0x8   : > { %3834 = vmatpush3.bf16.msra.mxu0 (!%p138_p2), %v4355_v1  ;;  %3643 = vmatprep.subr.bf16.mxu1 (!%p138_p2), %v4356_v2  ;;  %v4361_v7 = vld [vmem:[%s5224_s1 + $0x118] sm:$0xff] (!%p138_p2)   ;;  %v4363_v9 = vld [vmem:[%s5224_s1 + $0x120] sm:$0xff] (!%p138_p2)   ;;  %v4365_v11 = vld [vmem:[%s5224_s1 + $0x128] sm:$0xff] (!%p138_p2)  }
   0x9   : > { %3835 = vmatprep.subr.bf16.mxu0 (!%p138_p2), %v4357_v3  ;;  %v4366_v18 = vld [vmem:[%s5224_s1 + $0x70] sm:$0xff] (!%p138_p2)   ;;  %v4368_v20 = vld [vmem:[%s5224_s1 + $0x78] sm:$0xff] (!%p138_p2)   ;;  %v4370_v22 = vld [vmem:[%s5224_s1] sm:$0xff] (!%p138_p2)  }
   0xa   : > { %v4367_v19 = vld [vmem:[%s5224_s1 + $0x130] sm:$0xff] (!%p138_p2)   ;;  %v4369_v21 = vld [vmem:[%s5224_s1 + $0x138] sm:$0xff] (!%p138_p2)   ;;  %v4371_v25 = vld [vmem:[%s5224_s1 + $0x140] sm:$0xff] (!%p138_p2)  }
   0xb   : > { %3644 = vmatpush3.bf16.msra.mxu1 (!%p138_p2), %v4356_v2  ;;  %v4372_v29 = vld [vmem:[%s5224_s1 + $0x148] sm:$0xff] (!%p138_p2)   ;;  %v4374_v34 = vld [vmem:[%s5224_s1 + $0x150] sm:$0xff] (!%p138_p2)   ;;  %v4375_v40 = vld [vmem:[%s5224_s1 + $0x158] sm:$0xff] (!%p138_p2)  }
   0xc   : > { %3836 = vmatpush3.bf16.msra.mxu0 (!%p138_p2), %v4357_v3  ;;  %3645 = vmatprep.subr.bf16.mxu1 (!%p138_p2), %v4358_v4  ;;  %v4373_v31 = vld [vmem:[%s5224_s1 + $0x8] sm:$0xff] (!%p138_p2)   ;;  %v4376_v36 = vld [vmem:[%s5224_s1 + $0x10] sm:$0xff] (!%p138_p2)   ;;  %v4379_v41 = vld [vmem:[%s5224_s1 + $0x18] sm:$0xff] (!%p138_p2)  }
   0xd   : > { %s5228_s13 = smov (!%p161_p3, %s3021_s13), 1  ;;  %3837 = vmatprep.subr.bf16.mxu0 %v4359_v5  ;;  %v4377_v44 = vld [vmem:[%s5224_s1 + $0x160] sm:$0xff]   ;;  %v4378_v50 = vld [vmem:[%s5224_s1 + $0x168] sm:$0xff]   ;;  %v4380_v54 = vld [vmem:[%s5224_s1 + $0x170] sm:$0xff]  }
   0xe   : > { %s4345_s30 = smul.u32 432, %s5228_s13  ;;  %v4382_v47 = vld [vmem:[%s5224_s1 + $0x20] sm:$0xff]   ;;  %v4384_v51 = vld [vmem:[%s5224_s1 + $0x28] sm:$0xff]   ;;  %v4386_v57 = vld [vmem:[%s5224_s1 + $0x30] sm:$0xff]   ;;  %s3424_s7 = sshll.u32 %s5228_s13, 8 }
   0xf   : > { %3646 = vmatpush3.bf16.msra.mxu1 %v4358_v4  ;;  %v4381_v60 = vld [vmem:[%s5224_s1 + $0x178] sm:$0xff]   ;;  %v4383_v4 = vld [vmem:[%s5224_s1 + $0x180] sm:$0xff]   ;;  %s5156_s11 = scalar_lea.vmem %s5226_s3, %s3424_s7 }
  0x10   : > { %3838 = vmatpush3.bf16.msra.mxu0 %v4359_v5  ;;  %3647 = vmatprep.subr.bf16.mxu1 %v4360_v6  ;;  %s4570_s10 = scalar_lea.vmem %s5223_s0, %s4345_s30  ;;  %v4388_v0 = vld [vmem:[%s5224_s1 + $0x38] sm:$0xff]  }
  0x11   : > { %3839 = vmatprep.subr.bf16.mxu0 %v4361_v7  ;;  %v236_v12 = vld [vmem:[%s4570_s10 + $0x1] sm:$0xff]  ;;  %v237_v13 = vld [vmem:[%s4570_s10 + $0x9] sm:$0xff]  ;;  %v3141_v14 = vld [vmem:[%s4570_s10 + $0x19] sm:$0xff] }
  0x12   : > { %v268_v15 = vpack.c.bf16 %v237_v13, %v236_v12  ;;  %v3142_v16 = vld [vmem:[%s4570_s10 + $0x21] sm:$0xff]  ;;  %v3143_v23 = vld [vmem:[%s4570_s10 + $0x31] sm:$0xff]  ;;  %v3144_v24 = vld [vmem:[%s4570_s10 + $0x39] sm:$0xff] }
  0x13   : > { %3648 = vmatpush3.bf16.msra.mxu1 %v4360_v6  ;;  %v1364_v17 = vpack.c.bf16 %v3142_v16, %v3141_v14  ;;  %v3145_v26 = vld [vmem:[%s4570_s10 + $0x49] sm:$0xff]  ;;  %v3146_v27 = vld [vmem:[%s4570_s10 + $0x51] sm:$0xff]  ;;  %v1365_v28 = vpack.c.bf16 %v3144_v24, %v3143_v23  ;;  %v3147_v32 = vld [vmem:[%s4570_s10 + $0x61] sm:$0xff] }
  0x14   : > { %3840 = vmatpush3.bf16.msra.mxu0 %v4361_v7  ;;  %3649 = vmatprep.subr.bf16.mxu1 %v4362_v8  ;;  %v1366_v30 = vpack.c.bf16 %v3146_v27, %v3145_v26  ;;  %v3148_v33 = vld [vmem:[%s4570_s10 + $0x69] sm:$0xff]  ;;  %v3149_v35 = vld [vmem:[%s4570_s10 + $0x79] sm:$0xff]  ;;  %v3150_v37 = vld [vmem:[%s4570_s10 + $0x81] sm:$0xff] }
  0x15   : > { %3841 = vmatprep.subr.bf16.mxu0 %v4363_v9  ;;  %3657 = vmatprep.mubr.bf16.mxu1 %v268_v15  ;;  %v1367_v38 = vpack.c.bf16 %v3148_v33, %v3147_v32  ;;  %v1368_v39 = vpack.c.bf16 %v3150_v37, %v3149_v35  ;;  %v3151_v42 = vld [vmem:[%s4570_s10 + $0x91] sm:$0xff]  ;;  %v3152_v43 = vld [vmem:[%s4570_s10 + $0x99] sm:$0xff]  ;;  %v3153_v45 = vld [vmem:[%s4570_s10 + $0xa9] sm:$0xff] }
  0x16   : > { %3849 = vmatprep.mubr.bf16.mxu0 %v1364_v17  ;;  %v3154_v46 = vld [vmem:[%s4570_s10 + $0xb1] sm:$0xff]  ;;  %v1369_v48 = vpack.c.bf16 %v3152_v43, %v3151_v42  ;;  %v3155_v52 = vld [vmem:[%s4570_s10 + $0xc1] sm:$0xff]  ;;  %v3156_v53 = vld [vmem:[%s4570_s10 + $0xc9] sm:$0xff] }
  0x17   : > { %3650 = vmatpush3.bf16.msra.mxu1 %v4362_v8  ;;  %v4636_v49 = vpack.c.bf16 %v3154_v46, %v3153_v45  ;;  %v3197_v55 = vld [vmem:[%s4570_s10 + $0x1a] sm:$0xff]  ;;  %v3198_v56 = vld [vmem:[%s4570_s10 + $0x22] sm:$0xff]  ;;  %v1371_v58 = vpack.c.bf16 %v3156_v53, %v3155_v52  ;;  %v3199_v63 = vld [vmem:[%s4570_s10 + $0x32] sm:$0xff] }
  0x18   : > { %3842 = vmatpush3.bf16.msra.mxu0 %v4363_v9  ;;  %3651 = vmatprep.subr.bf16.mxu1 %v4364_v10  ;;  %v4655_v59 = vpack.c.bf16 %v3198_v56, %v3197_v55  ;;  %v254_v61 = vld [vmem:[%s4570_s10 + $0xd9] sm:$0xff]  ;;  %v255_v62 = vld [vmem:[%s4570_s10 + $0xe1] sm:$0xff]  ;;  %v256_v2 = vld [vmem:[%s4570_s10 + $0xf1] sm:$0xff] }
  0x19   : > { %3843 = vmatprep.subr.bf16.mxu0 %v4365_v11  ;;  %v3200_v1 = vld [vmem:[%s4570_s10 + $0x3a] sm:$0xff]  ;;  %v3201_v5 = vld [vmem:[%s4570_s10 + $0x4a] sm:$0xff]  ;;  %v3202_v6 = vld [vmem:[%s4570_s10 + $0x52] sm:$0xff]  ;;  %v4676_v7 = vpack.c.bf16 %v255_v62, %v254_v61 }
  0x1a   : > { %v257_v3 = vld [vmem:[%s4570_s10 + $0xf9] sm:$0xff]  ;;  %v4683_v9 = vpack.c.bf16 %v3200_v1, %v3199_v63  ;;  %v4385_v12 = vld [vmem:[%s5224_s1 + $0x188] sm:$0xff]   ;;  %v259_v14 = vld [vmem:[%s4570_s10 + $0x111] sm:$0xff] }
  0x1b   : > { %3652 = vmatpush3.bf16.msra.mxu1 %v4364_v10  ;;  %v4681_v8 = vld [vmem:[%s5224_s1 + $0x80] sm:$0xff]   ;;  %v4685_v10 = vpack.c.bf16 %v257_v3, %v256_v2  ;;  %v258_v13 = vld [vmem:[%s4570_s10 + $0x109] sm:$0xff]  ;;  %v4389_v27 = vld [vmem:[%s5224_s1 + $0x198] sm:$0xff]  }
  0x1c   : > { %3844 = vmatpush3.bf16.msra.mxu0 %v4365_v11  ;;  %3653 = vmatprep.subr.bf16.mxu1 %v4366_v18  ;;  %v4687_v11 = vpack.c.bf16 %v3202_v6, %v3201_v5  ;;  %v3203_v15 = vld [vmem:[%s4570_s10 + $0x62] sm:$0xff]  ;;  %v3204_v16 = vld [vmem:[%s4570_s10 + $0x6a] sm:$0xff]  ;;  %v262_v26 = vld [vmem:[%s4570_s10 + $0x139] sm:$0xff] }
  0x1d   : > { %3845 = vmatprep.subr.bf16.mxu0 %v4367_v19  ;;  %v4710_v23 = vpack.c.bf16 %v3204_v16, %v3203_v15  ;;  %v265_v32 = vld [vmem:[%s4570_s10 + $0x159] sm:$0xff]  ;;  %v3209_v33 = vld [vmem:[%s4570_s10 + $0xaa] sm:$0xff]  ;;  %v3211_v43 = vld [vmem:[%s4570_s10 + $0xc2] sm:$0xff] }
  0x1e   : > { %v4391_v35 = vld [vmem:[%s5224_s1 + $0x1a0] sm:$0xff]   ;;  %v4393_v42 = vld [vmem:[%s5224_s1 + $0x1a8] sm:$0xff]   ;;  %v174_v55 = vld [vmem:[%s4570_s10 + $0x18] sm:$0xff] }
  0x1f   : > { %3654 = vmatpush3.bf16.msra.mxu1 %v4366_v18  ;;  %v261_v18 = vld [vmem:[%s4570_s10 + $0x129] sm:$0xff]  ;;  %v172_v45 = vld [vmem:[%s4570_s10] sm:$0xff]  ;;  %v177_v62 = vld [vmem:[%s4570_s10 + $0x38] sm:$0xff] }
  0x20   : > { %3846 = vmatpush3.bf16.msra.mxu0 %v4367_v19  ;;  %3655 = vmatprep.subr.bf16.mxu1 %v4368_v20  ;;  %v3205_v19 = vld [vmem:[%s4570_s10 + $0x7a] sm:$0xff]  ;;  %v173_v46 = vld [vmem:[%s4570_s10 + $0x8] sm:$0xff]  ;;  %v176_v61 = vld [vmem:[%s4570_s10 + $0x30] sm:$0xff] }
  0x21   : > { %3847 = vmatprep.subr.bf16.mxu0 %v4369_v21  ;;  %v204_v53 = vpack.c.bf16 %v173_v46, %v172_v45  ;;  %v175_v56 = vld [vmem:[%s4570_s10 + $0x20] sm:$0xff]  ;;  %v3217_v63 = vld [vmem:[%s4570_s10 + $0x10a] sm:$0xff] }
  0x22   : > { %v4783_v1 = vld [vmem:[%s5224_s1 + $0x1c0] sm:$0xff]   ;;  %v4785_v2 = vpack.c.bf16 %v175_v56, %v174_v55  ;;  %v178_v6 = vld [vmem:[%s4570_s10 + $0x48] sm:$0xff] }
  0x23   : > { %3656 = vmatpush3.bf16.msra.mxu1 %v4368_v20  ;;  %v3206_v20 = vld [vmem:[%s4570_s10 + $0x82] sm:$0xff]  ;;  %v3220_v15 = vld [vmem:[%s4570_s10 + $0x12a] sm:$0xff] }
  0x24   : > { %3848 = vmatpush3.bf16.msra.mxu0 %v4369_v21  ;;  %3689 = vmatprep.subr.bf16.mxu1 %v4370_v22  ;;  %v4387_v21 = vld [vmem:[%s5224_s1 + $0x190] sm:$0xff]   ;;  %v180_v16 = vld [vmem:[%s4570_s10 + $0x60] sm:$0xff]  ;;  %v4400_v46 = vld [vmem:[%s5224_s1 + $0xa8] sm:$0xff]  }
  0x25   : > { %3881 = vmatprep.subr.bf16.mxu0 %v4371_v25  ;;  %v188_v55 = vld [vmem:[%s4570_s10 + $0xc0] sm:$0xff]  ;;  %v189_v56 = vld [vmem:[%s4570_s10 + $0xc8] sm:$0xff] }
  0x26   : > { %3658 = vmatmul.mubr.bf16.vlgmr.msra.gmra.mrb[0].mxu1 %v1364_v17  ;;  %v260_v17 = vld [vmem:[%s4570_s10 + $0x121] sm:$0xff] }
  0x27   : > { %3850 = vmatmul.mubr.bf16.vlgmr.msra.gmra.mrb[0].mxu0 %v1365_v28  ;;  %3690 = vmatpush3.bf16.msra.mxu1 %v4370_v22  ;;  %v4708_v22 = vpack.c.bf16 %v259_v14, %v258_v13  ;;  %v4712_v24 = vpack.c.bf16 %v261_v18, %v260_v17  ;;  %v4392_v13 = vld [vmem:[%s5224_s1 + $0x88] sm:$0xff]   ;;  %v3221_v18 = vld [vmem:[%s4570_s10 + $0x13a] sm:$0xff] }
  0x28   : > { %3882 = vmatpush3.bf16.msra.mxu0 %v4371_v25  ;;  %3661 = vmatprep.mubr.bf16.mxu1 %v1365_v28  ;;  %v4714_v25 = vpack.c.bf16 %v3206_v20, %v3205_v19  ;;  %v263_v28 = vld [vmem:[%s4570_s10 + $0x141] sm:$0xff]  ;;  %v4394_v19 = vld [vmem:[%s5224_s1 + $0x90] sm:$0xff]  }
  0x29   : > { %3883 = vmatprep.subr.bf16.mxu0 %v4372_v29  ;;  %3853 = vmatprep.mubr.bf16.mxu0 %v1366_v30  ;;  %v3219_v14 = vld [vmem:[%s4570_s10 + $0x122] sm:$0xff] }
  0x2a   : > { %3691 = vmatprep.subr.bf16.mxu1 %v4373_v31  ;;  %v181_v17 = vld [vmem:[%s4570_s10 + $0x68] sm:$0xff] }
  0x2b   : > { %3692 = vmatpush3.bf16.msra.mxu1 %v4373_v31  ;;  %v264_v31 = vld [vmem:[%s4570_s10 + $0x151] sm:$0xff]  ;;  %v3222_v20 = vld [vmem:[%s4570_s10 + $0x142] sm:$0xff] }
  0x2c   : > { %3884 = vmatpush3.bf16.msra.mxu0 %v4372_v29  ;;  %3693 = vmatprep.subr.bf16.mxu1 %v4376_v36  ;;  %v3207_v29 = vld [vmem:[%s4570_s10 + $0x92] sm:$0xff] }
  0x2d   : > { %3885 = vmatprep.subr.bf16.mxu0 %v4374_v34 }
  0x2e   : > { %3662 = vmatmul.mubr.bf16.gmra.mrb[4].mxu1 %v1366_v30  ;;  %v3208_v30 = vld [vmem:[%s4570_s10 + $0x9a] sm:$0xff] }
  0x2f   : > { %3854 = vmatmul.mubr.bf16.gmra.mrb[4].mxu0 %v1367_v38  ;;  %3665 = vmatprep.mubr.bf16.mxu1 %v1367_v38  ;;  %v4736_v37 = vpack.c.bf16 %v3208_v30, %v3207_v29  ;;  %v4738_v38 = vpack.c.bf16 %v265_v32, %v264_v31  ;;  %v183_v29 = vld [vmem:[%s4570_s10 + $0x80] sm:$0xff]  ;;  %v4396_v30 = vld [vmem:[%s5224_s1 + $0x98] sm:$0xff]  }
  0x30   : > { %3886 = vmatpush3.bf16.msra.mxu0 %v4374_v34  ;;  %3857 = vmatprep.mubr.bf16.mxu0 %v1368_v39  ;;  %v3210_v34 = vld [vmem:[%s4570_s10 + $0xb2] sm:$0xff]  ;;  %v3224_v32 = vld [vmem:[%s4570_s10 + $0x15a] sm:$0xff] }
  0x31   : > { %3887 = vmatprep.subr.bf16.mxu0 %v4375_v40  ;;  %3694 = vmatpush3.bf16.msra.mxu1 %v4376_v36  ;;  %v4734_v36 = vpack.c.bf16 %v263_v28, %v262_v26  ;;  %v4817_v26 = vpack.c.bf16 %v181_v17, %v180_v16  ;;  %v182_v28 = vld [vmem:[%s4570_s10 + $0x78] sm:$0xff]  ;;  %v4401_v16 = vld [vmem:[%s5224_s1 + $0x1c8] sm:$0xff]  }
  0x32   : > { %3695 = vmatprep.subr.bf16.mxu1 %v4379_v41  ;;  %v3223_v31 = vld [vmem:[%s4570_s10 + $0x152] sm:$0xff]  ;;  %v194_v17 = vld [vmem:[%s4570_s10 + $0x108] sm:$0xff] }
  0x34   : > { %3888 = vmatpush3.bf16.msra.mxu0 %v4375_v40  ;;  %v266_v40 = vld [vmem:[%s4570_s10 + $0x169] sm:$0xff] }
  0x35   : > { %3889 = vmatprep.subr.bf16.mxu0 %v4377_v44  ;;  %3696 = vmatpush3.bf16.msra.mxu1 %v4379_v41  ;;  %v267_v41 = vld [vmem:[%s4570_s10 + $0x171] sm:$0xff] }
  0x36   : > { %3666 = vmatmul.mubr.bf16.gmra.mrb[8].mxu1 %v1368_v39  ;;  %3697 = vmatprep.subr.bf16.mxu1 %v4382_v47  ;;  %v4740_v39 = vpack.c.bf16 %v3210_v34, %v3209_v33  ;;  %v184_v33 = vld [vmem:[%s4570_s10 + $0x90] sm:$0xff]  ;;  %v185_v34 = vld [vmem:[%s4570_s10 + $0x98] sm:$0xff] }
  0x37   : > { %3858 = vmatmul.mubr.bf16.gmra.mrb[8].mxu0 %v1369_v48  ;;  %3669 = vmatprep.mubr.bf16.mxu1 %v1369_v48  ;;  %v3214_v48 = vld [vmem:[%s4570_s10 + $0xe2] sm:$0xff] }
  0x38   : > { %3890 = vmatpush3.bf16.msra.mxu0 %v4377_v44  ;;  %3861 = vmatprep.mubr.bf16.mxu0 %v4636_v49  ;;  %v3212_v44 = vld [vmem:[%s4570_s10 + $0xca] sm:$0xff] }
  0x39   : > { %3891 = vmatprep.subr.bf16.mxu0 %v4378_v50  ;;  %3698 = vmatpush3.bf16.msra.mxu1 %v4382_v47  ;;  %v3213_v47 = vld [vmem:[%s4570_s10 + $0xda] sm:$0xff]  ;;  %v4762_v52 = vpack.c.bf16 %v3212_v44, %v3211_v43  ;;  %v4841_v43 = vpack.c.bf16 %v3224_v32, %v3223_v31  ;;  %v4843_v44 = vpack.c.bf16 %v185_v34, %v184_v33  ;;  %v200_v33 = vld [vmem:[%s4570_s10 + $0x150] sm:$0xff] }
  0x3a   : > { %3699 = vmatprep.subr.bf16.mxu1 %v4384_v51  ;;  %v198_v31 = vld [vmem:[%s4570_s10 + $0x138] sm:$0xff]  ;;  %v199_v32 = vld [vmem:[%s4570_s10 + $0x140] sm:$0xff] }
  0x3b   : > { %v201_v34 = vld [vmem:[%s4570_s10 + $0x158] sm:$0xff] }
  0x3c   : > { %3892 = vmatpush3.bf16.msra.mxu0 %v4378_v50  ;;  %v4395_v50 = vld [vmem:[%s5224_s1 + $0x1b0] sm:$0xff]  }
  0x3d   : > { %3893 = vmatprep.subr.bf16.mxu0 %v4380_v54  ;;  %3700 = vmatpush3.bf16.msra.mxu1 %v4384_v51  ;;  %v4760_v51 = vpack.c.bf16 %v267_v41, %v266_v40  ;;  %v3226_v40 = vld [vmem:[%s4570_s10 + $0x172] sm:$0xff]  ;;  %v4398_v41 = vld [vmem:[%s5224_s1 + $0xa0] sm:$0xff]  }
  0x3e   : > { %3670 = vmatmul.mubr.bf16.gmra.mrb[12].mxu1 %v4636_v49  ;;  %3701 = vmatprep.subr.bf16.mxu1 %v4386_v57 }
  0x3f   : > { %3862 = vmatmul.mubr.bf16.gmra.mrb[12].mxu0 %v1371_v58  ;;  %3673 = vmatprep.mubr.bf16.mxu1 %v1371_v58  ;;  %v3215_v58 = vld [vmem:[%s4570_s10 + $0xf2] sm:$0xff] }
  0x40   : > { %3894 = vmatpush3.bf16.msra.mxu0 %v4380_v54  ;;  %3897 = vmatprep.mubr.bf16.mxu0 %v4655_v59  ;;  %v4764_v54 = vpack.c.bf16 %v3214_v48, %v3213_v47  ;;  %v186_v47 = vld [vmem:[%s4570_s10 + $0xa8] sm:$0xff]  ;;  %v187_v48 = vld [vmem:[%s4570_s10 + $0xb0] sm:$0xff] }
  0x41   : > { %3895 = vmatprep.subr.bf16.mxu0 %v4381_v60  ;;  %3702 = vmatpush3.bf16.msra.mxu1 %v4386_v57  ;;  %v4397_v57 = vld [vmem:[%s5224_s1 + $0x1b8] sm:$0xff]  }
  0x42   : > { %3703 = vmatprep.subr.bf16.mxu1 %v4388_v0 }
  0x44   : > { %3896 = vmatpush3.bf16.msra.mxu0 %v4381_v60  ;;  %v3216_v60 = vld [vmem:[%s4570_s10 + $0xfa] sm:$0xff] }
  0x45   : > { %3929 = vmatprep.subr.bf16.mxu0 %v4383_v4  ;;  %3704 = vmatpush3.bf16.msra.mxu1 %v4388_v0  ;;  %v3218_v0 = vld [vmem:[%s4570_s10 + $0x112] sm:$0xff]  ;;  %v4787_v3 = vpack.c.bf16 %v3216_v60, %v3215_v58  ;;  %v4863_v58 = vpack.c.bf16 %v187_v48, %v186_v47  ;;  %v202_v47 = vld [vmem:[%s4570_s10 + $0x168] sm:$0xff] }
  0x46   : > { %3674 = vmatmul.mubr.bf16.gmra.mrb[16].mxu1 %v4676_v7  ;;  %3737 = vmatprep.subr.bf16.mxu1 %v4681_v8  ;;  %v4791_v5 = vpack.c.bf16 %v3218_v0, %v3217_v63  ;;  %v190_v63 = vld [vmem:[%s4570_s10 + $0xd8] sm:$0xff]  ;;  %v191_v0 = vld [vmem:[%s4570_s10 + $0xe0] sm:$0xff]  ;;  %v203_v48 = vld [vmem:[%s4570_s10 + $0x170] sm:$0xff] }
  0x47   : > { %3898 = vmatmul.mubr.bf16.vlgmr.msra.gmra.mrb[0].mxu0 %v4683_v9  ;;  %3677 = vmatprep.mubr.bf16.mxu1 %v4685_v10 }
  0x48   : > { %3930 = vmatpush3.bf16.msra.mxu0 %v4383_v4  ;;  %3901 = vmatprep.mubr.bf16.mxu0 %v4687_v11  ;;  %v4789_v4 = vpack.c.bf16 %v177_v62, %v176_v61  ;;  %v4865_v61 = vpack.c.bf16 %v189_v56, %v188_v55  ;;  %v4404_v62 = vld [vmem:[%s5224_s1 + $0xb8] sm:$0xff]   ;;  %v4411_v55 = vld [vmem:[%s5224_s1 + $0x1f0] sm:$0xff]   ;;  %v4938_v56 = vpack.c.bf16 %v203_v48, %v202_v47 }
  0x49   : > { %3931 = vmatprep.subr.bf16.mxu0 %v4385_v12  ;;  %v3317_v47 = vld [vmem:[%s4570_s10 + $0x91] sm:$0xff]  ;;  %v3318_v48 = vld [vmem:[%s4570_s10 + $0x99] sm:$0xff] }
  0x4c   : > { %3932 = vmatpush3.bf16.msra.mxu0 %v4385_v12  ;;  %v179_v12 = vld [vmem:[%s4570_s10 + $0x50] sm:$0xff] }
  0x4d   : > { %3933 = vmatprep.subr.bf16.mxu0 %v4387_v21 }
  0x4e   : > { %3678 = vmatmul.mubr.bf16.gmra.mrb[20].mxu1 %v4708_v22 }
  0x4f   : > { %3902 = vmatmul.mubr.bf16.gmra.mrb[4].mxu0 %v4710_v23  ;;  %3681 = vmatprep.mubr.bf16.mxu1 %v4712_v24 }
  0x50   : > { %3905 = vmatprep.mubr.bf16.mxu0 %v4714_v25  ;;  %3934 = vmatpush3.bf16.msra.mxu0 %v4387_v21  ;;  %v4813_v21 = vpack.c.bf16 %v179_v12, %v178_v6  ;;  %v192_v6 = vld [vmem:[%s4570_s10 + $0xf0] sm:$0xff]  ;;  %v193_v12 = vld [vmem:[%s4570_s10 + $0xf8] sm:$0xff] }
  0x51   : > { %3935 = vmatprep.subr.bf16.mxu0 %v4389_v27 }
  0x54   : > { %3936 = vmatpush3.bf16.msra.mxu0 %v4389_v27  ;;  %v4819_v27 = vpack.c.bf16 %v3222_v20, %v3221_v18  ;;  %v195_v18 = vld [vmem:[%s4570_s10 + $0x110] sm:$0xff]  ;;  %v197_v20 = vld [vmem:[%s4570_s10 + $0x128] sm:$0xff] }
  0x55   : > { %3937 = vmatprep.subr.bf16.mxu0 %v4391_v35 }
  0x56   : > { %3682 = vmatmul.mubr.bf16.gmra.mrb[24].mxu1 %v4734_v36 }
  0x57   : > { %3906 = vmatmul.mubr.bf16.gmra.mrb[8].mxu0 %v4736_v37  ;;  %3685 = vmatprep.mubr.bf16.mxu1 %v4738_v38 }
  0x58   : > { %3909 = vmatprep.mubr.bf16.mxu0 %v4740_v39  ;;  %3938 = vmatpush3.bf16.msra.mxu0 %v4391_v35  ;;  %v3225_v35 = vld [vmem:[%s4570_s10 + $0x16a] sm:$0xff] }
  0x59   : > { %3939 = vmatprep.subr.bf16.mxu0 %v4393_v42  ;;  %v4845_v45 = vpack.c.bf16 %v3226_v40, %v3225_v35  ;;  %v4407_v35 = vld [vmem:[%s5224_s1 + $0x1e0] sm:$0xff]   ;;  %v4920_v40 = vpack.c.bf16 %v199_v32, %v198_v31  ;;  %v3314_v32 = vld [vmem:[%s4570_s10 + $0x69] sm:$0xff] }
  0x5a   : > { %v3313_v31 = vld [vmem:[%s4570_s10 + $0x61] sm:$0xff] }
  0x5c   : > { %3940 = vmatpush3.bf16.msra.mxu0 %v4393_v42  ;;  %v4839_v42 = vpack.c.bf16 %v183_v29, %v182_v28  ;;  %v4403_v28 = vld [vmem:[%s5224_s1 + $0x1d0] sm:$0xff]   ;;  %v4902_v29 = vpack.c.bf16 %v195_v18, %v194_v17  ;;  %v3310_v18 = vld [vmem:[%s4570_s10 + $0x39] sm:$0xff] }
  0x5d   : > { %3941 = vmatprep.subr.bf16.mxu0 %v4395_v50  ;;  %v3309_v17 = vld [vmem:[%s4570_s10 + $0x31] sm:$0xff] }
  0x5e   : > { %3686 = vmatmul.mubr.bf16.gmra.mrb[28].mxu1 %v4760_v51 }
  0x5f   : > { %3910 = vmatmul.mubr.bf16.gmra.mrb[12].mxu0 %v4762_v52  ;;  %3705 = vmatprep.mubr.bf16.mxu1 %v204_v53  ;;  %v3228_v53 = vld [vmem:[%s4570_s10 + $0x18a] sm:$0xff] }
  0x60   : > { %3913 = vmatprep.mubr.bf16.mxu0 %v4764_v54  ;;  %3942 = vmatpush3.bf16.msra.mxu0 %v4395_v50  ;;  %v3227_v50 = vld [vmem:[%s4570_s10 + $0x182] sm:$0xff] }
  0x61   : > { %3943 = vmatprep.subr.bf16.mxu0 %v4397_v57  ;;  %v1685_v60 = vpack.c.bf16 %v3228_v53, %v3227_v50  ;;  %v719_v50 = vld [vmem:[%s4570_s10 + $0x2] sm:$0xff]  ;;  %v720_v53 = vld [vmem:[%s4570_s10 + $0xa] sm:$0xff] }
  0x64   : > { %3944 = vmatpush3.bf16.msra.mxu0 %v4397_v57  ;;  %v4402_v57 = vld [vmem:[%s5224_s1 + $0xb0] sm:$0xff]  }
  0x65   : > { %3977 = vmatprep.subr.bf16.mxu0 %v4783_v1 }
  0x66   : > { %3706 = vmatmul.mubr.bf16.vlgmr.msra.gmra.mrb[0].mxu1 %v4785_v2 }
  0x67   : > { %3914 = vmatmul.mubr.bf16.gmra.mrb[16].mxu0 %v4787_v3  ;;  %3738 = vmatpush3.bf16.msra.mxu1 %v4681_v8  ;;  %v4815_v8 = vpack.c.bf16 %v3220_v15, %v3219_v14  ;;  %v4882_v14 = vpack.c.bf16 %v191_v0, %v190_v63  ;;  %v4884_v15 = vpack.c.bf16 %v193_v12, %v192_v6  ;;  %v4408_v63 = vld [vmem:[%s5224_s1 + $0xc8] sm:$0xff]   ;;  %v4410_v0 = vld [vmem:[%s5224_s1 + $0xd0] sm:$0xff]   ;;  %v4414_v12 = vld [vmem:[%s5224_s1 + $0xe0] sm:$0xff]  }
  0x68   : > { %3709 = vmatprep.mubr.bf16.mxu1 %v4789_v4  ;;  %3917 = vmatprep.mubr.bf16.mxu0 %v4791_v5  ;;  %v3282_v6 = vld [vmem:[%s4570_s10 + $0x188] sm:$0xff] }
  0x69   : > { %3739 = vmatprep.subr.bf16.mxu1 %v4392_v13 }
  0x6b   : > { %3740 = vmatpush3.bf16.msra.mxu1 %v4392_v13  ;;  %v4880_v13 = vld [vmem:[%s5224_s1 + $0xc0] sm:$0xff]  }
  0x6c   : > { %3741 = vmatprep.subr.bf16.mxu1 %v4394_v19 }
  0x6e   : > { %3710 = vmatmul.mubr.bf16.gmra.mrb[4].mxu1 %v4813_v21 }
  0x6f   : > { %3918 = vmatmul.mubr.bf16.gmra.mrb[20].mxu0 %v4815_v8  ;;  %3713 = vmatprep.mubr.bf16.mxu1 %v4817_v26 }
  0x70   : > { %3921 = vmatprep.mubr.bf16.mxu0 %v4819_v27  ;;  %3742 = vmatpush3.bf16.msra.mxu1 %v4394_v19  ;;  %v196_v19 = vld [vmem:[%s4570_s10 + $0x120] sm:$0xff] }
  0x71   : > { %3743 = vmatprep.subr.bf16.mxu1 %v4396_v30 }
  0x74   : > { %3744 = vmatpush3.bf16.msra.mxu1 %v4396_v30  ;;  %v4904_v30 = vpack.c.bf16 %v197_v20, %v196_v19  ;;  %v2283_v20 = vpack.c.bf16 %v3310_v18, %v3309_v17  ;;  %v3377_v17 = vld [vmem:[%s4570_s10 + $0xc2] sm:$0xff]  ;;  %v3378_v18 = vld [vmem:[%s4570_s10 + $0xca] sm:$0xff] }
  0x75   : > { %3745 = vmatprep.subr.bf16.mxu1 %v4398_v41 }
  0x76   : > { %3714 = vmatmul.mubr.bf16.gmra.mrb[8].mxu1 %v4839_v42 }
  0x77   : > { %3922 = vmatmul.mubr.bf16.gmra.mrb[24].mxu0 %v4841_v43  ;;  %3717 = vmatprep.mubr.bf16.mxu1 %v4843_v44 }
  0x78   : > { %3925 = vmatprep.mubr.bf16.mxu0 %v4845_v45  ;;  %3746 = vmatpush3.bf16.msra.mxu1 %v4398_v41  ;;  %v4922_v41 = vpack.c.bf16 %v201_v34, %v200_v33  ;;  %v2285_v34 = vpack.c.bf16 %v3314_v32, %v3313_v31 }
  0x79   : > { %3747 = vmatprep.subr.bf16.mxu1 %v4400_v46 }
  0x7c   : > { %3748 = vmatpush3.bf16.msra.mxu1 %v4400_v46  ;;  %v4409_v46 = vld [vmem:[%s5224_s1 + $0x1e8] sm:$0xff]  }
  0x7d   : > { %3749 = vmatprep.subr.bf16.mxu1 %v4402_v57 }
  0x7e   : > { %3718 = vmatmul.mubr.bf16.gmra.mrb[12].mxu1 %v4863_v58 }
  0x7f   : > { %3926 = vmatmul.mubr.bf16.gmra.mrb[28].mxu0 %v1685_v60  ;;  %3721 = vmatprep.mubr.bf16.mxu1 %v4865_v61  ;;  %v4413_v60 = vld [vmem:[%s5224_s1 + $0x1f8] sm:$0xff]  }
  0x80   : > { %3945 = vmatprep.mubr.bf16.mxu0 %v4789_v4  ;;  %3750 = vmatpush3.bf16.msra.mxu1 %v4402_v57  ;;  %v751_v57 = vpack.c.bf16 %v720_v53, %v719_v50  ;;  %v4419_v50 = vld [vmem:[%s5224_s1 + $0x210] sm:$0xff]  }
  0x81   : > { %3751 = vmatprep.subr.bf16.mxu1 %v4404_v62 }
  0x84   : > { %3752 = vmatpush3.bf16.msra.mxu1 %v4404_v62  ;;  %v4415_v62 = vld [vmem:[%s5224_s1 + $0x200] sm:$0xff]  }
  0x85   : > { %3785 = vmatprep.subr.bf16.mxu1 %v4880_v13 }
  0x86   : > { %3722 = vmatmul.mubr.bf16.gmra.mrb[16].mxu1 %v4882_v14 }
  0x87   : > { %3946 = vmatmul.mubr.bf16.vlgmr.msra.gmra.mrb[0].mxu0 %v4813_v21  ;;  %3725 = vmatprep.mubr.bf16.mxu1 %v4884_v15 }
  0x88   : > { %3978 = vmatpush3.bf16.msra.mxu0 %v4783_v1  ;;  %3949 = vmatprep.mubr.bf16.mxu0 %v4817_v26  ;;  %v4405_v1 = vld [vmem:[%s5224_s1 + $0x1d8] sm:$0xff]  }
  0x89   : > { %3979 = vmatprep.subr.bf16.mxu0 %v4401_v16 }
  0x8c   : > { %3980 = vmatpush3.bf16.msra.mxu0 %v4401_v16  ;;  %v3284_v16 = vld [vmem:[%s4570_s10 + $0x1a0] sm:$0xff] }
  0x8d   : > { %3981 = vmatprep.subr.bf16.mxu0 %v4403_v28 }
  0x8e   : > { %3726 = vmatmul.mubr.bf16.gmra.mrb[20].mxu1 %v4902_v29 }
  0x8f   : > { %3950 = vmatmul.mubr.bf16.gmra.mrb[4].mxu0 %v4839_v42  ;;  %3729 = vmatprep.mubr.bf16.mxu1 %v4904_v30 }
  0x90   : > { %3953 = vmatprep.mubr.bf16.mxu0 %v4843_v44  ;;  %3982 = vmatpush3.bf16.msra.mxu0 %v4403_v28  ;;  %v3311_v28 = vld [vmem:[%s4570_s10 + $0x49] sm:$0xff] }
  0x91   : > { %3983 = vmatprep.subr.bf16.mxu0 %v4405_v1 }
  0x94   : > { %3984 = vmatpush3.bf16.msra.mxu0 %v4405_v1  ;;  %v3312_v1 = vld [vmem:[%s4570_s10 + $0x51] sm:$0xff] }
  0x95   : > { %3985 = vmatprep.subr.bf16.mxu0 %v4407_v35  ;;  %v2284_v33 = vpack.c.bf16 %v3312_v1, %v3311_v28  ;;  %v3381_v28 = vld [vmem:[%s4570_s10 + $0xf2] sm:$0xff]  ;;  %v3382_v1 = vld [vmem:[%s4570_s10 + $0xfa] sm:$0xff] }
  0x96   : > { %3730 = vmatmul.mubr.bf16.gmra.mrb[24].mxu1 %v4920_v40  ;;  %v2597_v32 = vpack.c.bf16 %v3382_v1, %v3381_v28 }
  0x97   : > { %3954 = vmatmul.mubr.bf16.gmra.mrb[8].mxu0 %v4863_v58  ;;  %3733 = vmatprep.mubr.bf16.mxu1 %v4922_v41 }
  0x98   : > { %3957 = vmatprep.mubr.bf16.mxu0 %v4865_v61  ;;  %3986 = vmatpush3.bf16.msra.mxu0 %v4407_v35  ;;  %v3315_v35 = vld [vmem:[%s4570_s10 + $0x79] sm:$0xff] }
  0x99   : > { %3987 = vmatprep.subr.bf16.mxu0 %v4409_v46 }
  0x9c   : > { %3988 = vmatpush3.bf16.msra.mxu0 %v4409_v46  ;;  %v3316_v46 = vld [vmem:[%s4570_s10 + $0x81] sm:$0xff] }
  0x9d   : > { %3989 = vmatprep.subr.bf16.mxu0 %v4411_v55  ;;  %v2286_v53 = vpack.c.bf16 %v3316_v46, %v3315_v35  ;;  %v3162_v35 = vld [vmem:[%s4570_s10 + $0x111] sm:$0xff]  ;;  %v3385_v46 = vld [vmem:[%s4570_s10 + $0x122] sm:$0xff] }
  0x9e   : > { %3734 = vmatmul.mubr.bf16.gmra.mrb[28].mxu1 %v4938_v56 }
  0x9f   : > { %3958 = vmatmul.mubr.bf16.gmra.mrb[12].mxu0 %v4882_v14  ;;  %3753 = vmatprep.mubr.bf16.mxu1 %v751_v57  ;;  %v3322_v57 = vld [vmem:[%s4570_s10 + $0xc9] sm:$0xff] }
  0xa0   : > { %3961 = vmatprep.mubr.bf16.mxu0 %v4884_v15  ;;  %3990 = vmatpush3.bf16.msra.mxu0 %v4411_v55  ;;  %v2287_v55 = vpack.c.bf16 %v3318_v48, %v3317_v47  ;;  %v3386_v47 = vld [vmem:[%s4570_s10 + $0x12a] sm:$0xff] }
  0xa1   : > { %3991 = vmatprep.subr.bf16.mxu0 %v4413_v60 }
  0xa4   : > { %3992 = vmatpush3.bf16.msra.mxu0 %v4413_v60  ;;  %v4422_v60 = vld [vmem:[%s5224_s1 + $0x220] sm:$0xff]  }
  0xa5   : > { %4025 = vmatprep.subr.bf16.mxu0 %v4415_v62 }
  0xa6   : > { %3754 = vmatmul.mubr.bf16.vlgmr.msra.gmra.mrb[0].mxu1 %v4655_v59  ;;  %v4412_v59 = vld [vmem:[%s5224_s1 + $0xd8] sm:$0xff]  }
  0xa7   : > { %3962 = vmatmul.mubr.bf16.gmra.mrb[16].mxu0 %v4902_v29  ;;  %3786 = vmatpush3.bf16.msra.mxu1 %v4880_v13 }
  0xa8   : > { %3757 = vmatprep.mubr.bf16.mxu1 %v4683_v9  ;;  %3965 = vmatprep.mubr.bf16.mxu0 %v4904_v30  ;;  %v3281_v9 = vld [vmem:[%s4570_s10 + $0x180] sm:$0xff] }
  0xa9   : > { %3787 = vmatprep.subr.bf16.mxu1 %v4408_v63  ;;  %v4972_v13 = vpack.c.bf16 %v3282_v6, %v3281_v9  ;;  %v3372_v6 = vld [vmem:[%s4570_s10 + $0x82] sm:$0xff] }
  0xab   : > { %3788 = vmatpush3.bf16.msra.mxu1 %v4408_v63  ;;  %v4423_v63 = vld [vmem:[%s5224_s1 + $0x228] sm:$0xff]  }
  0xac   : > { %3789 = vmatprep.subr.bf16.mxu1 %v4410_v0 }
  0xae   : > { %3758 = vmatmul.mubr.bf16.gmra.mrb[4].mxu1 %v4687_v11  ;;  %v4416_v11 = vld [vmem:[%s5224_s1 + $0xe8] sm:$0xff]  }
  0xaf   : > { %3966 = vmatmul.mubr.bf16.gmra.mrb[20].mxu0 %v4920_v40  ;;  %3761 = vmatprep.mubr.bf16.mxu1 %v4710_v23  ;;  %v3283_v23 = vld [vmem:[%s4570_s10 + $0x198] sm:$0xff] }
  0xb0   : > { %3969 = vmatprep.mubr.bf16.mxu0 %v4922_v41  ;;  %3790 = vmatpush3.bf16.msra.mxu1 %v4410_v0  ;;  %v1992_v19 = vpack.c.bf16 %v3284_v16, %v3283_v23  ;;  %v3370_v0 = vld [vmem:[%s4570_s10 + $0x6a] sm:$0xff] }
  0xb1   : > { %3791 = vmatprep.subr.bf16.mxu1 %v4412_v59 }
  0xb4   : > { %3792 = vmatpush3.bf16.msra.mxu1 %v4412_v59  ;;  %v4497_v59 = vld [vmem:[%s5224_s1 + $0x138] sm:$0xff]  }
  0xb5   : > { %3793 = vmatprep.subr.bf16.mxu1 %v4414_v12 }
  0xb6   : > { %3762 = vmatmul.mubr.bf16.gmra.mrb[8].mxu1 %v4714_v25  ;;  %v4418_v25 = vld [vmem:[%s5224_s1 + $0xf0] sm:$0xff]  }
  0xb7   : > { %3970 = vmatmul.mubr.bf16.gmra.mrb[24].mxu0 %v4938_v56  ;;  %3765 = vmatprep.mubr.bf16.mxu1 %v4736_v37  ;;  %v4420_v37 = vld [vmem:[%s5224_s1 + $0xf8] sm:$0xff]  }
  0xb8   : > { %3973 = vmatprep.mubr.bf16.mxu0 %v4972_v13  ;;  %3794 = vmatpush3.bf16.msra.mxu1 %v4414_v12  ;;  %v3373_v12 = vld [vmem:[%s4570_s10 + $0x92] sm:$0xff] }
  0xb9   : > { %3795 = vmatprep.subr.bf16.mxu1 %v4416_v11 }
  0xbc   : > { %3796 = vmatpush3.bf16.msra.mxu1 %v4416_v11  ;;  %v3374_v11 = vld [vmem:[%s4570_s10 + $0x9a] sm:$0xff] }
  0xbd   : > { %3797 = vmatprep.subr.bf16.mxu1 %v4418_v25  ;;  %v2593_v16 = vpack.c.bf16 %v3374_v11, %v3373_v12 }
  0xbe   : > { %3766 = vmatmul.mubr.bf16.gmra.mrb[12].mxu1 %v4740_v39  ;;  %v4417_v39 = vld [vmem:[%s5224_s1 + $0x208] sm:$0xff]  }
  0xbf   : > { %3974 = vmatmul.mubr.bf16.gmra.mrb[28].mxu0 %v1992_v19  ;;  %3769 = vmatprep.mubr.bf16.mxu1 %v4762_v52  ;;  %v4490_v52 = vld [vmem:[%s5224_s1 + $0x100] sm:$0xff]   ;;  %v2595_v19 = vpack.c.bf16 %v3378_v18, %v3377_v17 }
  0xc0   : > { %3993 = vmatprep.mubr.bf16.mxu0 %v2283_v20  ;;  %3798 = vmatpush3.bf16.msra.mxu1 %v4418_v25  ;;  %v3157_v20 = vld [vmem:[%s4570_s10 + $0xd9] sm:$0xff] }
  0xc1   : > { %3799 = vmatprep.subr.bf16.mxu1 %v4420_v37 }
  0xc4   : > { %3800 = vmatpush3.bf16.msra.mxu1 %v4420_v37  ;;  %v3158_v37 = vld [vmem:[%s4570_s10 + $0xe1] sm:$0xff] }
  0xc5   : > { %4073 = vmatprep.subr.bf16.mxu1 %v4490_v52 }
  0xc6   : > { %3770 = vmatmul.mubr.bf16.gmra.mrb[16].mxu1 %v4764_v54  ;;  %v4421_v54 = vld [vmem:[%s5224_s1 + $0x218] sm:$0xff]  }
  0xc7   : > { %3994 = vmatmul.mubr.bf16.vlgmr.msra.gmra.mrb[0].mxu0 %v2284_v33  ;;  %3773 = vmatprep.mubr.bf16.mxu1 %v4787_v3  ;;  %v3321_v3 = vld [vmem:[%s4570_s10 + $0xc1] sm:$0xff]  ;;  %v3160_v33 = vld [vmem:[%s4570_s10 + $0xf9] sm:$0xff] }
  0xc8   : > { %4026 = vmatpush3.bf16.msra.mxu0 %v4415_v62  ;;  %3997 = vmatprep.mubr.bf16.mxu0 %v2285_v34  ;;  %v2289_v62 = vpack.c.bf16 %v3322_v57, %v3321_v3  ;;  %v3383_v34 = vld [vmem:[%s4570_s10 + $0x10a] sm:$0xff]  ;;  %v3387_v3 = vld [vmem:[%s4570_s10 + $0x13a] sm:$0xff]  ;;  %v3388_v57 = vld [vmem:[%s4570_s10 + $0x142] sm:$0xff] }
  0xc9   : > { %4027 = vmatprep.subr.bf16.mxu0 %v4417_v39 }
  0xcc   : > { %4028 = vmatpush3.bf16.msra.mxu0 %v4417_v39  ;;  %v3384_v39 = vld [vmem:[%s4570_s10 + $0x112] sm:$0xff] }
  0xcd   : > { %4029 = vmatprep.subr.bf16.mxu0 %v4419_v50  ;;  %v2598_v48 = vpack.c.bf16 %v3384_v39, %v3383_v34 }
  0xce   : > { %3774 = vmatmul.mubr.bf16.gmra.mrb[20].mxu1 %v4791_v5  ;;  %v4424_v5 = vld [vmem:[%s5224_s1 + $0x230] sm:$0xff]  }
  0xcf   : > { %3998 = vmatmul.mubr.bf16.gmra.mrb[4].mxu0 %v2286_v53  ;;  %3777 = vmatprep.mubr.bf16.mxu1 %v4815_v8  ;;  %v4425_v8 = vld [vmem:[%s5224_s1 + $0x238] sm:$0xff]   ;;  %v2599_v53 = vpack.c.bf16 %v3386_v47, %v3385_v46 }
  0xd0   : > { %4001 = vmatprep.mubr.bf16.mxu0 %v2287_v55  ;;  %4030 = vmatpush3.bf16.msra.mxu0 %v4419_v50  ;;  %v3163_v55 = vld [vmem:[%s4570_s10 + $0x121] sm:$0xff] }
  0xd1   : > { %4031 = vmatprep.subr.bf16.mxu0 %v4421_v54 }
  0xd4   : > { %4032 = vmatpush3.bf16.msra.mxu0 %v4421_v54  ;;  %v3164_v54 = vld [vmem:[%s4570_s10 + $0x129] sm:$0xff] }
  0xd5   : > { %4033 = vmatprep.subr.bf16.mxu0 %v4422_v60 }
  0xd6   : > { %3778 = vmatmul.mubr.bf16.gmra.mrb[24].mxu1 %v4819_v27  ;;  %v4495_v27 = vld [vmem:[%s5224_s1 + $0x128] sm:$0xff]  }
  0xd7   : > { %4002 = vmatmul.mubr.bf16.gmra.mrb[8].mxu0 %v4636_v49  ;;  %3781 = vmatprep.mubr.bf16.mxu1 %v4841_v43  ;;  %v4491_v49 = vld [vmem:[%s5224_s1 + $0x108] sm:$0xff]   ;;  %v4496_v43 = vld [vmem:[%s5224_s1 + $0x130] sm:$0xff]  }
  0xd8   : > { %4005 = vmatprep.mubr.bf16.mxu0 %v2289_v62  ;;  %4034 = vmatpush3.bf16.msra.mxu0 %v4422_v60  ;;  %v3165_v60 = vld [vmem:[%s4570_s10 + $0x139] sm:$0xff]  ;;  %v3166_v62 = vld [vmem:[%s4570_s10 + $0x141] sm:$0xff] }
  0xd9   : > { %4035 = vmatprep.subr.bf16.mxu0 %v4423_v63 }
  0xdc   : > { %4036 = vmatpush3.bf16.msra.mxu0 %v4423_v63  ;;  %v3389_v63 = vld [vmem:[%s4570_s10 + $0x152] sm:$0xff] }
  0xdd   : > { %4037 = vmatprep.subr.bf16.mxu0 %v4424_v5 }
  0xde   : > { %3782 = vmatmul.mubr.bf16.gmra.mrb[28].mxu1 %v4845_v45  ;;  %v3368_v45 = vld [vmem:[%s4570_s10 + $0x52] sm:$0xff] }
  0xdf   : > { %4006 = vmatmul.mubr.bf16.gmra.mrb[12].mxu0 %v4676_v7  ;;  %3801 = vmatprep.mubr.bf16.mxu1 %v4785_v2  ;;  %v4492_v7 = vld [vmem:[%s5224_s1 + $0x110] sm:$0xff]  }
  0xe0   : > { %4009 = vmatprep.mubr.bf16.mxu0 %v4685_v10  ;;  %4038 = vmatpush3.bf16.msra.mxu0 %v4424_v5  ;;  %v3337_v10 = vld [vmem:[%s4570_s10 + $0x181] sm:$0xff] }
  0xe1   : > { %4039 = vmatprep.subr.bf16.mxu0 %v4425_v8  ;;  %v3390_v5 = vld [vmem:[%s4570_s10 + $0x15a] sm:$0xff] }
  0xe4   : > { %4040 = vmatpush3.bf16.msra.mxu0 %v4425_v8  ;;  %v1375_v8 = vpack.c.bf16 %v3164_v54, %v3163_v55 }
  0xe6   : > { %3802 = vmatmul.mubr.bf16.vlgmr.msra.gmra.mrb[0].mxu1 %v4789_v4  ;;  %v3340_v4 = vld [vmem:[%s4570_s10 + $0x1a1] sm:$0xff] }
  0xe7   : > { %4010 = vmatmul.mubr.bf16.gmra.mrb[16].mxu0 %v4708_v22  ;;  %4081 = vmatpush3.bf16.msra.mxu1 %v4490_v52  ;;  %v3338_v22 = vld [vmem:[%s4570_s10 + $0x189] sm:$0xff] }
  0xe8   : > { %3805 = vmatprep.mubr.bf16.mxu1 %v4813_v21  ;;  %4013 = vmatprep.mubr.bf16.mxu0 %v4712_v24  ;;  %v4493_v24 = vld [vmem:[%s5224_s1 + $0x118] sm:$0xff]   ;;  %v5057_v2 = vpack.c.bf16 %v3338_v22, %v3337_v10  ;;  %v3161_v52 = vld [vmem:[%s4570_s10 + $0x109] sm:$0xff]  ;;  %v2601_v10 = vpack.c.bf16 %v3390_v5, %v3389_v63 }
  0xe9   : > { %4074 = vmatprep.subr.bf16.mxu1 %v4491_v49  ;;  %v3365_v21 = vld [vmem:[%s4570_s10 + $0x32] sm:$0xff]  ;;  %v1374_v50 = vpack.c.bf16 %v3162_v35, %v3161_v52 }
  0xea   : > { %v3167_v22 = vld [vmem:[%s4570_s10 + $0x151] sm:$0xff] }
  0xeb   : > { %4082 = vmatpush3.bf16.msra.mxu1 %v4491_v49  ;;  %v2600_v49 = vpack.c.bf16 %v3388_v57, %v3387_v3 }
  0xec   : > { %4075 = vmatprep.subr.bf16.mxu1 %v4492_v7 }
  0xee   : > { %3806 = vmatmul.mubr.bf16.gmra.mrb[4].mxu1 %v4817_v26  ;;  %v3366_v26 = vld [vmem:[%s4570_s10 + $0x3a] sm:$0xff] }
  0xef   : > { %4014 = vmatmul.mubr.bf16.gmra.mrb[20].mxu0 %v4734_v36  ;;  %3809 = vmatprep.mubr.bf16.mxu1 %v4839_v42  ;;  %v4494_v36 = vld [vmem:[%s5224_s1 + $0x120] sm:$0xff]  }
  0xf0   : > { %4017 = vmatprep.mubr.bf16.mxu0 %v4738_v38  ;;  %4083 = vmatpush3.bf16.msra.mxu1 %v4492_v7  ;;  %v3339_v38 = vld [vmem:[%s4570_s10 + $0x199] sm:$0xff]  ;;  %v1376_v7 = vpack.c.bf16 %v3166_v62, %v3165_v60 }
  0xf1   : > { %4076 = vmatprep.subr.bf16.mxu1 %v4493_v24  ;;  %v2298_v42 = vpack.c.bf16 %v3340_v4, %v3339_v38  ;;  %v3392_v38 = vld [vmem:[%s4570_s10 + $0x172] sm:$0xff]  ;;  %v3169_v4 = vld [vmem:[%s4570_s10 + $0x169] sm:$0xff] }
  0xf4   : > { %4084 = vmatpush3.bf16.msra.mxu1 %v4493_v24  ;;  %v3168_v24 = vld [vmem:[%s4570_s10 + $0x159] sm:$0xff] }
  0xf5   : > { %4077 = vmatprep.subr.bf16.mxu1 %v4494_v36 }
  0xf6   : > { %3810 = vmatmul.mubr.bf16.gmra.mrb[8].mxu1 %v4843_v44  ;;  %v3367_v44 = vld [vmem:[%s4570_s10 + $0x4a] sm:$0xff] }
  0xf7   : > { %4018 = vmatmul.mubr.bf16.gmra.mrb[24].mxu0 %v4760_v51  ;;  %3813 = vmatprep.mubr.bf16.mxu1 %v4863_v58  ;;  %v2589_v51 = vpack.c.bf16 %v3366_v26, %v3365_v21  ;;  %v3369_v58 = vld [vmem:[%s4570_s10 + $0x62] sm:$0xff]  ;;  %v2590_v9 = vpack.c.bf16 %v3368_v45, %v3367_v44  ;;  %v3170_v21 = vld [vmem:[%s4570_s10 + $0x171] sm:$0xff]  ;;  %v3395_v45 = vld [vmem:[%s4570_s10 + $0x19a] sm:$0xff] }
  0xf8   : > { %4021 = vmatprep.mubr.bf16.mxu0 %v5057_v2  ;;  %4085 = vmatpush3.bf16.msra.mxu1 %v4494_v36  ;;  %v3391_v36 = vld [vmem:[%s4570_s10 + $0x16a] sm:$0xff]  ;;  %v3393_v26 = vld [vmem:[%s4570_s10 + $0x182] sm:$0xff] }
  0xf9   : > { %4078 = vmatprep.subr.bf16.mxu1 %v4495_v27 }
  0xfc   : > { %4086 = vmatpush3.bf16.msra.mxu1 %v4495_v27  ;;  %v3394_v27 = vld [vmem:[%s4570_s10 + $0x18a] sm:$0xff] }
  0xfd   : > { %4079 = vmatprep.subr.bf16.mxu1 %v4496_v43  ;;  %v2603_v44 = vpack.c.bf16 %v3394_v27, %v3393_v26 }
  0xfe   : > { %3814 = vmatmul.mubr.bf16.gmra.mrb[12].mxu1 %v4865_v61  ;;  %v2591_v61 = vpack.c.bf16 %v3370_v0, %v3369_v58  ;;  %v3396_v58 = vld [vmem:[%s4570_s10 + $0x1a2] sm:$0xff] }
  0xff   : > { %4022 = vmatmul.mubr.bf16.gmra.mrb[28].mxu0 %v2298_v42  ;;  %3817 = vmatprep.mubr.bf16.mxu1 %v4882_v14  ;;  %v3371_v14 = vld [vmem:[%s4570_s10 + $0x7a] sm:$0xff]  ;;  %v1377_v42 = vpack.c.bf16 %v3168_v24, %v3167_v22  ;;  %v2604_v0 = vpack.c.bf16 %v3396_v58, %v3395_v45 }
 0x100   : > { %4041 = vmatprep.mubr.bf16.mxu0 %v2589_v51  ;;  %4087 = vmatpush3.bf16.msra.mxu1 %v4496_v43  ;;  %v2592_v23 = vpack.c.bf16 %v3372_v6, %v3371_v14  ;;  %v2602_v51 = vpack.c.bf16 %v3392_v38, %v3391_v36  ;;  %v1378_v43 = vpack.c.bf16 %v3170_v21, %v3169_v4 }
 0x101   : > { %4080 = vmatprep.subr.bf16.mxu1 %v4497_v59 }
 0x104   : > { %4088 = vmatpush3.bf16.msra.mxu1 %v4497_v59 }
 0x106   : > { %3818 = vmatmul.mubr.bf16.gmra.mrb[16].mxu1 %v4884_v15  ;;  %v3375_v15 = vld [vmem:[%s4570_s10 + $0xaa] sm:$0xff] }
 0x107   : > { %4042 = vmatmul.mubr.bf16.vlgmr.msra.gmra.mrb[0].mxu0 %v2590_v9  ;;  %3821 = vmatprep.mubr.bf16.mxu1 %v4902_v29  ;;  %v3376_v29 = vld [vmem:[%s4570_s10 + $0xb2] sm:$0xff] }
 0x108   : > { %4045 = vmatprep.mubr.bf16.mxu0 %v2591_v61  ;;  %v2594_v25 = vpack.c.bf16 %v3376_v29, %v3375_v15 }
 0x10e   : > { %3822 = vmatmul.mubr.bf16.gmra.mrb[20].mxu1 %v4904_v30  ;;  %v3379_v30 = vld [vmem:[%s4570_s10 + $0xda] sm:$0xff] }
 0x10f   : > { %4046 = vmatmul.mubr.bf16.gmra.mrb[4].mxu0 %v2592_v23  ;;  %3825 = vmatprep.mubr.bf16.mxu1 %v4920_v40  ;;  %v3380_v40 = vld [vmem:[%s4570_s10 + $0xe2] sm:$0xff] }
 0x110   : > { %4049 = vmatprep.mubr.bf16.mxu0 %v2593_v16  ;;  %v2596_v31 = vpack.c.bf16 %v3380_v40, %v3379_v30  ;;  %v5144_v40 = vld [vmem:[%s5225_s2] ss:$0 sm:$0xff] }
 0x116   : > { %3826 = vmatmul.mubr.bf16.gmra.mrb[24].mxu1 %v4922_v41  ;;  %v1372_v41 = vpack.c.bf16 %v3158_v37, %v3157_v20 }
 0x117   : > { %4050 = vmatmul.mubr.bf16.gmra.mrb[8].mxu0 %v2594_v25  ;;  %3829 = vmatprep.mubr.bf16.mxu1 %v4938_v56  ;;  %v3159_v56 = vld [vmem:[%s4570_s10 + $0xf1] sm:$0xff] }
 0x118   : > { %4053 = vmatprep.mubr.bf16.mxu0 %v2595_v19 }
 0x11e   : > { %3830 = vmatmul.mubr.bf16.gmra.mrb[28].mxu1 %v4972_v13  ;;  %v1373_v13 = vpack.c.bf16 %v3160_v33, %v3159_v56 }
 0x11f   : > { %4054 = vmatmul.mubr.bf16.gmra.mrb[12].mxu0 %v2596_v31  ;;  %3865 = vmatprep.mubr.bf16.mxu1 %v1372_v41 }
 0x120   : > { %4057 = vmatprep.mubr.bf16.mxu0 %v2597_v32 }
 0x126   : > { %3866 = vmatmul.mubr.bf16.vlgmr.msra.gmra.mrb[16].mxu1 %v1373_v13 }
 0x127   : > { %4058 = vmatmul.mubr.bf16.gmra.mrb[16].mxu0 %v2598_v48  ;;  %3869 = vmatprep.mubr.bf16.mxu1 %v1374_v50 }
 0x128   : > { %4061 = vmatprep.mubr.bf16.mxu0 %v2599_v53 }
 0x12e   : > { %3870 = vmatmul.mubr.bf16.gmra.mrb[20].mxu1 %v1375_v8 }
 0x12f   : > { %4062 = vmatmul.mubr.bf16.gmra.mrb[20].mxu0 %v2600_v49  ;;  %3873 = vmatprep.mubr.bf16.mxu1 %v1376_v7 }
 0x130   : > { %4065 = vmatprep.mubr.bf16.mxu0 %v2601_v10 }
 0x136   : > { %3874 = vmatmul.mubr.bf16.gmra.mrb[24].mxu1 %v1377_v42 }
 0x137   : > { %4066 = vmatmul.mubr.bf16.gmra.mrb[24].mxu0 %v2602_v51  ;;  %3877 = vmatprep.mubr.bf16.mxu1 %v1378_v43 }
 0x138   : > { %4069 = vmatprep.mubr.bf16.mxu0 %v2603_v44 }
 0x13e   : > { %3878 = vmatmul.mubr.bf16.gmra.mrb[28].mxu1 %v5057_v2 }
 0x13f   : > { %4070 = vmatmul.mubr.bf16.gmra.mrb[28].mxu0 %v2604_v0 }
 0x1b9   : > { %v3803_v59 = vpop.f32.mrb[0].mxu1 }
 0x1ba   : > { %v1173_v9 = vpop.f32.mrb[1].mxu1 }
 0x1bb   : > { %v3804_v61 = vpop.f32.mrb[2].mxu1 }
 0x1bc   : > { %v1176_v14 = vpop.f32.mrb[3].mxu1 }
 0x1c1   : > { %v3807_v6 = vpop.f32.mrb[4].mxu1 }
 0x1c2   : > { %v1189_v12 = vpop.f32.mrb[5].mxu1 }
 0x1c3   : > { %v3808_v11 = vpop.f32.mrb[6].mxu1 }
 0x1c4   : > { %v1192_v23 = vpop.f32.mrb[7].mxu1 }
 0x1c9   : > { %v3811_v16 = vpop.f32.mrb[8].mxu1 }
 0x1ca   : > { %v1205_v15 = vpop.f32.mrb[9].mxu1 }
 0x1cb   : > { %v3812_v29 = vpop.f32.mrb[10].mxu1 }
 0x1cc   : > { %v1208_v17 = vpop.f32.mrb[11].mxu1 }
 0x1d1   : > { %v5133_v18 = vpop.f32.mrb[12].mxu1 }
 0x1d2   : > { %v5135_v25 = vpop.f32.mrb[13].mxu1 }
 0x1d3   : > { %v5137_v19 = vpop.f32.mrb[14].mxu1 }
 0x1d4   : > { %v5139_v2 = vpop.f32.mrb[15].mxu1 }
 0x1da   : > { %v4043_v30 = vpop.f32.mrb[0].mxu0 }
 0x1db   : > { %v4089_v20 = vadd.f32 %v4043_v30, %v3803_v59  ;;  %v2704_v37 = vpop.f32.mrb[1].mxu0 }
 0x1dc   : > { %v4090_v28 = vadd.f32 %v2704_v37, %v1173_v9  ;;  %v4044_v1 = vpop.f32.mrb[2].mxu0 }
 0x1dd   : > { %v2872_v31 = vadd.f32 %v4089_v20, %v5144_v40  ;;  %v4091_v41 = vadd.f32 %v4044_v1, %v3804_v61  ;;  %v2707_v32 = vpop.f32.mrb[3].mxu0 }
 0x1de   : > { %v2870_v56 = vadd.f32 %v4090_v28, %v5144_v40  ;;  %v4092_v33 = vadd.f32 %v2707_v32, %v1176_v14 }
 0x1df   : > { %4426 = vtanh.f32 %v2872_v31  ;;  %v2873_v34 = vadd.f32 %v4091_v41, %v5144_v40 }
 0x1e0   : > { %4428 = vtanh.f32 %v2870_v56  ;;  %v2871_v39 = vadd.f32 %v4092_v33, %v5144_v40 }
 0x1e1   : > { %4430 = vtanh.f32 %v2873_v34 }
 0x1e2   : > { %4432 = vtanh.f32 %v2871_v39  ;;  %v4047_v52 = vpop.f32.mrb[4].mxu0 }
 0x1e3   : > { %v4093_v35 = vadd.f32 %v4047_v52, %v3807_v6  ;;  %v2720_v46 = vpop.f32.mrb[5].mxu0 }
 0x1e4   : > { %v4094_v47 = vadd.f32 %v2720_v46, %v1189_v12  ;;  %v4048_v13 = vpop.f32.mrb[6].mxu0 }
 0x1e5   : > { %v2876_v48 = vadd.f32 %v4093_v35, %v5144_v40  ;;  %v4095_v50 = vadd.f32 %v4048_v13, %v3808_v11  ;;  %v2723_v53 = vpop.f32.mrb[7].mxu0 }
 0x1e6   : > { %v2874_v55 = vadd.f32 %v4094_v47, %v5144_v40  ;;  %v4096_v54 = vadd.f32 %v2723_v53, %v1192_v23 }
 0x1e7   : > { %4434 = vtanh.f32 %v2876_v48  ;;  %v2877_v3 = vadd.f32 %v4095_v50, %v5144_v40 }
 0x1e8   : > { %4436 = vtanh.f32 %v2874_v55  ;;  %v2875_v57 = vadd.f32 %v4096_v54, %v5144_v40 }
 0x1e9   : > { %v4427_v60 = vpop.eup %4426  ;;  %4438 = vtanh.f32 %v2877_v3 }
 0x1ea   : > { %v4429_v62 = vpop.eup %4428  ;;  %2936 = vst [vmem:[%s5156_s11 + $0x10] sm:$0xff] %v4427_v60  ;;  %4440 = vtanh.f32 %v2875_v57  ;;  %v4051_v63 = vpop.f32.mrb[8].mxu0 }
 0x1eb   : > { %v4431_v5 = vpop.eup %4430  ;;  %2934 = vst [vmem:[%s5156_s11] sm:$0xff] %v4429_v62  ;;  %v4097_v8 = vadd.f32 %v4051_v63, %v3811_v16  ;;  %v2736_v49 = vpop.f32.mrb[9].mxu0 }
 0x1ec   : > { %v4433_v7 = vpop.eup %4432  ;;  %2937 = vst [vmem:[%s5156_s11 + $0x18] sm:$0xff] %v4431_v5  ;;  %v4098_v10 = vadd.f32 %v2736_v49, %v1205_v15  ;;  %v4052_v22 = vpop.f32.mrb[10].mxu0 }
 0x1ed   : > { %2935 = vst [vmem:[%s5156_s11 + $0x8] sm:$0xff] %v4433_v7  ;;  %v2880_v24 = vadd.f32 %v4097_v8, %v5144_v40  ;;  %v4099_v36 = vadd.f32 %v4052_v22, %v3812_v29  ;;  %v2739_v38 = vpop.f32.mrb[11].mxu0 }
 0x1ee   : > { %v2878_v4 = vadd.f32 %v4098_v10, %v5144_v40  ;;  %v4100_v21 = vadd.f32 %v2739_v38, %v1208_v17 }
 0x1ef   : > { %4442 = vtanh.f32 %v2880_v24  ;;  %v2881_v26 = vadd.f32 %v4099_v36, %v5144_v40 }
 0x1f0   : > { %4444 = vtanh.f32 %v2878_v4  ;;  %v2879_v27 = vadd.f32 %v4100_v21, %v5144_v40 }
 0x1f1   : > { %v4435_v42 = vpop.eup %4434  ;;  %4446 = vtanh.f32 %v2881_v26 }
 0x1f2   : > { %v4437_v51 = vpop.eup %4436  ;;  %2940 = vst [vmem:[%s5156_s11 + $0x30] sm:$0xff] %v4435_v42  ;;  %4448 = vtanh.f32 %v2879_v27  ;;  %v4055_v43 = vpop.f32.mrb[12].mxu0 }
 0x1f3   : > { %v4439_v44 = vpop.eup %4438  ;;  %2938 = vst [vmem:[%s5156_s11 + $0x20] sm:$0xff] %v4437_v51  ;;  %v4101_v45 = vadd.f32 %v4055_v43, %v5133_v18  ;;  %v2752_v58 = vpop.f32.mrb[13].mxu0 }
 0x1f4   : > { %v4441_v0 = vpop.eup %4440  ;;  %2941 = vst [vmem:[%s5156_s11 + $0x38] sm:$0xff] %v4439_v44  ;;  %v4102_v59 = vadd.f32 %v2752_v58, %v5135_v25  ;;  %v4056_v9 = vpop.f32.mrb[14].mxu0 }
 0x1f5   : > { %2939 = vst [vmem:[%s5156_s11 + $0x28] sm:$0xff] %v4441_v0  ;;  %v2884_v61 = vadd.f32 %v4101_v45, %v5144_v40  ;;  %v4103_v14 = vadd.f32 %v4056_v9, %v5137_v19  ;;  %v2755_v6 = vpop.f32.mrb[15].mxu0 }
 0x1f6   : > { %v2882_v12 = vadd.f32 %v4102_v59, %v5144_v40  ;;  %v4104_v11 = vadd.f32 %v2755_v6, %v5139_v2 }
 0x1f7   : > { %4450 = vtanh.f32 %v2884_v61  ;;  %v2885_v23 = vadd.f32 %v4103_v14, %v5144_v40 }
 0x1f8   : > { %4452 = vtanh.f32 %v2882_v12  ;;  %v2883_v16 = vadd.f32 %v4104_v11, %v5144_v40 }
 0x1f9   : > { %v4443_v15 = vpop.eup %4442  ;;  %4454 = vtanh.f32 %v2885_v23  ;;  %v3867_v29 = vpop.f32.mrb[16].mxu1 }
 0x1fa   : > { %v4445_v17 = vpop.eup %4444  ;;  %2944 = vst [vmem:[%s5156_s11 + $0x50] sm:$0xff] %v4443_v15  ;;  %4456 = vtanh.f32 %v2883_v16  ;;  %v4059_v18 = vpop.f32.mrb[16].mxu0 }
 0x1fb   : > { %v1543_v25 = vpop.f32.mrb[17].mxu1  ;;  %v4447_v19 = vpop.eup %4446  ;;  %2942 = vst [vmem:[%s5156_s11 + $0x40] sm:$0xff] %v4445_v17  ;;  %v4105_v30 = vadd.f32 %v4059_v18, %v3867_v29 }
 0x1fc   : > { %v2768_v2 = vpop.f32.mrb[17].mxu0  ;;  %v3868_v20 = vpop.f32.mrb[18].mxu1  ;;  %2945 = vst [vmem:[%s5156_s11 + $0x58] sm:$0xff] %v4447_v19 }
 0x1fd   : > { %v4449_v37 = vpop.eup %4448  ;;  %v4106_v28 = vadd.f32 %v2768_v2, %v1543_v25  ;;  %v4060_v1 = vpop.f32.mrb[18].mxu0  ;;  %v2888_v41 = vadd.f32 %v4105_v30, %v5144_v40 }
 0x1fe   : > { %v1546_v31 = vpop.f32.mrb[19].mxu1  ;;  %2943 = vst [vmem:[%s5156_s11 + $0x48] sm:$0xff] %v4449_v37  ;;  %v4107_v32 = vadd.f32 %v4060_v1, %v3868_v20  ;;  %v2771_v56 = vpop.f32.mrb[19].mxu0 }
 0x1ff   : > { %v2886_v33 = vadd.f32 %v4106_v28, %v5144_v40  ;;  %v4108_v34 = vadd.f32 %v2771_v56, %v1546_v31  ;;  %4458 = vtanh.f32 %v2888_v41 }
 0x200   : > { %v2889_v39 = vadd.f32 %v4107_v32, %v5144_v40 }
 0x201   : > { %4460 = vtanh.f32 %v2886_v33  ;;  %v2887_v52 = vadd.f32 %v4108_v34, %v5144_v40  ;;  %v4451_v35 = vpop.eup %4450  ;;  %v3871_v46 = vpop.f32.mrb[20].mxu1 }
 0x202   : > { %4462 = vtanh.f32 %v2889_v39  ;;  %v4453_v47 = vpop.eup %4452  ;;  %2948 = vst [vmem:[%s5156_s11 + $0x70] sm:$0xff] %v4451_v35  ;;  %v4063_v13 = vpop.f32.mrb[20].mxu0 }
 0x203   : > { %4464 = vtanh.f32 %v2887_v52  ;;  %v1559_v48 = vpop.f32.mrb[21].mxu1  ;;  %v4455_v50 = vpop.eup %4454  ;;  %2946 = vst [vmem:[%s5156_s11 + $0x60] sm:$0xff] %v4453_v47  ;;  %v4109_v53 = vadd.f32 %v4063_v13, %v3871_v46 }
 0x204   : > { %v2784_v55 = vpop.f32.mrb[21].mxu0  ;;  %v3872_v54 = vpop.f32.mrb[22].mxu1  ;;  %2949 = vst [vmem:[%s5156_s11 + $0x78] sm:$0xff] %v4455_v50 }
 0x205   : > { %v4457_v3 = vpop.eup %4456  ;;  %v4110_v57 = vadd.f32 %v2784_v55, %v1559_v48  ;;  %v4064_v60 = vpop.f32.mrb[22].mxu0  ;;  %v2892_v63 = vadd.f32 %v4109_v53, %v5144_v40 }
 0x206   : > { %v1562_v62 = vpop.f32.mrb[23].mxu1  ;;  %2947 = vst [vmem:[%s5156_s11 + $0x68] sm:$0xff] %v4457_v3  ;;  %v4111_v5 = vadd.f32 %v4064_v60, %v3872_v54  ;;  %v2787_v8 = vpop.f32.mrb[23].mxu0 }
 0x207   : > { %v2890_v49 = vadd.f32 %v4110_v57, %v5144_v40  ;;  %v4112_v7 = vadd.f32 %v2787_v8, %v1562_v62  ;;  %4466 = vtanh.f32 %v2892_v63 }
 0x208   : > { %v2893_v10 = vadd.f32 %v4111_v5, %v5144_v40 }
 0x209   : > { %4468 = vtanh.f32 %v2890_v49  ;;  %v2891_v22 = vadd.f32 %v4112_v7, %v5144_v40  ;;  %v4459_v24 = vpop.eup %4458  ;;  %v3875_v36 = vpop.f32.mrb[24].mxu1 }
 0x20a   : > { %4470 = vtanh.f32 %v2893_v10  ;;  %2952 = vst [vmem:[%s5156_s11 + $0x90] sm:$0xff] %v4459_v24  ;;  %v4067_v4 = vpop.f32.mrb[24].mxu0  ;;  %v1575_v21 = vpop.f32.mrb[25].mxu1 }
 0x20b   : > { %v4461_v38 = vpop.eup %4460  ;;  %4472 = vtanh.f32 %v2891_v22  ;;  %v4113_v27 = vadd.f32 %v4067_v4, %v3875_v36  ;;  %v2800_v42 = vpop.f32.mrb[25].mxu0 }
 0x20c   : > { %v4463_v26 = vpop.eup %4462  ;;  %2950 = vst [vmem:[%s5156_s11 + $0x80] sm:$0xff] %v4461_v38  ;;  %v3876_v51 = vpop.f32.mrb[26].mxu1  ;;  %v4114_v44 = vadd.f32 %v2800_v42, %v1575_v21 }
 0x20d   : > { %v4465_v43 = vpop.eup %4464  ;;  %2953 = vst [vmem:[%s5156_s11 + $0x98] sm:$0xff] %v4463_v26  ;;  %v4068_v45 = vpop.f32.mrb[26].mxu0  ;;  %v2896_v0 = vadd.f32 %v4113_v27, %v5144_v40 }
 0x20e   : > { %v1578_v58 = vpop.f32.mrb[27].mxu1  ;;  %2951 = vst [vmem:[%s5156_s11 + $0x88] sm:$0xff] %v4465_v43  ;;  %v4115_v59 = vadd.f32 %v4068_v45, %v3876_v51  ;;  %v2803_v9 = vpop.f32.mrb[27].mxu0  ;;  %v2894_v61 = vadd.f32 %v4114_v44, %v5144_v40 }
 0x20f   : > { %v4116_v14 = vadd.f32 %v2803_v9, %v1578_v58  ;;  %4474 = vtanh.f32 %v2896_v0 }
 0x210   : > { %v2897_v6 = vadd.f32 %v4115_v59, %v5144_v40  ;;  %4476 = vtanh.f32 %v2894_v61 }
 0x211   : > { %v2895_v12 = vadd.f32 %v4116_v14, %v5144_v40  ;;  %v4467_v11 = vpop.eup %4466  ;;  %v3879_v23 = vpop.f32.mrb[28].mxu1 }
 0x212   : > { %4478 = vtanh.f32 %v2897_v6  ;;  %2956 = vst [vmem:[%s5156_s11 + $0xb0] sm:$0xff] %v4467_v11  ;;  %v4071_v15 = vpop.f32.mrb[28].mxu0  ;;  %v1591_v29 = vpop.f32.mrb[29].mxu1 }
 0x213   : > { %v4469_v16 = vpop.eup %4468  ;;  %4480 = vtanh.f32 %v2895_v12  ;;  %v4117_v18 = vadd.f32 %v4071_v15, %v3879_v23  ;;  %v2816_v25 = vpop.f32.mrb[29].mxu0 }
 0x214   : > { %v4471_v17 = vpop.eup %4470  ;;  %2954 = vst [vmem:[%s5156_s11 + $0xa0] sm:$0xff] %v4469_v16  ;;  %v3880_v19 = vpop.f32.mrb[30].mxu1  ;;  %v4118_v2 = vadd.f32 %v2816_v25, %v1591_v29 }
 0x215   : > { %v4473_v30 = vpop.eup %4472  ;;  %2957 = vst [vmem:[%s5156_s11 + $0xb8] sm:$0xff] %v4471_v17  ;;  %v4072_v20 = vpop.f32.mrb[30].mxu0  ;;  %v2900_v28 = vadd.f32 %v4117_v18, %v5144_v40 }
 0x216   : > { %v1594_v37 = vpop.f32.mrb[31].mxu1  ;;  %2955 = vst [vmem:[%s5156_s11 + $0xa8] sm:$0xff] %v4473_v30  ;;  %v4119_v1 = vadd.f32 %v4072_v20, %v3880_v19  ;;  %v2819_v31 = vpop.f32.mrb[31].mxu0  ;;  %v2898_v41 = vadd.f32 %v4118_v2, %v5144_v40 }
 0x217   : > { %v4120_v32 = vadd.f32 %v2819_v31, %v1594_v37  ;;  %4482 = vtanh.f32 %v2900_v28 }
 0x218   : > { %v2901_v56 = vadd.f32 %v4119_v1, %v5144_v40  ;;  %4484 = vtanh.f32 %v2898_v41 }
 0x219   : > { %v2899_v33 = vadd.f32 %v4120_v32, %v5144_v40  ;;  %v4475_v34 = vpop.eup %4474 }
 0x21a   : > { %4486 = vtanh.f32 %v2901_v56  ;;  %v4477_v39 = vpop.eup %4476  ;;  %2960 = vst [vmem:[%s5156_s11 + $0xd0] sm:$0xff] %v4475_v34 }
 0x21b   : > { %4488 = vtanh.f32 %v2899_v33  ;;  %2958 = vst [vmem:[%s5156_s11 + $0xc0] sm:$0xff] %v4477_v39 }
 0x21c   : > { %v4479_v52 = vpop.eup %4478 }
 0x21d   : > { %v4481_v35 = vpop.eup %4480  ;;  %2961 = vst [vmem:[%s5156_s11 + $0xd8] sm:$0xff] %v4479_v52 }
 0x21e   : > { %2959 = vst [vmem:[%s5156_s11 + $0xc8] sm:$0xff] %v4481_v35 }
 0x221   : > { %v4483_v46 = vpop.eup %4482 }
 0x222   : > { %v4485_v47 = vpop.eup %4484  ;;  %2964 = vst [vmem:[%s5156_s11 + $0xf0] sm:$0xff] %v4483_v46 }
 0x223   : > { %2962 = vst [vmem:[%s5156_s11 + $0xe0] sm:$0xff] %v4485_v47 }
 0x224   : > { %v4487_v13 = vpop.eup %4486 }
 0x225   : > { %v4489_v48 = vpop.eup %4488  ;;  %2965 = vst [vmem:[%s5156_s11 + $0xf8] sm:$0xff] %v4487_v13 }
 0x226   : > { %2963 = vst [vmem:[%s5156_s11 + $0xe8] sm:$0xff] %v4489_v48 }
 0x227 PF: > { %s13_s12 = sadd.s32 1, %s4504_s12  }
 0x228   : > { %p10_p4 = scmp.ge.s32.totalorder %s13_s12, 4  }
 0x22a   :  { %12 = sbr.rel (!%p10_p4) target bundleno = 1 (0x1), region = 72 }

</bundles_post_ra>
